<compile_context>
chip_gen: v6e
topology: v6e:2x2x1
jax: 0.10.0
libtpu: 0.0.40
codegen_flags: <defaults>
</compile_context>

<pallas_src>
import numpy as np
import jax
import jax.numpy as jnp
from jax import lax
from jax.experimental import pallas as pl
from jax.experimental.pallas import tpu as pltpu


TB = 32                 # batch tile (lane blocks inside the kernel are TB wide)
C1P = 16                # conv1 channels (10) padded to 16 -> aligned sublane blocks
LW = 12 * TB            # 384: lanes of one pooled conv1 row = (pw, b)


# ------------------------------ fused kernel --------------------------------

def _fused_kernel(p1_ref, w1m_ref, b1_ref, w2p_ref, b2_ref,
                  wq_ref, bf1_ref, wf2t_ref, bf2_ref, o_ref, a1s):
    # ---- stage 1: conv1 (transposed GEMM) + 2x2 max-pool + ReLU ----
    # p1_ref[0, ph] : (25, 4*LW) bf16, lanes = (pool_group g, pw, b).
    w1m = w1m_ref[...]                                      # (16, 25) bf16
    b1 = b1_ref[...]                                        # (16, 1)  f32
    for ph in range(12):
        y = jnp.dot(w1m, p1_ref[0, ph, :, :],
                    preferred_element_type=jnp.float32)     # (16, 4*LW) f32
        m = jnp.maximum(jnp.maximum(y[:, 0 * LW:1 * LW], y[:, 1 * LW:2 * LW]),
                        jnp.maximum(y[:, 2 * LW:3 * LW], y[:, 3 * LW:4 * LW]))
        a = jnp.maximum(m + b1, 0.0)                        # (16, LW) f32
        a1s[ph * C1P:(ph + 1) * C1P, :] = a.astype(jnp.bfloat16)

    # ---- stage 2+3: conv2 (transposed, sliced im2col) + pool + ReLU + FCs ----
    b2 = b2_ref[...]                                        # (20, 1) f32
    h = jnp.zeros((TB, 50), jnp.float32)
    for poh in range(4):                                    # pooled conv2 row
        acc0 = jnp.zeros((20, 8 * TB), jnp.float32)         # conv2 row oh = 2*poh
        acc1 = jnp.zeros((20, 8 * TB), jnp.float32)         # conv2 row oh = 2*poh+1
        r0 = (2 * poh) * C1P
        r1 = (2 * poh + 1) * C1P
        for kw in range(5):
            w2k = w2p_ref[kw, :, :]                         # (20, 80) bf16
            c0 = kw * TB
            acc0 = acc0 + jnp.dot(
                w2k, a1s[r0:r0 + 5 * C1P, c0:c0 + 8 * TB],
                preferred_element_type=jnp.float32)
            acc1 = acc1 + jnp.dot(
                w2k, a1s[r1:r1 + 5 * C1P, c0:c0 + 8 * TB],
                preferred_element_type=jnp.float32)
        m = jnp.maximum(acc0, acc1)                         # pool over oh: (20, 8*TB)
        for q in range(4):                                  # pooled conv2 col
            blk = jnp.maximum(m[:, (2 * q) * TB:(2 * q + 1) * TB],
                              m[:, (2 * q + 1) * TB:(2 * q + 2) * TB])
            a2 = jnp.maximum(blk + b2, 0.0)                 # (20, TB) f32
            # fc1 partial sum: contract the channel (sublane) dim.
            h = h + lax.dot_general(
                a2, wq_ref[poh, q, :, :],
                dimension_numbers=(((0,), (0,)), ((), ())),
                preferred_element_type=jnp.float32)         # (TB, 50)
    h = jnp.maximum(h + bf1_ref[...], 0.0)                  # (TB, 50)
    o = jnp.dot(h, wf2t_ref[...], preferred_element_type=jnp.float32)
    o_ref[...] = jnp.maximum(o + bf2_ref[...], 0.0)         # (TB, 10)


# ------------------------------- host glue ----------------------------------

def prepare_params(params):
    """One-time weight re-layout (channel padding, flatten folding)."""
    w1, b1, w2, b2, wf1, bf1, wf2, bf2 = params
    # conv1: (16, 25) bf16, rows = padded output channels, cols = (kh, kw).
    w1m = jnp.zeros((C1P, 25), jnp.float32).at[:10].set(w1.reshape(10, 25))
    w1m = w1m.astype(jnp.bfloat16)
    b1c = jnp.zeros((C1P, 1), jnp.float32).at[:10, 0].set(b1)
    # conv2: w2p[kw, co, kh*16 + ci] = w2[co, ci, kh, kw]  (zeros for ci >= 10).
    w2p = jnp.zeros((5, 20, 5, C1P), jnp.float32)
    w2p = w2p.at[:, :, :, :10].set(jnp.transpose(w2, (3, 0, 2, 1)))
    w2p = w2p.reshape(5, 20, 5 * C1P).astype(jnp.bfloat16)
    b2c = b2.reshape(20, 1).astype(jnp.float32)
    # fc1: wq[poh, pow, c, o] = wf1[o, c*16 + poh*4 + pow]  (PyTorch flatten order).
    wq = wf1.reshape(50, 20, 4, 4).transpose(2, 3, 1, 0).astype(jnp.float32)
    bf1r = bf1.reshape(1, 50).astype(jnp.float32)
    wf2t = wf2.T.astype(jnp.float32)                        # (50, 10)
    bf2r = bf2.reshape(1, 10).astype(jnp.float32)
    return (w1m, b1c, w2p, b2c, wq, bf1r, wf2t, bf2r)


def _build_conv1_patches(xb, n_tiles):
    """xb: (Bp, 28, 28) f32 -> (nT, 12, 25, 4*LW) bf16 pool-grouped im2col.

    p1[t, ph, kh*5+kw, g*LW + pw*TB + b] = x[t*TB+b, 2*ph+dy+kh, 2*pw+dx+kw],
    with pool group g = 2*dy + dx; i.e. channels-on-sublanes / (g,pw,b)-on-lanes.
    """
    taps = jnp.stack([xb[:, kh:kh + 24, kw:kw + 24]
                      for kh in range(5) for kw in range(5)], axis=1)  # (Bp,25,24,24)
    t = taps.reshape(n_tiles, TB, 25, 12, 2, 12, 2)   # (nT, tb, k, ph, dy, pw, dx)
    t = t.transpose(0, 3, 2, 4, 6, 5, 1)              # (nT, ph, k, dy, dx, pw, tb)
    return t.reshape(n_tiles, 12, 25, 4 * LW).astype(jnp.bfloat16)


def small_mnist_cnn_phi_forward(x, prep):
    """x: (B, 1, 28, 28) float32 (NCHW, as in PyTorch). Returns (B, 10)."""
    w1m, b1c, w2p, b2c, wq, bf1r, wf2t, bf2r = prep
    B = x.shape[0]
    xb = x[:, 0, :, :].astype(jnp.float32)                  # (B, 28, 28)

    # pad batch to a multiple of TB (zeros; sliced off at the end)
    Bp = ((B + TB - 1) // TB) * TB
    if Bp != B:
        xb = jnp.concatenate(
            [xb, jnp.zeros((Bp - B, 28, 28), jnp.float32)], axis=0)
    nT = Bp // TB

    p1 = _build_conv1_patches(xb, nT)                       # (nT, 12, 25, 4*LW)

    flops = 2 * Bp * (25 * 10 * 24 * 24 + 250 * 20 * 8 * 8 + 320 * 50 + 50 * 10)
    bytes_accessed = int(
        p1.size * 2 + Bp * 10 * 4
        + sum(a.size * a.dtype.itemsize for a in (w1m, w2p, wq, wf2t)))

    out = pl.pallas_call(
        _fused_kernel,
        out_shape=jax.ShapeDtypeStruct((Bp, 10), jnp.float32),
        grid=(nT,),
        in_specs=[
            pl.BlockSpec((1, 12, 25, 4 * LW), lambda i: (i, 0, 0, 0)),
            pl.BlockSpec((C1P, 25), lambda i: (0, 0)),
            pl.BlockSpec((C1P, 1), lambda i: (0, 0)),
            pl.BlockSpec((5, 20, 5 * C1P), lambda i: (0, 0, 0)),
            pl.BlockSpec((20, 1), lambda i: (0, 0)),
            pl.BlockSpec((4, 4, 20, 50), lambda i: (0, 0, 0, 0)),
            pl.BlockSpec((1, 50), lambda i: (0, 0)),
            pl.BlockSpec((50, 10), lambda i: (0, 0)),
            pl.BlockSpec((1, 10), lambda i: (0, 0)),
        ],
        out_specs=pl.BlockSpec((TB, 10), lambda i: (i, 0)),
        scratch_shapes=[pltpu.VMEM((12 * C1P, LW), jnp.bfloat16)],
        compiler_params=pltpu.CompilerParams(
            dimension_semantics=("parallel",),
            vmem_limit_bytes=32 * 1024 * 1024),
        cost_estimate=pl.CostEstimate(flops=flops, transcendentals=0,
                                      bytes_accessed=bytes_accessed),
    )(p1, w1m, b1c, w2p, b2c, wq, bf1r, wf2t, bf2r)

    return out[:B]


# ------------------------------ pure-JAX reference ---------------------------

def reference_forward(x, params):
    w1, b1, w2, b2, wf1, bf1, wf2, bf2 = params
    dn = ('NCHW', 'OIHW', 'NCHW')
    y = lax.conv_general_dilated(x, w1, (1, 1), 'VALID', dimension_numbers=dn)
    y = y + b1[None, :, None, None]
    y = lax.reduce_window(y, -jnp.inf, lax.max, (1, 1, 2, 2), (1, 1, 2, 2), 'VALID')
    y = jnp.maximum(y, 0.0)
    y = lax.conv_general_dilated(y, w2, (1, 1), 'VALID', dimension_numbers=dn)
    y = y + b2[None, :, None, None]
    y = lax.reduce_window(y, -jnp.inf, lax.max, (1, 1, 2, 2), (1, 1, 2, 2), 'VALID')
    y = jnp.maximum(y, 0.0)
    y = y.reshape(y.shape[0], -1)
    y = jnp.maximum(y @ wf1.T + bf1, 0.0)
    y = jnp.maximum(y @ wf2.T + bf2, 0.0)
    return y


# ----------------------------------- main ------------------------------------

if __name__ == "__main__":
    key = jax.random.PRNGKey(0)
    ks = jax.random.split(key, 9)

    def uni(k, shape, fan_in):
        bound = 1.0 / np.sqrt(fan_in)
        return jax.random.uniform(k, shape, jnp.float32, -bound, bound)

    # parameter shapes from SmallMNISTCNNPhi.__init__ (deterministic init)
    w1 = uni(ks[0], (10, 1, 5, 5), 1 * 5 * 5)
    b1 = uni(ks[1], (10,), 1 * 5 * 5)
    w2 = uni(ks[2], (20, 10, 5, 5), 10 * 5 * 5)
    b2 = uni(ks[3], (20,), 10 * 5 * 5)
    wf1 = uni(ks[4], (50, 320), 320)
    bf1 = uni(ks[5], (50,), 320)
    wf2 = uni(ks[6], (10, 50), 50)
    bf2 = uni(ks[7], (10,), 50)
    params = (w1, b1, w2, b2, wf1, bf1, wf2, bf2)

    # 320 = 20*4*4 forces 28x28 spatial input (MNIST); small batch of 2.
    x = jax.random.normal(ks[8], (2, 1, 28, 28), jnp.float32)

    prep = prepare_params(params)
    fwd = jax.jit(small_mnist_cnn_phi_forward)
    out = jax.block_until_ready(fwd(x, prep))

    ref = jax.block_until_ready(reference_forward(x, params))
    # bf16 GEMM inputs (f32 accumulation) -> loosened tolerance.
    np.testing.assert_allclose(np.asarray(out), np.asarray(ref),
                               rtol=5e-2, atol=2e-2)

    print("KERNEL_OK")
</pallas_src>

<mosaic_0001>
module attributes {stable_mosaic.version = 11 : i64} {
  func.func @_fused_kernel(%arg0: i32, %arg1: memref<1x12x25x1536xbf16, #tpu.memory_space<vmem>>, %arg2: memref<16x25xbf16, #tpu.memory_space<vmem>>, %arg3: memref<16x1xf32, #tpu.memory_space<vmem>>, %arg4: memref<5x20x80xbf16, #tpu.memory_space<vmem>>, %arg5: memref<20x1xf32, #tpu.memory_space<vmem>>, %arg6: memref<4x4x20x50xf32, #tpu.memory_space<vmem>>, %arg7: memref<1x50xf32, #tpu.memory_space<vmem>>, %arg8: memref<50x10xf32, #tpu.memory_space<vmem>>, %arg9: memref<1x10xf32, #tpu.memory_space<vmem>>, %arg10: memref<32x10xf32, #tpu.memory_space<vmem>>, %arg11: memref<192x384xbf16, #tpu.memory_space<vmem>>) attributes {dimension_semantics = [#tpu.dimension_semantics<parallel>], iteration_bounds = array<i64: 1>, scalar_prefetch = 0 : i64, scratch_operands = 1 : i64, tpu.core_type = #tpu.core_type<tc>, window_params = [{transform_indices = @transform_0, window_bounds = array<i64: 1, 12, 25, 1536>}, {pipeline_mode = #tpu.pipeline_mode<synchronous>, transform_indices = @transform_1, window_bounds = array<i64: 16, 25>}, {pipeline_mode = #tpu.pipeline_mode<synchronous>, transform_indices = @transform_2, window_bounds = array<i64: 16, 1>}, {pipeline_mode = #tpu.pipeline_mode<synchronous>, transform_indices = @transform_3, window_bounds = array<i64: 5, 20, 80>}, {pipeline_mode = #tpu.pipeline_mode<synchronous>, transform_indices = @transform_4, window_bounds = array<i64: 20, 1>}, {pipeline_mode = #tpu.pipeline_mode<synchronous>, transform_indices = @transform_5, window_bounds = array<i64: 4, 4, 20, 50>}, {pipeline_mode = #tpu.pipeline_mode<synchronous>, transform_indices = @transform_6, window_bounds = array<i64: 1, 50>}, {pipeline_mode = #tpu.pipeline_mode<synchronous>, transform_indices = @transform_7, window_bounds = array<i64: 50, 10>}, {pipeline_mode = #tpu.pipeline_mode<synchronous>, transform_indices = @transform_8, window_bounds = array<i64: 1, 10>}, {transform_indices = @transform_9, window_bounds = array<i64: 32, 10>}]} {
    %c0 = arith.constant 0 : index
    %c0_0 = arith.constant 0 : index
    %0 = vector.load %arg2[%c0, %c0_0] : memref<16x25xbf16, #tpu.memory_space<vmem>>, vector<16x25xbf16>
    %c0_1 = arith.constant 0 : index
    %c0_2 = arith.constant 0 : index
    %1 = vector.load %arg3[%c0_1, %c0_2] : memref<16x1xf32, #tpu.memory_space<vmem>>, vector<16x1xf32>
    %c0_3 = arith.constant 0 : index
    %c0_4 = arith.constant 0 : index
    %c0_5 = arith.constant 0 : index
    %c0_6 = arith.constant 0 : index
    %2 = vector.load %arg1[%c0_3, %c0_4, %c0_5, %c0_6] : memref<1x12x25x1536xbf16, #tpu.memory_space<vmem>>, vector<1x1x25x1536xbf16>
    %3 = vector.shape_cast %2 : vector<1x1x25x1536xbf16> to vector<25x1536xbf16>
    %cst = arith.constant dense<0.000000e+00> : vector<16x1536xf32>
    %4 = tpu.matmul %0, %3, %cst {dimension_numbers = #tpu.dot_dimension_numbers<[1], [0], [0], [1], [0, 0, 1, 1], [], []>} : vector<16x25xbf16>, vector<25x1536xbf16>, vector<16x1536xf32> -> vector<16x1536xf32>
    %5 = vector.extract_strided_slice %4 {offsets = [0, 0], sizes = [16, 384], strides = [1, 1]} : vector<16x1536xf32> to vector<16x384xf32>
    %6 = vector.extract_strided_slice %4 {offsets = [0, 384], sizes = [16, 384], strides = [1, 1]} : vector<16x1536xf32> to vector<16x384xf32>
    %7 = arith.maximumf %5, %6 : vector<16x384xf32>
    %8 = vector.extract_strided_slice %4 {offsets = [0, 768], sizes = [16, 384], strides = [1, 1]} : vector<16x1536xf32> to vector<16x384xf32>
    %9 = vector.extract_strided_slice %4 {offsets = [0, 1152], sizes = [16, 384], strides = [1, 1]} : vector<16x1536xf32> to vector<16x384xf32>
    %10 = arith.maximumf %8, %9 : vector<16x384xf32>
    %11 = arith.maximumf %7, %10 : vector<16x384xf32>
    %12 = vector.broadcast %1 : vector<16x1xf32> to vector<16x384xf32>
    %13 = arith.addf %11, %12 : vector<16x384xf32>
    %cst_7 = arith.constant 0.000000e+00 : f32
    %14 = vector.broadcast %cst_7 : f32 to vector<16x384xf32>
    %15 = arith.maximumf %13, %14 : vector<16x384xf32>
    %16 = arith.truncf %15 : vector<16x384xf32> to vector<16x384xbf16>
    %c0_8 = arith.constant 0 : index
    %c0_9 = arith.constant 0 : index
    %17 = vector.load %arg11[%c0_8, %c0_9] : memref<192x384xbf16, #tpu.memory_space<vmem>>, vector<16x384xbf16>
    tpu.vector_store %arg11[%c0_8, %c0_9], %16 {strides = array<i32>} : memref<192x384xbf16, #tpu.memory_space<vmem>>, vector<16x384xbf16>,
    %c0_10 = arith.constant 0 : index
    %c1 = arith.constant 1 : index
    %c0_11 = arith.constant 0 : index
    %c0_12 = arith.constant 0 : index
    %18 = vector.load %arg1[%c0_10, %c1, %c0_11, %c0_12] : memref<1x12x25x1536xbf16, #tpu.memory_space<vmem>>, vector<1x1x25x1536xbf16>
    %19 = vector.shape_cast %18 : vector<1x1x25x1536xbf16> to vector<25x1536xbf16>
    %cst_13 = arith.constant dense<0.000000e+00> : vector<16x1536xf32>
    %20 = tpu.matmul %0, %19, %cst_13 {dimension_numbers = #tpu.dot_dimension_numbers<[1], [0], [0], [1], [0, 0, 1, 1], [], []>} : vector<16x25xbf16>, vector<25x1536xbf16>, vector<16x1536xf32> -> vector<16x1536xf32>
    %21 = vector.extract_strided_slice %20 {offsets = [0, 0], sizes = [16, 384], strides = [1, 1]} : vector<16x1536xf32> to vector<16x384xf32>
    %22 = vector.extract_strided_slice %20 {offsets = [0, 384], sizes = [16, 384], strides = [1, 1]} : vector<16x1536xf32> to vector<16x384xf32>
    %23 = arith.maximumf %21, %22 : vector<16x384xf32>
    %24 = vector.extract_strided_slice %20 {offsets = [0, 768], sizes = [16, 384], strides = [1, 1]} : vector<16x1536xf32> to vector<16x384xf32>
    %25 = vector.extract_strided_slice %20 {offsets = [0, 1152], sizes = [16, 384], strides = [1, 1]} : vector<16x1536xf32> to vector<16x384xf32>
    %26 = arith.maximumf %24, %25 : vector<16x384xf32>
    %27 = arith.maximumf %23, %26 : vector<16x384xf32>
    %28 = vector.broadcast %1 : vector<16x1xf32> to vector<16x384xf32>
    %29 = arith.addf %27, %28 : vector<16x384xf32>
    %cst_14 = arith.constant 0.000000e+00 : f32
    %30 = vector.broadcast %cst_14 : f32 to vector<16x384xf32>
    %31 = arith.maximumf %29, %30 : vector<16x384xf32>
    %32 = arith.truncf %31 : vector<16x384xf32> to vector<16x384xbf16>
    %c16 = arith.constant 16 : index
    %c0_15 = arith.constant 0 : index
    %33 = vector.load %arg11[%c16, %c0_15] : memref<192x384xbf16, #tpu.memory_space<vmem>>, vector<16x384xbf16>
    tpu.vector_store %arg11[%c16, %c0_15], %32 {strides = array<i32>} : memref<192x384xbf16, #tpu.memory_space<vmem>>, vector<16x384xbf16>,
    %c0_16 = arith.constant 0 : index
    %c2 = arith.constant 2 : index
    %c0_17 = arith.constant 0 : index
    %c0_18 = arith.constant 0 : index
    %34 = vector.load %arg1[%c0_16, %c2, %c0_17, %c0_18] : memref<1x12x25x1536xbf16, #tpu.memory_space<vmem>>, vector<1x1x25x1536xbf16>
    %35 = vector.shape_cast %34 : vector<1x1x25x1536xbf16> to vector<25x1536xbf16>
    %cst_19 = arith.constant dense<0.000000e+00> : vector<16x1536xf32>
    %36 = tpu.matmul %0, %35, %cst_19 {dimension_numbers = #tpu.dot_dimension_numbers<[1], [0], [0], [1], [0, 0, 1, 1], [], []>} : vector<16x25xbf16>, vector<25x1536xbf16>, vector<16x1536xf32> -> vector<16x1536xf32>
    %37 = vector.extract_strided_slice %36 {offsets = [0, 0], sizes = [16, 384], strides = [1, 1]} : vector<16x1536xf32> to vector<16x384xf32>
    %38 = vector.extract_strided_slice %36 {offsets = [0, 384], sizes = [16, 384], strides = [1, 1]} : vector<16x1536xf32> to vector<16x384xf32>
    %39 = arith.maximumf %37, %38 : vector<16x384xf32>
    %40 = vector.extract_strided_slice %36 {offsets = [0, 768], sizes = [16, 384], strides = [1, 1]} : vector<16x1536xf32> to vector<16x384xf32>
    %41 = vector.extract_strided_slice %36 {offsets = [0, 1152], sizes = [16, 384], strides = [1, 1]} : vector<16x1536xf32> to vector<16x384xf32>
    %42 = arith.maximumf %40, %41 : vector<16x384xf32>
    %43 = arith.maximumf %39, %42 : vector<16x384xf32>
    %44 = vector.broadcast %1 : vector<16x1xf32> to vector<16x384xf32>
    %45 = arith.addf %43, %44 : vector<16x384xf32>
    %cst_20 = arith.constant 0.000000e+00 : f32
    %46 = vector.broadcast %cst_20 : f32 to vector<16x384xf32>
    %47 = arith.maximumf %45, %46 : vector<16x384xf32>
    %48 = arith.truncf %47 : vector<16x384xf32> to vector<16x384xbf16>
    %c32 = arith.constant 32 : index
    %c0_21 = arith.constant 0 : index
    %49 = vector.load %arg11[%c32, %c0_21] : memref<192x384xbf16, #tpu.memory_space<vmem>>, vector<16x384xbf16>
    tpu.vector_store %arg11[%c32, %c0_21], %48 {strides = array<i32>} : memref<192x384xbf16, #tpu.memory_space<vmem>>, vector<16x384xbf16>,
    %c0_22 = arith.constant 0 : index
    %c3 = arith.constant 3 : index
    %c0_23 = arith.constant 0 : index
    %c0_24 = arith.constant 0 : index
    %50 = vector.load %arg1[%c0_22, %c3, %c0_23, %c0_24] : memref<1x12x25x1536xbf16, #tpu.memory_space<vmem>>, vector<1x1x25x1536xbf16>
    %51 = vector.shape_cast %50 : vector<1x1x25x1536xbf16> to vector<25x1536xbf16>
    %cst_25 = arith.constant dense<0.000000e+00> : vector<16x1536xf32>
    %52 = tpu.matmul %0, %51, %cst_25 {dimension_numbers = #tpu.dot_dimension_numbers<[1], [0], [0], [1], [0, 0, 1, 1], [], []>} : vector<16x25xbf16>, vector<25x1536xbf16>, vector<16x1536xf32> -> vector<16x1536xf32>
    %53 = vector.extract_strided_slice %52 {offsets = [0, 0], sizes = [16, 384], strides = [1, 1]} : vector<16x1536xf32> to vector<16x384xf32>
    %54 = vector.extract_strided_slice %52 {offsets = [0, 384], sizes = [16, 384], strides = [1, 1]} : vector<16x1536xf32> to vector<16x384xf32>
    %55 = arith.maximumf %53, %54 : vector<16x384xf32>
    %56 = vector.extract_strided_slice %52 {offsets = [0, 768], sizes = [16, 384], strides = [1, 1]} : vector<16x1536xf32> to vector<16x384xf32>
    %57 = vector.extract_strided_slice %52 {offsets = [0, 1152], sizes = [16, 384], strides = [1, 1]} : vector<16x1536xf32> to vector<16x384xf32>
    %58 = arith.maximumf %56, %57 : vector<16x384xf32>
    %59 = arith.maximumf %55, %58 : vector<16x384xf32>
    %60 = vector.broadcast %1 : vector<16x1xf32> to vector<16x384xf32>
    %61 = arith.addf %59, %60 : vector<16x384xf32>
    %cst_26 = arith.constant 0.000000e+00 : f32
    %62 = vector.broadcast %cst_26 : f32 to vector<16x384xf32>
    %63 = arith.maximumf %61, %62 : vector<16x384xf32>
    %64 = arith.truncf %63 : vector<16x384xf32> to vector<16x384xbf16>
    %c48 = arith.constant 48 : index
    %c0_27 = arith.constant 0 : index
    %65 = vector.load %arg11[%c48, %c0_27] : memref<192x384xbf16, #tpu.memory_space<vmem>>, vector<16x384xbf16>
    tpu.vector_store %arg11[%c48, %c0_27], %64 {strides = array<i32>} : memref<192x384xbf16, #tpu.memory_space<vmem>>, vector<16x384xbf16>,
    %c0_28 = arith.constant 0 : index
    %c4 = arith.constant 4 : index
    %c0_29 = arith.constant 0 : index
    %c0_30 = arith.constant 0 : index
    %66 = vector.load %arg1[%c0_28, %c4, %c0_29, %c0_30] : memref<1x12x25x1536xbf16, #tpu.memory_space<vmem>>, vector<1x1x25x1536xbf16>
    %67 = vector.shape_cast %66 : vector<1x1x25x1536xbf16> to vector<25x1536xbf16>
    %cst_31 = arith.constant dense<0.000000e+00> : vector<16x1536xf32>
    %68 = tpu.matmul %0, %67, %cst_31 {dimension_numbers = #tpu.dot_dimension_numbers<[1], [0], [0], [1], [0, 0, 1, 1], [], []>} : vector<16x25xbf16>, vector<25x1536xbf16>, vector<16x1536xf32> -> vector<16x1536xf32>
    %69 = vector.extract_strided_slice %68 {offsets = [0, 0], sizes = [16, 384], strides = [1, 1]} : vector<16x1536xf32> to vector<16x384xf32>
    %70 = vector.extract_strided_slice %68 {offsets = [0, 384], sizes = [16, 384], strides = [1, 1]} : vector<16x1536xf32> to vector<16x384xf32>
    %71 = arith.maximumf %69, %70 : vector<16x384xf32>
    %72 = vector.extract_strided_slice %68 {offsets = [0, 768], sizes = [16, 384], strides = [1, 1]} : vector<16x1536xf32> to vector<16x384xf32>
    %73 = vector.extract_strided_slice %68 {offsets = [0, 1152], sizes = [16, 384], strides = [1, 1]} : vector<16x1536xf32> to vector<16x384xf32>
    %74 = arith.maximumf %72, %73 : vector<16x384xf32>
    %75 = arith.maximumf %71, %74 : vector<16x384xf32>
    %76 = vector.broadcast %1 : vector<16x1xf32> to vector<16x384xf32>
    %77 = arith.addf %75, %76 : vector<16x384xf32>
    %cst_32 = arith.constant 0.000000e+00 : f32
    %78 = vector.broadcast %cst_32 : f32 to vector<16x384xf32>
    %79 = arith.maximumf %77, %78 : vector<16x384xf32>
    %80 = arith.truncf %79 : vector<16x384xf32> to vector<16x384xbf16>
    %c64 = arith.constant 64 : index
    %c0_33 = arith.constant 0 : index
    %81 = vector.load %arg11[%c64, %c0_33] : memref<192x384xbf16, #tpu.memory_space<vmem>>, vector<16x384xbf16>
    tpu.vector_store %arg11[%c64, %c0_33], %80 {strides = array<i32>} : memref<192x384xbf16, #tpu.memory_space<vmem>>, vector<16x384xbf16>,
    %c0_34 = arith.constant 0 : index
    %c5 = arith.constant 5 : index
    %c0_35 = arith.constant 0 : index
    %c0_36 = arith.constant 0 : index
    %82 = vector.load %arg1[%c0_34, %c5, %c0_35, %c0_36] : memref<1x12x25x1536xbf16, #tpu.memory_space<vmem>>, vector<1x1x25x1536xbf16>
    %83 = vector.shape_cast %82 : vector<1x1x25x1536xbf16> to vector<25x1536xbf16>
    %cst_37 = arith.constant dense<0.000000e+00> : vector<16x1536xf32>
    %84 = tpu.matmul %0, %83, %cst_37 {dimension_numbers = #tpu.dot_dimension_numbers<[1], [0], [0], [1], [0, 0, 1, 1], [], []>} : vector<16x25xbf16>, vector<25x1536xbf16>, vector<16x1536xf32> -> vector<16x1536xf32>
    %85 = vector.extract_strided_slice %84 {offsets = [0, 0], sizes = [16, 384], strides = [1, 1]} : vector<16x1536xf32> to vector<16x384xf32>
    %86 = vector.extract_strided_slice %84 {offsets = [0, 384], sizes = [16, 384], strides = [1, 1]} : vector<16x1536xf32> to vector<16x384xf32>
    %87 = arith.maximumf %85, %86 : vector<16x384xf32>
    %88 = vector.extract_strided_slice %84 {offsets = [0, 768], sizes = [16, 384], strides = [1, 1]} : vector<16x1536xf32> to vector<16x384xf32>
    %89 = vector.extract_strided_slice %84 {offsets = [0, 1152], sizes = [16, 384], strides = [1, 1]} : vector<16x1536xf32> to vector<16x384xf32>
    %90 = arith.maximumf %88, %89 : vector<16x384xf32>
    %91 = arith.maximumf %87, %90 : vector<16x384xf32>
    %92 = vector.broadcast %1 : vector<16x1xf32> to vector<16x384xf32>
    %93 = arith.addf %91, %92 : vector<16x384xf32>
    %cst_38 = arith.constant 0.000000e+00 : f32
    %94 = vector.broadcast %cst_38 : f32 to vector<16x384xf32>
    %95 = arith.maximumf %93, %94 : vector<16x384xf32>
    %96 = arith.truncf %95 : vector<16x384xf32> to vector<16x384xbf16>
    %c80 = arith.constant 80 : index
    %c0_39 = arith.constant 0 : index
    %97 = vector.load %arg11[%c80, %c0_39] : memref<192x384xbf16, #tpu.memory_space<vmem>>, vector<16x384xbf16>
    tpu.vector_store %arg11[%c80, %c0_39], %96 {strides = array<i32>} : memref<192x384xbf16, #tpu.memory_space<vmem>>, vector<16x384xbf16>,
    %c0_40 = arith.constant 0 : index
    %c6 = arith.constant 6 : index
    %c0_41 = arith.constant 0 : index
    %c0_42 = arith.constant 0 : index
    %98 = vector.load %arg1[%c0_40, %c6, %c0_41, %c0_42] : memref<1x12x25x1536xbf16, #tpu.memory_space<vmem>>, vector<1x1x25x1536xbf16>
    %99 = vector.shape_cast %98 : vector<1x1x25x1536xbf16> to vector<25x1536xbf16>
    %cst_43 = arith.constant dense<0.000000e+00> : vector<16x1536xf32>
    %100 = tpu.matmul %0, %99, %cst_43 {dimension_numbers = #tpu.dot_dimension_numbers<[1], [0], [0], [1], [0, 0, 1, 1], [], []>} : vector<16x25xbf16>, vector<25x1536xbf16>, vector<16x1536xf32> -> vector<16x1536xf32>
    %101 = vector.extract_strided_slice %100 {offsets = [0, 0], sizes = [16, 384], strides = [1, 1]} : vector<16x1536xf32> to vector<16x384xf32>
    %102 = vector.extract_strided_slice %100 {offsets = [0, 384], sizes = [16, 384], strides = [1, 1]} : vector<16x1536xf32> to vector<16x384xf32>
    %103 = arith.maximumf %101, %102 : vector<16x384xf32>
    %104 = vector.extract_strided_slice %100 {offsets = [0, 768], sizes = [16, 384], strides = [1, 1]} : vector<16x1536xf32> to vector<16x384xf32>
    %105 = vector.extract_strided_slice %100 {offsets = [0, 1152], sizes = [16, 384], strides = [1, 1]} : vector<16x1536xf32> to vector<16x384xf32>
    %106 = arith.maximumf %104, %105 : vector<16x384xf32>
    %107 = arith.maximumf %103, %106 : vector<16x384xf32>
    %108 = vector.broadcast %1 : vector<16x1xf32> to vector<16x384xf32>
    %109 = arith.addf %107, %108 : vector<16x384xf32>
    %cst_44 = arith.constant 0.000000e+00 : f32
    %110 = vector.broadcast %cst_44 : f32 to vector<16x384xf32>
    %111 = arith.maximumf %109, %110 : vector<16x384xf32>
    %112 = arith.truncf %111 : vector<16x384xf32> to vector<16x384xbf16>
    %c96 = arith.constant 96 : index
    %c0_45 = arith.constant 0 : index
    %113 = vector.load %arg11[%c96, %c0_45] : memref<192x384xbf16, #tpu.memory_space<vmem>>, vector<16x384xbf16>
    tpu.vector_store %arg11[%c96, %c0_45], %112 {strides = array<i32>} : memref<192x384xbf16, #tpu.memory_space<vmem>>, vector<16x384xbf16>,
    %c0_46 = arith.constant 0 : index
    %c7 = arith.constant 7 : index
    %c0_47 = arith.constant 0 : index
    %c0_48 = arith.constant 0 : index
    %114 = vector.load %arg1[%c0_46, %c7, %c0_47, %c0_48] : memref<1x12x25x1536xbf16, #tpu.memory_space<vmem>>, vector<1x1x25x1536xbf16>
    %115 = vector.shape_cast %114 : vector<1x1x25x1536xbf16> to vector<25x1536xbf16>
    %cst_49 = arith.constant dense<0.000000e+00> : vector<16x1536xf32>
    %116 = tpu.matmul %0, %115, %cst_49 {dimension_numbers = #tpu.dot_dimension_numbers<[1], [0], [0], [1], [0, 0, 1, 1], [], []>} : vector<16x25xbf16>, vector<25x1536xbf16>, vector<16x1536xf32> -> vector<16x1536xf32>
    %117 = vector.extract_strided_slice %116 {offsets = [0, 0], sizes = [16, 384], strides = [1, 1]} : vector<16x1536xf32> to vector<16x384xf32>
    %118 = vector.extract_strided_slice %116 {offsets = [0, 384], sizes = [16, 384], strides = [1, 1]} : vector<16x1536xf32> to vector<16x384xf32>
    %119 = arith.maximumf %117, %118 : vector<16x384xf32>
    %120 = vector.extract_strided_slice %116 {offsets = [0, 768], sizes = [16, 384], strides = [1, 1]} : vector<16x1536xf32> to vector<16x384xf32>
    %121 = vector.extract_strided_slice %116 {offsets = [0, 1152], sizes = [16, 384], strides = [1, 1]} : vector<16x1536xf32> to vector<16x384xf32>
    %122 = arith.maximumf %120, %121 : vector<16x384xf32>
    %123 = arith.maximumf %119, %122 : vector<16x384xf32>
    %124 = vector.broadcast %1 : vector<16x1xf32> to vector<16x384xf32>
    %125 = arith.addf %123, %124 : vector<16x384xf32>
    %cst_50 = arith.constant 0.000000e+00 : f32
    %126 = vector.broadcast %cst_50 : f32 to vector<16x384xf32>
    %127 = arith.maximumf %125, %126 : vector<16x384xf32>
    %128 = arith.truncf %127 : vector<16x384xf32> to vector<16x384xbf16>
    %c112 = arith.constant 112 : index
    %c0_51 = arith.constant 0 : index
    %129 = vector.load %arg11[%c112, %c0_51] : memref<192x384xbf16, #tpu.memory_space<vmem>>, vector<16x384xbf16>
    tpu.vector_store %arg11[%c112, %c0_51], %128 {strides = array<i32>} : memref<192x384xbf16, #tpu.memory_space<vmem>>, vector<16x384xbf16>,
    %c0_52 = arith.constant 0 : index
    %c8 = arith.constant 8 : index
    %c0_53 = arith.constant 0 : index
    %c0_54 = arith.constant 0 : index
    %130 = vector.load %arg1[%c0_52, %c8, %c0_53, %c0_54] : memref<1x12x25x1536xbf16, #tpu.memory_space<vmem>>, vector<1x1x25x1536xbf16>
    %131 = vector.shape_cast %130 : vector<1x1x25x1536xbf16> to vector<25x1536xbf16>
    %cst_55 = arith.constant dense<0.000000e+00> : vector<16x1536xf32>
    %132 = tpu.matmul %0, %131, %cst_55 {dimension_numbers = #tpu.dot_dimension_numbers<[1], [0], [0], [1], [0, 0, 1, 1], [], []>} : vector<16x25xbf16>, vector<25x1536xbf16>, vector<16x1536xf32> -> vector<16x1536xf32>
    %133 = vector.extract_strided_slice %132 {offsets = [0, 0], sizes = [16, 384], strides = [1, 1]} : vector<16x1536xf32> to vector<16x384xf32>
    %134 = vector.extract_strided_slice %132 {offsets = [0, 384], sizes = [16, 384], strides = [1, 1]} : vector<16x1536xf32> to vector<16x384xf32>
    %135 = arith.maximumf %133, %134 : vector<16x384xf32>
    %136 = vector.extract_strided_slice %132 {offsets = [0, 768], sizes = [16, 384], strides = [1, 1]} : vector<16x1536xf32> to vector<16x384xf32>
    %137 = vector.extract_strided_slice %132 {offsets = [0, 1152], sizes = [16, 384], strides = [1, 1]} : vector<16x1536xf32> to vector<16x384xf32>
    %138 = arith.maximumf %136, %137 : vector<16x384xf32>
    %139 = arith.maximumf %135, %138 : vector<16x384xf32>
    %140 = vector.broadcast %1 : vector<16x1xf32> to vector<16x384xf32>
    %141 = arith.addf %139, %140 : vector<16x384xf32>
    %cst_56 = arith.constant 0.000000e+00 : f32
    %142 = vector.broadcast %cst_56 : f32 to vector<16x384xf32>
    %143 = arith.maximumf %141, %142 : vector<16x384xf32>
    %144 = arith.truncf %143 : vector<16x384xf32> to vector<16x384xbf16>
    %c128 = arith.constant 128 : index
    %c0_57 = arith.constant 0 : index
    %145 = vector.load %arg11[%c128, %c0_57] : memref<192x384xbf16, #tpu.memory_space<vmem>>, vector<16x384xbf16>
    tpu.vector_store %arg11[%c128, %c0_57], %144 {strides = array<i32>} : memref<192x384xbf16, #tpu.memory_space<vmem>>, vector<16x384xbf16>,
    %c0_58 = arith.constant 0 : index
    %c9 = arith.constant 9 : index
    %c0_59 = arith.constant 0 : index
    %c0_60 = arith.constant 0 : index
    %146 = vector.load %arg1[%c0_58, %c9, %c0_59, %c0_60] : memref<1x12x25x1536xbf16, #tpu.memory_space<vmem>>, vector<1x1x25x1536xbf16>
    %147 = vector.shape_cast %146 : vector<1x1x25x1536xbf16> to vector<25x1536xbf16>
    %cst_61 = arith.constant dense<0.000000e+00> : vector<16x1536xf32>
    %148 = tpu.matmul %0, %147, %cst_61 {dimension_numbers = #tpu.dot_dimension_numbers<[1], [0], [0], [1], [0, 0, 1, 1], [], []>} : vector<16x25xbf16>, vector<25x1536xbf16>, vector<16x1536xf32> -> vector<16x1536xf32>
    %149 = vector.extract_strided_slice %148 {offsets = [0, 0], sizes = [16, 384], strides = [1, 1]} : vector<16x1536xf32> to vector<16x384xf32>
    %150 = vector.extract_strided_slice %148 {offsets = [0, 384], sizes = [16, 384], strides = [1, 1]} : vector<16x1536xf32> to vector<16x384xf32>
    %151 = arith.maximumf %149, %150 : vector<16x384xf32>
    %152 = vector.extract_strided_slice %148 {offsets = [0, 768], sizes = [16, 384], strides = [1, 1]} : vector<16x1536xf32> to vector<16x384xf32>
    %153 = vector.extract_strided_slice %148 {offsets = [0, 1152], sizes = [16, 384], strides = [1, 1]} : vector<16x1536xf32> to vector<16x384xf32>
    %154 = arith.maximumf %152, %153 : vector<16x384xf32>
    %155 = arith.maximumf %151, %154 : vector<16x384xf32>
    %156 = vector.broadcast %1 : vector<16x1xf32> to vector<16x384xf32>
    %157 = arith.addf %155, %156 : vector<16x384xf32>
    %cst_62 = arith.constant 0.000000e+00 : f32
    %158 = vector.broadcast %cst_62 : f32 to vector<16x384xf32>
    %159 = arith.maximumf %157, %158 : vector<16x384xf32>
    %160 = arith.truncf %159 : vector<16x384xf32> to vector<16x384xbf16>
    %c144 = arith.constant 144 : index
    %c0_63 = arith.constant 0 : index
    %161 = vector.load %arg11[%c144, %c0_63] : memref<192x384xbf16, #tpu.memory_space<vmem>>, vector<16x384xbf16>
    tpu.vector_store %arg11[%c144, %c0_63], %160 {strides = array<i32>} : memref<192x384xbf16, #tpu.memory_space<vmem>>, vector<16x384xbf16>,
    %c0_64 = arith.constant 0 : index
    %c10 = arith.constant 10 : index
    %c0_65 = arith.constant 0 : index
    %c0_66 = arith.constant 0 : index
    %162 = vector.load %arg1[%c0_64, %c10, %c0_65, %c0_66] : memref<1x12x25x1536xbf16, #tpu.memory_space<vmem>>, vector<1x1x25x1536xbf16>
    %163 = vector.shape_cast %162 : vector<1x1x25x1536xbf16> to vector<25x1536xbf16>
    %cst_67 = arith.constant dense<0.000000e+00> : vector<16x1536xf32>
    %164 = tpu.matmul %0, %163, %cst_67 {dimension_numbers = #tpu.dot_dimension_numbers<[1], [0], [0], [1], [0, 0, 1, 1], [], []>} : vector<16x25xbf16>, vector<25x1536xbf16>, vector<16x1536xf32> -> vector<16x1536xf32>
    %165 = vector.extract_strided_slice %164 {offsets = [0, 0], sizes = [16, 384], strides = [1, 1]} : vector<16x1536xf32> to vector<16x384xf32>
    %166 = vector.extract_strided_slice %164 {offsets = [0, 384], sizes = [16, 384], strides = [1, 1]} : vector<16x1536xf32> to vector<16x384xf32>
    %167 = arith.maximumf %165, %166 : vector<16x384xf32>
    %168 = vector.extract_strided_slice %164 {offsets = [0, 768], sizes = [16, 384], strides = [1, 1]} : vector<16x1536xf32> to vector<16x384xf32>
    %169 = vector.extract_strided_slice %164 {offsets = [0, 1152], sizes = [16, 384], strides = [1, 1]} : vector<16x1536xf32> to vector<16x384xf32>
    %170 = arith.maximumf %168, %169 : vector<16x384xf32>
    %171 = arith.maximumf %167, %170 : vector<16x384xf32>
    %172 = vector.broadcast %1 : vector<16x1xf32> to vector<16x384xf32>
    %173 = arith.addf %171, %172 : vector<16x384xf32>
    %cst_68 = arith.constant 0.000000e+00 : f32
    %174 = vector.broadcast %cst_68 : f32 to vector<16x384xf32>
    %175 = arith.maximumf %173, %174 : vector<16x384xf32>
    %176 = arith.truncf %175 : vector<16x384xf32> to vector<16x384xbf16>
    %c160 = arith.constant 160 : index
    %c0_69 = arith.constant 0 : index
    %177 = vector.load %arg11[%c160, %c0_69] : memref<192x384xbf16, #tpu.memory_space<vmem>>, vector<16x384xbf16>
    tpu.vector_store %arg11[%c160, %c0_69], %176 {strides = array<i32>} : memref<192x384xbf16, #tpu.memory_space<vmem>>, vector<16x384xbf16>,
    %c0_70 = arith.constant 0 : index
    %c11 = arith.constant 11 : index
    %c0_71 = arith.constant 0 : index
    %c0_72 = arith.constant 0 : index
    %178 = vector.load %arg1[%c0_70, %c11, %c0_71, %c0_72] : memref<1x12x25x1536xbf16, #tpu.memory_space<vmem>>, vector<1x1x25x1536xbf16>
    %179 = vector.shape_cast %178 : vector<1x1x25x1536xbf16> to vector<25x1536xbf16>
    %cst_73 = arith.constant dense<0.000000e+00> : vector<16x1536xf32>
    %180 = tpu.matmul %0, %179, %cst_73 {dimension_numbers = #tpu.dot_dimension_numbers<[1], [0], [0], [1], [0, 0, 1, 1], [], []>} : vector<16x25xbf16>, vector<25x1536xbf16>, vector<16x1536xf32> -> vector<16x1536xf32>
    %181 = vector.extract_strided_slice %180 {offsets = [0, 0], sizes = [16, 384], strides = [1, 1]} : vector<16x1536xf32> to vector<16x384xf32>
    %182 = vector.extract_strided_slice %180 {offsets = [0, 384], sizes = [16, 384], strides = [1, 1]} : vector<16x1536xf32> to vector<16x384xf32>
    %183 = arith.maximumf %181, %182 : vector<16x384xf32>
    %184 = vector.extract_strided_slice %180 {offsets = [0, 768], sizes = [16, 384], strides = [1, 1]} : vector<16x1536xf32> to vector<16x384xf32>
    %185 = vector.extract_strided_slice %180 {offsets = [0, 1152], sizes = [16, 384], strides = [1, 1]} : vector<16x1536xf32> to vector<16x384xf32>
    %186 = arith.maximumf %184, %185 : vector<16x384xf32>
    %187 = arith.maximumf %183, %186 : vector<16x384xf32>
    %188 = vector.broadcast %1 : vector<16x1xf32> to vector<16x384xf32>
    %189 = arith.addf %187, %188 : vector<16x384xf32>
    %cst_74 = arith.constant 0.000000e+00 : f32
    %190 = vector.broadcast %cst_74 : f32 to vector<16x384xf32>
    %191 = arith.maximumf %189, %190 : vector<16x384xf32>
    %192 = arith.truncf %191 : vector<16x384xf32> to vector<16x384xbf16>
    %c176 = arith.constant 176 : index
    %c0_75 = arith.constant 0 : index
    %193 = vector.load %arg11[%c176, %c0_75] : memref<192x384xbf16, #tpu.memory_space<vmem>>, vector<16x384xbf16>
    tpu.vector_store %arg11[%c176, %c0_75], %192 {strides = array<i32>} : memref<192x384xbf16, #tpu.memory_space<vmem>>, vector<16x384xbf16>,
    %c0_76 = arith.constant 0 : index
    %c0_77 = arith.constant 0 : index
    %194 = vector.load %arg5[%c0_76, %c0_77] : memref<20x1xf32, #tpu.memory_space<vmem>>, vector<20x1xf32>
    %cst_78 = arith.constant 0.000000e+00 : f32
    %195 = vector.broadcast %cst_78 : f32 to vector<32x50xf32>
    %cst_79 = arith.constant 0.000000e+00 : f32
    %196 = vector.broadcast %cst_79 : f32 to vector<20x256xf32>
    %cst_80 = arith.constant 0.000000e+00 : f32
    %197 = vector.broadcast %cst_80 : f32 to vector<20x256xf32>
    %c0_81 = arith.constant 0 : index
    %c0_82 = arith.constant 0 : index
    %c0_83 = arith.constant 0 : index
    %198 = vector.load %arg4[%c0_81, %c0_82, %c0_83] : memref<5x20x80xbf16, #tpu.memory_space<vmem>>, vector<1x20x80xbf16>
    %199 = vector.shape_cast %198 : vector<1x20x80xbf16> to vector<20x80xbf16>
    %c0_84 = arith.constant 0 : index
    %c0_85 = arith.constant 0 : index
    %200 = vector.load %arg11[%c0_84, %c0_85] : memref<192x384xbf16, #tpu.memory_space<vmem>>, vector<80x256xbf16>
    %cst_86 = arith.constant dense<0.000000e+00> : vector<20x256xf32>
    %201 = tpu.matmul %199, %200, %cst_86 {dimension_numbers = #tpu.dot_dimension_numbers<[1], [0], [0], [1], [0, 0, 1, 1], [], []>} : vector<20x80xbf16>, vector<80x256xbf16>, vector<20x256xf32> -> vector<20x256xf32>
    %202 = arith.addf %196, %201 : vector<20x256xf32>
    %c16_87 = arith.constant 16 : index
    %c0_88 = arith.constant 0 : index
    %203 = vector.load %arg11[%c16_87, %c0_88] : memref<192x384xbf16, #tpu.memory_space<vmem>>, vector<80x256xbf16>
    %cst_89 = arith.constant dense<0.000000e+00> : vector<20x256xf32>
    %204 = tpu.matmul %199, %203, %cst_89 {dimension_numbers = #tpu.dot_dimension_numbers<[1], [0], [0], [1], [0, 0, 1, 1], [], []>} : vector<20x80xbf16>, vector<80x256xbf16>, vector<20x256xf32> -> vector<20x256xf32>
    %205 = arith.addf %197, %204 : vector<20x256xf32>
    %c1_90 = arith.constant 1 : index
    %c0_91 = arith.constant 0 : index
    %c0_92 = arith.constant 0 : index
    %206 = vector.load %arg4[%c1_90, %c0_91, %c0_92] : memref<5x20x80xbf16, #tpu.memory_space<vmem>>, vector<1x20x80xbf16>
    %207 = vector.shape_cast %206 : vector<1x20x80xbf16> to vector<20x80xbf16>
    %c0_93 = arith.constant 0 : index
    %c32_94 = arith.constant 32 : index
    %208 = vector.load %arg11[%c0_93, %c32_94] : memref<192x384xbf16, #tpu.memory_space<vmem>>, vector<80x256xbf16>
    %cst_95 = arith.constant dense<0.000000e+00> : vector<20x256xf32>
    %209 = tpu.matmul %207, %208, %cst_95 {dimension_numbers = #tpu.dot_dimension_numbers<[1], [0], [0], [1], [0, 0, 1, 1], [], []>} : vector<20x80xbf16>, vector<80x256xbf16>, vector<20x256xf32> -> vector<20x256xf32>
    %210 = arith.addf %202, %209 : vector<20x256xf32>
    %c16_96 = arith.constant 16 : index
    %c32_97 = arith.constant 32 : index
    %211 = vector.load %arg11[%c16_96, %c32_97] : memref<192x384xbf16, #tpu.memory_space<vmem>>, vector<80x256xbf16>
    %cst_98 = arith.constant dense<0.000000e+00> : vector<20x256xf32>
    %212 = tpu.matmul %207, %211, %cst_98 {dimension_numbers = #tpu.dot_dimension_numbers<[1], [0], [0], [1], [0, 0, 1, 1], [], []>} : vector<20x80xbf16>, vector<80x256xbf16>, vector<20x256xf32> -> vector<20x256xf32>
    %213 = arith.addf %205, %212 : vector<20x256xf32>
    %c2_99 = arith.constant 2 : index
    %c0_100 = arith.constant 0 : index
    %c0_101 = arith.constant 0 : index
    %214 = vector.load %arg4[%c2_99, %c0_100, %c0_101] : memref<5x20x80xbf16, #tpu.memory_space<vmem>>, vector<1x20x80xbf16>
    %215 = vector.shape_cast %214 : vector<1x20x80xbf16> to vector<20x80xbf16>
    %c0_102 = arith.constant 0 : index
    %c64_103 = arith.constant 64 : index
    %216 = vector.load %arg11[%c0_102, %c64_103] : memref<192x384xbf16, #tpu.memory_space<vmem>>, vector<80x256xbf16>
    %cst_104 = arith.constant dense<0.000000e+00> : vector<20x256xf32>
    %217 = tpu.matmul %215, %216, %cst_104 {dimension_numbers = #tpu.dot_dimension_numbers<[1], [0], [0], [1], [0, 0, 1, 1], [], []>} : vector<20x80xbf16>, vector<80x256xbf16>, vector<20x256xf32> -> vector<20x256xf32>
    %218 = arith.addf %210, %217 : vector<20x256xf32>
    %c16_105 = arith.constant 16 : index
    %c64_106 = arith.constant 64 : index
    %219 = vector.load %arg11[%c16_105, %c64_106] : memref<192x384xbf16, #tpu.memory_space<vmem>>, vector<80x256xbf16>
    %cst_107 = arith.constant dense<0.000000e+00> : vector<20x256xf32>
    %220 = tpu.matmul %215, %219, %cst_107 {dimension_numbers = #tpu.dot_dimension_numbers<[1], [0], [0], [1], [0, 0, 1, 1], [], []>} : vector<20x80xbf16>, vector<80x256xbf16>, vector<20x256xf32> -> vector<20x256xf32>
    %221 = arith.addf %213, %220 : vector<20x256xf32>
    %c3_108 = arith.constant 3 : index
    %c0_109 = arith.constant 0 : index
    %c0_110 = arith.constant 0 : index
    %222 = vector.load %arg4[%c3_108, %c0_109, %c0_110] : memref<5x20x80xbf16, #tpu.memory_space<vmem>>, vector<1x20x80xbf16>
    %223 = vector.shape_cast %222 : vector<1x20x80xbf16> to vector<20x80xbf16>
    %c0_111 = arith.constant 0 : index
    %c96_112 = arith.constant 96 : index
    %224 = vector.load %arg11[%c0_111, %c96_112] : memref<192x384xbf16, #tpu.memory_space<vmem>>, vector<80x256xbf16>
    %cst_113 = arith.constant dense<0.000000e+00> : vector<20x256xf32>
    %225 = tpu.matmul %223, %224, %cst_113 {dimension_numbers = #tpu.dot_dimension_numbers<[1], [0], [0], [1], [0, 0, 1, 1], [], []>} : vector<20x80xbf16>, vector<80x256xbf16>, vector<20x256xf32> -> vector<20x256xf32>
    %226 = arith.addf %218, %225 : vector<20x256xf32>
    %c16_114 = arith.constant 16 : index
    %c96_115 = arith.constant 96 : index
    %227 = vector.load %arg11[%c16_114, %c96_115] : memref<192x384xbf16, #tpu.memory_space<vmem>>, vector<80x256xbf16>
    %cst_116 = arith.constant dense<0.000000e+00> : vector<20x256xf32>
    %228 = tpu.matmul %223, %227, %cst_116 {dimension_numbers = #tpu.dot_dimension_numbers<[1], [0], [0], [1], [0, 0, 1, 1], [], []>} : vector<20x80xbf16>, vector<80x256xbf16>, vector<20x256xf32> -> vector<20x256xf32>
    %229 = arith.addf %221, %228 : vector<20x256xf32>
    %c4_117 = arith.constant 4 : index
    %c0_118 = arith.constant 0 : index
    %c0_119 = arith.constant 0 : index
    %230 = vector.load %arg4[%c4_117, %c0_118, %c0_119] : memref<5x20x80xbf16, #tpu.memory_space<vmem>>, vector<1x20x80xbf16>
    %231 = vector.shape_cast %230 : vector<1x20x80xbf16> to vector<20x80xbf16>
    %c0_120 = arith.constant 0 : index
    %c128_121 = arith.constant 128 : index
    %232 = vector.load %arg11[%c0_120, %c128_121] : memref<192x384xbf16, #tpu.memory_space<vmem>>, vector<80x256xbf16>
    %cst_122 = arith.constant dense<0.000000e+00> : vector<20x256xf32>
    %233 = tpu.matmul %231, %232, %cst_122 {dimension_numbers = #tpu.dot_dimension_numbers<[1], [0], [0], [1], [0, 0, 1, 1], [], []>} : vector<20x80xbf16>, vector<80x256xbf16>, vector<20x256xf32> -> vector<20x256xf32>
    %234 = arith.addf %226, %233 : vector<20x256xf32>
    %c16_123 = arith.constant 16 : index
    %c128_124 = arith.constant 128 : index
    %235 = vector.load %arg11[%c16_123, %c128_124] : memref<192x384xbf16, #tpu.memory_space<vmem>>, vector<80x256xbf16>
    %cst_125 = arith.constant dense<0.000000e+00> : vector<20x256xf32>
    %236 = tpu.matmul %231, %235, %cst_125 {dimension_numbers = #tpu.dot_dimension_numbers<[1], [0], [0], [1], [0, 0, 1, 1], [], []>} : vector<20x80xbf16>, vector<80x256xbf16>, vector<20x256xf32> -> vector<20x256xf32>
    %237 = arith.addf %229, %236 : vector<20x256xf32>
    %238 = arith.maximumf %234, %237 : vector<20x256xf32>
    %239 = vector.extract_strided_slice %238 {offsets = [0, 0], sizes = [20, 32], strides = [1, 1]} : vector<20x256xf32> to vector<20x32xf32>
    %240 = vector.extract_strided_slice %238 {offsets = [0, 32], sizes = [20, 32], strides = [1, 1]} : vector<20x256xf32> to vector<20x32xf32>
    %241 = arith.maximumf %239, %240 : vector<20x32xf32>
    %242 = vector.broadcast %194 : vector<20x1xf32> to vector<20x32xf32>
    %243 = arith.addf %241, %242 : vector<20x32xf32>
    %cst_126 = arith.constant 0.000000e+00 : f32
    %244 = vector.broadcast %cst_126 : f32 to vector<20x32xf32>
    %245 = arith.maximumf %243, %244 : vector<20x32xf32>
    %c0_127 = arith.constant 0 : index
    %c0_128 = arith.constant 0 : index
    %c0_129 = arith.constant 0 : index
    %c0_130 = arith.constant 0 : index
    %246 = vector.load %arg6[%c0_127, %c0_128, %c0_129, %c0_130] : memref<4x4x20x50xf32, #tpu.memory_space<vmem>>, vector<1x1x20x50xf32>
    %247 = vector.shape_cast %246 : vector<1x1x20x50xf32> to vector<20x50xf32>
    %cst_131 = arith.constant dense<0.000000e+00> : vector<32x50xf32>
    %248 = tpu.matmul %245, %247, %cst_131 {dimension_numbers = #tpu.dot_dimension_numbers<[0], [0], [1], [1], [0, 1, 1, 1], [], []>} : vector<20x32xf32>, vector<20x50xf32>, vector<32x50xf32> -> vector<32x50xf32>
    %249 = arith.addf %195, %248 : vector<32x50xf32>
    %250 = vector.extract_strided_slice %238 {offsets = [0, 64], sizes = [20, 32], strides = [1, 1]} : vector<20x256xf32> to vector<20x32xf32>
    %251 = vector.extract_strided_slice %238 {offsets = [0, 96], sizes = [20, 32], strides = [1, 1]} : vector<20x256xf32> to vector<20x32xf32>
    %252 = arith.maximumf %250, %251 : vector<20x32xf32>
    %253 = vector.broadcast %194 : vector<20x1xf32> to vector<20x32xf32>
    %254 = arith.addf %252, %253 : vector<20x32xf32>
    %cst_132 = arith.constant 0.000000e+00 : f32
    %255 = vector.broadcast %cst_132 : f32 to vector<20x32xf32>
    %256 = arith.maximumf %254, %255 : vector<20x32xf32>
    %c0_133 = arith.constant 0 : index
    %c1_134 = arith.constant 1 : index
    %c0_135 = arith.constant 0 : index
    %c0_136 = arith.constant 0 : index
    %257 = vector.load %arg6[%c0_133, %c1_134, %c0_135, %c0_136] : memref<4x4x20x50xf32, #tpu.memory_space<vmem>>, vector<1x1x20x50xf32>
    %258 = vector.shape_cast %257 : vector<1x1x20x50xf32> to vector<20x50xf32>
    %cst_137 = arith.constant dense<0.000000e+00> : vector<32x50xf32>
    %259 = tpu.matmul %256, %258, %cst_137 {dimension_numbers = #tpu.dot_dimension_numbers<[0], [0], [1], [1], [0, 1, 1, 1], [], []>} : vector<20x32xf32>, vector<20x50xf32>, vector<32x50xf32> -> vector<32x50xf32>
    %260 = arith.addf %249, %259 : vector<32x50xf32>
    %261 = vector.extract_strided_slice %238 {offsets = [0, 128], sizes = [20, 32], strides = [1, 1]} : vector<20x256xf32> to vector<20x32xf32>
    %262 = vector.extract_strided_slice %238 {offsets = [0, 160], sizes = [20, 32], strides = [1, 1]} : vector<20x256xf32> to vector<20x32xf32>
    %263 = arith.maximumf %261, %262 : vector<20x32xf32>
    %264 = vector.broadcast %194 : vector<20x1xf32> to vector<20x32xf32>
    %265 = arith.addf %263, %264 : vector<20x32xf32>
    %cst_138 = arith.constant 0.000000e+00 : f32
    %266 = vector.broadcast %cst_138 : f32 to vector<20x32xf32>
    %267 = arith.maximumf %265, %266 : vector<20x32xf32>
    %c0_139 = arith.constant 0 : index
    %c2_140 = arith.constant 2 : index
    %c0_141 = arith.constant 0 : index
    %c0_142 = arith.constant 0 : index
    %268 = vector.load %arg6[%c0_139, %c2_140, %c0_141, %c0_142] : memref<4x4x20x50xf32, #tpu.memory_space<vmem>>, vector<1x1x20x50xf32>
    %269 = vector.shape_cast %268 : vector<1x1x20x50xf32> to vector<20x50xf32>
    %cst_143 = arith.constant dense<0.000000e+00> : vector<32x50xf32>
    %270 = tpu.matmul %267, %269, %cst_143 {dimension_numbers = #tpu.dot_dimension_numbers<[0], [0], [1], [1], [0, 1, 1, 1], [], []>} : vector<20x32xf32>, vector<20x50xf32>, vector<32x50xf32> -> vector<32x50xf32>
    %271 = arith.addf %260, %270 : vector<32x50xf32>
    %272 = vector.extract_strided_slice %238 {offsets = [0, 192], sizes = [20, 32], strides = [1, 1]} : vector<20x256xf32> to vector<20x32xf32>
    %273 = vector.extract_strided_slice %238 {offsets = [0, 224], sizes = [20, 32], strides = [1, 1]} : vector<20x256xf32> to vector<20x32xf32>
    %274 = arith.maximumf %272, %273 : vector<20x32xf32>
    %275 = vector.broadcast %194 : vector<20x1xf32> to vector<20x32xf32>
    %276 = arith.addf %274, %275 : vector<20x32xf32>
    %cst_144 = arith.constant 0.000000e+00 : f32
    %277 = vector.broadcast %cst_144 : f32 to vector<20x32xf32>
    %278 = arith.maximumf %276, %277 : vector<20x32xf32>
    %c0_145 = arith.constant 0 : index
    %c3_146 = arith.constant 3 : index
    %c0_147 = arith.constant 0 : index
    %c0_148 = arith.constant 0 : index
    %279 = vector.load %arg6[%c0_145, %c3_146, %c0_147, %c0_148] : memref<4x4x20x50xf32, #tpu.memory_space<vmem>>, vector<1x1x20x50xf32>
    %280 = vector.shape_cast %279 : vector<1x1x20x50xf32> to vector<20x50xf32>
    %cst_149 = arith.constant dense<0.000000e+00> : vector<32x50xf32>
    %281 = tpu.matmul %278, %280, %cst_149 {dimension_numbers = #tpu.dot_dimension_numbers<[0], [0], [1], [1], [0, 1, 1, 1], [], []>} : vector<20x32xf32>, vector<20x50xf32>, vector<32x50xf32> -> vector<32x50xf32>
    %282 = arith.addf %271, %281 : vector<32x50xf32>
    %cst_150 = arith.constant 0.000000e+00 : f32
    %283 = vector.broadcast %cst_150 : f32 to vector<20x256xf32>
    %cst_151 = arith.constant 0.000000e+00 : f32
    %284 = vector.broadcast %cst_151 : f32 to vector<20x256xf32>
    %c0_152 = arith.constant 0 : index
    %c0_153 = arith.constant 0 : index
    %c0_154 = arith.constant 0 : index
    %285 = vector.load %arg4[%c0_152, %c0_153, %c0_154] : memref<5x20x80xbf16, #tpu.memory_space<vmem>>, vector<1x20x80xbf16>
    %286 = vector.shape_cast %285 : vector<1x20x80xbf16> to vector<20x80xbf16>
    %c32_155 = arith.constant 32 : index
    %c0_156 = arith.constant 0 : index
    %287 = vector.load %arg11[%c32_155, %c0_156] : memref<192x384xbf16, #tpu.memory_space<vmem>>, vector<80x256xbf16>
    %cst_157 = arith.constant dense<0.000000e+00> : vector<20x256xf32>
    %288 = tpu.matmul %286, %287, %cst_157 {dimension_numbers = #tpu.dot_dimension_numbers<[1], [0], [0], [1], [0, 0, 1, 1], [], []>} : vector<20x80xbf16>, vector<80x256xbf16>, vector<20x256xf32> -> vector<20x256xf32>
    %289 = arith.addf %283, %288 : vector<20x256xf32>
    %c48_158 = arith.constant 48 : index
    %c0_159 = arith.constant 0 : index
    %290 = vector.load %arg11[%c48_158, %c0_159] : memref<192x384xbf16, #tpu.memory_space<vmem>>, vector<80x256xbf16>
    %cst_160 = arith.constant dense<0.000000e+00> : vector<20x256xf32>
    %291 = tpu.matmul %286, %290, %cst_160 {dimension_numbers = #tpu.dot_dimension_numbers<[1], [0], [0], [1], [0, 0, 1, 1], [], []>} : vector<20x80xbf16>, vector<80x256xbf16>, vector<20x256xf32> -> vector<20x256xf32>
    %292 = arith.addf %284, %291 : vector<20x256xf32>
    %c1_161 = arith.constant 1 : index
    %c0_162 = arith.constant 0 : index
    %c0_163 = arith.constant 0 : index
    %293 = vector.load %arg4[%c1_161, %c0_162, %c0_163] : memref<5x20x80xbf16, #tpu.memory_space<vmem>>, vector<1x20x80xbf16>
    %294 = vector.shape_cast %293 : vector<1x20x80xbf16> to vector<20x80xbf16>
    %c32_164 = arith.constant 32 : index
    %c32_165 = arith.constant 32 : index
    %295 = vector.load %arg11[%c32_164, %c32_165] : memref<192x384xbf16, #tpu.memory_space<vmem>>, vector<80x256xbf16>
    %cst_166 = arith.constant dense<0.000000e+00> : vector<20x256xf32>
    %296 = tpu.matmul %294, %295, %cst_166 {dimension_numbers = #tpu.dot_dimension_numbers<[1], [0], [0], [1], [0, 0, 1, 1], [], []>} : vector<20x80xbf16>, vector<80x256xbf16>, vector<20x256xf32> -> vector<20x256xf32>
    %297 = arith.addf %289, %296 : vector<20x256xf32>
    %c48_167 = arith.constant 48 : index
    %c32_168 = arith.constant 32 : index
    %298 = vector.load %arg11[%c48_167, %c32_168] : memref<192x384xbf16, #tpu.memory_space<vmem>>, vector<80x256xbf16>
    %cst_169 = arith.constant dense<0.000000e+00> : vector<20x256xf32>
    %299 = tpu.matmul %294, %298, %cst_169 {dimension_numbers = #tpu.dot_dimension_numbers<[1], [0], [0], [1], [0, 0, 1, 1], [], []>} : vector<20x80xbf16>, vector<80x256xbf16>, vector<20x256xf32> -> vector<20x256xf32>
    %300 = arith.addf %292, %299 : vector<20x256xf32>
    %c2_170 = arith.constant 2 : index
    %c0_171 = arith.constant 0 : index
    %c0_172 = arith.constant 0 : index
    %301 = vector.load %arg4[%c2_170, %c0_171, %c0_172] : memref<5x20x80xbf16, #tpu.memory_space<vmem>>, vector<1x20x80xbf16>
    %302 = vector.shape_cast %301 : vector<1x20x80xbf16> to vector<20x80xbf16>
    %c32_173 = arith.constant 32 : index
    %c64_174 = arith.constant 64 : index
    %303 = vector.load %arg11[%c32_173, %c64_174] : memref<192x384xbf16, #tpu.memory_space<vmem>>, vector<80x256xbf16>
    %cst_175 = arith.constant dense<0.000000e+00> : vector<20x256xf32>
    %304 = tpu.matmul %302, %303, %cst_175 {dimension_numbers = #tpu.dot_dimension_numbers<[1], [0], [0], [1], [0, 0, 1, 1], [], []>} : vector<20x80xbf16>, vector<80x256xbf16>, vector<20x256xf32> -> vector<20x256xf32>
    %305 = arith.addf %297, %304 : vector<20x256xf32>
    %c48_176 = arith.constant 48 : index
    %c64_177 = arith.constant 64 : index
    %306 = vector.load %arg11[%c48_176, %c64_177] : memref<192x384xbf16, #tpu.memory_space<vmem>>, vector<80x256xbf16>
    %cst_178 = arith.constant dense<0.000000e+00> : vector<20x256xf32>
    %307 = tpu.matmul %302, %306, %cst_178 {dimension_numbers = #tpu.dot_dimension_numbers<[1], [0], [0], [1], [0, 0, 1, 1], [], []>} : vector<20x80xbf16>, vector<80x256xbf16>, vector<20x256xf32> -> vector<20x256xf32>
    %308 = arith.addf %300, %307 : vector<20x256xf32>
    %c3_179 = arith.constant 3 : index
    %c0_180 = arith.constant 0 : index
    %c0_181 = arith.constant 0 : index
    %309 = vector.load %arg4[%c3_179, %c0_180, %c0_181] : memref<5x20x80xbf16, #tpu.memory_space<vmem>>, vector<1x20x80xbf16>
    %310 = vector.shape_cast %309 : vector<1x20x80xbf16> to vector<20x80xbf16>
    %c32_182 = arith.constant 32 : index
    %c96_183 = arith.constant 96 : index
    %311 = vector.load %arg11[%c32_182, %c96_183] : memref<192x384xbf16, #tpu.memory_space<vmem>>, vector<80x256xbf16>
    %cst_184 = arith.constant dense<0.000000e+00> : vector<20x256xf32>
    %312 = tpu.matmul %310, %311, %cst_184 {dimension_numbers = #tpu.dot_dimension_numbers<[1], [0], [0], [1], [0, 0, 1, 1], [], []>} : vector<20x80xbf16>, vector<80x256xbf16>, vector<20x256xf32> -> vector<20x256xf32>
    %313 = arith.addf %305, %312 : vector<20x256xf32>
    %c48_185 = arith.constant 48 : index
    %c96_186 = arith.constant 96 : index
    %314 = vector.load %arg11[%c48_185, %c96_186] : memref<192x384xbf16, #tpu.memory_space<vmem>>, vector<80x256xbf16>
    %cst_187 = arith.constant dense<0.000000e+00> : vector<20x256xf32>
    %315 = tpu.matmul %310, %314, %cst_187 {dimension_numbers = #tpu.dot_dimension_numbers<[1], [0], [0], [1], [0, 0, 1, 1], [], []>} : vector<20x80xbf16>, vector<80x256xbf16>, vector<20x256xf32> -> vector<20x256xf32>
    %316 = arith.addf %308, %315 : vector<20x256xf32>
    %c4_188 = arith.constant 4 : index
    %c0_189 = arith.constant 0 : index
    %c0_190 = arith.constant 0 : index
    %317 = vector.load %arg4[%c4_188, %c0_189, %c0_190] : memref<5x20x80xbf16, #tpu.memory_space<vmem>>, vector<1x20x80xbf16>
    %318 = vector.shape_cast %317 : vector<1x20x80xbf16> to vector<20x80xbf16>
    %c32_191 = arith.constant 32 : index
    %c128_192 = arith.constant 128 : index
    %319 = vector.load %arg11[%c32_191, %c128_192] : memref<192x384xbf16, #tpu.memory_space<vmem>>, vector<80x256xbf16>
    %cst_193 = arith.constant dense<0.000000e+00> : vector<20x256xf32>
    %320 = tpu.matmul %318, %319, %cst_193 {dimension_numbers = #tpu.dot_dimension_numbers<[1], [0], [0], [1], [0, 0, 1, 1], [], []>} : vector<20x80xbf16>, vector<80x256xbf16>, vector<20x256xf32> -> vector<20x256xf32>
    %321 = arith.addf %313, %320 : vector<20x256xf32>
    %c48_194 = arith.constant 48 : index
    %c128_195 = arith.constant 128 : index
    %322 = vector.load %arg11[%c48_194, %c128_195] : memref<192x384xbf16, #tpu.memory_space<vmem>>, vector<80x256xbf16>
    %cst_196 = arith.constant dense<0.000000e+00> : vector<20x256xf32>
    %323 = tpu.matmul %318, %322, %cst_196 {dimension_numbers = #tpu.dot_dimension_numbers<[1], [0], [0], [1], [0, 0, 1, 1], [], []>} : vector<20x80xbf16>, vector<80x256xbf16>, vector<20x256xf32> -> vector<20x256xf32>
    %324 = arith.addf %316, %323 : vector<20x256xf32>
    %325 = arith.maximumf %321, %324 : vector<20x256xf32>
    %326 = vector.extract_strided_slice %325 {offsets = [0, 0], sizes = [20, 32], strides = [1, 1]} : vector<20x256xf32> to vector<20x32xf32>
    %327 = vector.extract_strided_slice %325 {offsets = [0, 32], sizes = [20, 32], strides = [1, 1]} : vector<20x256xf32> to vector<20x32xf32>
    %328 = arith.maximumf %326, %327 : vector<20x32xf32>
    %329 = vector.broadcast %194 : vector<20x1xf32> to vector<20x32xf32>
    %330 = arith.addf %328, %329 : vector<20x32xf32>
    %cst_197 = arith.constant 0.000000e+00 : f32
    %331 = vector.broadcast %cst_197 : f32 to vector<20x32xf32>
    %332 = arith.maximumf %330, %331 : vector<20x32xf32>
    %c1_198 = arith.constant 1 : index
    %c0_199 = arith.constant 0 : index
    %c0_200 = arith.constant 0 : index
    %c0_201 = arith.constant 0 : index
    %333 = vector.load %arg6[%c1_198, %c0_199, %c0_200, %c0_201] : memref<4x4x20x50xf32, #tpu.memory_space<vmem>>, vector<1x1x20x50xf32>
    %334 = vector.shape_cast %333 : vector<1x1x20x50xf32> to vector<20x50xf32>
    %cst_202 = arith.constant dense<0.000000e+00> : vector<32x50xf32>
    %335 = tpu.matmul %332, %334, %cst_202 {dimension_numbers = #tpu.dot_dimension_numbers<[0], [0], [1], [1], [0, 1, 1, 1], [], []>} : vector<20x32xf32>, vector<20x50xf32>, vector<32x50xf32> -> vector<32x50xf32>
    %336 = arith.addf %282, %335 : vector<32x50xf32>
    %337 = vector.extract_strided_slice %325 {offsets = [0, 64], sizes = [20, 32], strides = [1, 1]} : vector<20x256xf32> to vector<20x32xf32>
    %338 = vector.extract_strided_slice %325 {offsets = [0, 96], sizes = [20, 32], strides = [1, 1]} : vector<20x256xf32> to vector<20x32xf32>
    %339 = arith.maximumf %337, %338 : vector<20x32xf32>
    %340 = vector.broadcast %194 : vector<20x1xf32> to vector<20x32xf32>
    %341 = arith.addf %339, %340 : vector<20x32xf32>
    %cst_203 = arith.constant 0.000000e+00 : f32
    %342 = vector.broadcast %cst_203 : f32 to vector<20x32xf32>
    %343 = arith.maximumf %341, %342 : vector<20x32xf32>
    %c1_204 = arith.constant 1 : index
    %c1_205 = arith.constant 1 : index
    %c0_206 = arith.constant 0 : index
    %c0_207 = arith.constant 0 : index
    %344 = vector.load %arg6[%c1_204, %c1_205, %c0_206, %c0_207] : memref<4x4x20x50xf32, #tpu.memory_space<vmem>>, vector<1x1x20x50xf32>
    %345 = vector.shape_cast %344 : vector<1x1x20x50xf32> to vector<20x50xf32>
    %cst_208 = arith.constant dense<0.000000e+00> : vector<32x50xf32>
    %346 = tpu.matmul %343, %345, %cst_208 {dimension_numbers = #tpu.dot_dimension_numbers<[0], [0], [1], [1], [0, 1, 1, 1], [], []>} : vector<20x32xf32>, vector<20x50xf32>, vector<32x50xf32> -> vector<32x50xf32>
    %347 = arith.addf %336, %346 : vector<32x50xf32>
    %348 = vector.extract_strided_slice %325 {offsets = [0, 128], sizes = [20, 32], strides = [1, 1]} : vector<20x256xf32> to vector<20x32xf32>
    %349 = vector.extract_strided_slice %325 {offsets = [0, 160], sizes = [20, 32], strides = [1, 1]} : vector<20x256xf32> to vector<20x32xf32>
    %350 = arith.maximumf %348, %349 : vector<20x32xf32>
    %351 = vector.broadcast %194 : vector<20x1xf32> to vector<20x32xf32>
    %352 = arith.addf %350, %351 : vector<20x32xf32>
    %cst_209 = arith.constant 0.000000e+00 : f32
    %353 = vector.broadcast %cst_209 : f32 to vector<20x32xf32>
    %354 = arith.maximumf %352, %353 : vector<20x32xf32>
    %c1_210 = arith.constant 1 : index
    %c2_211 = arith.constant 2 : index
    %c0_212 = arith.constant 0 : index
    %c0_213 = arith.constant 0 : index
    %355 = vector.load %arg6[%c1_210, %c2_211, %c0_212, %c0_213] : memref<4x4x20x50xf32, #tpu.memory_space<vmem>>, vector<1x1x20x50xf32>
    %356 = vector.shape_cast %355 : vector<1x1x20x50xf32> to vector<20x50xf32>
    %cst_214 = arith.constant dense<0.000000e+00> : vector<32x50xf32>
    %357 = tpu.matmul %354, %356, %cst_214 {dimension_numbers = #tpu.dot_dimension_numbers<[0], [0], [1], [1], [0, 1, 1, 1], [], []>} : vector<20x32xf32>, vector<20x50xf32>, vector<32x50xf32> -> vector<32x50xf32>
    %358 = arith.addf %347, %357 : vector<32x50xf32>
    %359 = vector.extract_strided_slice %325 {offsets = [0, 192], sizes = [20, 32], strides = [1, 1]} : vector<20x256xf32> to vector<20x32xf32>
    %360 = vector.extract_strided_slice %325 {offsets = [0, 224], sizes = [20, 32], strides = [1, 1]} : vector<20x256xf32> to vector<20x32xf32>
    %361 = arith.maximumf %359, %360 : vector<20x32xf32>
    %362 = vector.broadcast %194 : vector<20x1xf32> to vector<20x32xf32>
    %363 = arith.addf %361, %362 : vector<20x32xf32>
    %cst_215 = arith.constant 0.000000e+00 : f32
    %364 = vector.broadcast %cst_215 : f32 to vector<20x32xf32>
    %365 = arith.maximumf %363, %364 : vector<20x32xf32>
    %c1_216 = arith.constant 1 : index
    %c3_217 = arith.constant 3 : index
    %c0_218 = arith.constant 0 : index
    %c0_219 = arith.constant 0 : index
    %366 = vector.load %arg6[%c1_216, %c3_217, %c0_218, %c0_219] : memref<4x4x20x50xf32, #tpu.memory_space<vmem>>, vector<1x1x20x50xf32>
    %367 = vector.shape_cast %366 : vector<1x1x20x50xf32> to vector<20x50xf32>
    %cst_220 = arith.constant dense<0.000000e+00> : vector<32x50xf32>
    %368 = tpu.matmul %365, %367, %cst_220 {dimension_numbers = #tpu.dot_dimension_numbers<[0], [0], [1], [1], [0, 1, 1, 1], [], []>} : vector<20x32xf32>, vector<20x50xf32>, vector<32x50xf32> -> vector<32x50xf32>
    %369 = arith.addf %358, %368 : vector<32x50xf32>
    %cst_221 = arith.constant 0.000000e+00 : f32
    %370 = vector.broadcast %cst_221 : f32 to vector<20x256xf32>
    %cst_222 = arith.constant 0.000000e+00 : f32
    %371 = vector.broadcast %cst_222 : f32 to vector<20x256xf32>
    %c0_223 = arith.constant 0 : index
    %c0_224 = arith.constant 0 : index
    %c0_225 = arith.constant 0 : index
    %372 = vector.load %arg4[%c0_223, %c0_224, %c0_225] : memref<5x20x80xbf16, #tpu.memory_space<vmem>>, vector<1x20x80xbf16>
    %373 = vector.shape_cast %372 : vector<1x20x80xbf16> to vector<20x80xbf16>
    %c64_226 = arith.constant 64 : index
    %c0_227 = arith.constant 0 : index
    %374 = vector.load %arg11[%c64_226, %c0_227] : memref<192x384xbf16, #tpu.memory_space<vmem>>, vector<80x256xbf16>
    %cst_228 = arith.constant dense<0.000000e+00> : vector<20x256xf32>
    %375 = tpu.matmul %373, %374, %cst_228 {dimension_numbers = #tpu.dot_dimension_numbers<[1], [0], [0], [1], [0, 0, 1, 1], [], []>} : vector<20x80xbf16>, vector<80x256xbf16>, vector<20x256xf32> -> vector<20x256xf32>
    %376 = arith.addf %370, %375 : vector<20x256xf32>
    %c80_229 = arith.constant 80 : index
    %c0_230 = arith.constant 0 : index
    %377 = vector.load %arg11[%c80_229, %c0_230] : memref<192x384xbf16, #tpu.memory_space<vmem>>, vector<80x256xbf16>
    %cst_231 = arith.constant dense<0.000000e+00> : vector<20x256xf32>
    %378 = tpu.matmul %373, %377, %cst_231 {dimension_numbers = #tpu.dot_dimension_numbers<[1], [0], [0], [1], [0, 0, 1, 1], [], []>} : vector<20x80xbf16>, vector<80x256xbf16>, vector<20x256xf32> -> vector<20x256xf32>
    %379 = arith.addf %371, %378 : vector<20x256xf32>
    %c1_232 = arith.constant 1 : index
    %c0_233 = arith.constant 0 : index
    %c0_234 = arith.constant 0 : index
    %380 = vector.load %arg4[%c1_232, %c0_233, %c0_234] : memref<5x20x80xbf16, #tpu.memory_space<vmem>>, vector<1x20x80xbf16>
    %381 = vector.shape_cast %380 : vector<1x20x80xbf16> to vector<20x80xbf16>
    %c64_235 = arith.constant 64 : index
    %c32_236 = arith.constant 32 : index
    %382 = vector.load %arg11[%c64_235, %c32_236] : memref<192x384xbf16, #tpu.memory_space<vmem>>, vector<80x256xbf16>
    %cst_237 = arith.constant dense<0.000000e+00> : vector<20x256xf32>
    %383 = tpu.matmul %381, %382, %cst_237 {dimension_numbers = #tpu.dot_dimension_numbers<[1], [0], [0], [1], [0, 0, 1, 1], [], []>} : vector<20x80xbf16>, vector<80x256xbf16>, vector<20x256xf32> -> vector<20x256xf32>
    %384 = arith.addf %376, %383 : vector<20x256xf32>
    %c80_238 = arith.constant 80 : index
    %c32_239 = arith.constant 32 : index
    %385 = vector.load %arg11[%c80_238, %c32_239] : memref<192x384xbf16, #tpu.memory_space<vmem>>, vector<80x256xbf16>
    %cst_240 = arith.constant dense<0.000000e+00> : vector<20x256xf32>
    %386 = tpu.matmul %381, %385, %cst_240 {dimension_numbers = #tpu.dot_dimension_numbers<[1], [0], [0], [1], [0, 0, 1, 1], [], []>} : vector<20x80xbf16>, vector<80x256xbf16>, vector<20x256xf32> -> vector<20x256xf32>
    %387 = arith.addf %379, %386 : vector<20x256xf32>
    %c2_241 = arith.constant 2 : index
    %c0_242 = arith.constant 0 : index
    %c0_243 = arith.constant 0 : index
    %388 = vector.load %arg4[%c2_241, %c0_242, %c0_243] : memref<5x20x80xbf16, #tpu.memory_space<vmem>>, vector<1x20x80xbf16>
    %389 = vector.shape_cast %388 : vector<1x20x80xbf16> to vector<20x80xbf16>
    %c64_244 = arith.constant 64 : index
    %c64_245 = arith.constant 64 : index
    %390 = vector.load %arg11[%c64_244, %c64_245] : memref<192x384xbf16, #tpu.memory_space<vmem>>, vector<80x256xbf16>
    %cst_246 = arith.constant dense<0.000000e+00> : vector<20x256xf32>
    %391 = tpu.matmul %389, %390, %cst_246 {dimension_numbers = #tpu.dot_dimension_numbers<[1], [0], [0], [1], [0, 0, 1, 1], [], []>} : vector<20x80xbf16>, vector<80x256xbf16>, vector<20x256xf32> -> vector<20x256xf32>
    %392 = arith.addf %384, %391 : vector<20x256xf32>
    %c80_247 = arith.constant 80 : index
    %c64_248 = arith.constant 64 : index
    %393 = vector.load %arg11[%c80_247, %c64_248] : memref<192x384xbf16, #tpu.memory_space<vmem>>, vector<80x256xbf16>
    %cst_249 = arith.constant dense<0.000000e+00> : vector<20x256xf32>
    %394 = tpu.matmul %389, %393, %cst_249 {dimension_numbers = #tpu.dot_dimension_numbers<[1], [0], [0], [1], [0, 0, 1, 1], [], []>} : vector<20x80xbf16>, vector<80x256xbf16>, vector<20x256xf32> -> vector<20x256xf32>
    %395 = arith.addf %387, %394 : vector<20x256xf32>
    %c3_250 = arith.constant 3 : index
    %c0_251 = arith.constant 0 : index
    %c0_252 = arith.constant 0 : index
    %396 = vector.load %arg4[%c3_250, %c0_251, %c0_252] : memref<5x20x80xbf16, #tpu.memory_space<vmem>>, vector<1x20x80xbf16>
    %397 = vector.shape_cast %396 : vector<1x20x80xbf16> to vector<20x80xbf16>
    %c64_253 = arith.constant 64 : index
    %c96_254 = arith.constant 96 : index
    %398 = vector.load %arg11[%c64_253, %c96_254] : memref<192x384xbf16, #tpu.memory_space<vmem>>, vector<80x256xbf16>
    %cst_255 = arith.constant dense<0.000000e+00> : vector<20x256xf32>
    %399 = tpu.matmul %397, %398, %cst_255 {dimension_numbers = #tpu.dot_dimension_numbers<[1], [0], [0], [1], [0, 0, 1, 1], [], []>} : vector<20x80xbf16>, vector<80x256xbf16>, vector<20x256xf32> -> vector<20x256xf32>
    %400 = arith.addf %392, %399 : vector<20x256xf32>
    %c80_256 = arith.constant 80 : index
    %c96_257 = arith.constant 96 : index
    %401 = vector.load %arg11[%c80_256, %c96_257] : memref<192x384xbf16, #tpu.memory_space<vmem>>, vector<80x256xbf16>
    %cst_258 = arith.constant dense<0.000000e+00> : vector<20x256xf32>
    %402 = tpu.matmul %397, %401, %cst_258 {dimension_numbers = #tpu.dot_dimension_numbers<[1], [0], [0], [1], [0, 0, 1, 1], [], []>} : vector<20x80xbf16>, vector<80x256xbf16>, vector<20x256xf32> -> vector<20x256xf32>
    %403 = arith.addf %395, %402 : vector<20x256xf32>
    %c4_259 = arith.constant 4 : index
    %c0_260 = arith.constant 0 : index
    %c0_261 = arith.constant 0 : index
    %404 = vector.load %arg4[%c4_259, %c0_260, %c0_261] : memref<5x20x80xbf16, #tpu.memory_space<vmem>>, vector<1x20x80xbf16>
    %405 = vector.shape_cast %404 : vector<1x20x80xbf16> to vector<20x80xbf16>
    %c64_262 = arith.constant 64 : index
    %c128_263 = arith.constant 128 : index
    %406 = vector.load %arg11[%c64_262, %c128_263] : memref<192x384xbf16, #tpu.memory_space<vmem>>, vector<80x256xbf16>
    %cst_264 = arith.constant dense<0.000000e+00> : vector<20x256xf32>
    %407 = tpu.matmul %405, %406, %cst_264 {dimension_numbers = #tpu.dot_dimension_numbers<[1], [0], [0], [1], [0, 0, 1, 1], [], []>} : vector<20x80xbf16>, vector<80x256xbf16>, vector<20x256xf32> -> vector<20x256xf32>
    %408 = arith.addf %400, %407 : vector<20x256xf32>
    %c80_265 = arith.constant 80 : index
    %c128_266 = arith.constant 128 : index
    %409 = vector.load %arg11[%c80_265, %c128_266] : memref<192x384xbf16, #tpu.memory_space<vmem>>, vector<80x256xbf16>
    %cst_267 = arith.constant dense<0.000000e+00> : vector<20x256xf32>
    %410 = tpu.matmul %405, %409, %cst_267 {dimension_numbers = #tpu.dot_dimension_numbers<[1], [0], [0], [1], [0, 0, 1, 1], [], []>} : vector<20x80xbf16>, vector<80x256xbf16>, vector<20x256xf32> -> vector<20x256xf32>
    %411 = arith.addf %403, %410 : vector<20x256xf32>
    %412 = arith.maximumf %408, %411 : vector<20x256xf32>
    %413 = vector.extract_strided_slice %412 {offsets = [0, 0], sizes = [20, 32], strides = [1, 1]} : vector<20x256xf32> to vector<20x32xf32>
    %414 = vector.extract_strided_slice %412 {offsets = [0, 32], sizes = [20, 32], strides = [1, 1]} : vector<20x256xf32> to vector<20x32xf32>
    %415 = arith.maximumf %413, %414 : vector<20x32xf32>
    %416 = vector.broadcast %194 : vector<20x1xf32> to vector<20x32xf32>
    %417 = arith.addf %415, %416 : vector<20x32xf32>
    %cst_268 = arith.constant 0.000000e+00 : f32
    %418 = vector.broadcast %cst_268 : f32 to vector<20x32xf32>
    %419 = arith.maximumf %417, %418 : vector<20x32xf32>
    %c2_269 = arith.constant 2 : index
    %c0_270 = arith.constant 0 : index
    %c0_271 = arith.constant 0 : index
    %c0_272 = arith.constant 0 : index
    %420 = vector.load %arg6[%c2_269, %c0_270, %c0_271, %c0_272] : memref<4x4x20x50xf32, #tpu.memory_space<vmem>>, vector<1x1x20x50xf32>
    %421 = vector.shape_cast %420 : vector<1x1x20x50xf32> to vector<20x50xf32>
    %cst_273 = arith.constant dense<0.000000e+00> : vector<32x50xf32>
    %422 = tpu.matmul %419, %421, %cst_273 {dimension_numbers = #tpu.dot_dimension_numbers<[0], [0], [1], [1], [0, 1, 1, 1], [], []>} : vector<20x32xf32>, vector<20x50xf32>, vector<32x50xf32> -> vector<32x50xf32>
    %423 = arith.addf %369, %422 : vector<32x50xf32>
    %424 = vector.extract_strided_slice %412 {offsets = [0, 64], sizes = [20, 32], strides = [1, 1]} : vector<20x256xf32> to vector<20x32xf32>
    %425 = vector.extract_strided_slice %412 {offsets = [0, 96], sizes = [20, 32], strides = [1, 1]} : vector<20x256xf32> to vector<20x32xf32>
    %426 = arith.maximumf %424, %425 : vector<20x32xf32>
    %427 = vector.broadcast %194 : vector<20x1xf32> to vector<20x32xf32>
    %428 = arith.addf %426, %427 : vector<20x32xf32>
    %cst_274 = arith.constant 0.000000e+00 : f32
    %429 = vector.broadcast %cst_274 : f32 to vector<20x32xf32>
    %430 = arith.maximumf %428, %429 : vector<20x32xf32>
    %c2_275 = arith.constant 2 : index
    %c1_276 = arith.constant 1 : index
    %c0_277 = arith.constant 0 : index
    %c0_278 = arith.constant 0 : index
    %431 = vector.load %arg6[%c2_275, %c1_276, %c0_277, %c0_278] : memref<4x4x20x50xf32, #tpu.memory_space<vmem>>, vector<1x1x20x50xf32>
    %432 = vector.shape_cast %431 : vector<1x1x20x50xf32> to vector<20x50xf32>
    %cst_279 = arith.constant dense<0.000000e+00> : vector<32x50xf32>
    %433 = tpu.matmul %430, %432, %cst_279 {dimension_numbers = #tpu.dot_dimension_numbers<[0], [0], [1], [1], [0, 1, 1, 1], [], []>} : vector<20x32xf32>, vector<20x50xf32>, vector<32x50xf32> -> vector<32x50xf32>
    %434 = arith.addf %423, %433 : vector<32x50xf32>
    %435 = vector.extract_strided_slice %412 {offsets = [0, 128], sizes = [20, 32], strides = [1, 1]} : vector<20x256xf32> to vector<20x32xf32>
    %436 = vector.extract_strided_slice %412 {offsets = [0, 160], sizes = [20, 32], strides = [1, 1]} : vector<20x256xf32> to vector<20x32xf32>
    %437 = arith.maximumf %435, %436 : vector<20x32xf32>
    %438 = vector.broadcast %194 : vector<20x1xf32> to vector<20x32xf32>
    %439 = arith.addf %437, %438 : vector<20x32xf32>
    %cst_280 = arith.constant 0.000000e+00 : f32
    %440 = vector.broadcast %cst_280 : f32 to vector<20x32xf32>
    %441 = arith.maximumf %439, %440 : vector<20x32xf32>
    %c2_281 = arith.constant 2 : index
    %c2_282 = arith.constant 2 : index
    %c0_283 = arith.constant 0 : index
    %c0_284 = arith.constant 0 : index
    %442 = vector.load %arg6[%c2_281, %c2_282, %c0_283, %c0_284] : memref<4x4x20x50xf32, #tpu.memory_space<vmem>>, vector<1x1x20x50xf32>
    %443 = vector.shape_cast %442 : vector<1x1x20x50xf32> to vector<20x50xf32>
    %cst_285 = arith.constant dense<0.000000e+00> : vector<32x50xf32>
    %444 = tpu.matmul %441, %443, %cst_285 {dimension_numbers = #tpu.dot_dimension_numbers<[0], [0], [1], [1], [0, 1, 1, 1], [], []>} : vector<20x32xf32>, vector<20x50xf32>, vector<32x50xf32> -> vector<32x50xf32>
    %445 = arith.addf %434, %444 : vector<32x50xf32>
    %446 = vector.extract_strided_slice %412 {offsets = [0, 192], sizes = [20, 32], strides = [1, 1]} : vector<20x256xf32> to vector<20x32xf32>
    %447 = vector.extract_strided_slice %412 {offsets = [0, 224], sizes = [20, 32], strides = [1, 1]} : vector<20x256xf32> to vector<20x32xf32>
    %448 = arith.maximumf %446, %447 : vector<20x32xf32>
    %449 = vector.broadcast %194 : vector<20x1xf32> to vector<20x32xf32>
    %450 = arith.addf %448, %449 : vector<20x32xf32>
    %cst_286 = arith.constant 0.000000e+00 : f32
    %451 = vector.broadcast %cst_286 : f32 to vector<20x32xf32>
    %452 = arith.maximumf %450, %451 : vector<20x32xf32>
    %c2_287 = arith.constant 2 : index
    %c3_288 = arith.constant 3 : index
    %c0_289 = arith.constant 0 : index
    %c0_290 = arith.constant 0 : index
    %453 = vector.load %arg6[%c2_287, %c3_288, %c0_289, %c0_290] : memref<4x4x20x50xf32, #tpu.memory_space<vmem>>, vector<1x1x20x50xf32>
    %454 = vector.shape_cast %453 : vector<1x1x20x50xf32> to vector<20x50xf32>
    %cst_291 = arith.constant dense<0.000000e+00> : vector<32x50xf32>
    %455 = tpu.matmul %452, %454, %cst_291 {dimension_numbers = #tpu.dot_dimension_numbers<[0], [0], [1], [1], [0, 1, 1, 1], [], []>} : vector<20x32xf32>, vector<20x50xf32>, vector<32x50xf32> -> vector<32x50xf32>
    %456 = arith.addf %445, %455 : vector<32x50xf32>
    %cst_292 = arith.constant 0.000000e+00 : f32
    %457 = vector.broadcast %cst_292 : f32 to vector<20x256xf32>
    %cst_293 = arith.constant 0.000000e+00 : f32
    %458 = vector.broadcast %cst_293 : f32 to vector<20x256xf32>
    %c0_294 = arith.constant 0 : index
    %c0_295 = arith.constant 0 : index
    %c0_296 = arith.constant 0 : index
    %459 = vector.load %arg4[%c0_294, %c0_295, %c0_296] : memref<5x20x80xbf16, #tpu.memory_space<vmem>>, vector<1x20x80xbf16>
    %460 = vector.shape_cast %459 : vector<1x20x80xbf16> to vector<20x80xbf16>
    %c96_297 = arith.constant 96 : index
    %c0_298 = arith.constant 0 : index
    %461 = vector.load %arg11[%c96_297, %c0_298] : memref<192x384xbf16, #tpu.memory_space<vmem>>, vector<80x256xbf16>
    %cst_299 = arith.constant dense<0.000000e+00> : vector<20x256xf32>
    %462 = tpu.matmul %460, %461, %cst_299 {dimension_numbers = #tpu.dot_dimension_numbers<[1], [0], [0], [1], [0, 0, 1, 1], [], []>} : vector<20x80xbf16>, vector<80x256xbf16>, vector<20x256xf32> -> vector<20x256xf32>
    %463 = arith.addf %457, %462 : vector<20x256xf32>
    %c112_300 = arith.constant 112 : index
    %c0_301 = arith.constant 0 : index
    %464 = vector.load %arg11[%c112_300, %c0_301] : memref<192x384xbf16, #tpu.memory_space<vmem>>, vector<80x256xbf16>
    %cst_302 = arith.constant dense<0.000000e+00> : vector<20x256xf32>
    %465 = tpu.matmul %460, %464, %cst_302 {dimension_numbers = #tpu.dot_dimension_numbers<[1], [0], [0], [1], [0, 0, 1, 1], [], []>} : vector<20x80xbf16>, vector<80x256xbf16>, vector<20x256xf32> -> vector<20x256xf32>
    %466 = arith.addf %458, %465 : vector<20x256xf32>
    %c1_303 = arith.constant 1 : index
    %c0_304 = arith.constant 0 : index
    %c0_305 = arith.constant 0 : index
    %467 = vector.load %arg4[%c1_303, %c0_304, %c0_305] : memref<5x20x80xbf16, #tpu.memory_space<vmem>>, vector<1x20x80xbf16>
    %468 = vector.shape_cast %467 : vector<1x20x80xbf16> to vector<20x80xbf16>
    %c96_306 = arith.constant 96 : index
    %c32_307 = arith.constant 32 : index
    %469 = vector.load %arg11[%c96_306, %c32_307] : memref<192x384xbf16, #tpu.memory_space<vmem>>, vector<80x256xbf16>
    %cst_308 = arith.constant dense<0.000000e+00> : vector<20x256xf32>
    %470 = tpu.matmul %468, %469, %cst_308 {dimension_numbers = #tpu.dot_dimension_numbers<[1], [0], [0], [1], [0, 0, 1, 1], [], []>} : vector<20x80xbf16>, vector<80x256xbf16>, vector<20x256xf32> -> vector<20x256xf32>
    %471 = arith.addf %463, %470 : vector<20x256xf32>
    %c112_309 = arith.constant 112 : index
    %c32_310 = arith.constant 32 : index
    %472 = vector.load %arg11[%c112_309, %c32_310] : memref<192x384xbf16, #tpu.memory_space<vmem>>, vector<80x256xbf16>
    %cst_311 = arith.constant dense<0.000000e+00> : vector<20x256xf32>
    %473 = tpu.matmul %468, %472, %cst_311 {dimension_numbers = #tpu.dot_dimension_numbers<[1], [0], [0], [1], [0, 0, 1, 1], [], []>} : vector<20x80xbf16>, vector<80x256xbf16>, vector<20x256xf32> -> vector<20x256xf32>
    %474 = arith.addf %466, %473 : vector<20x256xf32>
    %c2_312 = arith.constant 2 : index
    %c0_313 = arith.constant 0 : index
    %c0_314 = arith.constant 0 : index
    %475 = vector.load %arg4[%c2_312, %c0_313, %c0_314] : memref<5x20x80xbf16, #tpu.memory_space<vmem>>, vector<1x20x80xbf16>
    %476 = vector.shape_cast %475 : vector<1x20x80xbf16> to vector<20x80xbf16>
    %c96_315 = arith.constant 96 : index
    %c64_316 = arith.constant 64 : index
    %477 = vector.load %arg11[%c96_315, %c64_316] : memref<192x384xbf16, #tpu.memory_space<vmem>>, vector<80x256xbf16>
    %cst_317 = arith.constant dense<0.000000e+00> : vector<20x256xf32>
    %478 = tpu.matmul %476, %477, %cst_317 {dimension_numbers = #tpu.dot_dimension_numbers<[1], [0], [0], [1], [0, 0, 1, 1], [], []>} : vector<20x80xbf16>, vector<80x256xbf16>, vector<20x256xf32> -> vector<20x256xf32>
    %479 = arith.addf %471, %478 : vector<20x256xf32>
    %c112_318 = arith.constant 112 : index
    %c64_319 = arith.constant 64 : index
    %480 = vector.load %arg11[%c112_318, %c64_319] : memref<192x384xbf16, #tpu.memory_space<vmem>>, vector<80x256xbf16>
    %cst_320 = arith.constant dense<0.000000e+00> : vector<20x256xf32>
    %481 = tpu.matmul %476, %480, %cst_320 {dimension_numbers = #tpu.dot_dimension_numbers<[1], [0], [0], [1], [0, 0, 1, 1], [], []>} : vector<20x80xbf16>, vector<80x256xbf16>, vector<20x256xf32> -> vector<20x256xf32>
    %482 = arith.addf %474, %481 : vector<20x256xf32>
    %c3_321 = arith.constant 3 : index
    %c0_322 = arith.constant 0 : index
    %c0_323 = arith.constant 0 : index
    %483 = vector.load %arg4[%c3_321, %c0_322, %c0_323] : memref<5x20x80xbf16, #tpu.memory_space<vmem>>, vector<1x20x80xbf16>
    %484 = vector.shape_cast %483 : vector<1x20x80xbf16> to vector<20x80xbf16>
    %c96_324 = arith.constant 96 : index
    %c96_325 = arith.constant 96 : index
    %485 = vector.load %arg11[%c96_324, %c96_325] : memref<192x384xbf16, #tpu.memory_space<vmem>>, vector<80x256xbf16>
    %cst_326 = arith.constant dense<0.000000e+00> : vector<20x256xf32>
    %486 = tpu.matmul %484, %485, %cst_326 {dimension_numbers = #tpu.dot_dimension_numbers<[1], [0], [0], [1], [0, 0, 1, 1], [], []>} : vector<20x80xbf16>, vector<80x256xbf16>, vector<20x256xf32> -> vector<20x256xf32>
    %487 = arith.addf %479, %486 : vector<20x256xf32>
    %c112_327 = arith.constant 112 : index
    %c96_328 = arith.constant 96 : index
    %488 = vector.load %arg11[%c112_327, %c96_328] : memref<192x384xbf16, #tpu.memory_space<vmem>>, vector<80x256xbf16>
    %cst_329 = arith.constant dense<0.000000e+00> : vector<20x256xf32>
    %489 = tpu.matmul %484, %488, %cst_329 {dimension_numbers = #tpu.dot_dimension_numbers<[1], [0], [0], [1], [0, 0, 1, 1], [], []>} : vector<20x80xbf16>, vector<80x256xbf16>, vector<20x256xf32> -> vector<20x256xf32>
    %490 = arith.addf %482, %489 : vector<20x256xf32>
    %c4_330 = arith.constant 4 : index
    %c0_331 = arith.constant 0 : index
    %c0_332 = arith.constant 0 : index
    %491 = vector.load %arg4[%c4_330, %c0_331, %c0_332] : memref<5x20x80xbf16, #tpu.memory_space<vmem>>, vector<1x20x80xbf16>
    %492 = vector.shape_cast %491 : vector<1x20x80xbf16> to vector<20x80xbf16>
    %c96_333 = arith.constant 96 : index
    %c128_334 = arith.constant 128 : index
    %493 = vector.load %arg11[%c96_333, %c128_334] : memref<192x384xbf16, #tpu.memory_space<vmem>>, vector<80x256xbf16>
    %cst_335 = arith.constant dense<0.000000e+00> : vector<20x256xf32>
    %494 = tpu.matmul %492, %493, %cst_335 {dimension_numbers = #tpu.dot_dimension_numbers<[1], [0], [0], [1], [0, 0, 1, 1], [], []>} : vector<20x80xbf16>, vector<80x256xbf16>, vector<20x256xf32> -> vector<20x256xf32>
    %495 = arith.addf %487, %494 : vector<20x256xf32>
    %c112_336 = arith.constant 112 : index
    %c128_337 = arith.constant 128 : index
    %496 = vector.load %arg11[%c112_336, %c128_337] : memref<192x384xbf16, #tpu.memory_space<vmem>>, vector<80x256xbf16>
    %cst_338 = arith.constant dense<0.000000e+00> : vector<20x256xf32>
    %497 = tpu.matmul %492, %496, %cst_338 {dimension_numbers = #tpu.dot_dimension_numbers<[1], [0], [0], [1], [0, 0, 1, 1], [], []>} : vector<20x80xbf16>, vector<80x256xbf16>, vector<20x256xf32> -> vector<20x256xf32>
    %498 = arith.addf %490, %497 : vector<20x256xf32>
    %499 = arith.maximumf %495, %498 : vector<20x256xf32>
    %500 = vector.extract_strided_slice %499 {offsets = [0, 0], sizes = [20, 32], strides = [1, 1]} : vector<20x256xf32> to vector<20x32xf32>
    %501 = vector.extract_strided_slice %499 {offsets = [0, 32], sizes = [20, 32], strides = [1, 1]} : vector<20x256xf32> to vector<20x32xf32>
    %502 = arith.maximumf %500, %501 : vector<20x32xf32>
    %503 = vector.broadcast %194 : vector<20x1xf32> to vector<20x32xf32>
    %504 = arith.addf %502, %503 : vector<20x32xf32>
    %cst_339 = arith.constant 0.000000e+00 : f32
    %505 = vector.broadcast %cst_339 : f32 to vector<20x32xf32>
    %506 = arith.maximumf %504, %505 : vector<20x32xf32>
    %c3_340 = arith.constant 3 : index
    %c0_341 = arith.constant 0 : index
    %c0_342 = arith.constant 0 : index
    %c0_343 = arith.constant 0 : index
    %507 = vector.load %arg6[%c3_340, %c0_341, %c0_342, %c0_343] : memref<4x4x20x50xf32, #tpu.memory_space<vmem>>, vector<1x1x20x50xf32>
    %508 = vector.shape_cast %507 : vector<1x1x20x50xf32> to vector<20x50xf32>
    %cst_344 = arith.constant dense<0.000000e+00> : vector<32x50xf32>
    %509 = tpu.matmul %506, %508, %cst_344 {dimension_numbers = #tpu.dot_dimension_numbers<[0], [0], [1], [1], [0, 1, 1, 1], [], []>} : vector<20x32xf32>, vector<20x50xf32>, vector<32x50xf32> -> vector<32x50xf32>
    %510 = arith.addf %456, %509 : vector<32x50xf32>
    %511 = vector.extract_strided_slice %499 {offsets = [0, 64], sizes = [20, 32], strides = [1, 1]} : vector<20x256xf32> to vector<20x32xf32>
    %512 = vector.extract_strided_slice %499 {offsets = [0, 96], sizes = [20, 32], strides = [1, 1]} : vector<20x256xf32> to vector<20x32xf32>
    %513 = arith.maximumf %511, %512 : vector<20x32xf32>
    %514 = vector.broadcast %194 : vector<20x1xf32> to vector<20x32xf32>
    %515 = arith.addf %513, %514 : vector<20x32xf32>
    %cst_345 = arith.constant 0.000000e+00 : f32
    %516 = vector.broadcast %cst_345 : f32 to vector<20x32xf32>
    %517 = arith.maximumf %515, %516 : vector<20x32xf32>
    %c3_346 = arith.constant 3 : index
    %c1_347 = arith.constant 1 : index
    %c0_348 = arith.constant 0 : index
    %c0_349 = arith.constant 0 : index
    %518 = vector.load %arg6[%c3_346, %c1_347, %c0_348, %c0_349] : memref<4x4x20x50xf32, #tpu.memory_space<vmem>>, vector<1x1x20x50xf32>
    %519 = vector.shape_cast %518 : vector<1x1x20x50xf32> to vector<20x50xf32>
    %cst_350 = arith.constant dense<0.000000e+00> : vector<32x50xf32>
    %520 = tpu.matmul %517, %519, %cst_350 {dimension_numbers = #tpu.dot_dimension_numbers<[0], [0], [1], [1], [0, 1, 1, 1], [], []>} : vector<20x32xf32>, vector<20x50xf32>, vector<32x50xf32> -> vector<32x50xf32>
    %521 = arith.addf %510, %520 : vector<32x50xf32>
    %522 = vector.extract_strided_slice %499 {offsets = [0, 128], sizes = [20, 32], strides = [1, 1]} : vector<20x256xf32> to vector<20x32xf32>
    %523 = vector.extract_strided_slice %499 {offsets = [0, 160], sizes = [20, 32], strides = [1, 1]} : vector<20x256xf32> to vector<20x32xf32>
    %524 = arith.maximumf %522, %523 : vector<20x32xf32>
    %525 = vector.broadcast %194 : vector<20x1xf32> to vector<20x32xf32>
    %526 = arith.addf %524, %525 : vector<20x32xf32>
    %cst_351 = arith.constant 0.000000e+00 : f32
    %527 = vector.broadcast %cst_351 : f32 to vector<20x32xf32>
    %528 = arith.maximumf %526, %527 : vector<20x32xf32>
    %c3_352 = arith.constant 3 : index
    %c2_353 = arith.constant 2 : index
    %c0_354 = arith.constant 0 : index
    %c0_355 = arith.constant 0 : index
    %529 = vector.load %arg6[%c3_352, %c2_353, %c0_354, %c0_355] : memref<4x4x20x50xf32, #tpu.memory_space<vmem>>, vector<1x1x20x50xf32>
    %530 = vector.shape_cast %529 : vector<1x1x20x50xf32> to vector<20x50xf32>
    %cst_356 = arith.constant dense<0.000000e+00> : vector<32x50xf32>
    %531 = tpu.matmul %528, %530, %cst_356 {dimension_numbers = #tpu.dot_dimension_numbers<[0], [0], [1], [1], [0, 1, 1, 1], [], []>} : vector<20x32xf32>, vector<20x50xf32>, vector<32x50xf32> -> vector<32x50xf32>
    %532 = arith.addf %521, %531 : vector<32x50xf32>
    %533 = vector.extract_strided_slice %499 {offsets = [0, 192], sizes = [20, 32], strides = [1, 1]} : vector<20x256xf32> to vector<20x32xf32>
    %534 = vector.extract_strided_slice %499 {offsets = [0, 224], sizes = [20, 32], strides = [1, 1]} : vector<20x256xf32> to vector<20x32xf32>
    %535 = arith.maximumf %533, %534 : vector<20x32xf32>
    %536 = vector.broadcast %194 : vector<20x1xf32> to vector<20x32xf32>
    %537 = arith.addf %535, %536 : vector<20x32xf32>
    %cst_357 = arith.constant 0.000000e+00 : f32
    %538 = vector.broadcast %cst_357 : f32 to vector<20x32xf32>
    %539 = arith.maximumf %537, %538 : vector<20x32xf32>
    %c3_358 = arith.constant 3 : index
    %c3_359 = arith.constant 3 : index
    %c0_360 = arith.constant 0 : index
    %c0_361 = arith.constant 0 : index
    %540 = vector.load %arg6[%c3_358, %c3_359, %c0_360, %c0_361] : memref<4x4x20x50xf32, #tpu.memory_space<vmem>>, vector<1x1x20x50xf32>
    %541 = vector.shape_cast %540 : vector<1x1x20x50xf32> to vector<20x50xf32>
    %cst_362 = arith.constant dense<0.000000e+00> : vector<32x50xf32>
    %542 = tpu.matmul %539, %541, %cst_362 {dimension_numbers = #tpu.dot_dimension_numbers<[0], [0], [1], [1], [0, 1, 1, 1], [], []>} : vector<20x32xf32>, vector<20x50xf32>, vector<32x50xf32> -> vector<32x50xf32>
    %543 = arith.addf %532, %542 : vector<32x50xf32>
    %c0_363 = arith.constant 0 : index
    %c0_364 = arith.constant 0 : index
    %544 = vector.load %arg7[%c0_363, %c0_364] : memref<1x50xf32, #tpu.memory_space<vmem>>, vector<1x50xf32>
    %545 = vector.broadcast %544 : vector<1x50xf32> to vector<32x50xf32>
    %546 = arith.addf %543, %545 : vector<32x50xf32>
    %cst_365 = arith.constant 0.000000e+00 : f32
    %547 = vector.broadcast %cst_365 : f32 to vector<32x50xf32>
    %548 = arith.maximumf %546, %547 : vector<32x50xf32>
    %c0_366 = arith.constant 0 : index
    %c0_367 = arith.constant 0 : index
    %549 = vector.load %arg8[%c0_366, %c0_367] : memref<50x10xf32, #tpu.memory_space<vmem>>, vector<50x10xf32>
    %cst_368 = arith.constant dense<0.000000e+00> : vector<32x10xf32>
    %550 = tpu.matmul %548, %549, %cst_368 {dimension_numbers = #tpu.dot_dimension_numbers<[1], [0], [0], [1], [0, 0, 1, 1], [], []>} : vector<32x50xf32>, vector<50x10xf32>, vector<32x10xf32> -> vector<32x10xf32>
    %c0_369 = arith.constant 0 : index
    %c0_370 = arith.constant 0 : index
    %551 = vector.load %arg9[%c0_369, %c0_370] : memref<1x10xf32, #tpu.memory_space<vmem>>, vector<1x10xf32>
    %552 = vector.broadcast %551 : vector<1x10xf32> to vector<32x10xf32>
    %553 = arith.addf %550, %552 : vector<32x10xf32>
    %cst_371 = arith.constant 0.000000e+00 : f32
    %554 = vector.broadcast %cst_371 : f32 to vector<32x10xf32>
    %555 = arith.maximumf %553, %554 : vector<32x10xf32>
    %c0_372 = arith.constant 0 : index
    %c0_373 = arith.constant 0 : index
    %556 = vector.load %arg10[%c0_372, %c0_373] : memref<32x10xf32, #tpu.memory_space<vmem>>, vector<32x10xf32>
    tpu.vector_store %arg10[%c0_372, %c0_373], %555 {strides = array<i32>} : memref<32x10xf32, #tpu.memory_space<vmem>>, vector<32x10xf32>,
    return
  }
  func.func @transform_0(%arg0: i32) -> (i32, i32, i32, i32) {
    %c0_i32 = arith.constant 0 : i32
    %c0_i32_0 = arith.constant 0 : i32
    %c0_i32_1 = arith.constant 0 : i32
    %c0_i32_2 = arith.constant 0 : i32
    return %arg0, %c0_i32, %c0_i32_0, %c0_i32_1 : i32, i32, i32, i32
  }
  func.func @transform_1(%arg0: i32) -> (i32, i32) {
    %c0_i32 = arith.constant 0 : i32
    %c0_i32_0 = arith.constant 0 : i32
    %c0_i32_1 = arith.constant 0 : i32
    return %c0_i32, %c0_i32_0 : i32, i32
  }
  func.func @transform_2(%arg0: i32) -> (i32, i32) {
    %c0_i32 = arith.constant 0 : i32
    %c0_i32_0 = arith.constant 0 : i32
    %c0_i32_1 = arith.constant 0 : i32
    return %c0_i32, %c0_i32_0 : i32, i32
  }
  func.func @transform_3(%arg0: i32) -> (i32, i32, i32) {
    %c0_i32 = arith.constant 0 : i32
    %c0_i32_0 = arith.constant 0 : i32
    %c0_i32_1 = arith.constant 0 : i32
    %c0_i32_2 = arith.constant 0 : i32
    return %c0_i32, %c0_i32_0, %c0_i32_1 : i32, i32, i32
  }
  func.func @transform_4(%arg0: i32) -> (i32, i32) {
    %c0_i32 = arith.constant 0 : i32
    %c0_i32_0 = arith.constant 0 : i32
    %c0_i32_1 = arith.constant 0 : i32
    return %c0_i32, %c0_i32_0 : i32, i32
  }
  func.func @transform_5(%arg0: i32) -> (i32, i32, i32, i32) {
    %c0_i32 = arith.constant 0 : i32
    %c0_i32_0 = arith.constant 0 : i32
    %c0_i32_1 = arith.constant 0 : i32
    %c0_i32_2 = arith.constant 0 : i32
    %c0_i32_3 = arith.constant 0 : i32
    return %c0_i32, %c0_i32_0, %c0_i32_1, %c0_i32_2 : i32, i32, i32, i32
  }
  func.func @transform_6(%arg0: i32) -> (i32, i32) {
    %c0_i32 = arith.constant 0 : i32
    %c0_i32_0 = arith.constant 0 : i32
    %c0_i32_1 = arith.constant 0 : i32
    return %c0_i32, %c0_i32_0 : i32, i32
  }
  func.func @transform_7(%arg0: i32) -> (i32, i32) {
    %c0_i32 = arith.constant 0 : i32
    %c0_i32_0 = arith.constant 0 : i32
    %c0_i32_1 = arith.constant 0 : i32
    return %c0_i32, %c0_i32_0 : i32, i32
  }
  func.func @transform_8(%arg0: i32) -> (i32, i32) {
    %c0_i32 = arith.constant 0 : i32
    %c0_i32_0 = arith.constant 0 : i32
    %c0_i32_1 = arith.constant 0 : i32
    return %c0_i32, %c0_i32_0 : i32, i32
  }
  func.func @transform_9(%arg0: i32) -> (i32, i32) {
    %c0_i32 = arith.constant 0 : i32
    %c0_i32_0 = arith.constant 0 : i32
    return %arg0, %c0_i32 : i32, i32
  }
}

</mosaic_0001>

<bundles_post_ra>
// kernel: small_mnist_cnn_phi_forward.1
= control target key start
LH: loop header
LB: loop body
LE: loop exit
PB: predicated region body
PF: predicated region fallthrough
CT: control target
= control target key end

     0   :  { %vm178_vm0 = vcmask 1043456   ;;  %vm179_vm1 = vcmask 1044480   ;;  %v20740_v1 = vmov 0   ;;  %v15452_v2 = vmov 65535   ;;  %s15453_s19 = smov 96   ;;  %s15454_s13 = smov 64   ;;  %s20730_s0 = inlined_call_operand.vmem [shape: bf16[1,12,25,1536], index: 0, kind: input, shape index: {}]   ;;  %s20731_s1 = inlined_call_operand.vmem [shape: bf16[16,25], index: 1, kind: input, shape index: {}]   ;;  %s20732_s2 = inlined_call_operand.vmem [shape: f32[16,1], index: 2, kind: input, shape index: {}]   ;;  %s20733_s3 = inlined_call_operand.vmem [shape: bf16[5,20,80], index: 3, kind: input, shape index: {}]   ;;  %s20734_s4 = inlined_call_operand.vmem [shape: f32[20,1], index: 4, kind: input, shape index: {}]   ;;  %s20735_s5 = inlined_call_operand.vmem [shape: f32[4,4,20,50], index: 5, kind: input, shape index: {}]   ;;  %s20736_s7 = inlined_call_operand.vmem [shape: f32[50,10], index: 7, kind: input, shape index: {}]   ;;  %s20737_s6 = inlined_call_operand.vmem [shape: f32[1,50], index: 6, kind: input, shape index: {}]   ;;  %s20738_s8 = inlined_call_operand.vmem [shape: f32[1,10], index: 8, kind: input, shape index: {}]   ;;  %s20739_s9 = inlined_call_operand.vmem [shape: f32[32,10], index: 9, kind: output, shape index: {}]  }
   0x1   :  { %v14744_v0 = vld [vmem:[%s20730_s0 + $0x64] ss:$48 sps:$4 sm:$0x1f]   ;;  %250 = vmatprep.mubr.bf16.mxu1 %v20740_v1  ;;  %336 = vmatprep.mubr.bf16.mxu0 %v20740_v1  ;;  %v180_v3 = vsel %vm178_vm0, 4294967295, %v15452_v2  ;;  %v14752_v13 = vld [vmem:[%s20730_s0] ss:$48 sps:$4 sm:$0xff]  }
   0x2   :  { %v14746_v4 = vld [vmem:[%s20730_s0 + $0x60] ss:$48 sps:$4 sm:$0x1f]   ;;  %14742 = vset.pattern.permute.xlu0 %v20740_v1  ;;  %14743 = vset.pattern.permute.xlu1 %v20740_v1  ;;  %v15517_v5 = vsel %vm179_vm1, %v180_v3, 0  ;;  %v14750_v10 = vld [vmem:[%s20730_s0 + $0x4] ss:$48 sps:$4 sm:$0xff]  }
   0x3   :  { %v14747_v6 = vld [vmem:[%s20730_s0 + $0x74] ss:$48 sps:$4 sm:$0x1f]   ;;  %v186_v7 = vand.u32 %v14744_v0, %v15517_v5  ;;  %v183_v8 = vand.u32 %v14746_v4, %v15517_v5  ;;  %v14749_v9 = vld [vmem:[%s20730_s0 + $0x70] ss:$48 sps:$4 sm:$0x1f]  }
   0x4   :  { %v198_v11 = vand.u32 %v14747_v6, %v15517_v5  ;;  %v195_v12 = vand.u32 %v14749_v9, %v15517_v5  ;;  %v14753_v14 = vld [vmem:[%s20730_s0 + $0x14] ss:$48 sps:$4 sm:$0xff]   ;;  %v14755_v15 = vld [vmem:[%s20730_s0 + $0x10] ss:$48 sps:$4 sm:$0xff]   ;;  %vm174_vm2 = vcmask 203776   ;;  %vm5987_vm3 = vcmask 654336  }
   0x5   :  { %230 = vmatprep.subr.bf16.mxu1 %v186_v7  ;;  %v15544_v16 = vld [vmem:[%s20731_s1] sm:$0xff]   ;;  %v14757_v17 = vld [vmem:[%s20730_s0 + $0x68] ss:$48 sps:$4 sm:$0x1f]   ;;  %v14765_v24 = vld [vmem:[%s20730_s0 + $0xc] ss:$48 sps:$4 sm:$0xff]  }
   0x6   :  { %231 = vmatpush1.bf16.msra.mxu1 %v183_v8  ;;  %316 = vmatprep.subr.bf16.mxu0 %v198_v11  ;;  %v14759_v18 = vld [vmem:[%s20730_s0 + $0x6c] ss:$48 sps:$4 sm:$0x1f]   ;;  %v14760_v19 = vld [vmem:[%s20730_s0 + $0x80] ss:$48 sps:$4 sm:$0x1f]   ;;  %v189_v22 = vand.u32 %v14757_v17, %v15517_v5 }
   0x7   :  { %317 = vmatpush1.bf16.msra.mxu0 %v195_v12  ;;  %232 = vmatprep.subr.bf16.mxu1 %v14750_v10  ;;  %v14762_v20 = vld [vmem:[%s20730_s0 + $0x84] ss:$48 sps:$4 sm:$0x1f]   ;;  %v192_v21 = vand.u32 %v14759_v18, %v15517_v5  ;;  %v207_v25 = vand.u32 %v14760_v19, %v15517_v5  ;;  %v14763_v26 = vld [vmem:[%s20730_s0 + $0x8] ss:$48 sps:$4 sm:$0xff]   ;;  %s15455_s11 = smov 32  }
   0x8   :  { %318 = vmatprep.subr.bf16.mxu0 %v14753_v14  ;;  %v210_v23 = vand.u32 %v14762_v20, %v15517_v5  ;;  %v14768_v27 = vld [vmem:[%s20730_s0 + $0x24] ss:$48 sps:$4 sm:$0xff]   ;;  %v14766_v28 = vld [vmem:[%s20730_s0 + $0x20] ss:$48 sps:$4 sm:$0xff]   ;;  %v14777_v36 = vld [vmem:[%s20730_s0 + $0x1c] ss:$48 sps:$4 sm:$0xff]  }
   0x9   :  { %v14769_v29 = vld [vmem:[%s20730_s0 + $0x78] ss:$48 sps:$4 sm:$0x1f]   ;;  %v14771_v30 = vld [vmem:[%s20730_s0 + $0x7c] ss:$48 sps:$4 sm:$0x1f]  }
   0xa   :  { %233 = vmatpush1.bf16.msra.mxu1 %v14752_v13  ;;  %v14772_v31 = vld [vmem:[%s20730_s0 + $0x120] ss:$48 sps:$4 sm:$0x1f]   ;;  %v204_v32 = vand.u32 %v14771_v30, %v15517_v5  ;;  %v14774_v33 = vld [vmem:[%s20730_s0 + $0x124] ss:$48 sps:$4 sm:$0x1f]   ;;  %v201_v35 = vand.u32 %v14769_v29, %v15517_v5 }
   0xb   :  { %319 = vmatpush1.bf16.msra.mxu0 %v14755_v15  ;;  %273 = vmatprep.subr.bf16.mxu1 %v192_v21  ;;  %v677_v34 = vand.u32 %v14774_v33, %v15517_v5  ;;  %v674_v37 = vand.u32 %v14772_v31, %v15517_v5  ;;  %v14783_v38 = vld [vmem:[%s20730_s0 + $0x8c] ss:$48 sps:$4 sm:$0x1f]   ;;  %v14780_v39 = vld [vmem:[%s20730_s0 + $0xc4] ss:$48 sps:$4 sm:$0xff]   ;;  %vm5966_vm4 = vcmask 785408  }
   0xc   :  { %402 = vmatprep.subr.bf16.mxu0 %v210_v23  ;;  %v14786_v40 = vld [vmem:[%s20730_s0 + $0x134] ss:$48 sps:$4 sm:$0x1f]   ;;  %v14775_v41 = vld [vmem:[%s20730_s0 + $0x18] ss:$48 sps:$4 sm:$0xff]   ;;  %v216_v44 = vand.u32 %v14783_v38, %v15517_v5  ;;  %vm6409_vm5 = vcmask 523264  }
   0xd   :  { %13263 = vmatmul.mubr.msk.bf16.vlgmr.msra.gmra.mxu1 %vm174_vm2, %v15544_v16  ;;  %v14781_v42 = vld [vmem:[%s20730_s0 + $0x88] ss:$48 sps:$4 sm:$0x1f]   ;;  %v14778_v43 = vld [vmem:[%s20730_s0 + $0xc0] ss:$48 sps:$4 sm:$0xff]   ;;  %v689_v46 = vand.u32 %v14786_v40, %v15517_v5  ;;  %vm6642_vm6 = vcmask 261120  }
   0xe   :  { %274 = vmatpush1.bf16.msra.mxu1 %v189_v22  ;;  %13265 = vmatmul.mubr.msk.bf16.vlgmr.msra.gmra.mxu0 %vm174_vm2, %v15544_v16  ;;  %v14784_v45 = vld [vmem:[%s20730_s0 + $0x130] ss:$48 sps:$4 sm:$0x1f]   ;;  %v213_v47 = vand.u32 %v14781_v42, %v15517_v5  ;;  %v14789_v48 = vld [vmem:[%s20730_s0 + $0x2c] ss:$48 sps:$4 sm:$0xff]   ;;  %vm7178_vm7 = vcmask 162816  }
   0xf   :  { %275 = vmatprep.subr.bf16.mxu1 %v14765_v24  ;;  %403 = vmatpush1.bf16.msra.mxu0 %v207_v25  ;;  %v686_v49 = vand.u32 %v14784_v45, %v15517_v5  ;;  %v14792_v50 = vld [vmem:[%s20730_s0 + $0xd4] ss:$48 sps:$4 sm:$0xff]   ;;  %v14795_v51 = vld [vmem:[%s20730_s0 + $0x12c] ss:$48 sps:$4 sm:$0x1f]   ;;  %vm13136_vm8 = vcmask 1041408  }
  0x10   :  { %293 = vmatprep.mubr.bf16.mxu1 %v20740_v1  ;;  %404 = vmatprep.subr.bf16.mxu0 %v14768_v27  ;;  %v14798_v52 = vld [vmem:[%s20730_s0 + $0x144] ss:$48 sps:$4 sm:$0x1f]   ;;  %v14787_v53 = vld [vmem:[%s20730_s0 + $0x28] ss:$48 sps:$4 sm:$0xff]   ;;  %v683_v56 = vand.u32 %v14795_v51, %v15517_v5  ;;  %vm13123_vm9 = vcmask 408576  }
  0x11   :  { %422 = vmatprep.mubr.bf16.mxu0 %v20740_v1  ;;  %v14790_v54 = vld [vmem:[%s20730_s0 + $0xd0] ss:$48 sps:$4 sm:$0xff]   ;;  %v14793_v55 = vld [vmem:[%s20730_s0 + $0x128] ss:$48 sps:$4 sm:$0x1f]   ;;  %v701_v58 = vand.u32 %v14798_v52, %v15517_v5  ;;  %vm13229_vm10 = vcmask 80896  }
  0x12   :  { %276 = vmatpush1.bf16.msra.mxu1 %v14763_v26  ;;  %v14796_v57 = vld [vmem:[%s20730_s0 + $0x140] ss:$48 sps:$4 sm:$0x1f]   ;;  %v680_v59 = vand.u32 %v14793_v55, %v15517_v5  ;;  %v14801_v60 = vld [vmem:[%s20730_s0 + $0xcc] ss:$48 sps:$4 sm:$0xff]  }
  0x13   :  { %359 = vmatprep.subr.bf16.mxu1 %v204_v32  ;;  %405 = vmatpush1.bf16.msra.mxu0 %v14766_v28  ;;  %v14804_v61 = vld [vmem:[%s20730_s0 + $0xe4] ss:$48 sps:$4 sm:$0xff]   ;;  %v698_v62 = vand.u32 %v14796_v57, %v15517_v5  ;;  %v14807_v63 = vld [vmem:[%s20730_s0 + $0x13c] ss:$48 sps:$4 sm:$0x1f]  }
  0x14   :  { %721 = vmatprep.subr.bf16.mxu0 %v677_v34  ;;  %v14810_v0 = vld [vmem:[%s20730_s0 + $0x1e4] ss:$48 sps:$4 sm:$0x1f]   ;;  %v14799_v2 = vld [vmem:[%s20730_s0 + $0xc8] ss:$48 sps:$4 sm:$0xff]   ;;  %v695_v6 = vand.u32 %v14807_v63, %v15517_v5 }
  0x15   :  { %13264 = vmatmul.mubr.msk.bf16.vlgmr.msra.gmra.mxu1 %vm174_vm2, %v15544_v16  ;;  %v14802_v3 = vld [vmem:[%s20730_s0 + $0xe0] ss:$48 sps:$4 sm:$0xff]   ;;  %v14805_v4 = vld [vmem:[%s20730_s0 + $0x138] ss:$48 sps:$4 sm:$0x1f]   ;;  %v1158_v8 = vand.u32 %v14810_v0, %v15517_v5 }
  0x16   :  { %360 = vmatpush1.bf16.msra.mxu1 %v201_v35  ;;  %13267 = vmatmul.mubr.msk.bf16.vlgmr.msra.gmra.mxu0 %vm174_vm2, %v15544_v16  ;;  %v14808_v7 = vld [vmem:[%s20730_s0 + $0x1e0] ss:$48 sps:$4 sm:$0x1f]   ;;  %v692_v9 = vand.u32 %v14805_v4, %v15517_v5  ;;  %v14813_v10 = vld [vmem:[%s20730_s0 + $0xdc] ss:$48 sps:$4 sm:$0xff]  }
  0x17   :  { %361 = vmatprep.subr.bf16.mxu1 %v14777_v36  ;;  %722 = vmatpush1.bf16.msra.mxu0 %v674_v37  ;;  %v1155_v11 = vand.u32 %v14808_v7, %v15517_v5  ;;  %v14819_v12 = vld [vmem:[%s20730_s0 + $0x14c] ss:$48 sps:$4 sm:$0x1f]   ;;  %v14816_v13 = vld [vmem:[%s20730_s0 + $0x184] ss:$48 sps:$4 sm:$0xff]  }
  0x18   :  { %379 = vmatprep.mubr.bf16.mxu1 %v20740_v1  ;;  %723 = vmatprep.subr.bf16.mxu0 %v14780_v39  ;;  %v14822_v14 = vld [vmem:[%s20730_s0 + $0x1f4] ss:$48 sps:$4 sm:$0x1f]   ;;  %v14811_v15 = vld [vmem:[%s20730_s0 + $0xd8] ss:$48 sps:$4 sm:$0xff]   ;;  %v707_v19 = vand.u32 %v14819_v12, %v15517_v5 }
  0x19   :  { %741 = vmatprep.mubr.bf16.mxu0 %v20740_v1  ;;  %v14817_v17 = vld [vmem:[%s20730_s0 + $0x148] ss:$48 sps:$4 sm:$0x1f]   ;;  %v14814_v18 = vld [vmem:[%s20730_s0 + $0x180] ss:$48 sps:$4 sm:$0xff]   ;;  %v1170_v21 = vand.u32 %v14822_v14, %v15517_v5 }
  0x1a   :  { %362 = vmatpush1.bf16.msra.mxu1 %v14775_v41  ;;  %v14820_v20 = vld [vmem:[%s20730_s0 + $0x1f0] ss:$48 sps:$4 sm:$0x1f]   ;;  %v704_v22 = vand.u32 %v14817_v17, %v15517_v5  ;;  %v14825_v23 = vld [vmem:[%s20730_s0 + $0xec] ss:$48 sps:$4 sm:$0xff]  }
  0x1b   :  { %445 = vmatprep.subr.bf16.mxu1 %v216_v44  ;;  %724 = vmatpush1.bf16.msra.mxu0 %v14778_v43  ;;  %v1167_v24 = vand.u32 %v14820_v20, %v15517_v5  ;;  %v14828_v25 = vld [vmem:[%s20730_s0 + $0x194] ss:$48 sps:$4 sm:$0xff]   ;;  %v14831_v26 = vld [vmem:[%s20730_s0 + $0x1ec] ss:$48 sps:$4 sm:$0x1f]  }
  0x1c   :  { %807 = vmatprep.subr.bf16.mxu0 %v689_v46  ;;  %v14834_v27 = vld [vmem:[%s20730_s0 + $0x204] ss:$48 sps:$4 sm:$0x1f]   ;;  %v14823_v28 = vld [vmem:[%s20730_s0 + $0xe8] ss:$48 sps:$4 sm:$0xff]   ;;  %v1164_v31 = vand.u32 %v14831_v26, %v15517_v5 }
  0x1d   :  { %13266 = vmatmul.mubr.msk.bf16.vlgmr.msra.gmra.mxu1 %vm174_vm2, %v15544_v16  ;;  %v14826_v29 = vld [vmem:[%s20730_s0 + $0x190] ss:$48 sps:$4 sm:$0xff]   ;;  %v14829_v30 = vld [vmem:[%s20730_s0 + $0x1e8] ss:$48 sps:$4 sm:$0x1f]   ;;  %v1182_v33 = vand.u32 %v14834_v27, %v15517_v5 }
  0x1e   :  { %446 = vmatpush1.bf16.msra.mxu1 %v213_v47  ;;  %13321 = vmatmul.mubr.msk.bf16.vlgmr.msra.gmra.mxu0 %vm174_vm2, %v15544_v16  ;;  %v14832_v32 = vld [vmem:[%s20730_s0 + $0x200] ss:$48 sps:$4 sm:$0x1f]   ;;  %v1161_v34 = vand.u32 %v14829_v30, %v15517_v5  ;;  %v14837_v35 = vld [vmem:[%s20730_s0 + $0x18c] ss:$48 sps:$4 sm:$0xff]  }
  0x1f   :  { %447 = vmatprep.subr.bf16.mxu1 %v14789_v48  ;;  %808 = vmatpush1.bf16.msra.mxu0 %v686_v49  ;;  %v1179_v36 = vand.u32 %v14832_v32, %v15517_v5  ;;  %v14840_v37 = vld [vmem:[%s20730_s0 + $0x1a4] ss:$48 sps:$4 sm:$0xff]   ;;  %v14843_v38 = vld [vmem:[%s20730_s0 + $0x1fc] ss:$48 sps:$4 sm:$0x1f]  }
  0x20   :  { %465 = vmatprep.mubr.bf16.mxu1 %v20740_v1  ;;  %809 = vmatprep.subr.bf16.mxu0 %v14792_v50  ;;  %v14846_v39 = vld [vmem:[%s20730_s0 + $0x2a4] ss:$48 sps:$4 sm:$0x1f]   ;;  %v14835_v40 = vld [vmem:[%s20730_s0 + $0x188] ss:$48 sps:$4 sm:$0xff]   ;;  %v1176_v43 = vand.u32 %v14843_v38, %v15517_v5 }
  0x21   :  { %827 = vmatprep.mubr.bf16.mxu0 %v20740_v1  ;;  %v14838_v41 = vld [vmem:[%s20730_s0 + $0x1a0] ss:$48 sps:$4 sm:$0xff]   ;;  %v14841_v42 = vld [vmem:[%s20730_s0 + $0x1f8] ss:$48 sps:$4 sm:$0x1f]   ;;  %v1639_v45 = vand.u32 %v14846_v39, %v15517_v5 }
  0x22   :  { %448 = vmatpush1.bf16.msra.mxu1 %v14787_v53  ;;  %v14844_v44 = vld [vmem:[%s20730_s0 + $0x2a0] ss:$48 sps:$4 sm:$0x1f]   ;;  %v1173_v46 = vand.u32 %v14841_v42, %v15517_v5  ;;  %v14849_v47 = vld [vmem:[%s20730_s0 + $0x19c] ss:$48 sps:$4 sm:$0xff]  }
  0x23   :  { %764 = vmatprep.subr.bf16.mxu1 %v683_v56  ;;  %810 = vmatpush1.bf16.msra.mxu0 %v14790_v54  ;;  %v1636_v48 = vand.u32 %v14844_v44, %v15517_v5  ;;  %v14855_v49 = vld [vmem:[%s20730_s0 + $0x20c] ss:$48 sps:$4 sm:$0x1f]   ;;  %v14852_v50 = vld [vmem:[%s20730_s0 + $0x244] ss:$48 sps:$4 sm:$0xff]  }
  0x24   :  { %893 = vmatprep.subr.bf16.mxu0 %v701_v58  ;;  %v14858_v51 = vld [vmem:[%s20730_s0 + $0x2b4] ss:$48 sps:$4 sm:$0x1f]   ;;  %v14847_v52 = vld [vmem:[%s20730_s0 + $0x198] ss:$48 sps:$4 sm:$0xff]   ;;  %v1188_v56 = vand.u32 %v14855_v49, %v15517_v5 }
  0x25   :  { %13268 = vmatmul.mubr.msk.bf16.vlgmr.msra.gmra.mxu1 %vm174_vm2, %v15544_v16  ;;  %v14853_v53 = vld [vmem:[%s20730_s0 + $0x208] ss:$48 sps:$4 sm:$0x1f]   ;;  %v35_v54 = vld [vmem:[%s20732_s2] sm:$0xff]  ;;  %v1651_v58 = vand.u32 %v14858_v51, %v15517_v5 }
  0x26   :  { %765 = vmatpush1.bf16.msra.mxu1 %v680_v59  ;;  %13323 = vmatmul.mubr.msk.bf16.vlgmr.msra.gmra.mxu0 %vm174_vm2, %v15544_v16  ;;  %v14850_v55 = vld [vmem:[%s20730_s0 + $0x240] ss:$48 sps:$4 sm:$0xff]   ;;  %v14861_v59 = vld [vmem:[%s20730_s0 + $0x1ac] ss:$48 sps:$4 sm:$0xff]   ;;  %v14864_v0 = vld [vmem:[%s20730_s0 + $0x254] ss:$48 sps:$4 sm:$0xff]  }
  0x27   :  { %766 = vmatprep.subr.bf16.mxu1 %v14801_v60  ;;  %894 = vmatpush1.bf16.msra.mxu0 %v698_v62  ;;  %v14856_v57 = vld [vmem:[%s20730_s0 + $0x2b0] ss:$48 sps:$4 sm:$0x1f]   ;;  %v1185_v60 = vand.u32 %v14853_v53, %v15517_v5  ;;  %v14867_v63 = vld [vmem:[%s20730_s0 + $0x2ac] ss:$48 sps:$4 sm:$0x1f]  }
  0x28   :  { %784 = vmatprep.mubr.bf16.mxu1 %v20740_v1  ;;  %895 = vmatprep.subr.bf16.mxu0 %v14804_v61  ;;  %v36_v61 = vld [vmem:[%s20732_s2 + $0x8] sm:$0xff]  ;;  %v1648_v62 = vand.u32 %v14856_v57, %v15517_v5  ;;  %v1645_v7 = vand.u32 %v14867_v63, %v15517_v5  ;;  %v14879_v14 = vld [vmem:[%s20730_s0 + $0x264] ss:$48 sps:$4 sm:$0xff]   ;;  %v14877_v20 = vld [vmem:[%s20730_s0 + $0x260] ss:$48 sps:$4 sm:$0xff]  }
  0x29   :  { %913 = vmatprep.mubr.bf16.mxu0 %v20740_v1  ;;  %496 = vperm.xlu0 %14742, %v35_v54   ;;  %v14865_v4 = vld [vmem:[%s20730_s0 + $0x2a8] ss:$48 sps:$4 sm:$0x1f]   ;;  %v14876_v12 = vld [vmem:[%s20730_s0 + $0x2bc] ss:$48 sps:$4 sm:$0x1f]  }
  0x2a   :  { %767 = vmatpush1.bf16.msra.mxu1 %v14799_v2  ;;  %v14873_v2 = vld [vmem:[%s20730_s0 + $0x2c4] ss:$48 sps:$4 sm:$0x1f]   ;;  %v14868_v17 = vld [vmem:[%s20730_s0 + $0x248] ss:$48 sps:$4 sm:$0xff]  }
  0x2b   :  { %850 = vmatprep.subr.bf16.mxu1 %v695_v6  ;;  %896 = vmatpush1.bf16.msra.mxu0 %v14802_v3  ;;  %v14859_v3 = vld [vmem:[%s20730_s0 + $0x1a8] ss:$48 sps:$4 sm:$0xff]   ;;  %v14862_v6 = vld [vmem:[%s20730_s0 + $0x250] ss:$48 sps:$4 sm:$0xff]   ;;  %v14891_v27 = vld [vmem:[%s20730_s0 + $0x304] ss:$48 sps:$4 sm:$0xff]  }
  0x2c   :  { %1202 = vmatprep.subr.bf16.mxu0 %v1158_v8  ;;  %v14871_v8 = vld [vmem:[%s20730_s0 + $0x2c0] ss:$48 sps:$4 sm:$0x1f]   ;;  %v14886_v30 = vld [vmem:[%s20730_s0 + $0x2c8] ss:$48 sps:$4 sm:$0x1f]  }
  0x2d   :  { %13322 = vmatmul.mubr.msk.bf16.vlgmr.msra.gmra.mxu1 %vm174_vm2, %v15544_v16  ;;  %501 = vperm.xlu0 %14742, %v36_v61   ;;  %v14889_v32 = vld [vmem:[%s20730_s0 + $0x300] ss:$48 sps:$4 sm:$0xff]   ;;  %v14892_v38 = vld [vmem:[%s20730_s0 + $0x268] ss:$48 sps:$4 sm:$0xff]   ;;  %v14915_v51 = vld [vmem:[%s20730_s0 + $0x324] ss:$48 sps:$4 sm:$0xff]  }
  0x2e   :  { %851 = vmatpush1.bf16.msra.mxu1 %v692_v9  ;;  %13325 = vmatmul.mubr.msk.bf16.vlgmr.msra.gmra.mxu0 %vm174_vm2, %v15544_v16  ;;  %v1663_v9 = vand.u32 %v14873_v2, %v15517_v5  ;;  %v14898_v42 = vld [vmem:[%s20730_s0 + $0x368] ss:$48 sps:$4 sm:$0x1f]   ;;  %v14901_v44 = vld [vmem:[%s20730_s0 + $0x310] ss:$48 sps:$4 sm:$0xff]  }
  0x2f   :  { %852 = vmatprep.subr.bf16.mxu1 %v14813_v10  ;;  %1203 = vmatpush1.bf16.msra.mxu0 %v1155_v11  ;;  %v1642_v10 = vand.u32 %v14865_v4, %v15517_v5  ;;  %v14870_v11 = vld [vmem:[%s20730_s0 + $0x24c] ss:$48 sps:$4 sm:$0xff]   ;;  %v14904_v53 = vld [vmem:[%s20730_s0 + $0x308] ss:$48 sps:$4 sm:$0xff]  }
  0x30   :  { %870 = vmatprep.mubr.bf16.mxu1 %v20740_v1  ;;  %1204 = vmatprep.subr.bf16.mxu0 %v14816_v13  ;;  %v1660_v13 = vand.u32 %v14871_v8, %v15517_v5  ;;  %v14912_v49 = vld [vmem:[%s20730_s0 + $0x37c] ss:$48 sps:$4 sm:$0x1f]   ;;  %v14910_v54 = vld [vmem:[%s20730_s0 + $0x378] ss:$48 sps:$4 sm:$0x1f]  }
  0x31   :  { %1222 = vmatprep.mubr.bf16.mxu0 %v20740_v1  ;;  %v14919_v57 = vld [vmem:[%s20730_s0 + $0x420] ss:$48 sps:$4 sm:$0x1f]   ;;  %v14924_v61 = vld [vmem:[%s20730_s0 + $0x38c] ss:$48 sps:$4 sm:$0x1f]  }
  0x32   :  { %853 = vmatpush1.bf16.msra.mxu1 %v14811_v15  ;;  %v14885_v15 = vld [vmem:[%s20730_s0 + $0x364] ss:$48 sps:$4 sm:$0x1f]   ;;  %v2598_v63 = vand.u32 %v14919_v57, %v15517_v5  ;;  %v2150_v4 = vand.u32 %v14924_v61, %v15517_v5 }
  0x33   :  { %936 = vmatprep.subr.bf16.mxu1 %v707_v19  ;;  %1205 = vmatpush1.bf16.msra.mxu0 %v14814_v18  ;;  %v14874_v18 = vld [vmem:[%s20730_s0 + $0x2b8] ss:$48 sps:$4 sm:$0x1f]   ;;  %v1657_v19 = vand.u32 %v14876_v12, %v15517_v5  ;;  %v14933_v2 = vld [vmem:[%s20730_s0 + $0x434] ss:$48 sps:$4 sm:$0x1f]  }
  0x34   :  { %1288 = vmatprep.subr.bf16.mxu0 %v1170_v21  ;;  %v14883_v21 = vld [vmem:[%s20730_s0 + $0x360] ss:$48 sps:$4 sm:$0x1f]   ;;  %v2613_v8 = vand.u32 %v14933_v2, %v15517_v5  ;;  %v14982_v2 = vld [vmem:[%s20730_s0 + $0x4f8] ss:$48 sps:$4 sm:$0x1f]  }
  0x35   :  { %13324 = vmatmul.mubr.msk.bf16.vlgmr.msra.gmra.mxu1 %vm174_vm2, %v15544_v16  ;;  %v2117_v26 = vand.u32 %v14883_v21, %v15517_v5 }
  0x36   :  { %937 = vmatpush1.bf16.msra.mxu1 %v704_v22  ;;  %13379 = vmatmul.mubr.msk.bf16.vlgmr.msra.gmra.mxu0 %vm174_vm2, %v15544_v16  ;;  %v2120_v22 = vand.u32 %v14885_v15, %v15517_v5  ;;  %v14945_v15 = vld [vmem:[%s20730_s0 + $0x444] ss:$48 sps:$4 sm:$0x1f]  }
  0x37   :  { %938 = vmatprep.subr.bf16.mxu1 %v14825_v23  ;;  %1289 = vmatpush1.bf16.msra.mxu0 %v1167_v24  ;;  %v1654_v23 = vand.u32 %v14874_v18, %v15517_v5  ;;  %v14882_v24 = vld [vmem:[%s20730_s0 + $0x25c] ss:$48 sps:$4 sm:$0xff]   ;;  %v2625_v21 = vand.u32 %v14945_v15, %v15517_v5  ;;  %v14994_v15 = vld [vmem:[%s20730_s0 + $0x508] ss:$48 sps:$4 sm:$0x1f]  }
  0x38   :  { %956 = vmatprep.mubr.bf16.mxu1 %v20740_v1  ;;  %1290 = vmatprep.subr.bf16.mxu0 %v14828_v25  ;;  %v14888_v25 = vld [vmem:[%s20730_s0 + $0x2cc] ss:$48 sps:$4 sm:$0x1f]  }
  0x39   :  { %1308 = vmatprep.mubr.bf16.mxu0 %v20740_v1 }
  0x3a   :  { %939 = vmatpush1.bf16.msra.mxu1 %v14823_v28  ;;  %v14897_v28 = vld [vmem:[%s20730_s0 + $0x374] ss:$48 sps:$4 sm:$0x1f]  }
  0x3b   :  { %1245 = vmatprep.subr.bf16.mxu1 %v1164_v31  ;;  %1291 = vmatpush1.bf16.msra.mxu0 %v14826_v29  ;;  %v14880_v29 = vld [vmem:[%s20730_s0 + $0x258] ss:$48 sps:$4 sm:$0xff]   ;;  %v1669_v31 = vand.u32 %v14888_v25, %v15517_v5 }
  0x3c   :  { %1374 = vmatprep.subr.bf16.mxu0 %v1182_v33  ;;  %v14895_v33 = vld [vmem:[%s20730_s0 + $0x370] ss:$48 sps:$4 sm:$0x1f]  }
  0x3d   :  { %13326 = vmatmul.mubr.msk.bf16.vlgmr.msra.gmra.mxu1 %vm174_vm2, %v15544_v16  ;;  %v2129_v39 = vand.u32 %v14895_v33, %v15517_v5 }
  0x3e   :  { %1246 = vmatpush1.bf16.msra.mxu1 %v1161_v34  ;;  %13381 = vmatmul.mubr.msk.bf16.vlgmr.msra.gmra.mxu0 %vm174_vm2, %v15544_v16  ;;  %v2132_v34 = vand.u32 %v14897_v28, %v15517_v5  ;;  %v14940_v28 = vld [vmem:[%s20730_s0 + $0x3c8] ss:$48 sps:$4 sm:$0xff]  }
  0x3f   :  { %1247 = vmatprep.subr.bf16.mxu1 %v14837_v35  ;;  %1375 = vmatpush1.bf16.msra.mxu0 %v1179_v36  ;;  %v1666_v35 = vand.u32 %v14886_v30, %v15517_v5  ;;  %v14894_v36 = vld [vmem:[%s20730_s0 + $0x26c] ss:$48 sps:$4 sm:$0xff]  }
  0x40   :  { %1265 = vmatprep.mubr.bf16.mxu1 %v20740_v1  ;;  %1376 = vmatprep.subr.bf16.mxu0 %v14840_v37  ;;  %v14900_v37 = vld [vmem:[%s20730_s0 + $0x36c] ss:$48 sps:$4 sm:$0x1f]  }
  0x41   :  { %1394 = vmatprep.mubr.bf16.mxu0 %v20740_v1 }
  0x42   :  { %1248 = vmatpush1.bf16.msra.mxu1 %v14835_v40  ;;  %v14903_v40 = vld [vmem:[%s20730_s0 + $0x314] ss:$48 sps:$4 sm:$0xff]  }
  0x43   :  { %1331 = vmatprep.subr.bf16.mxu1 %v1176_v43  ;;  %1377 = vmatpush1.bf16.msra.mxu0 %v14838_v41  ;;  %v14909_v41 = vld [vmem:[%s20730_s0 + $0x384] ss:$48 sps:$4 sm:$0x1f]   ;;  %v2126_v43 = vand.u32 %v14900_v37, %v15517_v5  ;;  %v14952_v37 = vld [vmem:[%s20730_s0 + $0x3d8] ss:$48 sps:$4 sm:$0xff]  }
  0x44   :  { %1683 = vmatprep.subr.bf16.mxu0 %v1639_v45  ;;  %v14907_v45 = vld [vmem:[%s20730_s0 + $0x380] ss:$48 sps:$4 sm:$0x1f]  }
  0x45   :  { %13380 = vmatmul.mubr.msk.bf16.vlgmr.msra.gmra.mxu1 %vm174_vm2, %v15544_v16 }
  0x46   :  { %1332 = vmatpush1.bf16.msra.mxu1 %v1173_v46  ;;  %13383 = vmatmul.mubr.msk.bf16.vlgmr.msra.gmra.mxu0 %vm174_vm2, %v15544_v16  ;;  %v2144_v46 = vand.u32 %v14909_v41, %v15517_v5  ;;  %v14958_v41 = vld [vmem:[%s20730_s0 + $0x448] ss:$48 sps:$4 sm:$0x1f]  }
  0x47   :  { %1333 = vmatprep.subr.bf16.mxu1 %v14849_v47  ;;  %1684 = vmatpush1.bf16.msra.mxu0 %v1636_v48  ;;  %v2123_v47 = vand.u32 %v14898_v42, %v15517_v5  ;;  %v14906_v48 = vld [vmem:[%s20730_s0 + $0x30c] ss:$48 sps:$4 sm:$0xff]  }
  0x48   :  { %1351 = vmatprep.mubr.bf16.mxu1 %v20740_v1  ;;  %1685 = vmatprep.subr.bf16.mxu0 %v14852_v50  ;;  %v2141_v50 = vand.u32 %v14907_v45, %v15517_v5 }
  0x49   :  { %1703 = vmatprep.mubr.bf16.mxu0 %v20740_v1 }
  0x4a   :  { %1334 = vmatpush1.bf16.msra.mxu1 %v14847_v52  ;;  %v14921_v52 = vld [vmem:[%s20730_s0 + $0x424] ss:$48 sps:$4 sm:$0x1f]  }
  0x4b   :  { %1417 = vmatprep.subr.bf16.mxu1 %v1188_v56  ;;  %1686 = vmatpush1.bf16.msra.mxu0 %v14850_v55  ;;  %v2138_v55 = vand.u32 %v14912_v49, %v15517_v5  ;;  %v14913_v56 = vld [vmem:[%s20730_s0 + $0x320] ss:$48 sps:$4 sm:$0xff]   ;;  %v14964_v49 = vld [vmem:[%s20730_s0 + $0x3e8] ss:$48 sps:$4 sm:$0xff]  }
  0x4c   :  { %1769 = vmatprep.subr.bf16.mxu0 %v1651_v58  ;;  %v2601_v58 = vand.u32 %v14921_v52, %v15517_v5  ;;  %v14981_v52 = vld [vmem:[%s20730_s0 + $0x504] ss:$48 sps:$4 sm:$0x1f]  }
  0x4d   :  { %13382 = vmatmul.mubr.msk.bf16.vlgmr.msra.gmra.mxu1 %vm174_vm2, %v15544_v16  ;;  %v3106_v57 = vand.u32 %v14981_v52, %v15517_v5  ;;  %v15030_v52 = vld [vmem:[%s20730_s0 + $0x5c8] ss:$48 sps:$4 sm:$0x1f]  }
  0x4e   :  { %1418 = vmatpush1.bf16.msra.mxu1 %v1185_v60  ;;  %13437 = vmatmul.mubr.msk.bf16.vlgmr.msra.gmra.mxu0 %vm174_vm2, %v15544_v16  ;;  %v14918_v60 = vld [vmem:[%s20730_s0 + $0x31c] ss:$48 sps:$4 sm:$0xff]  }
  0x4f   :  { %1419 = vmatprep.subr.bf16.mxu1 %v14861_v59  ;;  %1770 = vmatpush1.bf16.msra.mxu0 %v1648_v62  ;;  %v2135_v59 = vand.u32 %v14910_v54, %v15517_v5  ;;  %v14916_v62 = vld [vmem:[%s20730_s0 + $0x318] ss:$48 sps:$4 sm:$0xff]  }
  0x50   :  { %1437 = vmatprep.mubr.bf16.mxu1 %v20740_v1  ;;  %1771 = vmatprep.subr.bf16.mxu0 %v14864_v0  ;;  %v14927_v0 = vld [vmem:[%s20730_s0 + $0x3c4] ss:$48 sps:$4 sm:$0xff]  }
  0x51   :  { %1789 = vmatprep.mubr.bf16.mxu0 %v20740_v1 }
  0x52   :  { %1420 = vmatpush1.bf16.msra.mxu1 %v14859_v3  ;;  %v14922_v3 = vld [vmem:[%s20730_s0 + $0x388] ss:$48 sps:$4 sm:$0x1f]  }
  0x53   :  { %1726 = vmatprep.subr.bf16.mxu1 %v1645_v7  ;;  %1772 = vmatpush1.bf16.msra.mxu0 %v14862_v6  ;;  %v14925_v6 = vld [vmem:[%s20730_s0 + $0x3c0] ss:$48 sps:$4 sm:$0xff]  }
  0x54   :  { %1855 = vmatprep.subr.bf16.mxu0 %v1663_v9  ;;  %v14931_v7 = vld [vmem:[%s20730_s0 + $0x430] ss:$48 sps:$4 sm:$0x1f]   ;;  %v2147_v9 = vand.u32 %v14922_v3, %v15517_v5 }
  0x55   :  { %13384 = vmatmul.mubr.msk.bf16.vlgmr.msra.gmra.mxu1 %vm174_vm2, %v15544_v16  ;;  %v2610_v12 = vand.u32 %v14931_v7, %v15517_v5 }
  0x56   :  { %1727 = vmatpush1.bf16.msra.mxu1 %v1642_v10  ;;  %13439 = vmatmul.mubr.msk.bf16.vlgmr.msra.gmra.mxu0 %vm174_vm2, %v15544_v16  ;;  %v14936_v10 = vld [vmem:[%s20730_s0 + $0x42c] ss:$48 sps:$4 sm:$0x1f]  }
  0x57   :  { %1728 = vmatprep.subr.bf16.mxu1 %v14870_v11  ;;  %1746 = vmatprep.mubr.bf16.mxu1 %v20740_v1  ;;  %v14928_v11 = vld [vmem:[%s20730_s0 + $0x328] ss:$48 sps:$4 sm:$0xff]   ;;  %v2607_v18 = vand.u32 %v14936_v10, %v15517_v5 }
  0x58   :  { %1856 = vmatpush1.bf16.msra.mxu0 %v1660_v13  ;;  %1875 = vmatprep.mubr.bf16.mxu0 %v20740_v1  ;;  %v14939_v13 = vld [vmem:[%s20730_s0 + $0x3d4] ss:$48 sps:$4 sm:$0xff]   ;;  %v14988_v10 = vld [vmem:[%s20730_s0 + $0x498] ss:$48 sps:$4 sm:$0xff]  }
  0x59   :  { %1857 = vmatprep.subr.bf16.mxu0 %v14879_v14  ;;  %v16059_v14 = vld [vmem:[%s20731_s1] sm:$0xff]  }
  0x5a   :  { %1729 = vmatpush1.bf16.msra.mxu1 %v14868_v17  ;;  %v14934_v17 = vld [vmem:[%s20730_s0 + $0x428] ss:$48 sps:$4 sm:$0x1f]  }
  0x5b   :  { %1812 = vmatprep.subr.bf16.mxu1 %v1657_v19  ;;  %v14937_v19 = vld [vmem:[%s20730_s0 + $0x3d0] ss:$48 sps:$4 sm:$0xff]  }
  0x5c   :  { %1858 = vmatpush1.bf16.msra.mxu0 %v14877_v20  ;;  %v14943_v20 = vld [vmem:[%s20730_s0 + $0x440] ss:$48 sps:$4 sm:$0x1f]  }
  0x5d   :  { %13438 = vmatmul.mubr.msk.bf16.vlgmr.msra.gmra.mxu1 %vm174_vm2, %v15544_v16  ;;  %2164 = vmatprep.subr.bf16.mxu0 %v2120_v22  ;;  %v2604_v22 = vand.u32 %v14934_v17, %v15517_v5  ;;  %v2622_v25 = vand.u32 %v14943_v20, %v15517_v5 }
  0x5e   :  { %1813 = vmatpush1.bf16.msra.mxu1 %v1654_v23  ;;  %1832 = vmatprep.mubr.bf16.mxu1 %v20740_v1  ;;  %v14942_v23 = vld [vmem:[%s20730_s0 + $0x3cc] ss:$48 sps:$4 sm:$0xff]  }
  0x5f   :  { %1814 = vmatprep.subr.bf16.mxu1 %v14882_v24  ;;  %13441 = vmatmul.mubr.msk.bf16.vlgmr.msra.gmra.mxu0 %vm174_vm2, %v15544_v16  ;;  %v14948_v24 = vld [vmem:[%s20730_s0 + $0x43c] ss:$48 sps:$4 sm:$0x1f]  }
  0x60   :  { %2165 = vmatpush1.bf16.msra.mxu0 %v2117_v26  ;;  %2184 = vmatprep.mubr.bf16.mxu0 %v20740_v1  ;;  %v14951_v26 = vld [vmem:[%s20730_s0 + $0x3e4] ss:$48 sps:$4 sm:$0xff]   ;;  %v2619_v30 = vand.u32 %v14948_v24, %v15517_v5  ;;  %v15000_v24 = vld [vmem:[%s20730_s0 + $0x4a8] ss:$48 sps:$4 sm:$0xff]  }
  0x61   :  { %2166 = vmatprep.subr.bf16.mxu0 %v14891_v27  ;;  %v14957_v27 = vld [vmem:[%s20730_s0 + $0x4e4] ss:$48 sps:$4 sm:$0x1f]  }
  0x62   :  { %1815 = vmatpush1.bf16.msra.mxu1 %v14880_v29  ;;  %v14946_v29 = vld [vmem:[%s20730_s0 + $0x438] ss:$48 sps:$4 sm:$0x1f]   ;;  %v3082_v33 = vand.u32 %v14957_v27, %v15517_v5  ;;  %v15017_v27 = vld [vmem:[%s20730_s0 + $0x5c4] ss:$48 sps:$4 sm:$0x1f]  }
  0x63   :  { %1898 = vmatprep.subr.bf16.mxu1 %v1669_v31  ;;  %v14949_v31 = vld [vmem:[%s20730_s0 + $0x3e0] ss:$48 sps:$4 sm:$0xff]  }
  0x64   :  { %2167 = vmatpush1.bf16.msra.mxu0 %v14889_v32  ;;  %v14955_v32 = vld [vmem:[%s20730_s0 + $0x4e0] ss:$48 sps:$4 sm:$0x1f]  }
  0x65   :  { %13440 = vmatmul.mubr.msk.bf16.vlgmr.msra.gmra.mxu1 %vm174_vm2, %v15544_v16  ;;  %2250 = vmatprep.subr.bf16.mxu0 %v2132_v34  ;;  %v2616_v34 = vand.u32 %v14946_v29, %v15517_v5 }
  0x66   :  { %1899 = vmatpush1.bf16.msra.mxu1 %v1666_v35  ;;  %1918 = vmatprep.mubr.bf16.mxu1 %v20740_v1  ;;  %v14954_v35 = vld [vmem:[%s20730_s0 + $0x3dc] ss:$48 sps:$4 sm:$0xff]  }
  0x67   :  { %1900 = vmatprep.subr.bf16.mxu1 %v14894_v36  ;;  %13495 = vmatmul.mubr.msk.bf16.vlgmr.msra.gmra.mxu0 %vm174_vm2, %v15544_v16  ;;  %v14960_v36 = vld [vmem:[%s20730_s0 + $0x44c] ss:$48 sps:$4 sm:$0x1f]  }
  0x68   :  { %2251 = vmatpush1.bf16.msra.mxu0 %v2129_v39  ;;  %2270 = vmatprep.mubr.bf16.mxu0 %v20740_v1  ;;  %v14963_v39 = vld [vmem:[%s20730_s0 + $0x484] ss:$48 sps:$4 sm:$0xff]   ;;  %v2631_v42 = vand.u32 %v14960_v36, %v15517_v5 }
  0x69   :  { %2252 = vmatprep.subr.bf16.mxu0 %v14903_v40  ;;  %v14969_v40 = vld [vmem:[%s20730_s0 + $0x4f4] ss:$48 sps:$4 sm:$0x1f]  }
  0x6a   :  { %1901 = vmatpush1.bf16.msra.mxu1 %v14892_v38  ;;  %v3079_v38 = vand.u32 %v14955_v32, %v15517_v5  ;;  %v3094_v45 = vand.u32 %v14969_v40, %v15517_v5  ;;  %v3587_v32 = vand.u32 %v15017_v27, %v15517_v5  ;;  %v15018_v40 = vld [vmem:[%s20730_s0 + $0x5b8] ss:$48 sps:$4 sm:$0x1f]  }
  0x6b   :  { %2207 = vmatprep.subr.bf16.mxu1 %v2126_v43  ;;  %v14961_v43 = vld [vmem:[%s20730_s0 + $0x480] ss:$48 sps:$4 sm:$0xff]  }
  0x6c   :  { %2253 = vmatpush1.bf16.msra.mxu0 %v14901_v44  ;;  %v14967_v44 = vld [vmem:[%s20730_s0 + $0x4f0] ss:$48 sps:$4 sm:$0x1f]  }
  0x6d   :  { %13442 = vmatmul.mubr.msk.bf16.vlgmr.msra.gmra.mxu1 %vm174_vm2, %v15544_v16  ;;  %2336 = vmatprep.subr.bf16.mxu0 %v2144_v46  ;;  %v2628_v46 = vand.u32 %v14958_v41, %v15517_v5 }
  0x6e   :  { %2208 = vmatpush1.bf16.msra.mxu1 %v2123_v47  ;;  %2227 = vmatprep.mubr.bf16.mxu1 %v20740_v1  ;;  %v14966_v47 = vld [vmem:[%s20730_s0 + $0x3ec] ss:$48 sps:$4 sm:$0xff]  }
  0x6f   :  { %2209 = vmatprep.subr.bf16.mxu1 %v14906_v48  ;;  %13497 = vmatmul.mubr.msk.bf16.vlgmr.msra.gmra.mxu0 %vm174_vm2, %v15544_v16  ;;  %v14972_v48 = vld [vmem:[%s20730_s0 + $0x4ec] ss:$48 sps:$4 sm:$0x1f]  }
  0x70   :  { %2337 = vmatpush1.bf16.msra.mxu0 %v2141_v50  ;;  %2356 = vmatprep.mubr.bf16.mxu0 %v20740_v1  ;;  %v3091_v50 = vand.u32 %v14967_v44, %v15517_v5  ;;  %v3088_v54 = vand.u32 %v14972_v48, %v15517_v5  ;;  %v15024_v48 = vld [vmem:[%s20730_s0 + $0x558] ss:$48 sps:$4 sm:$0xff]  }
  0x71   :  { %2338 = vmatprep.subr.bf16.mxu0 %v14915_v51  ;;  %v14975_v51 = vld [vmem:[%s20730_s0 + $0x494] ss:$48 sps:$4 sm:$0xff]  }
  0x72   :  { %2210 = vmatpush1.bf16.msra.mxu1 %v14904_v53  ;;  %v14970_v53 = vld [vmem:[%s20730_s0 + $0x4e8] ss:$48 sps:$4 sm:$0x1f]  }
  0x73   :  { %2293 = vmatprep.subr.bf16.mxu1 %v2138_v55  ;;  %v14973_v55 = vld [vmem:[%s20730_s0 + $0x490] ss:$48 sps:$4 sm:$0xff]  }
  0x74   :  { %2339 = vmatpush1.bf16.msra.mxu0 %v14913_v56  ;;  %v14979_v56 = vld [vmem:[%s20730_s0 + $0x500] ss:$48 sps:$4 sm:$0x1f]  }
  0x75   :  { %13496 = vmatmul.mubr.msk.bf16.vlgmr.msra.gmra.mxu1 %vm174_vm2, %v15544_v16  ;;  %2645 = vmatprep.subr.bf16.mxu0 %v2601_v58  ;;  %v3085_v58 = vand.u32 %v14970_v53, %v15517_v5  ;;  %v3103_v61 = vand.u32 %v14979_v56, %v15517_v5 }
  0x76   :  { %2294 = vmatpush1.bf16.msra.mxu1 %v2135_v59  ;;  %2313 = vmatprep.mubr.bf16.mxu1 %v20740_v1  ;;  %v14978_v59 = vld [vmem:[%s20730_s0 + $0x48c] ss:$48 sps:$4 sm:$0xff]  }
  0x77   :  { %2295 = vmatprep.subr.bf16.mxu1 %v14918_v60  ;;  %13499 = vmatmul.mubr.msk.bf16.vlgmr.msra.gmra.mxu0 %vm174_vm2, %v15544_v16  ;;  %v14930_v16 = vld [vmem:[%s20730_s0 + $0x32c] ss:$48 sps:$4 sm:$0xff]  }
  0x78   :  { %2646 = vmatpush1.bf16.msra.mxu0 %v2598_v63  ;;  %2665 = vmatprep.mubr.bf16.mxu0 %v20740_v1  ;;  %v14984_v60 = vld [vmem:[%s20730_s0 + $0x4fc] ss:$48 sps:$4 sm:$0x1f]   ;;  %v14993_v63 = vld [vmem:[%s20730_s0 + $0x5a4] ss:$48 sps:$4 sm:$0x1f]  }
  0x79   :  { %2647 = vmatprep.subr.bf16.mxu0 %v14927_v0  ;;  %v14976_v0 = vld [vmem:[%s20730_s0 + $0x488] ss:$48 sps:$4 sm:$0xff]   ;;  %v3100_v3 = vand.u32 %v14984_v60, %v15517_v5  ;;  %v3563_v7 = vand.u32 %v14993_v63, %v15517_v5  ;;  %v15053_v63 = vld [vmem:[%s20730_s0 + $0x684] ss:$48 sps:$4 sm:$0x1f]  }
  0x7a   :  { %2296 = vmatpush1.bf16.msra.mxu1 %v14916_v62  ;;  %v14987_v62 = vld [vmem:[%s20730_s0 + $0x4a4] ss:$48 sps:$4 sm:$0xff]   ;;  %v15036_v60 = vld [vmem:[%s20730_s0 + $0x568] ss:$48 sps:$4 sm:$0xff]  }
  0x7b   :  { %2379 = vmatprep.subr.bf16.mxu1 %v2150_v4  ;;  %v14985_v4 = vld [vmem:[%s20730_s0 + $0x4a0] ss:$48 sps:$4 sm:$0xff]  }
  0x7c   :  { %2648 = vmatpush1.bf16.msra.mxu0 %v14925_v6  ;;  %v14991_v6 = vld [vmem:[%s20730_s0 + $0x5a0] ss:$48 sps:$4 sm:$0x1f]  }
  0x7d   :  { %13498 = vmatmul.mubr.msk.bf16.vlgmr.msra.gmra.mxu1 %vm174_vm2, %v16059_v14  ;;  %2731 = vmatprep.subr.bf16.mxu0 %v2613_v8  ;;  %v3097_v8 = vand.u32 %v14982_v2, %v15517_v5 }
  0x7e   :  { %2380 = vmatpush1.bf16.msra.mxu1 %v2147_v9  ;;  %2399 = vmatprep.mubr.bf16.mxu1 %v20740_v1  ;;  %v14990_v9 = vld [vmem:[%s20730_s0 + $0x49c] ss:$48 sps:$4 sm:$0xff]  }
  0x7f   :  { %2381 = vmatprep.subr.bf16.mxu1 %v14930_v16  ;;  %13553 = vmatmul.mubr.msk.bf16.vlgmr.msra.gmra.mxu0 %vm174_vm2, %v16059_v14  ;;  %v14996_v16 = vld [vmem:[%s20730_s0 + $0x50c] ss:$48 sps:$4 sm:$0x1f]  }
  0x80   :  { %2732 = vmatpush1.bf16.msra.mxu0 %v2610_v12  ;;  %2751 = vmatprep.mubr.bf16.mxu0 %v20740_v1  ;;  %v14999_v12 = vld [vmem:[%s20730_s0 + $0x544] ss:$48 sps:$4 sm:$0xff]   ;;  %v3112_v17 = vand.u32 %v14996_v16, %v15517_v5 }
  0x81   :  { %2733 = vmatprep.subr.bf16.mxu0 %v14939_v13  ;;  %v15005_v13 = vld [vmem:[%s20730_s0 + $0x5b4] ss:$48 sps:$4 sm:$0x1f]  }
  0x82   :  { %2382 = vmatpush1.bf16.msra.mxu1 %v14928_v11  ;;  %v3560_v11 = vand.u32 %v14991_v6, %v15517_v5  ;;  %v3575_v20 = vand.u32 %v15005_v13, %v15517_v5  ;;  %v4068_v6 = vand.u32 %v15053_v63, %v15517_v5  ;;  %v15087_v63 = vld [vmem:[%s20730_s0 + $0x740] ss:$48 sps:$4 sm:$0x1f]  }
  0x83   :  { %2688 = vmatprep.subr.bf16.mxu1 %v2607_v18  ;;  %v14997_v18 = vld [vmem:[%s20730_s0 + $0x540] ss:$48 sps:$4 sm:$0xff]  }
  0x84   :  { %2734 = vmatpush1.bf16.msra.mxu0 %v14937_v19  ;;  %v15003_v19 = vld [vmem:[%s20730_s0 + $0x5b0] ss:$48 sps:$4 sm:$0x1f]  }
  0x85   :  { %13500 = vmatmul.mubr.msk.bf16.vlgmr.msra.gmra.mxu1 %vm174_vm2, %v16059_v14  ;;  %2817 = vmatprep.subr.bf16.mxu0 %v2625_v21  ;;  %v3109_v21 = vand.u32 %v14994_v15, %v15517_v5  ;;  %v15048_v15 = vld [vmem:[%s20730_s0 + $0x608] ss:$48 sps:$4 sm:$0xff]  }
  0x86   :  { %2689 = vmatpush1.bf16.msra.mxu1 %v2604_v22  ;;  %2708 = vmatprep.mubr.bf16.mxu1 %v20740_v1  ;;  %v15002_v22 = vld [vmem:[%s20730_s0 + $0x4ac] ss:$48 sps:$4 sm:$0xff]  }
  0x87   :  { %2690 = vmatprep.subr.bf16.mxu1 %v14942_v23  ;;  %13555 = vmatmul.mubr.msk.bf16.vlgmr.msra.gmra.mxu0 %vm174_vm2, %v16059_v14  ;;  %v15008_v23 = vld [vmem:[%s20730_s0 + $0x5ac] ss:$48 sps:$4 sm:$0x1f]  }
  0x88   :  { %2818 = vmatpush1.bf16.msra.mxu0 %v2622_v25  ;;  %2837 = vmatprep.mubr.bf16.mxu0 %v20740_v1  ;;  %v3572_v25 = vand.u32 %v15003_v19, %v15517_v5  ;;  %v3569_v29 = vand.u32 %v15008_v23, %v15517_v5 }
  0x89   :  { %2819 = vmatprep.subr.bf16.mxu0 %v14951_v26  ;;  %v15011_v26 = vld [vmem:[%s20730_s0 + $0x554] ss:$48 sps:$4 sm:$0xff]  }
  0x8a   :  { %2691 = vmatpush1.bf16.msra.mxu1 %v14940_v28  ;;  %v15006_v28 = vld [vmem:[%s20730_s0 + $0x5a8] ss:$48 sps:$4 sm:$0x1f]  }
  0x8b   :  { %2774 = vmatprep.subr.bf16.mxu1 %v2619_v30  ;;  %v15009_v30 = vld [vmem:[%s20730_s0 + $0x550] ss:$48 sps:$4 sm:$0xff]  }
  0x8c   :  { %2820 = vmatpush1.bf16.msra.mxu0 %v14949_v31  ;;  %v15015_v31 = vld [vmem:[%s20730_s0 + $0x5c0] ss:$48 sps:$4 sm:$0x1f]  }
  0x8d   :  { %13554 = vmatmul.mubr.msk.bf16.vlgmr.msra.gmra.mxu1 %vm174_vm2, %v16059_v14  ;;  %3126 = vmatprep.subr.bf16.mxu0 %v3082_v33  ;;  %v3566_v33 = vand.u32 %v15006_v28, %v15517_v5  ;;  %v3584_v36 = vand.u32 %v15015_v31, %v15517_v5  ;;  %v15062_v28 = vld [vmem:[%s20730_s0 + $0x61c] ss:$48 sps:$4 sm:$0xff]  }
  0x8e   :  { %2775 = vmatpush1.bf16.msra.mxu1 %v2616_v34  ;;  %2794 = vmatprep.mubr.bf16.mxu1 %v20740_v1  ;;  %v15014_v34 = vld [vmem:[%s20730_s0 + $0x54c] ss:$48 sps:$4 sm:$0xff]  }
  0x8f   :  { %2776 = vmatprep.subr.bf16.mxu1 %v14954_v35  ;;  %13557 = vmatmul.mubr.msk.bf16.vlgmr.msra.gmra.mxu0 %vm174_vm2, %v16059_v14  ;;  %v15020_v35 = vld [vmem:[%s20730_s0 + $0x5bc] ss:$48 sps:$4 sm:$0x1f]  }
  0x90   :  { %3127 = vmatpush1.bf16.msra.mxu0 %v3079_v38  ;;  %3146 = vmatprep.mubr.bf16.mxu0 %v20740_v1  ;;  %v15029_v38 = vld [vmem:[%s20730_s0 + $0x664] ss:$48 sps:$4 sm:$0x1f]   ;;  %v3581_v41 = vand.u32 %v15020_v35, %v15517_v5 }
  0x91   :  { %3128 = vmatprep.subr.bf16.mxu0 %v14963_v39  ;;  %v15012_v39 = vld [vmem:[%s20730_s0 + $0x548] ss:$48 sps:$4 sm:$0xff]   ;;  %v4044_v44 = vand.u32 %v15029_v38, %v15517_v5 }
  0x92   :  { %2777 = vmatpush1.bf16.msra.mxu1 %v14952_v37  ;;  %v15023_v37 = vld [vmem:[%s20730_s0 + $0x564] ss:$48 sps:$4 sm:$0xff]  }
  0x93   :  { %2860 = vmatprep.subr.bf16.mxu1 %v2631_v42  ;;  %v15021_v42 = vld [vmem:[%s20730_s0 + $0x560] ss:$48 sps:$4 sm:$0xff]  }
  0x94   :  { %3129 = vmatpush1.bf16.msra.mxu0 %v14961_v43  ;;  %v15027_v43 = vld [vmem:[%s20730_s0 + $0x660] ss:$48 sps:$4 sm:$0x1f]  }
  0x95   :  { %13556 = vmatmul.mubr.msk.bf16.vlgmr.msra.gmra.mxu1 %vm174_vm2, %v16059_v14  ;;  %3212 = vmatprep.subr.bf16.mxu0 %v3094_v45  ;;  %v3578_v45 = vand.u32 %v15018_v40, %v15517_v5 }
  0x96   :  { %2861 = vmatpush1.bf16.msra.mxu1 %v2628_v46  ;;  %2880 = vmatprep.mubr.bf16.mxu1 %v20740_v1  ;;  %v15026_v46 = vld [vmem:[%s20730_s0 + $0x55c] ss:$48 sps:$4 sm:$0xff]  }
  0x97   :  { %2862 = vmatprep.subr.bf16.mxu1 %v14966_v47  ;;  %13611 = vmatmul.mubr.msk.bf16.vlgmr.msra.gmra.mxu0 %vm174_vm2, %v16059_v14  ;;  %v15032_v47 = vld [vmem:[%s20730_s0 + $0x5cc] ss:$48 sps:$4 sm:$0x1f]  }
  0x98   :  { %3213 = vmatpush1.bf16.msra.mxu0 %v3091_v50  ;;  %3232 = vmatprep.mubr.bf16.mxu0 %v20740_v1  ;;  %v15035_v50 = vld [vmem:[%s20730_s0 + $0x604] ss:$48 sps:$4 sm:$0xff]   ;;  %v3593_v53 = vand.u32 %v15032_v47, %v15517_v5 }
  0x99   :  { %3214 = vmatprep.subr.bf16.mxu0 %v14975_v51  ;;  %v15041_v51 = vld [vmem:[%s20730_s0 + $0x674] ss:$48 sps:$4 sm:$0x1f]  }
  0x9a   :  { %2863 = vmatpush1.bf16.msra.mxu1 %v14964_v49  ;;  %v4041_v49 = vand.u32 %v15027_v43, %v15517_v5  ;;  %v4056_v56 = vand.u32 %v15041_v51, %v15517_v5 }
  0x9b   :  { %3169 = vmatprep.subr.bf16.mxu1 %v3088_v54  ;;  %v15033_v54 = vld [vmem:[%s20730_s0 + $0x600] ss:$48 sps:$4 sm:$0xff]  }
  0x9c   :  { %3215 = vmatpush1.bf16.msra.mxu0 %v14973_v55  ;;  %v15039_v55 = vld [vmem:[%s20730_s0 + $0x670] ss:$48 sps:$4 sm:$0x1f]  }
  0x9d   :  { %13558 = vmatmul.mubr.msk.bf16.vlgmr.msra.gmra.mxu1 %vm174_vm2, %v16059_v14  ;;  %3298 = vmatprep.subr.bf16.mxu0 %v3106_v57  ;;  %v3590_v57 = vand.u32 %v15030_v52, %v15517_v5 }
  0x9e   :  { %3170 = vmatpush1.bf16.msra.mxu1 %v3085_v58  ;;  %3189 = vmatprep.mubr.bf16.mxu1 %v20740_v1  ;;  %v15038_v58 = vld [vmem:[%s20730_s0 + $0x56c] ss:$48 sps:$4 sm:$0xff]  }
  0x9f   :  { %3171 = vmatprep.subr.bf16.mxu1 %v14978_v59  ;;  %13613 = vmatmul.mubr.msk.bf16.vlgmr.msra.gmra.mxu0 %vm174_vm2, %v16059_v14  ;;  %v15044_v59 = vld [vmem:[%s20730_s0 + $0x66c] ss:$48 sps:$4 sm:$0x1f]  }
  0xa0   :  { %3299 = vmatpush1.bf16.msra.mxu0 %v3103_v61  ;;  %3318 = vmatprep.mubr.bf16.mxu0 %v20740_v1  ;;  %v4053_v61 = vand.u32 %v15039_v55, %v15517_v5  ;;  %v4050_v2 = vand.u32 %v15044_v59, %v15517_v5 }
  0xa1   :  { %3300 = vmatprep.subr.bf16.mxu0 %v14987_v62  ;;  %v15047_v62 = vld [vmem:[%s20730_s0 + $0x614] ss:$48 sps:$4 sm:$0xff]  }
  0xa2   :  { %3172 = vmatpush1.bf16.msra.mxu1 %v14976_v0  ;;  %v15042_v0 = vld [vmem:[%s20730_s0 + $0x668] ss:$48 sps:$4 sm:$0x1f]  }
  0xa3   :  { %3255 = vmatprep.subr.bf16.mxu1 %v3100_v3  ;;  %v15045_v3 = vld [vmem:[%s20730_s0 + $0x610] ss:$48 sps:$4 sm:$0xff]  }
  0xa4   :  { %3301 = vmatpush1.bf16.msra.mxu0 %v14985_v4  ;;  %v15051_v4 = vld [vmem:[%s20730_s0 + $0x680] ss:$48 sps:$4 sm:$0x1f]  }
  0xa5   :  { %13612 = vmatmul.mubr.msk.bf16.vlgmr.msra.gmra.mxu1 %vm174_vm2, %v16059_v14  ;;  %3607 = vmatprep.subr.bf16.mxu0 %v3563_v7  ;;  %v4047_v7 = vand.u32 %v15042_v0, %v15517_v5  ;;  %v4065_v16 = vand.u32 %v15051_v4, %v15517_v5  ;;  %v16518_v4 = vpop.permute.xlu0 %496 }
  0xa6   :  { %3256 = vmatpush1.bf16.msra.mxu1 %v3097_v8  ;;  %3275 = vmatprep.mubr.bf16.mxu1 %v20740_v1  ;;  %v15050_v8 = vld [vmem:[%s20730_s0 + $0x60c] ss:$48 sps:$4 sm:$0xff]  }
  0xa7   :  { %3257 = vmatprep.subr.bf16.mxu1 %v14990_v9  ;;  %13615 = vmatmul.mubr.msk.bf16.vlgmr.msra.gmra.mxu0 %vm174_vm2, %v16059_v14  ;;  %v15056_v9 = vld [vmem:[%s20730_s0 + $0x67c] ss:$48 sps:$4 sm:$0x1f]  }
  0xa8   :  { %3608 = vmatpush1.bf16.msra.mxu0 %v3560_v11  ;;  %3627 = vmatprep.mubr.bf16.mxu0 %v20740_v1  ;;  %v15059_v11 = vld [vmem:[%s20730_s0 + $0x624] ss:$48 sps:$4 sm:$0xff]   ;;  %v4062_v19 = vand.u32 %v15056_v9, %v15517_v5 }
  0xa9   :  { %3609 = vmatprep.subr.bf16.mxu0 %v14999_v12  ;;  %v15065_v12 = vld [vmem:[%s20730_s0 + $0x724] ss:$48 sps:$4 sm:$0x1f]  }
  0xaa   :  { %3258 = vmatpush1.bf16.msra.mxu1 %v14988_v10 }
  0xab   :  { %3341 = vmatprep.subr.bf16.mxu1 %v3112_v17  ;;  %v15054_v17 = vld [vmem:[%s20730_s0 + $0x678] ss:$48 sps:$4 sm:$0x1f]  }
  0xac   :  { %3610 = vmatpush1.bf16.msra.mxu0 %v14997_v18 }
  0xad   :  { %13614 = vmatmul.mubr.msk.bf16.vlgmr.msra.gmra.mxu1 %vm174_vm2, %v16059_v14  ;;  %3693 = vmatprep.subr.bf16.mxu0 %v3575_v20 }
  0xae   :  { %3342 = vmatpush1.bf16.msra.mxu1 %v3109_v21  ;;  %3361 = vmatprep.mubr.bf16.mxu1 %v20740_v1  ;;  %v15057_v21 = vld [vmem:[%s20730_s0 + $0x620] ss:$48 sps:$4 sm:$0xff]  }
  0xaf   :  { %3343 = vmatprep.subr.bf16.mxu1 %v15002_v22  ;;  %13669 = vmatmul.mubr.msk.bf16.vlgmr.msra.gmra.mxu0 %vm174_vm2, %v16059_v14  ;;  %v15063_v22 = vld [vmem:[%s20730_s0 + $0x720] ss:$48 sps:$4 sm:$0x1f]  }
  0xb0   :  { %3694 = vmatpush1.bf16.msra.mxu0 %v3572_v25  ;;  %3713 = vmatprep.mubr.bf16.mxu0 %v20740_v1  ;;  %v4522_v31 = vand.u32 %v15063_v22, %v15517_v5  ;;  %v15095_v22 = vld [vmem:[%s20730_s0 + $0x6e4] ss:$48 sps:$4 sm:$0xff]  }
  0xb1   :  { %3695 = vmatprep.subr.bf16.mxu0 %v15011_v26  ;;  %v4059_v26 = vand.u32 %v15054_v17, %v15517_v5  ;;  %v15090_v17 = vld [vmem:[%s20730_s0 + $0x738] ss:$48 sps:$4 sm:$0x1f]  }
  0xb2   :  { %3344 = vmatpush1.bf16.msra.mxu1 %v15000_v24  ;;  %v4525_v24 = vand.u32 %v15065_v12, %v15517_v5 }
  0xb3   :  { %3650 = vmatprep.subr.bf16.mxu1 %v3569_v29  ;;  %v15068_v29 = vld [vmem:[%s20730_s0 + $0x68c] ss:$48 sps:$4 sm:$0x1f]  }
  0xb4   :  { %3696 = vmatpush1.bf16.msra.mxu0 %v15009_v30 }
  0xb5   :  { %13616 = vmatmul.mubr.msk.bf16.vlgmr.msra.gmra.mxu1 %vm174_vm2, %v16059_v14  ;;  %3779 = vmatprep.subr.bf16.mxu0 %v3587_v32 }
  0xb6   :  { %3651 = vmatpush1.bf16.msra.mxu1 %v3566_v33  ;;  %3670 = vmatprep.mubr.bf16.mxu1 %v20740_v1  ;;  %v15071_v33 = vld [vmem:[%s20730_s0 + $0x6c4] ss:$48 sps:$4 sm:$0xff]  }
  0xb7   :  { %3652 = vmatprep.subr.bf16.mxu1 %v15014_v34  ;;  %13671 = vmatmul.mubr.msk.bf16.vlgmr.msra.gmra.mxu0 %vm174_vm2, %v16059_v14  ;;  %v15077_v34 = vld [vmem:[%s20730_s0 + $0x734] ss:$48 sps:$4 sm:$0x1f]  }
  0xb8   :  { %3780 = vmatpush1.bf16.msra.mxu0 %v3584_v36  ;;  %3799 = vmatprep.mubr.bf16.mxu0 %v20740_v1  ;;  %v15060_v36 = vld [vmem:[%s20730_s0 + $0x618] ss:$48 sps:$4 sm:$0xff]  }
  0xb9   :  { %3781 = vmatprep.subr.bf16.mxu0 %v15023_v37  ;;  %v15066_v37 = vld [vmem:[%s20730_s0 + $0x688] ss:$48 sps:$4 sm:$0x1f]  }
  0xba   :  { %3653 = vmatpush1.bf16.msra.mxu1 %v15012_v39  ;;  %v4074_v39 = vand.u32 %v15068_v29, %v15517_v5 }
  0xbb   :  { %3736 = vmatprep.subr.bf16.mxu1 %v3581_v41  ;;  %v15069_v41 = vld [vmem:[%s20730_s0 + $0x6c0] ss:$48 sps:$4 sm:$0xff]  }
  0xbc   :  { %3782 = vmatpush1.bf16.msra.mxu0 %v15021_v42  ;;  %v15075_v42 = vld [vmem:[%s20730_s0 + $0x730] ss:$48 sps:$4 sm:$0x1f]  }
  0xbd   :  { %13670 = vmatmul.mubr.msk.bf16.vlgmr.msra.gmra.mxu1 %vm174_vm2, %v16059_v14  ;;  %4088 = vmatprep.subr.bf16.mxu0 %v4044_v44  ;;  %v4537_v44 = vand.u32 %v15077_v34, %v15517_v5  ;;  %v4534_v51 = vand.u32 %v15075_v42, %v15517_v5 }
  0xbe   :  { %3737 = vmatpush1.bf16.msra.mxu1 %v3578_v45  ;;  %3756 = vmatprep.mubr.bf16.mxu1 %v20740_v1 }
  0xbf   :  { %3738 = vmatprep.subr.bf16.mxu1 %v15026_v46  ;;  %13673 = vmatmul.mubr.msk.bf16.vlgmr.msra.gmra.mxu0 %vm174_vm2, %v16059_v14  ;;  %v4071_v46 = vand.u32 %v15066_v37, %v15517_v5  ;;  %v16563_v37 = vpop.permute.xlu0 %501 }
  0xc0   :  { %4089 = vmatpush1.bf16.msra.mxu0 %v4041_v49  ;;  %4108 = vmatprep.mubr.bf16.mxu0 %v20740_v1  ;;  %v15080_v49 = vld [vmem:[%s20730_s0 + $0x72c] ss:$48 sps:$4 sm:$0x1f]  }
  0xc1   :  { %4090 = vmatprep.subr.bf16.mxu0 %v15035_v50 }
  0xc2   :  { %3739 = vmatpush1.bf16.msra.mxu1 %v15024_v48  ;;  %v15074_v48 = vld [vmem:[%s20730_s0 + $0x62c] ss:$48 sps:$4 sm:$0xff]  }
  0xc3   :  { %3822 = vmatprep.subr.bf16.mxu1 %v3593_v53  ;;  %v15083_v53 = vld [vmem:[%s20730_s0 + $0x6d4] ss:$48 sps:$4 sm:$0xff]  }
  0xc4   :  { %4091 = vmatpush1.bf16.msra.mxu0 %v15033_v54  ;;  %v15089_v54 = vld [vmem:[%s20730_s0 + $0x744] ss:$48 sps:$4 sm:$0x1f]  }
  0xc5   :  { %13672 = vmatmul.mubr.msk.bf16.vlgmr.msra.gmra.mxu1 %vm174_vm2, %v16059_v14  ;;  %4174 = vmatprep.subr.bf16.mxu0 %v4056_v56  ;;  %v15072_v56 = vld [vmem:[%s20730_s0 + $0x628] ss:$48 sps:$4 sm:$0xff]  }
  0xc6   :  { %3823 = vmatpush1.bf16.msra.mxu1 %v3590_v57  ;;  %3842 = vmatprep.mubr.bf16.mxu1 %v20740_v1  ;;  %v15078_v57 = vld [vmem:[%s20730_s0 + $0x728] ss:$48 sps:$4 sm:$0x1f]  }
  0xc7   :  { %3824 = vmatprep.subr.bf16.mxu1 %v15038_v58  ;;  %13727 = vmatmul.mubr.msk.bf16.vlgmr.msra.gmra.mxu0 %vm174_vm2, %v16059_v14 }
  0xc8   :  { %4175 = vmatpush1.bf16.msra.mxu0 %v4053_v61  ;;  %4194 = vmatprep.mubr.bf16.mxu0 %v20740_v1 }
  0xc9   :  { %4176 = vmatprep.subr.bf16.mxu0 %v15047_v62  ;;  %v15081_v62 = vld [vmem:[%s20730_s0 + $0x6d0] ss:$48 sps:$4 sm:$0xff]  }
  0xca   :  { %3825 = vmatpush1.bf16.msra.mxu1 %v15036_v60  ;;  %v4531_v60 = vand.u32 %v15080_v49, %v15517_v5 }
  0xcb   :  { %4131 = vmatprep.subr.bf16.mxu1 %v4050_v2 }
  0xcc   :  { %4177 = vmatpush1.bf16.msra.mxu0 %v15045_v3  ;;  %v4549_v3 = vand.u32 %v15089_v54, %v15517_v5 }
  0xcd   :  { %v16395_v10 = vpop.f32.mrf.mxu1  ;;  %13674 = vmatmul.mubr.msk.bf16.vlgmr.msra.gmra.mxu1 %vm174_vm2, %v16059_v14  ;;  %4260 = vmatprep.subr.bf16.mxu0 %v4068_v6 }
  0xce   :  { %4132 = vmatpush1.bf16.msra.mxu1 %v4047_v7  ;;  %v16405_v13 = vpop.f32.mrf.mxu0  ;;  %4151 = vmatprep.mubr.bf16.mxu1 %v20740_v1  ;;  %v4528_v7 = vand.u32 %v15078_v57, %v15517_v5 }
  0xcf   :  { %v16414_v18 = vpop.f32.mrf.mxu1  ;;  %4133 = vmatprep.subr.bf16.mxu1 %v15050_v8  ;;  %13729 = vmatmul.mubr.msk.bf16.vlgmr.msra.gmra.mxu0 %vm174_vm2, %v16059_v14 }
  0xd0   :  { %v16419_v20 = vpop.f32.mrf.mxu0  ;;  %4261 = vmatpush1.bf16.msra.mxu0 %v4065_v16  ;;  %4280 = vmatprep.mubr.bf16.mxu0 %v20740_v1 }
  0xd1   :  { %v16428_v23 = vpop.f32.mrf.mxu1  ;;  %4262 = vmatprep.subr.bf16.mxu0 %v15059_v11  ;;  %v15086_v11 = vld [vmem:[%s20730_s0 + $0x6cc] ss:$48 sps:$4 sm:$0xff]  }
  0xd2   :  { %4134 = vmatpush1.bf16.msra.mxu1 %v15048_v15  ;;  %v16431_v25 = vpop.f32.mrf.mxu0  ;;  %v4546_v15 = vand.u32 %v15087_v63, %v15517_v5 }
  0xd3   :  { %v16434_v27 = vpop.f32.mrf.mxu1  ;;  %4217 = vmatprep.subr.bf16.mxu1 %v4062_v19 }
  0xd4   :  { %v16442_v30 = vpop.f32.mrf.mxu0  ;;  %4263 = vmatpush1.bf16.msra.mxu0 %v15057_v21 }
  0xd5   :  { %v16445_v32 = vpop.f32.mrf.mxu1  ;;  %13728 = vmatmul.mubr.msk.bf16.vlgmr.msra.gmra.mxu1 %vm174_vm2, %v16059_v14  ;;  %4569 = vmatprep.subr.bf16.mxu0 %v4525_v24  ;;  %v15101_v24 = vld [vmem:[%s20730_s0 + $0x7e4] ss:$48 sps:$4 sm:$0x1f]  }
  0xd6   :  { %4218 = vmatpush1.bf16.msra.mxu1 %v4059_v26  ;;  %v16455_v35 = vpop.f32.mrf.mxu0  ;;  %4237 = vmatprep.mubr.bf16.mxu1 %v20740_v1  ;;  %v477_v26 = vmax.f32 %v16414_v18, %v16405_v13  ;;  %v15099_v18 = vld [vmem:[%s20730_s0 + $0x7e0] ss:$48 sps:$4 sm:$0x1f]  }
  0xd7   :  { %v297_v38 = vpop.f32.mrf.mxu1  ;;  %4219 = vmatprep.subr.bf16.mxu1 %v15062_v28  ;;  %13731 = vmatmul.mubr.msk.bf16.vlgmr.msra.gmra.mxu0 %vm174_vm2, %v16059_v14 }
  0xd8   :  { %v426_v40 = vpop.f32.mrf.mxu0  ;;  %4570 = vmatpush1.bf16.msra.mxu0 %v4522_v31  ;;  %4589 = vmatprep.mubr.bf16.mxu0 %v20740_v1  ;;  %v476_v0 = vmax.f32 %v16395_v10, %v297_v38  ;;  %v15092_v10 = vld [vmem:[%s20730_s0 + $0x73c] ss:$48 sps:$4 sm:$0x1f]  }
  0xd9   :  { %v16474_v43 = vpop.f32.mrf.mxu1  ;;  %4571 = vmatprep.subr.bf16.mxu0 %v15071_v33  ;;  %v4543_v13 = vand.u32 %v15092_v10, %v15517_v5 }
  0xda   :  { %4220 = vmatpush1.bf16.msra.mxu1 %v15060_v36  ;;  %v16477_v45 = vpop.f32.mrf.mxu0  ;;  %v478_v36 = vmax.f32 %v16445_v32, %v16419_v20  ;;  %v5006_v20 = vand.u32 %v15101_v24, %v15517_v5  ;;  %v480_v32 = vmax.f32 %v16434_v27, %v16431_v25  ;;  %v481_v49 = vmax.f32 %v16474_v43, %v16442_v30  ;;  %v15098_v25 = vld [vmem:[%s20730_s0 + $0x6dc] ss:$48 sps:$4 sm:$0xff]  }
  0xdb   :  { %v301_v47 = vpop.f32.mrf.mxu1  ;;  %4303 = vmatprep.subr.bf16.mxu1 %v4074_v39  ;;  %v5003_v27 = vand.u32 %v15099_v18, %v15517_v5  ;;  %v15110_v24 = vld [vmem:[%s20730_s0 + $0x6ec] ss:$48 sps:$4 sm:$0xff]  }
  0xdc   :  { %v430_v50 = vpop.f32.mrf.mxu0  ;;  %4572 = vmatpush1.bf16.msra.mxu0 %v15069_v41  ;;  %v479_v19 = vmax.f32 %v16428_v23, %v301_v47  ;;  %v15084_v23 = vld [vmem:[%s20730_s0 + $0x6c8] ss:$48 sps:$4 sm:$0xff]   ;;  %v15093_v41 = vld [vmem:[%s20730_s0 + $0x6e0] ss:$48 sps:$4 sm:$0xff]  }
  0xdd   :  { %v381_v52 = vpop.f32.mrf.mxu1  ;;  %13730 = vmatmul.mubr.msk.bf16.vlgmr.msra.gmra.mxu1 %vm174_vm2, %v16059_v14  ;;  %4655 = vmatprep.subr.bf16.mxu0 %v4537_v44  ;;  %v4540_v44 = vand.u32 %v15090_v17, %v15517_v5 }
  0xde   :  { %4304 = vmatpush1.bf16.msra.mxu1 %v4071_v46  ;;  %v16495_v55 = vpop.f32.mrf.mxu0  ;;  %4323 = vmatprep.mubr.bf16.mxu1 %v20740_v1  ;;  %v482_v58 = vmax.f32 %v381_v52, %v426_v40 }
  0xdf   :  { %v383_v59 = vpop.f32.mrf.mxu1  ;;  %4305 = vmatprep.subr.bf16.mxu1 %v15074_v48  ;;  %13785 = vmatmul.mubr.msk.bf16.vlgmr.msra.gmra.mxu0 %vm174_vm2, %v16059_v14 }
  0xe0   :  { %v16507_v61 = vpop.f32.mrf.mxu0  ;;  %4656 = vmatpush1.bf16.msra.mxu0 %v4534_v51  ;;  %4675 = vmatprep.mubr.bf16.mxu0 %v20740_v1  ;;  %v488_v8 = vmax.f32 %v476_v0, %v482_v58 }
  0xe1   :  { %v385_v2 = vpop.f32.mrf.mxu1  ;;  %4657 = vmatprep.subr.bf16.mxu0 %v15083_v53  ;;  %v15104_v53 = vld [vmem:[%s20730_s0 + $0x74c] ss:$48 sps:$4 sm:$0x1f]  }
  0xe2   :  { %4306 = vmatpush1.bf16.msra.mxu1 %v15072_v56  ;;  %v16520_v6 = vpop.f32.mrf.mxu0  ;;  %v485_v9 = vmax.f32 %v385_v2, %v430_v50  ;;  %v16553_v33 = vadd.f32 %v16518_v4, %v488_v8  ;;  %v16626_v8 = vld [vmem:[%s20731_s1] sm:$0xff]  }
  0xe3   :  { %v387_v16 = vpop.f32.mrf.mxu1  ;;  %4612 = vmatprep.subr.bf16.mxu1 %v4531_v60  ;;  %v15113_v60 = vld [vmem:[%s20730_s0 + $0x7f4] ss:$48 sps:$4 sm:$0x1f]  }
  0xe4   :  { %v16529_v12 = vpop.f32.mrf.mxu0  ;;  %4658 = vmatpush1.bf16.msra.mxu0 %v15081_v62  ;;  %v491_v31 = vmax.f32 %v479_v19, %v485_v9  ;;  %v510_v50 = vmax.f32 %v16553_v33, 0.0  ;;  %v4555_v9 = vand.u32 %v15104_v53, %v15517_v5  ;;  %v16711_v33 = vld [vmem:[%s20730_s0 + $0x7f8] ss:$48 sps:$4 sm:$0x1f]  }
  0xe5   :  { %v467_v21 = vpop.f32.mrf.mxu1  ;;  %13732 = vmatmul.mubr.msk.bf16.vlgmr.msra.gmra.mxu1 %vm174_vm2, %v16059_v14  ;;  %4741 = vmatprep.subr.bf16.mxu0 %v4549_v3  ;;  %v15102_v3 = vld [vmem:[%s20730_s0 + $0x748] ss:$48 sps:$4 sm:$0x1f]  }
  0xe6   :  { %v483_v28 = vmax.f32 %v383_v59, %v467_v21  ;;  %4613 = vmatpush1.bf16.msra.mxu1 %v4528_v7  ;;  %v16546_v29 = vpop.f32.mrf.mxu0  ;;  %4632 = vmatprep.mubr.bf16.mxu1 %v20740_v1  ;;  %v16585_v51 = vadd.f32 %v16563_v37, %v491_v31  ;;  %v15107_v59 = vld [vmem:[%s20730_s0 + $0x784] ss:$48 sps:$4 sm:$0xff]   ;;  %v15111_v21 = vld [vmem:[%s20730_s0 + $0x7f0] ss:$48 sps:$4 sm:$0x1f]  }
  0xe7   :  { %v469_v34 = vpop.f32.mrf.mxu1  ;;  %4614 = vmatprep.subr.bf16.mxu1 %v15086_v11  ;;  %13787 = vmatmul.mubr.msk.bf16.vlgmr.msra.gmra.mxu0 %vm174_vm2, %v16059_v14 }
  0xe8   :  { %v489_v38 = vmax.f32 %v477_v26, %v483_v28  ;;  %v484_v39 = vmax.f32 %v16455_v35, %v469_v34  ;;  %v16566_v40 = vpop.f32.mrf.mxu0  ;;  %4742 = vmatpush1.bf16.msra.mxu0 %v4546_v15  ;;  %4761 = vmatprep.mubr.bf16.mxu0 %v20740_v1  ;;  %v513_v10 = vmax.f32 %v16585_v51, 0.0  ;;  %v5018_v26 = vand.u32 %v15113_v60, %v15517_v5  ;;  %v15116_v28 = vld [vmem:[%s20730_s0 + $0x7ec] ss:$48 sps:$4 sm:$0x1f]  }
  0xe9   :  { %v471_v42 = vpop.f32.mrf.mxu1  ;;  %4743 = vmatprep.subr.bf16.mxu0 %v15095_v22  ;;  %v5012_v51 = vand.u32 %v15116_v28, %v15517_v5 }
  0xea   :  { %v16577_v35 = vadd.f32 %v16518_v4, %v489_v38  ;;  %v490_v46 = vmax.f32 %v478_v36, %v484_v39  ;;  %v486_v47 = vmax.f32 %v387_v16, %v471_v42  ;;  %4615 = vmatpush1.bf16.msra.mxu1 %v15084_v23  ;;  %v16579_v48 = vpop.f32.mrf.mxu0  ;;  %v15105_v16 = vld [vmem:[%s20730_s0 + $0x780] ss:$48 sps:$4 sm:$0xff]   ;;  %v15119_v36 = vld [vmem:[%s20730_s0 + $0x794] ss:$48 sps:$4 sm:$0xff]   ;;  %v15108_v42 = vld [vmem:[%s20730_s0 + $0x6e8] ss:$48 sps:$4 sm:$0xff]  }
  0xeb   :  { %v473_v52 = vpop.f32.mrf.mxu1  ;;  %4698 = vmatprep.subr.bf16.mxu1 %v4543_v13  ;;  %v4552_v13 = vand.u32 %v15102_v3, %v15517_v5  ;;  %v15126_v38 = vld [vmem:[%s20730_s0 + $0x804] ss:$48 sps:$4 sm:$0x1f]  }
  0xec   :  { %v511_v54 = vmax.f32 %v16577_v35, 0.0  ;;  %v506_v30 = vadd.f32 %v16518_v4, %v490_v46  ;;  %v492_v43 = vmax.f32 %v480_v32, %v486_v47  ;;  %v487_v56 = vmax.f32 %v16477_v45, %v473_v52  ;;  %v16597_v57 = vpop.f32.mrf.mxu0  ;;  %4744 = vmatpush1.bf16.msra.mxu0 %v15093_v41 }
  0xed   :  { %v16599_v58 = vpop.f32.mrf.mxu1  ;;  %13786 = vmatmul.mubr.msk.bf16.vlgmr.msra.gmra.mxu1 %vm174_vm2, %v16059_v14  ;;  %5050 = vmatprep.subr.bf16.mxu0 %v5006_v20  ;;  %v15096_v14 = vld [vmem:[%s20730_s0 + $0x6d8] ss:$48 sps:$4 sm:$0xff]  }
  0xee   :  { %v14353_v45 = vpack.c.bf16 %v511_v54, %v510_v50  ;;  %v512_v62 = vmax.f32 %v506_v30, 0.0  ;;  %v508_v63 = vadd.f32 %v16563_v37, %v492_v43  ;;  %v493_v0 = vmax.f32 %v481_v49, %v487_v56  ;;  %4699 = vmatpush1.bf16.msra.mxu1 %v4540_v44  ;;  %v16612_v2 = vpop.f32.mrf.mxu0  ;;  %4718 = vmatprep.mubr.bf16.mxu1 %v20740_v1  ;;  %v15114_v20 = vld [vmem:[%s20730_s0 + $0x7e8] ss:$48 sps:$4 sm:$0x1f]  }
  0xef   :  { %v16621_v7 = vpop.f32.mrf.mxu1  ;;  %4700 = vmatprep.subr.bf16.mxu1 %v15098_v25  ;;  %13789 = vmatmul.mubr.msk.bf16.vlgmr.msra.gmra.mxu0 %vm174_vm2, %v16626_v8  ;;  %v5015_v44 = vand.u32 %v15111_v21, %v15517_v5  ;;  %v15117_v25 = vld [vmem:[%s20730_s0 + $0x790] ss:$48 sps:$4 sm:$0xff]   ;;  %v5030_v30 = vand.u32 %v15126_v38, %v15517_v5  ;;  %v5009_v56 = vand.u32 %v15114_v20, %v15517_v5  ;;  %v15141_v20 = vld [vmem:[%s20730_s0 + $0x80c] ss:$48 sps:$4 sm:$0x1f]  }
  0xf0   :  { %536 = vst [vmem:[#allocation2] sm:$0xff] %v14353_v45  ;;  %v14354_v11 = vpack.c.bf16 %v512_v62, %v512_v62  ;;  %v514_v15 = vmax.f32 %v508_v63, 0.0  ;;  %v509_v17 = vadd.f32 %v16563_v37, %v493_v0  ;;  %v917_v19 = vpop.f32.mrf.mxu0  ;;  %5051 = vmatpush1.bf16.msra.mxu0 %v5003_v27  ;;  %5070 = vmatprep.mubr.bf16.mxu0 %v20740_v1  ;;  %v15123_v62 = vld [vmem:[%s20730_s0 + $0x78c] ss:$48 sps:$4 sm:$0xff]  }
  0xf1   :  { %v16640_v22 = vpop.f32.mrf.mxu1  ;;  %5052 = vmatprep.subr.bf16.mxu0 %v15107_v59  ;;  %v967_v27 = vmax.f32 %v16495_v55, %v16621_v7  ;;  %v16696_v59 = vpack.c.bf16 %v513_v10, %v510_v50  ;;  %v15129_v63 = vld [vmem:[%s20730_s0 + $0x7fc] ss:$48 sps:$4 sm:$0x1f]   ;;  %v16716_v50 = vld [vmem:[%s20730_s0 + $0x8a4] ss:$48 sps:$4 sm:$0x1f]  }
  0xf2   :  { %537 = vst [vmem:[#allocation2 + $0x8] sm:$0xf] %v14354_v11  ;;  %v14355_v23 = vpack.c.bf16 %v514_v15, %v513_v10  ;;  %v515_v31 = vmax.f32 %v509_v17, 0.0  ;;  %4701 = vmatpush1.bf16.msra.mxu1 %v15096_v14  ;;  %v16649_v34 = vpop.f32.mrf.mxu0  ;;  %v16667_v32 = vpack.c.bf16 %v514_v15, %v511_v54  ;;  %v15124_v54 = vld [vmem:[%s20730_s0 + $0x800] ss:$48 sps:$4 sm:$0x1f]   ;;  %v972_v38 = vmax.f32 %v16640_v22, %v16597_v57 }
  0xf3   :  { %v16652_v18 = vpop.f32.mrf.mxu1  ;;  %4784 = vmatprep.subr.bf16.mxu1 %v4555_v9  ;;  %v5027_v9 = vand.u32 %v15124_v54, %v15517_v5  ;;  %v15121_v15 = vld [vmem:[%s20730_s0 + $0x788] ss:$48 sps:$4 sm:$0xff]  }
  0xf4   :  { %538 = vst [vmem:[#allocation2 + $0xc] sm:$0xff] %v14355_v23  ;;  %v14356_v39 = vpack.c.bf16 %v515_v31, %v515_v31  ;;  %v921_v41 = vpop.f32.mrf.mxu0  ;;  %5053 = vmatpush1.bf16.msra.mxu0 %v15105_v16  ;;  %5938 = vrot.lane.b32.xlu0 %v16667_v32, %s15453_s19  ;;  %v970_v14 = vmax.f32 %v16520_v6, %v16652_v18  ;;  %v15132_v6 = vld [vmem:[%s20730_s0 + $0x7a4] ss:$48 sps:$4 sm:$0xff]  }
  0xf5   :  { %v872_v35 = vpop.f32.mrf.mxu1  ;;  %13788 = vmatmul.mubr.msk.bf16.vlgmr.msra.gmra.mxu1 %vm174_vm2, %v16626_v8  ;;  %5136 = vmatprep.subr.bf16.mxu0 %v5018_v26  ;;  %v968_v16 = vmax.f32 %v16507_v61, %v16546_v29  ;;  %v5024_v61 = vand.u32 %v15129_v63, %v15517_v5  ;;  %v969_v29 = vmax.f32 %v16599_v58, %v16566_v40  ;;  %v15130_v58 = vld [vmem:[%s20730_s0 + $0x7a0] ss:$48 sps:$4 sm:$0xff]  }
  0xf6   :  { %539 = vst [vmem:[#allocation2 + $0x14] sm:$0xf] %v14356_v39  ;;  %4785 = vmatpush1.bf16.msra.mxu1 %v4552_v13  ;;  %v16671_v46 = vpop.f32.mrf.mxu0  ;;  %4804 = vmatprep.mubr.bf16.mxu1 %v20740_v1  ;;  %v973_v47 = vmax.f32 %v872_v35, %v917_v19  ;;  %v971_v23 = vmax.f32 %v16529_v12, %v16579_v48 }
  0xf7   :  { %v874_v49 = vpop.f32.mrf.mxu1  ;;  %4786 = vmatprep.subr.bf16.mxu1 %v15110_v24  ;;  %13843 = vmatmul.mubr.msk.bf16.vlgmr.msra.gmra.mxu0 %vm174_vm2, %v16626_v8  ;;  %v5021_v40 = vand.u32 %v16711_v33, %v15517_v5  ;;  %v5487_v13 = vand.u32 %v16716_v50, %v15517_v5  ;;  %v5036_v63 = vand.u32 %v15141_v20, %v15517_v5 }
  0xf8   :  { %v16677_v52 = vpop.f32.mrf.mxu0  ;;  %5137 = vmatpush1.bf16.msra.mxu0 %v5015_v44  ;;  %5156 = vmatprep.mubr.bf16.mxu0 %v20740_v1  ;;  %v979_v55 = vmax.f32 %v967_v27, %v973_v47  ;;  %v15135_v44 = vld [vmem:[%s20730_s0 + $0x79c] ss:$48 sps:$4 sm:$0xff]  }
  0xf9   :  { %v876_v53 = vpop.f32.mrf.mxu1  ;;  %5138 = vmatprep.subr.bf16.mxu0 %v15119_v36  ;;  %5936 = vrot.lane.b32.xlu0 %v16696_v59, %s15453_s19 }
  0xfa   :  { %4787 = vmatpush1.bf16.msra.mxu1 %v15108_v42  ;;  %v16691_v43 = vpop.f32.mrf.mxu0  ;;  %v976_v60 = vmax.f32 %v876_v53, %v921_v41  ;;  %v16735_v17 = vadd.f32 %v979_v55, %v16518_v4 }
  0xfb   :  { %v878_v45 = vpop.f32.mrf.mxu1  ;;  %5093 = vmatprep.subr.bf16.mxu1 %v5012_v51 }
  0xfc   :  { %v16704_v0 = vpop.f32.mrf.mxu0  ;;  %5139 = vmatpush1.bf16.msra.mxu0 %v15117_v25  ;;  %v982_v19 = vmax.f32 %v970_v14, %v976_v60  ;;  %v991_v39 = vmax.f32 %v16735_v17, 0.0  ;;  %v15133_v25 = vld [vmem:[%s20730_s0 + $0x798] ss:$48 sps:$4 sm:$0xff]   ;;  %v15144_v60 = vld [vmem:[%s20730_s0 + $0x844] ss:$48 sps:$4 sm:$0xff]  }
  0xfd   :  { %v958_v3 = vpop.f32.mrf.mxu1  ;;  %13790 = vmatmul.mubr.msk.bf16.vlgmr.msra.gmra.mxu1 %vm174_vm2, %v16626_v8  ;;  %v15120_v7 = vld [vmem:[#allocation2 + $0x8] ss:$12 sps:$4 sm:$0xff]   ;;  %5222 = vmatprep.subr.bf16.mxu0 %v5030_v30 }
  0xfe   :  { %v974_v11 = vmax.f32 %v874_v49, %v958_v3  ;;  %5094 = vmatpush1.bf16.msra.mxu1 %v5009_v56  ;;  %v16725_v10 = vpop.f32.mrf.mxu0  ;;  %5113 = vmatprep.mubr.bf16.mxu1 %v20740_v1  ;;  %v16770_v41 = vadd.f32 %v982_v19, %v16563_v37  ;;  %v15163_v17 = vld [vmem:[%s20730_s0 + $0x8b8] ss:$48 sps:$4 sm:$0x1f]  }
  0xff   :  { %v960_v21 = vpop.f32.mrf.mxu1  ;;  %5940 = vrot.lane.b32.xlu1 %v15120_v7, %s15453_s19  ;;  %5095 = vmatprep.subr.bf16.mxu1 %v15123_v62 }
 0x100   :  { %v980_v24 = vmax.f32 %v968_v16, %v974_v11  ;;  %v975_v26 = vmax.f32 %v16612_v2, %v960_v21  ;;  %v16742_v28 = vpop.f32.mrf.mxu0  ;;  %13845 = vmatmul.mubr.msk.bf16.vlgmr.msra.gmra.mxu0 %vm174_vm2, %v16626_v8  ;;  %6381 = vrot.lane.b32.xlu0 %v16667_v32, %s15454_s13  ;;  %v15136_v2 = vld [vmem:[%s20730_s0 + $0x8a0] ss:$48 sps:$4 sm:$0x1f]   ;;  %v994_v33 = vmax.f32 %v16770_v41, 0.0 }
 0x101   :  { %v962_v31 = vpop.f32.mrf.mxu1  ;;  %5223 = vmatpush1.bf16.msra.mxu0 %v5027_v9  ;;  %5242 = vmatprep.mubr.bf16.mxu0 %v20740_v1  ;;  %v5484_v27 = vand.u32 %v15136_v2, %v15517_v5  ;;  %v15142_v16 = vld [vmem:[%s20730_s0 + $0x840] ss:$48 sps:$4 sm:$0xff]   ;;  %v15145_v2 = vld [vmem:[%s20730_s0 + $0x7a8] ss:$48 sps:$4 sm:$0xff]  }
 0x102   :  { %v16762_v12 = vadd.f32 %v980_v24, %v16518_v4  ;;  %v981_v48 = vmax.f32 %v969_v29, %v975_v26  ;;  %v977_v18 = vmax.f32 %v878_v45, %v962_v31  ;;  %5096 = vmatpush1.bf16.msra.mxu1 %v15121_v15  ;;  %v16764_v36 = vpop.f32.mrf.mxu0  ;;  %5224 = vmatprep.subr.bf16.mxu0 %v15132_v6  ;;  %v15150_v45 = vld [vmem:[%s20730_s0 + $0x8b4] ss:$48 sps:$4 sm:$0x1f]   ;;  %v15148_v11 = vld [vmem:[%s20730_s0 + $0x8b0] ss:$48 sps:$4 sm:$0x1f]  }
 0x103   :  { %v964_v42 = vpop.f32.mrf.mxu1  ;;  %6383 = vrot.lane.b32.xlu1 %v15120_v7, %s15454_s13  ;;  %5179 = vmatprep.subr.bf16.mxu1 %v5024_v61  ;;  %v5499_v61 = vand.u32 %v15150_v45, %v15517_v5  ;;  %v15147_v24 = vld [vmem:[%s20730_s0 + $0x7ac] ss:$48 sps:$4 sm:$0xff]  }
 0x104   :  { %v992_v35 = vmax.f32 %v16762_v12, 0.0  ;;  %v987_v57 = vadd.f32 %v981_v48, %v16518_v4  ;;  %v983_v22 = vmax.f32 %v971_v23, %v977_v18  ;;  %v978_v47 = vmax.f32 %v16649_v34, %v964_v42  ;;  %v16782_v49 = vpop.f32.mrf.mxu0  ;;  %6379 = vrot.lane.b32.xlu0 %v16696_v59, %s15454_s13  ;;  %v15139_v34 = vld [vmem:[%s20730_s0 + $0x808] ss:$48 sps:$4 sm:$0x1f]   ;;  %v15156_v18 = vld [vmem:[%s20730_s0 + $0x854] ss:$48 sps:$4 sm:$0xff]  }
 0x105   :  { %v16786_v51 = vpop.f32.mrf.mxu1  ;;  %13844 = vmatmul.mubr.msk.bf16.vlgmr.msra.gmra.mxu1 %vm174_vm2, %v16626_v8  ;;  %5225 = vmatpush1.bf16.msra.mxu0 %v15130_v58  ;;  %v5033_v21 = vand.u32 %v15139_v34, %v15517_v5  ;;  %v15153_v26 = vld [vmem:[%s20730_s0 + $0x8ac] ss:$48 sps:$4 sm:$0x1f]   ;;  %v15151_v48 = vld [vmem:[%s20730_s0 + $0x8a8] ss:$48 sps:$4 sm:$0x1f]   ;;  %v16879_v34 = vpack.c.bf16 %v994_v33, %v991_v39 }
 0x106   :  { %v14357_v53 = vpack.c.bf16 %v992_v35, %v991_v39  ;;  %v993_v54 = vmax.f32 %v987_v57, 0.0  ;;  %v989_v30 = vadd.f32 %v983_v22, %v16563_v37  ;;  %v984_v56 = vmax.f32 %v972_v38, %v978_v47  ;;  %5180 = vmatpush1.bf16.msra.mxu1 %v5021_v40  ;;  %v16800_v55 = vpop.f32.mrf.mxu0  ;;  %5531 = vmatprep.subr.bf16.mxu0 %v5487_v13  ;;  %v15160_v57 = vld [vmem:[%s20730_s0 + $0x8c0] ss:$48 sps:$4 sm:$0x1f]  }
 0x107   :  { %v16808_v62 = vpop.f32.mrf.mxu1  ;;  %5181 = vmatprep.subr.bf16.mxu1 %v15135_v44  ;;  %5199 = vmatprep.mubr.bf16.mxu1 %v20740_v1  ;;  %v5496_v13 = vand.u32 %v15148_v11, %v15517_v5  ;;  %v5493_v42 = vand.u32 %v15153_v26, %v15517_v5  ;;  %v15162_v44 = vld [vmem:[%s20730_s0 + $0x8c4] ss:$48 sps:$4 sm:$0x1f]   ;;  %v1450_v11 = vmax.f32 %v16786_v51, %v16742_v28  ;;  %v15166_v51 = vld [vmem:[%s20730_s0 + $0x860] ss:$48 sps:$4 sm:$0xff]  }
 0x108   :  { %1017 = vst [vmem:[#allocation2 + $0x18] sm:$0xff] %v14357_v53  ;;  %v14358_v50 = vpack.c.bf16 %v993_v54, %v993_v54  ;;  %v995_v14 = vmax.f32 %v989_v30, 0.0  ;;  %v990_v3 = vadd.f32 %v984_v56, %v16563_v37  ;;  %v1398_v7 = vpop.f32.mrf.mxu0  ;;  %13847 = vmatmul.mubr.msk.bf16.vlgmr.msra.gmra.mxu0 %vm174_vm2, %v16626_v8  ;;  %v1448_v22 = vmax.f32 %v16671_v46, %v16808_v62  ;;  %v15159_v46 = vld [vmem:[%s20730_s0 + $0x84c] ss:$48 sps:$4 sm:$0xff]  }
 0x109   :  { %v16816_v9 = vpop.f32.mrf.mxu1  ;;  %5532 = vmatpush1.bf16.msra.mxu0 %v5484_v27  ;;  %5551 = vmatprep.mubr.bf16.mxu0 %v20740_v1  ;;  %v5490_v27 = vand.u32 %v15151_v48, %v15517_v5  ;;  %v5511_v56 = vand.u32 %v15162_v44, %v15517_v5  ;;  %v5502_v28 = vand.u32 %v15163_v17, %v15517_v5 }
 0x10a   :  { %1018 = vst [vmem:[#allocation2 + $0x20] sm:$0xf] %v14358_v50  ;;  %v14359_v15 = vpack.c.bf16 %v995_v14, %v994_v33  ;;  %v996_v6 = vmax.f32 %v990_v3, 0.0  ;;  %5182 = vmatpush1.bf16.msra.mxu1 %v15133_v25  ;;  %v16825_v19 = vpop.f32.mrf.mxu0  ;;  %5533 = vmatprep.subr.bf16.mxu0 %v15144_v60  ;;  %v16837_v40 = vpack.c.bf16 %v995_v14, %v992_v35  ;;  %v15154_v35 = vld [vmem:[%s20730_s0 + $0x850] ss:$48 sps:$4 sm:$0xff]  }
 0x10b   :  { %v16829_v29 = vpop.f32.mrf.mxu1  ;;  %5265 = vmatprep.subr.bf16.mxu1 %v5036_v63  ;;  %v15165_v60 = vld [vmem:[%s20730_s0 + $0x8bc] ss:$48 sps:$4 sm:$0x1f]   ;;  %v5508_v63 = vand.u32 %v15160_v57, %v15517_v5  ;;  %v1449_v33 = vmax.f32 %v16677_v52, %v16725_v10  ;;  %v15157_v3 = vld [vmem:[%s20730_s0 + $0x848] ss:$48 sps:$4 sm:$0xff]  }
 0x10c   :  { %1019 = vst [vmem:[#allocation2 + $0x24] sm:$0xff] %v14359_v15  ;;  %v14360_v23 = vpack.c.bf16 %v996_v6, %v996_v6  ;;  %v1402_v31 = vpop.f32.mrf.mxu0  ;;  %6387 = vrot.lane.b32.xlu0 %v16837_v40, %s15454_s13  ;;  %5944 = vrot.lane.b32.xlu1 %v16837_v40, %s15453_s19  ;;  %v1451_v39 = vmax.f32 %v16691_v43, %v16829_v29  ;;  %v15168_v10 = vld [vmem:[%s20730_s0 + $0x864] ss:$48 sps:$4 sm:$0xff]  }
 0x10d   :  { %v1353_v58 = vpop.f32.mrf.mxu1  ;;  %13846 = vmatmul.mubr.msk.bf16.vlgmr.msra.gmra.mxu1 %vm174_vm2, %v16626_v8  ;;  %5534 = vmatpush1.bf16.msra.mxu0 %v15142_v16  ;;  %v5505_v52 = vand.u32 %v15165_v60, %v15517_v5 }
 0x10e   :  { %1020 = vst [vmem:[#allocation2 + $0x2c] sm:$0xf] %v14360_v23  ;;  %5266 = vmatpush1.bf16.msra.mxu1 %v5033_v21  ;;  %v16845_v12 = vpop.f32.mrf.mxu0  ;;  %5617 = vmatprep.subr.bf16.mxu0 %v5499_v61  ;;  %v1454_v38 = vmax.f32 %v1353_v58, %v1398_v7  ;;  %v1452_v61 = vmax.f32 %v16704_v0, %v16764_v36 }
 0x10f   :  { %v1355_v41 = vpop.f32.mrf.mxu1  ;;  %5267 = vmatprep.subr.bf16.mxu1 %v15147_v24  ;;  %5285 = vmatprep.mubr.bf16.mxu1 %v20740_v1  ;;  %v1453_v0 = vmax.f32 %v16816_v9, %v16782_v49 }
 0x110   :  { %v16858_v20 = vpop.f32.mrf.mxu0  ;;  %13901 = vmatmul.mubr.msk.bf16.vlgmr.msra.gmra.mxu0 %vm174_vm2, %v16626_v8  ;;  %v1460_v53 = vmax.f32 %v1448_v22, %v1454_v38  ;;  %6385 = vrot.lane.b32.xlu0 %v16879_v34, %s15454_s13 }
 0x111   :  { %v1357_v47 = vpop.f32.mrf.mxu1  ;;  %5618 = vmatpush1.bf16.msra.mxu0 %v5496_v13  ;;  %5637 = vmatprep.mubr.bf16.mxu0 %v20740_v1  ;;  %v15175_v13 = vld [vmem:[%s20730_s0 + $0x8cc] ss:$48 sps:$4 sm:$0x1f]  }
 0x112   :  { %5268 = vmatpush1.bf16.msra.mxu1 %v15145_v2  ;;  %v16874_v25 = vpop.f32.mrf.mxu0  ;;  %5619 = vmatprep.subr.bf16.mxu0 %v15156_v18  ;;  %v1457_v54 = vmax.f32 %v1357_v47, %v1402_v31  ;;  %v16911_v43 = vadd.f32 %v1460_v53, %v16518_v4  ;;  %v15171_v2 = vld [vmem:[%s20730_s0 + $0x85c] ss:$48 sps:$4 sm:$0xff]   ;;  %v15173_v47 = vld [vmem:[%s20730_s0 + $0x8c8] ss:$48 sps:$4 sm:$0x1f]  }
 0x113   :  { %v1359_v30 = vpop.f32.mrf.mxu1  ;;  %5574 = vmatprep.subr.bf16.mxu1 %v5493_v42  ;;  %5942 = vrot.lane.b32.xlu1 %v16879_v34, %s15453_s19 }
 0x114   :  { %v16889_v45 = vpop.f32.mrf.mxu0  ;;  %v1463_v7 = vmax.f32 %v1451_v39, %v1457_v54  ;;  %6495 = vrot.lane.b32.xlu0 %v16837_v40, %s15454_s13  ;;  %v1472_v36 = vmax.f32 %v16911_v43, 0.0  ;;  %v5517_v54 = vand.u32 %v15175_v13, %v15517_v5 }
 0x115   :  { %v1439_v62 = vpop.f32.mrf.mxu1  ;;  %13848 = vmatmul.mubr.msk.bf16.vlgmr.msra.gmra.mxu1 %vm174_vm2, %v16626_v8  ;;  %5620 = vmatpush1.bf16.msra.mxu0 %v15154_v35  ;;  %v15176_v17 = vld [vmem:[#allocation2 + $0x20] ss:$12 sps:$4 sm:$0xff]  }
 0x116   :  { %v1455_v50 = vmax.f32 %v1355_v41, %v1439_v62  ;;  %5575 = vmatpush1.bf16.msra.mxu1 %v5490_v27  ;;  %v16903_v14 = vpop.f32.mrf.mxu0  ;;  %5703 = vmatprep.subr.bf16.mxu0 %v5511_v56  ;;  %v16942_v31 = vadd.f32 %v1463_v7, %v16563_v37  ;;  %v15172_v41 = vld [vmem:[#allocation2 + $0x20] ss:$12 sps:$4 sm:$0xff]  }
 0x117   :  { %v1441_v16 = vpop.f32.mrf.mxu1  ;;  %5576 = vmatprep.subr.bf16.mxu1 %v15159_v46  ;;  %5594 = vmatprep.mubr.bf16.mxu1 %v20740_v1  ;;  %v1930_v43 = vmax.f32 %v16858_v20, %v16903_v14 }
 0x118   :  { %v1461_v15 = vmax.f32 %v1449_v33, %v1455_v50  ;;  %v1456_v6 = vmax.f32 %v16800_v55, %v1441_v16  ;;  %v16920_v21 = vpop.f32.mrf.mxu0  ;;  %13903 = vmatmul.mubr.msk.bf16.vlgmr.msra.gmra.mxu0 %vm174_vm2, %v16626_v8  ;;  %6207 = vrot.lane.b32.xlu1 %v16837_v40, %s15453_s19  ;;  %v5514_v50 = vand.u32 %v15173_v47, %v15517_v5  ;;  %v15179_v16 = vld [vmem:[%s20730_s0 + $0x86c] ss:$48 sps:$4 sm:$0xff]  }
 0x119   :  { %v1443_v29 = vpop.f32.mrf.mxu1  ;;  %5704 = vmatpush1.bf16.msra.mxu0 %v5508_v63  ;;  %5723 = vmatprep.mubr.bf16.mxu0 %v20740_v1 }
 0x11a   :  { %v1467_v55 = vadd.f32 %v1461_v15, %v16518_v4  ;;  %v1462_v24 = vmax.f32 %v1450_v11, %v1456_v6  ;;  %v1458_v26 = vmax.f32 %v1359_v30, %v1443_v29  ;;  %5577 = vmatpush1.bf16.msra.mxu1 %v15157_v3  ;;  %v16934_v23 = vpop.f32.mrf.mxu0  ;;  %5705 = vmatprep.subr.bf16.mxu0 %v15168_v10  ;;  %v1475_v30 = vmax.f32 %v16942_v31, 0.0  ;;  %v15177_v15 = vld [vmem:[%s20730_s0 + $0x868] ss:$48 sps:$4 sm:$0xff]  }
 0x11b   :  { %v1445_v58 = vpop.f32.mrf.mxu1  ;;  %5660 = vmatprep.subr.bf16.mxu1 %v5505_v52  ;;  %5946 = vrot.lane.b32.xlu0 %v15172_v41, %s15453_s19 }
 0x11c   :  { %v1473_v48 = vmax.f32 %v1467_v55, 0.0  ;;  %v1468_v18 = vadd.f32 %v1462_v24, %v16518_v4  ;;  %v1464_v49 = vmax.f32 %v1452_v61, %v1458_v26  ;;  %v1459_v9 = vmax.f32 %v16825_v19, %v1445_v58  ;;  %v16952_v38 = vpop.f32.mrf.mxu0  ;;  %v15169_v19 = vld [vmem:[%s20730_s0 + $0x858] ss:$48 sps:$4 sm:$0xff]   ;;  %6205 = vrot.lane.b32.xlu1 %v16879_v34, %s15453_s19 }
 0x11d   :  { %v16955_v42 = vpop.f32.mrf.mxu1  ;;  %13902 = vmatmul.mubr.msk.bf16.vlgmr.msra.gmra.mxu1 %vm174_vm2, %v16626_v8  ;;  %5706 = vmatpush1.bf16.msra.mxu0 %v15166_v51  ;;  %v17009_v24 = vpack.c.bf16 %v1475_v30, %v1472_v36 }
 0x11e   :  { %v14361_v44 = vpack.c.bf16 %v1473_v48, %v1472_v36  ;;  %v1474_v35 = vmax.f32 %v1468_v18, 0.0  ;;  %v1470_v57 = vadd.f32 %v1464_v49, %v16563_v37  ;;  %v1465_v22 = vmax.f32 %v1453_v0, %v1459_v9  ;;  %5661 = vmatpush1.bf16.msra.mxu1 %v5502_v28  ;;  %5680 = vmatprep.mubr.bf16.mxu1 %v20740_v1 }
 0x11f   :  { %v1750_v27 = vpop.f32.mrf.mxu1  ;;  %5662 = vmatprep.subr.bf16.mxu1 %v15171_v2  ;;  %v16971_v53 = vpop.f32.mrf.mxu0  ;;  %6209 = vrot.lane.b32.xlu0 %v15176_v17, %s15453_s19 }
 0x120   :  { %1498 = vst [vmem:[#allocation2 + $0x30] sm:$0xff] %v14361_v44  ;;  %v14362_v46 = vpack.c.bf16 %v1474_v35, %v1474_v35  ;;  %v1476_v56 = vmax.f32 %v1470_v57, 0.0  ;;  %v1471_v60 = vadd.f32 %v1465_v22, %v16563_v37  ;;  %13905 = vmatmul.mubr.msk.bf16.vlgmr.msra.gmra.mxu0 %vm174_vm2, %v16626_v8  ;;  %6493 = vrot.lane.b32.xlu1 %v16879_v34, %s15454_s13 }
 0x121   :  { %v16979_v39 = vpop.f32.mrf.mxu1  ;;  %v1879_v62 = vpop.f32.mrf.mxu0  ;;  %6026 = vmatprep.mubr.bf16.mxu0 %v20740_v1  ;;  %v1929_v28 = vmax.f32 %v16845_v12, %v1750_v27  ;;  %v1933_v35 = vmax.f32 %v16889_v45, %v16934_v23 }
 0x122   :  { %1499 = vst [vmem:[#allocation2 + $0x38] sm:$0xf] %v14362_v46  ;;  %v14363_v63 = vpack.c.bf16 %v1476_v56, %v1475_v30  ;;  %v1477_v33 = vmax.f32 %v1471_v60, 0.0  ;;  %5663 = vmatpush1.bf16.msra.mxu1 %v15169_v19  ;;  %v16991_v10 = vpack.c.bf16 %v1476_v56, %v1473_v48  ;;  %v1934_v47 = vmax.f32 %v16979_v39, %v16952_v38 }
 0x123   :  { %v1754_v3 = vpop.f32.mrf.mxu1  ;;  %5746 = vmatprep.subr.bf16.mxu1 %v5517_v54  ;;  %v16986_v7 = vpop.f32.mrf.mxu0 }
 0x124   :  { %1500 = vst [vmem:[#allocation2 + $0x3c] sm:$0xff] %v14363_v63  ;;  %v14364_v52 = vpack.c.bf16 %v1477_v33, %v1477_v33  ;;  %6389 = vrot.lane.b32.xlu1 %v15172_v41, %s15454_s13  ;;  %5950 = vrot.lane.b32.xlu0 %v16991_v10, %s15453_s19  ;;  %v1932_v12 = vmax.f32 %v16874_v25, %v1754_v3 }
 0x125   :  { %v1834_v11 = vpop.f32.mrf.mxu1  ;;  %13904 = vmatmul.mubr.msk.bf16.vlgmr.msra.gmra.mxu1 %vm174_vm2, %v16626_v8  ;;  %v1883_v5 = vpop.f32.mrf.mxu0 }
 0x126   :  { %1501 = vst [vmem:[#allocation2 + $0x44] sm:$0xf] %v14364_v52  ;;  %5747 = vmatpush1.bf16.msra.mxu1 %v5514_v50  ;;  %5766 = vmatprep.mubr.bf16.mxu1 %v20740_v1  ;;  %v1935_v6 = vmax.f32 %v1834_v11, %v1879_v62 }
 0x127   :  { %v1836_v61 = vpop.f32.mrf.mxu1  ;;  %5748 = vmatprep.subr.bf16.mxu1 %v15179_v16  ;;  %v17000_v29 = vpop.f32.mrf.mxu0 }
 0x128   :  { %v1941_v26 = vmax.f32 %v1929_v28, %v1935_v6  ;;  %6497 = vrot.lane.b32.xlu1 %v15176_v17, %s15454_s13  ;;  %5948 = vrot.lane.b32.xlu0 %v17009_v24, %s15453_s19 }
 0x129   :  { %v1838_v51 = vpop.f32.mrf.mxu1  ;;  %v17005_v55 = vpop.f32.mrf.mxu0 }
 0x12a   :  { %5749 = vmatpush1.bf16.msra.mxu1 %v15177_v15  ;;  %v1938_v0 = vmax.f32 %v1838_v51, %v1883_v5  ;;  %v17025_v48 = vadd.f32 %v1941_v26, %v16518_v4 }
 0x12b   :  { %v1840_v31 = vpop.f32.mrf.mxu1  ;;  %v17012_v58 = vpop.f32.mrf.mxu0 }
 0x12c   :  { %v1944_v18 = vmax.f32 %v1932_v12, %v1938_v0  ;;  %6499 = vrot.lane.b32.xlu1 %v17009_v24, %s15454_s13  ;;  %6213 = vrot.lane.b32.xlu0 %v16991_v10, %s15453_s19 }
 0x12d   :  { %v1920_v2 = vpop.f32.mrf.mxu1  ;;  %13906 = vmatmul.mubr.msk.bf16.vlgmr.msra.gmra.mxu1 %vm174_vm2, %v16626_v8  ;;  %v17019_v13 = vpop.f32.mrf.mxu0  ;;  %v17031_v9 = vld [vmem:[#allocation2 + $0x38] ss:$12 sps:$4 sm:$0xff]   ;;  %v1931_v8 = vmax.f32 %v16955_v42, %v16920_v21  ;;  %v1953_v21 = vmax.f32 %v17025_v48, 0.0 }
 0x12e   :  { %v1936_v36 = vmax.f32 %v1836_v61, %v1920_v2  ;;  %6101 = vmatprep.mubr.bf16.mxu1 %v20740_v1  ;;  %v1950_v42 = vadd.f32 %v1944_v18, %v16563_v37  ;;  %v15181_v56 = vld [vmem:[#allocation2 + $0x38] ss:$12 sps:$4 sm:$0xff]  }
 0x12f   :  { %v1922_v49 = vpop.f32.mrf.mxu1  ;;  %v17029_v25 = vpop.f32.mrf.mxu0 }
 0x130   :  { %v1942_v41 = vmax.f32 %v1930_v43, %v1936_v36  ;;  %v1937_v20 = vmax.f32 %v16971_v53, %v1922_v49  ;;  %5952 = vrot.lane.b32.xlu1 %v17031_v9, %s15453_s19  ;;  %6211 = vrot.lane.b32.xlu0 %v17009_v24, %s15453_s19  ;;  %v1956_v50 = vmax.f32 %v1950_v42, 0.0 }
 0x131   :  { %v1924_v14 = vpop.f32.mrf.mxu1  ;;  %v17038_v44 = vpop.f32.mrf.mxu0 }
 0x132   :  { %v1948_v57 = vadd.f32 %v1942_v41, %v16518_v4  ;;  %v1943_v22 = vmax.f32 %v1931_v8, %v1937_v20  ;;  %v1939_v19 = vmax.f32 %v1840_v31, %v1924_v14 }
 0x133   :  { %v1926_v27 = vpop.f32.mrf.mxu1  ;;  %v17049_v53 = vpop.f32.mrf.mxu0 }
 0x134   :  { %v1954_v54 = vmax.f32 %v1948_v57, 0.0  ;;  %v1949_v45 = vadd.f32 %v1943_v22, %v16518_v4  ;;  %v1945_v23 = vmax.f32 %v1933_v35, %v1939_v19  ;;  %v1940_v30 = vmax.f32 %v16986_v7, %v1926_v27  ;;  %6215 = vrot.lane.b32.xlu1 %v15181_v56, %s15453_s19  ;;  %6393 = vrot.lane.b32.xlu0 %v16991_v10, %s15454_s13 }
 0x135   :  { %v17055_v38 = vpop.f32.mrf.mxu1  ;;  %v17057_v46 = vpop.f32.mrf.mxu0  ;;  %v2411_v57 = vmax.f32 %v17005_v55, %v17029_v25  ;;  %v2414_v25 = vmax.f32 %v17019_v13, %v17049_v53 }
 0x136   :  { %v14365_v60 = vpack.c.bf16 %v1954_v54, %v1953_v21  ;;  %v1955_v17 = vmax.f32 %v1949_v45, 0.0  ;;  %v1951_v39 = vadd.f32 %v1945_v23, %v16563_v37  ;;  %v1946_v62 = vmax.f32 %v1934_v47, %v1940_v30 }
 0x137   :  { %v2231_v63 = vpop.f32.mrf.mxu1  ;;  %v2358_v33 = vpop.f32.mrf.mxu0 }
 0x138   :  { %1979 = vst [vmem:[#allocation2 + $0x48] sm:$0xff] %v14365_v60  ;;  %v14366_v3 = vpack.c.bf16 %v1955_v17, %v1955_v17  ;;  %v1957_v7 = vmax.f32 %v1951_v39, 0.0  ;;  %v1952_v16 = vadd.f32 %v1946_v62, %v16563_v37  ;;  %6395 = vrot.lane.b32.xlu1 %v17031_v9, %s15454_s13  ;;  %6391 = vrot.lane.b32.xlu0 %v17009_v24, %s15454_s13 }
 0x139   :  { %v17064_v52 = vpop.f32.mrf.mxu1  ;;  %v2360_v11 = vpop.f32.mrf.mxu0  ;;  %v2410_v43 = vmax.f32 %v17000_v29, %v2231_v63  ;;  %v17089_v29 = vpack.c.bf16 %v1956_v50, %v1953_v21 }
 0x13a   :  { %1980 = vst [vmem:[#allocation2 + $0x50] sm:$0xf] %v14366_v3  ;;  %v14367_v5 = vpack.c.bf16 %v1957_v7, %v1956_v50  ;;  %v1958_v15 = vmax.f32 %v1952_v16, 0.0  ;;  %v17073_v2 = vpack.c.bf16 %v1957_v7, %v1954_v54  ;;  %v2415_v60 = vmax.f32 %v17064_v52, %v17057_v46 }
 0x13b   :  { %v2235_v6 = vpop.f32.mrf.mxu1  ;;  %v2362_v61 = vpop.f32.mrf.mxu0 }
 0x13c   :  { %1981 = vst [vmem:[#allocation2 + $0x54] sm:$0xff] %v14367_v5  ;;  %v14368_v28 = vpack.c.bf16 %v1958_v15, %v1958_v15  ;;  %6503 = vrot.lane.b32.xlu1 %v15181_v56, %s15454_s13  ;;  %6501 = vrot.lane.b32.xlu0 %v16991_v10, %s15454_s13  ;;  %v2413_v20 = vmax.f32 %v17012_v58, %v2235_v6 }
 0x13d   :  { %v2315_v51 = vpop.f32.mrf.mxu1  ;;  %v2364_v26 = vpop.f32.mrf.mxu0  ;;  %v2412_v58 = vmax.f32 %v17055_v38, %v17038_v44 }
 0x13e   :  { %1982 = vst [vmem:[#allocation2 + $0x5c] sm:$0xf] %v14368_v28  ;;  %v2416_v0 = vmax.f32 %v2315_v51, %v2360_v11 }
 0x13f   :  { %v2317_v31 = vpop.f32.mrf.mxu1  ;;  %v17071_v12 = vpop.f32.mrf.mxu0 }
 0x140   :  { %v2422_v18 = vmax.f32 %v2410_v43, %v2416_v0  ;;  %5956 = vrot.lane.b32.xlu1 %v17073_v2, %s15453_s19  ;;  %6399 = vrot.lane.b32.xlu0 %v17073_v2, %s15454_s13 }
 0x141   :  { %v2319_v36 = vpop.f32.mrf.mxu1  ;;  %v17078_v48 = vpop.f32.mrf.mxu0 }
 0x142   :  { %v2419_v49 = vmax.f32 %v2319_v36, %v2364_v26  ;;  %v2428_v19 = vadd.f32 %v2422_v18, %v16518_v4 }
 0x143   :  { %v2321_v8 = vpop.f32.mrf.mxu1  ;;  %v17082_v41 = vpop.f32.mrf.mxu0 }
 0x144   :  { %v2425_v47 = vmax.f32 %v2413_v20, %v2419_v49  ;;  %5954 = vrot.lane.b32.xlu1 %v17089_v29, %s15453_s19  ;;  %6397 = vrot.lane.b32.xlu0 %v17089_v29, %s15454_s13  ;;  %v2434_v17 = vmax.f32 %v2428_v19, 0.0 }
 0x145   :  { %v2401_v14 = vpop.f32.mrf.mxu1  ;;  %v17087_v35 = vpop.f32.mrf.mxu0  ;;  %v17122_v52 = vld [vmem:[#allocation2 + $0x50] ss:$12 sps:$4 sm:$0xff]  }
 0x146   :  { %v2417_v22 = vmax.f32 %v2317_v31, %v2401_v14  ;;  %v2431_v44 = vadd.f32 %v2425_v47, %v16563_v37  ;;  %v17133_v43 = vld [vmem:[#allocation2 + $0x50] ss:$12 sps:$4 sm:$0xff]  }
 0x147   :  { %v2403_v42 = vpop.f32.mrf.mxu1  ;;  %v17096_v27 = vpop.f32.mrf.mxu0 }
 0x148   :  { %v2423_v54 = vmax.f32 %v2411_v57, %v2417_v22  ;;  %v2418_v45 = vmax.f32 %v2358_v33, %v2403_v42  ;;  %6219 = vrot.lane.b32.xlu1 %v17073_v2, %s15453_s19  ;;  %6507 = vrot.lane.b32.xlu0 %v17073_v2, %s15454_s13  ;;  %v2437_v15 = vmax.f32 %v2431_v44, 0.0 }
 0x149   :  { %v2405_v21 = vpop.f32.mrf.mxu1  ;;  %v17102_v55 = vpop.f32.mrf.mxu0 }
 0x14a   :  { %v2429_v23 = vadd.f32 %v2423_v54, %v16518_v4  ;;  %v2424_v30 = vmax.f32 %v2412_v58, %v2418_v45  ;;  %v2420_v56 = vmax.f32 %v2321_v8, %v2405_v21  ;;  %v17143_v20 = vpack.c.bf16 %v2437_v15, %v2434_v17 }
 0x14b   :  { %v2407_v38 = vpop.f32.mrf.mxu1  ;;  %v17112_v39 = vpop.f32.mrf.mxu0 }
 0x14c   :  { %v2435_v62 = vmax.f32 %v2429_v23, 0.0  ;;  %v2430_v63 = vadd.f32 %v2424_v30, %v16518_v4  ;;  %v2426_v13 = vmax.f32 %v2414_v25, %v2420_v56  ;;  %v2421_v53 = vmax.f32 %v2362_v61, %v2407_v38  ;;  %6217 = vrot.lane.b32.xlu1 %v17089_v29, %s15453_s19  ;;  %5958 = vrot.lane.b32.xlu0 %v17122_v52, %s15453_s19 }
 0x14d   :  { %v17117_v33 = vpop.f32.mrf.mxu1  ;;  %v17119_v46 = vpop.f32.mrf.mxu0 }
 0x14e   :  { %v14369_v50 = vpack.c.bf16 %v2435_v62, %v2434_v17  ;;  %v2436_v3 = vmax.f32 %v2430_v63, 0.0  ;;  %v2432_v7 = vadd.f32 %v2426_v13, %v16563_v37  ;;  %v2427_v16 = vmax.f32 %v2415_v60, %v2421_v53 }
 0x14f   :  { %v2712_v11 = vpop.f32.mrf.mxu1  ;;  %v17126_v5 = vpop.f32.mrf.mxu0  ;;  %v2892_v60 = vmax.f32 %v17078_v48, %v17096_v27 }
 0x150   :  { %2460 = vst [vmem:[#allocation2 + $0x60] sm:$0xff] %v14369_v50  ;;  %v14370_v6 = vpack.c.bf16 %v2436_v3, %v2436_v3  ;;  %v2438_v61 = vmax.f32 %v2432_v7, 0.0  ;;  %v2433_v28 = vadd.f32 %v2427_v16, %v16563_v37  ;;  %6505 = vrot.lane.b32.xlu1 %v17089_v29, %s15454_s13  ;;  %6221 = vrot.lane.b32.xlu0 %v17133_v43, %s15453_s19 }
 0x151   :  { %v17131_v51 = vpop.f32.mrf.mxu1  ;;  %v2841_v26 = vpop.f32.mrf.mxu0  ;;  %v2891_v42 = vmax.f32 %v17071_v12, %v2712_v11  ;;  %v2895_v50 = vmax.f32 %v17087_v35, %v17112_v39 }
 0x152   :  { %2461 = vst [vmem:[#allocation2 + $0x68] sm:$0xf] %v14370_v6  ;;  %v14371_v0 = vpack.c.bf16 %v2438_v61, %v2437_v15  ;;  %v2439_v31 = vmax.f32 %v2433_v28, 0.0  ;;  %v17141_v8 = vpack.c.bf16 %v2438_v61, %v2435_v62 }
 0x153   :  { %v2716_v36 = vpop.f32.mrf.mxu1  ;;  %v17137_v18 = vpop.f32.mrf.mxu0 }
 0x154   :  { %2462 = vst [vmem:[#allocation2 + $0x6c] sm:$0xff] %v14371_v0  ;;  %v14372_v49 = vpack.c.bf16 %v2439_v31, %v2439_v31  ;;  %6075 = vmatprep.subr.bf16.mxu1 %v17141_v8  ;;  %6401 = vrot.lane.b32.xlu1 %v17122_v52, %s15454_s13  ;;  %v2894_v12 = vmax.f32 %v17082_v41, %v2716_v36 }
 0x155   :  { %v2796_v14 = vpop.f32.mrf.mxu1  ;;  %v2845_v57 = vpop.f32.mrf.mxu0  ;;  %6076 = vmatpush1.bf16.msra.mxu1 %v17143_v20  ;;  %5960 = vrot.lane.b32.xlu0 %v17143_v20, %s15453_s19  ;;  %v2893_v41 = vmax.f32 %v17117_v33, %v17102_v55  ;;  %v2896_v55 = vmax.f32 %v17131_v51, %v17119_v46 }
 0x156   :  { %2463 = vst [vmem:[#allocation2 + $0x74] sm:$0xf] %v14372_v49  ;;  %v2897_v22 = vmax.f32 %v2796_v14, %v2841_v26  ;;  %6077 = vmatprep.subr.bf16.mxu1 %v17073_v2 }
 0x157   :  { %v2798_v19 = vpop.f32.mrf.mxu1  ;;  %v17148_v47 = vpop.f32.mrf.mxu0 }
 0x158   :  { %v2903_v45 = vmax.f32 %v2891_v42, %v2897_v22  ;;  %6509 = vrot.lane.b32.xlu1 %v17133_v43, %s15454_s13 }
 0x159   :  { %v2800_v58 = vpop.f32.mrf.mxu1  ;;  %v17155_v54 = vpop.f32.mrf.mxu0  ;;  %6078 = vmatpush1.bf16.msra.mxu1 %v17089_v29  ;;  %6225 = vrot.lane.b32.xlu0 %v17141_v8, %s15453_s19 }
 0x15a   :  { %v2900_v21 = vmax.f32 %v2800_v58, %v2845_v57  ;;  %6079 = vmatprep.subr.bf16.mxu1 %v16991_v10  ;;  %v17171_v44 = vadd.f32 %v2903_v45, %v16518_v4 }
 0x15b   :  { %v2802_v25 = vpop.f32.mrf.mxu1  ;;  %v17159_v23 = vpop.f32.mrf.mxu0 }
 0x15c   :  { %v2906_v38 = vmax.f32 %v2894_v12, %v2900_v21  ;;  %5962 = vrot.lane.b32.xlu1 %v17141_v8, %s15453_s19  ;;  %v2915_v33 = vmax.f32 %v17171_v44, 0.0 }
 0x15d   :  { %v2882_v30 = vpop.f32.mrf.mxu1  ;;  %v17166_v56 = vpop.f32.mrf.mxu0  ;;  %6080 = vmatpush1.bf16.msra.mxu1 %v17009_v24  ;;  %6223 = vrot.lane.b32.xlu0 %v17143_v20, %s15453_s19  ;;  %v17207_v51 = vld [vmem:[#allocation2 + $0x68] ss:$12 sps:$4 sm:$0xff]  }
 0x15e   :  { %v2898_v17 = vmax.f32 %v2798_v19, %v2882_v30  ;;  %6081 = vmatprep.subr.bf16.mxu1 %v16837_v40  ;;  %v2912_v11 = vadd.f32 %v2906_v38, %v16563_v37  ;;  %v17225_v21 = vld [vmem:[#allocation2 + $0x68] ss:$12 sps:$4 sm:$0xff]  }
 0x15f   :  { %v2884_v62 = vpop.f32.mrf.mxu1  ;;  %v17175_v63 = vpop.f32.mrf.mxu0 }
 0x160   :  { %v2904_v13 = vmax.f32 %v2892_v60, %v2898_v17  ;;  %v2899_v53 = vmax.f32 %v17126_v5, %v2884_v62  ;;  %6511 = vrot.lane.b32.xlu1 %v17143_v20, %s15454_s13  ;;  %v2918_v57 = vmax.f32 %v2912_v11, 0.0 }
 0x161   :  { %v2886_v48 = vpop.f32.mrf.mxu1  ;;  %v17184_v27 = vpop.f32.mrf.mxu0  ;;  %6082 = vmatpush1.bf16.msra.mxu1 %v16879_v34  ;;  %6405 = vrot.lane.b32.xlu0 %v17141_v8, %s15454_s13 }
 0x162   :  { %v2910_v3 = vadd.f32 %v2904_v13, %v16518_v4  ;;  %v2905_v7 = vmax.f32 %v2893_v41, %v2899_v53  ;;  %v2901_v16 = vmax.f32 %v2802_v25, %v2886_v48  ;;  %6083 = vmatprep.subr.bf16.mxu1 %v16667_v32  ;;  %v17241_v38 = vpack.c.bf16 %v2918_v57, %v2915_v33 }
 0x163   :  { %v2888_v5 = vpop.f32.mrf.mxu1  ;;  %v17195_v15 = vpop.f32.mrf.mxu0 }
 0x164   :  { %v2916_v35 = vmax.f32 %v2910_v3, 0.0  ;;  %v2911_v39 = vadd.f32 %v2905_v7, %v16518_v4  ;;  %v2907_v6 = vmax.f32 %v2895_v50, %v2901_v16  ;;  %v2902_v61 = vmax.f32 %v17137_v18, %v2888_v5  ;;  %v17213_v18 = vld [vmem:[%s20733_s3] sm:$0xff]   ;;  %5964 = vrot.lane.b32.xlu1 %v17207_v51, %s15453_s19  ;;  %20841 = vst [vmem:[#allocation3_spill] sm:$0xff] %v17241_v38 }
 0x165   :  { %v17203_v46 = vpop.f32.mrf.mxu1  ;;  %v17205_v28 = vpop.f32.mrf.mxu0  ;;  %6084 = vmatpush1.bf16.msra.mxu1 %v16696_v59  ;;  %6403 = vrot.lane.b32.xlu0 %v17143_v20, %s15454_s13 }
 0x166   :  { %v14373_v26 = vpack.c.bf16 %v2916_v35, %v2915_v33  ;;  %v2917_v0 = vmax.f32 %v2911_v39, 0.0  ;;  %v2913_v31 = vadd.f32 %v2907_v6, %v16563_v37  ;;  %v2908_v36 = vmax.f32 %v2896_v55, %v2902_v61  ;;  %v17237_v44 = vpop.permute.xlu0 %5938 }
 0x167   :  { %v3193_v49 = vpop.f32.mrf.mxu1  ;;  %v17217_v14 = vpop.f32.mrf.mxu0 }
 0x168   :  { %2941 = vst [vmem:[#allocation2 + $0x78] sm:$0xff] %v14373_v26  ;;  %v14374_v22 = vpack.c.bf16 %v2917_v0, %v2917_v0  ;;  %v2919_v19 = vmax.f32 %v2913_v31, 0.0  ;;  %v2914_v42 = vadd.f32 %v2908_v36, %v16563_v37  ;;  %13935 = vmatmul.mubr.msk.bf16.vlgmr.msra.gmra.mxu1 %vm5987_vm3, %v17213_v18  ;;  %6227 = vrot.lane.b32.xlu1 %v17225_v21, %s15453_s19 }
 0x169   :  { %v17223_v58 = vpop.f32.mrf.mxu1  ;;  %v3322_v45 = vpop.f32.mrf.mxu0  ;;  %6111 = vmatprep.mubr.bf16.mxu1 %v20740_v1  ;;  %6513 = vrot.lane.b32.xlu0 %v17141_v8, %s15454_s13  ;;  %v3372_v53 = vmax.f32 %v17148_v47, %v3193_v49 }
 0x16a   :  { %2942 = vst [vmem:[#allocation2 + $0x80] sm:$0xf] %v14374_v22  ;;  %v17227_v25 = vpack.c.bf16 %v2919_v19, %v2918_v57  ;;  %v2920_v12 = vmax.f32 %v2914_v42, 0.0  ;;  %v17243_v62 = vpack.c.bf16 %v2919_v19, %v2916_v35  ;;  %v3373_v35 = vmax.f32 %v17155_v54, %v17175_v63 }
 0x16b   :  { %v3197_v30 = vpop.f32.mrf.mxu1  ;;  %v17233_v60 = vpop.f32.mrf.mxu0  ;;  %v3376_v54 = vmax.f32 %v17166_v56, %v17195_v15  ;;  %v3377_v42 = vmax.f32 %v17223_v58, %v17205_v28 }
 0x16c   :  { %2943 = vst [vmem:[#allocation2 + $0x84] sm:$0xff] %v17227_v25  ;;  %v14376_v17 = vpack.c.bf16 %v2920_v12, %v2920_v12  ;;  %20842 = vst [vmem:[#allocation4_spill] sm:$0xff] %v17243_v62  ;;  %6322 = vmatprep.subr.bf16.mxu1 %v17243_v62  ;;  %6407 = vrot.lane.b32.xlu1 %v17207_v51, %s15454_s13  ;;  %v17255_v16 = vpop.permute.xlu0 %5936  ;;  %v3375_v47 = vmax.f32 %v17159_v23, %v3197_v30 }
 0x16d   :  { %v3277_v41 = vpop.f32.mrf.mxu1  ;;  %v3326_v13 = vpop.f32.mrf.mxu0  ;;  %6323 = vmatpush1.bf16.msra.mxu1 %v17241_v38  ;;  %6519 = vrot.lane.b32.xlu0 %v17243_v62, %s15454_s13  ;;  %v3374_v23 = vmax.f32 %v17203_v46, %v17184_v27 }
 0x16e   :  { %2944 = vst [vmem:[#allocation2 + $0x8c] sm:$0xf] %v14376_v17  ;;  %v3378_v48 = vmax.f32 %v3277_v41, %v3322_v45  ;;  %6324 = vmatprep.subr.bf16.mxu1 %v17141_v8 }
 0x16f   :  { %v3279_v50 = vpop.f32.mrf.mxu1  ;;  %v17249_v3 = vpop.f32.mrf.mxu0 }
 0x170   :  { %v3384_v33 = vmax.f32 %v3372_v53, %v3378_v48  ;;  %6515 = vrot.lane.b32.xlu1 %v17225_v21, %s15454_s13 }
 0x171   :  { %v3281_v7 = vpop.f32.mrf.mxu1  ;;  %v17257_v55 = vpop.f32.mrf.mxu0  ;;  %6325 = vmatpush1.bf16.msra.mxu1 %v17143_v20 }
 0x172   :  { %v3381_v11 = vmax.f32 %v3281_v7, %v3326_v13  ;;  %6326 = vmatprep.subr.bf16.mxu1 %v17073_v2  ;;  %v3390_v31 = vadd.f32 %v3384_v33, %v16518_v4  ;;  %v17282_v27 = vpop.permute.xlu0 %6381  ;;  %v17287_v22 = vpop.permute.xlu1 %5940 }
 0x173   :  { %v3283_v5 = vpop.f32.mrf.mxu1  ;;  %v17265_v39 = vpop.f32.mrf.mxu0  ;;  %20843 = vst [vmem:[#allocation5_spill] sm:$0xff] %v17282_v27 }
 0x174   :  { %v3387_v36 = vmax.f32 %v3375_v47, %v3381_v11  ;;  %6231 = vrot.lane.b32.xlu1 %v17243_v62, %s15453_s19 }
 0x175   :  { %v3363_v6 = vpop.f32.mrf.mxu1  ;;  %v17268_v61 = vld [vmem:[#allocation2 + $0x80] ss:$12 sps:$4 sm:$0xff]   ;;  %v17272_v0 = vpop.f32.mrf.mxu0  ;;  %6327 = vmatpush1.bf16.msra.mxu1 %v17089_v29 }
 0x176   :  { %v3379_v26 = vmax.f32 %v3279_v50, %v3363_v6  ;;  %6233 = vrot.lane.b32.xlu0 %v17268_v61, %s15453_s19  ;;  %6328 = vmatprep.subr.bf16.mxu1 %v16991_v10  ;;  %v3393_v30 = vadd.f32 %v3387_v36, %v16563_v37  ;;  %v17309_v11 = vpop.permute.xlu0 %6379 }
 0x177   :  { %v3365_v49 = vpop.f32.mrf.mxu1  ;;  %v17284_v46 = vpop.f32.mrf.mxu0  ;;  %20844 = vst [vmem:[#allocation6_spill] sm:$0xff] %v17309_v11 }
 0x178   :  { %v3385_v63 = vmax.f32 %v3373_v35, %v3379_v26  ;;  %v3380_v57 = vmax.f32 %v17217_v14, %v3365_v49  ;;  %v3396_v14 = vmax.f32 %v3390_v31, 0.0  ;;  %6229 = vrot.lane.b32.xlu1 %v17241_v38, %s15453_s19  ;;  %v17313_v35 = vpop.permute.xlu1 %6383  ;;  %v3399_v6 = vmax.f32 %v3393_v30, 0.0 }
 0x179   :  { %v3367_v19 = vpop.f32.mrf.mxu1  ;;  %v17293_v12 = vpop.f32.mrf.mxu0  ;;  %6329 = vmatpush1.bf16.msra.mxu1 %v17009_v24  ;;  %20845 = vst [vmem:[#allocation7_spill] sm:$0xff] %v17313_v35 }
 0x17a   :  { %v3391_v45 = vadd.f32 %v3385_v63, %v16518_v4  ;;  %v3386_v56 = vmax.f32 %v3374_v23, %v3380_v57  ;;  %v3382_v15 = vmax.f32 %v3283_v5, %v3367_v19  ;;  %6638 = vrot.lane.b32.xlu0 %v17141_v8, %s15455_s11  ;;  %6330 = vmatprep.subr.bf16.mxu1 %v16837_v40 }
 0x17b   :  { %v3369_v17 = vpop.f32.mrf.mxu1  ;;  %v17302_v53 = vpop.f32.mrf.mxu0 }
 0x17c   :  { %v3397_v41 = vmax.f32 %v3391_v45, 0.0  ;;  %v3392_v28 = vadd.f32 %v3386_v56, %v16518_v4  ;;  %v3388_v58 = vmax.f32 %v3376_v54, %v3382_v15  ;;  %v3383_v13 = vmax.f32 %v17233_v60, %v3369_v17  ;;  %6517 = vrot.lane.b32.xlu1 %v17241_v38, %s15454_s13  ;;  %v17326_v54 = vld [vmem:[%s20733_s3 + $0x8] ss:$0 sps:$4 sm:$0x33]  }
 0x17d   :  { %v17305_v48 = vpop.f32.mrf.mxu1  ;;  %v17311_v5 = vpop.f32.mrf.mxu0  ;;  %6331 = vmatpush1.bf16.msra.mxu1 %v16879_v34 }
 0x17e   :  { %v14377_v50 = vpack.c.bf16 %v3397_v41, %v3396_v14  ;;  %v3398_v7 = vmax.f32 %v3392_v28, 0.0  ;;  %v3394_v47 = vadd.f32 %v3388_v58, %v16563_v37  ;;  %v3389_v33 = vmax.f32 %v3377_v42, %v3383_v13  ;;  %6752 = vrot.lane.b32.xlu0 %v17243_v62, %s15455_s11  ;;  %v17328_v42 = vpop.permute.xlu0 %6387  ;;  %v17334_v56 = vpop.permute.xlu1 %5944  ;;  %13936 = vmatmul.mubr.msk.bf16.gmra.mxu1 %vm5987_vm3, %v17326_v54 }
 0x17f   :  { %v3674_v60 = vpop.f32.mrf.mxu1  ;;  %v3801_v36 = vpop.f32.mrf.mxu0  ;;  %20846 = vst [vmem:[#allocation8_spill] sm:$0xff] %v17328_v42  ;;  %6348 = vmatprep.mubr.bf16.mxu1 %v20740_v1 }
 0x180   :  { %3422 = vst [vmem:[#allocation2 + $0x90] sm:$0xff] %v14377_v50  ;;  %v14378_v23 = vpack.c.bf16 %v3398_v7, %v3398_v7  ;;  %v3400_v26 = vmax.f32 %v3394_v47, 0.0  ;;  %v3395_v31 = vadd.f32 %v3389_v33, %v16563_v37  ;;  %6640 = vrot.lane.b32.xlu1 %v17207_v51, %s15455_s11  ;;  %v3853_v28 = vmax.f32 %v17249_v3, %v3674_v60 }
 0x181   :  { %v17321_v49 = vpop.f32.mrf.mxu1  ;;  %v3803_v19 = vpop.f32.mrf.mxu0 }
 0x182   :  { %3423 = vst [vmem:[#allocation2 + $0x98] sm:$0xf] %v14378_v23  ;;  %v14379_v63 = vpack.c.bf16 %v3400_v26, %v3399_v6  ;;  %v3401_v57 = vmax.f32 %v3395_v31, 0.0  ;;  %6636 = vrot.lane.b32.xlu0 %v17143_v20, %s15455_s11  ;;  %v17341_v41 = vpop.permute.xlu0 %6385  ;;  %v3854_v26 = vmax.f32 %v17257_v55, %v17284_v46 }
 0x183   :  { %v3678_v45 = vpop.f32.mrf.mxu1  ;;  %v17336_v14 = vpop.f32.mrf.mxu0  ;;  %20847 = vst [vmem:[#allocation9_spill] sm:$0xff] %v17341_v41 }
 0x184   :  { %3424 = vst [vmem:[#allocation2 + $0x9c] sm:$0xff] %v14379_v63  ;;  %v14380_v15 = vpack.c.bf16 %v3401_v57, %v3401_v57  ;;  %6750 = vrot.lane.b32.xlu1 %v17241_v38, %s15455_s11  ;;  %v3856_v33 = vmax.f32 %v17265_v39, %v3678_v45 }
 0x185   :  { %v3758_v30 = vpop.f32.mrf.mxu1  ;;  %v3807_v17 = vpop.f32.mrf.mxu0 }
 0x186   :  { %3425 = vst [vmem:[#allocation2 + $0xa4] sm:$0xf] %v14380_v15  ;;  %v3859_v58 = vmax.f32 %v3758_v30, %v3803_v19  ;;  %6632 = vrot.lane.b32.xlu0 %v17073_v2, %s15455_s11  ;;  %v17350_v50 = vpop.permute.xlu1 %5942  ;;  %v17359_v60 = vpop.permute.xlu0 %6495  ;;  %13956 = vmatmul.mubr.msk.bf16.vlgmr.msra.gmra.mxu1 %vm5987_vm3, %v17213_v18  ;;  %v3857_v18 = vmax.f32 %v17272_v0, %v17302_v53 }
 0x187   :  { %v3760_v51 = vpop.f32.mrf.mxu1  ;;  %v17348_v13 = vpop.f32.mrf.mxu0  ;;  %20848 = vst [vmem:[#allocation10_spill] sm:$0xff] %v17359_v60  ;;  %6358 = vmatprep.mubr.bf16.mxu1 %v20740_v1 }
 0x188   :  { %v3865_v6 = vmax.f32 %v3853_v28, %v3859_v58  ;;  %6634 = vrot.lane.b32.xlu1 %v17122_v52, %s15455_s11  ;;  %v3858_v28 = vmax.f32 %v17321_v49, %v17311_v5 }
 0x189   :  { %v3762_v7 = vpop.f32.mrf.mxu1  ;;  %v17352_v47 = vpop.f32.mrf.mxu0 }
 0x18a   :  { %v3862_v23 = vmax.f32 %v3762_v7, %v3807_v17  ;;  %6746 = vrot.lane.b32.xlu0 %v17141_v8, %s15455_s11  ;;  %v17365_v63 = vpop.permute.xlu1 %6207  ;;  %v3855_v8 = vmax.f32 %v17305_v48, %v17293_v12  ;;  %v3871_v19 = vadd.f32 %v3865_v6, %v16518_v4 }
 0x18b   :  { %v3764_v3 = vpop.f32.mrf.mxu1  ;;  %v17363_v31 = vpop.f32.mrf.mxu0  ;;  %20849 = vst [vmem:[#allocation11_spill] sm:$0xff] %v17365_v63 }
 0x18c   :  { %v3868_v45 = vmax.f32 %v3856_v33, %v3862_v23  ;;  %6748 = vrot.lane.b32.xlu1 %v17225_v21, %s15455_s11  ;;  %v3877_v33 = vmax.f32 %v3871_v19, 0.0 }
 0x18d   :  { %v3844_v39 = vpop.f32.mrf.mxu1  ;;  %v17372_v52 = vpop.f32.mrf.mxu0 }
 0x18e   :  { %v3860_v57 = vmax.f32 %v3760_v51, %v3844_v39  ;;  %6630 = vrot.lane.b32.xlu0 %v17089_v29, %s15455_s11  ;;  %v17383_v12 = vpop.permute.xlu0 %5946  ;;  %v17385_v17 = vpop.permute.xlu1 %6205  ;;  %v3874_v0 = vadd.f32 %v3868_v45, %v16563_v37  ;;  %13957 = vmatmul.mubr.msk.bf16.gmra.mxu1 %vm5987_vm3, %v17326_v54 }
 0x18f   :  { %v3846_v55 = vpop.f32.mrf.mxu1  ;;  %v17381_v30 = vpop.f32.mrf.mxu0  ;;  %20850 = vst [vmem:[#allocation12_spill] sm:$0xff] %v17385_v17  ;;  %6575 = vmatprep.mubr.bf16.mxu1 %v20740_v1 }
 0x190   :  { %v3866_v46 = vmax.f32 %v3854_v26, %v3860_v57  ;;  %v3861_v15 = vmax.f32 %v3801_v36, %v3846_v55  ;;  %6744 = vrot.lane.b32.xlu1 %v17143_v20, %s15455_s11  ;;  %v3880_v54 = vmax.f32 %v3874_v0, 0.0 }
 0x191   :  { %v3848_v48 = vpop.f32.mrf.mxu1  ;;  %v17390_v21 = vpop.f32.mrf.mxu0 }
 0x192   :  { %v3872_v58 = vadd.f32 %v3866_v46, %v16518_v4  ;;  %v3867_v51 = vmax.f32 %v3855_v8, %v3861_v15  ;;  %v3863_v7 = vmax.f32 %v3764_v3, %v3848_v48  ;;  %6626 = vrot.lane.b32.xlu0 %v16991_v10, %s15455_s11  ;;  %v17405_v26 = vpop.permute.xlu1 %6493  ;;  %v17409_v19 = vpop.permute.xlu0 %6209 }
 0x193   :  { %v3850_v53 = vpop.f32.mrf.mxu1  ;;  %v17399_v23 = vpop.f32.mrf.mxu0  ;;  %20851 = vst [vmem:[#allocation13_spill] sm:$0xff] %v17405_v26  ;;  %20852 = vst [vmem:[#allocation14_spill] sm:$0xff] %v17409_v19 }
 0x194   :  { %v3878_v36 = vmax.f32 %v3872_v58, 0.0  ;;  %v3873_v6 = vadd.f32 %v3867_v51, %v16518_v4  ;;  %v3869_v5 = vmax.f32 %v3857_v18, %v3863_v7  ;;  %v3864_v49 = vmax.f32 %v17336_v14, %v3850_v53  ;;  %6521 = vrot.lane.b32.xlu1 %v17268_v61, %s15454_s13 }
 0x195   :  { %v17403_v3 = vpop.f32.mrf.mxu1  ;;  %v17411_v45 = vpop.f32.mrf.mxu0 }
 0x196   :  { %v14381_v39 = vpack.c.bf16 %v3878_v36, %v3877_v33  ;;  %v3879_v8 = vmax.f32 %v3873_v6, 0.0  ;;  %v3875_v20 = vadd.f32 %v3869_v5, %v16563_v37  ;;  %v3870_v57 = vmax.f32 %v3858_v28, %v3864_v49  ;;  %6740 = vrot.lane.b32.xlu0 %v17073_v2, %s15455_s11  ;;  %v17420_v28 = vpop.permute.xlu1 %6389  ;;  %v17422_v33 = vpop.permute.xlu0 %5950 }
 0x197   :  { %v4155_v14 = vpop.f32.mrf.mxu1  ;;  %v4282_v15 = vpop.f32.mrf.mxu0  ;;  %20853 = vst [vmem:[#allocation15_spill] sm:$0xff] %v17420_v28 }
 0x198   :  { %3903 = vst [vmem:[#allocation2 + $0xa8] sm:$0xff] %v14381_v39  ;;  %v14382_v55 = vpack.c.bf16 %v3879_v8, %v3879_v8  ;;  %v3881_v18 = vmax.f32 %v3875_v20, 0.0  ;;  %v3876_v46 = vadd.f32 %v3870_v57, %v16563_v37  ;;  %6628 = vrot.lane.b32.xlu1 %v17031_v9, %s15455_s11  ;;  %v4334_v39 = vmax.f32 %v17348_v13, %v4155_v14 }
 0x199   :  { %v17418_v48 = vpop.f32.mrf.mxu1  ;;  %v4284_v7 = vpop.f32.mrf.mxu0 }
 0x19a   :  { %3904 = vst [vmem:[#allocation2 + $0xb0] sm:$0xf] %v14382_v55  ;;  %v14383_v58 = vpack.c.bf16 %v3881_v18, %v3880_v54  ;;  %v3882_v51 = vmax.f32 %v3876_v46, 0.0  ;;  %6624 = vrot.lane.b32.xlu0 %v17009_v24, %s15455_s11  ;;  %v17430_v6 = vpop.permute.xlu1 %6497  ;;  %v17432_v49 = vpop.permute.xlu0 %5948 }
 0x19b   :  { %v4159_v2 = vpop.f32.mrf.mxu1  ;;  %v17428_v53 = vpop.f32.mrf.mxu0  ;;  %20854 = vst [vmem:[#allocation16_spill] sm:$0xff] %v17430_v6 }
 0x19c   :  { %3905 = vst [vmem:[#allocation2 + $0xb4] sm:$0xff] %v14383_v58  ;;  %v14384_v0 = vpack.c.bf16 %v3882_v51, %v3882_v51  ;;  %6742 = vrot.lane.b32.xlu1 %v17133_v43, %s15455_s11  ;;  %v4337_v46 = vmax.f32 %v17363_v31, %v4159_v2  ;;  %v4335_v43 = vmax.f32 %v17352_v47, %v17381_v30  ;;  %v15355_v47 = vld [vmem:[#allocation2 + $0x20] ss:$12 sps:$4 sm:$0xff]  }
 0x19d   :  { %v4239_v36 = vpop.f32.mrf.mxu1  ;;  %v4288_v5 = vpop.f32.mrf.mxu0  ;;  %v4336_v31 = vmax.f32 %v17403_v3, %v17390_v21  ;;  %v4338_v30 = vmax.f32 %v17372_v52, %v17399_v23 }
 0x19e   :  { %3906 = vst [vmem:[#allocation2 + $0xbc] sm:$0xf] %v14384_v0  ;;  %v4340_v8 = vmax.f32 %v4239_v36, %v4284_v7  ;;  %6620 = vrot.lane.b32.xlu0 %v16837_v40, %s15455_s11  ;;  %v17441_v54 = vpop.permute.xlu1 %6499  ;;  %v17445_v18 = vpop.permute.xlu0 %6213 }
 0x19f   :  { %v4241_v20 = vpop.f32.mrf.mxu1  ;;  %v17439_v9 = vpop.f32.mrf.mxu0  ;;  %20855 = vst [vmem:[#allocation17_spill] sm:$0xff] %v17441_v54 }
 0x1a0   :  { %v4346_v13 = vmax.f32 %v4334_v39, %v4340_v8  ;;  %6738 = vrot.lane.b32.xlu1 %v17089_v29, %s15455_s11 }
 0x1a1   :  { %v4243_v57 = vpop.f32.mrf.mxu1  ;;  %v17443_v55 = vpop.f32.mrf.mxu0 }
 0x1a2   :  { %v4343_v14 = vmax.f32 %v4243_v57, %v4288_v5  ;;  %6734 = vrot.lane.b32.xlu0 %v16991_v10, %s15455_s11  ;;  %v17456_v0 = vpop.permute.xlu1 %5952  ;;  %v17462_v5 = vpop.permute.xlu0 %6211  ;;  %v4352_v10 = vadd.f32 %v4346_v13, %v16518_v4 }
 0x1a3   :  { %v4245_v58 = vpop.f32.mrf.mxu1  ;;  %v17454_v51 = vpop.f32.mrf.mxu0 }
 0x1a4   :  { %v4349_v39 = vmax.f32 %v4337_v46, %v4343_v14  ;;  %6622 = vrot.lane.b32.xlu1 %v15355_v47, %s15455_s11  ;;  %v4339_v46 = vmax.f32 %v17418_v48, %v17411_v45  ;;  %v4358_v26 = vmax.f32 %v4352_v10, 0.0 }
 0x1a5   :  { %v4325_v7 = vpop.f32.mrf.mxu1  ;;  %v17460_v36 = vpop.f32.mrf.mxu0 }
 0x1a6   :  { %v4341_v2 = vmax.f32 %v4241_v20, %v4325_v7  ;;  %6618 = vrot.lane.b32.xlu0 %v16879_v34, %s15455_s11  ;;  %v17472_v57 = vpop.permute.xlu1 %6215  ;;  %v17479_v47 = vpop.permute.xlu0 %6393  ;;  %v4355_v52 = vadd.f32 %v4349_v39, %v16563_v37 }
 0x1a7   :  { %v4327_v29 = vpop.f32.mrf.mxu1  ;;  %v17470_v3 = vpop.f32.mrf.mxu0  ;;  %20856 = vst [vmem:[#allocation18_spill] sm:$0xff] %v17479_v47 }
 0x1a8   :  { %v4347_v8 = vmax.f32 %v4335_v43, %v4341_v2  ;;  %v4342_v21 = vmax.f32 %v4282_v15, %v4327_v29  ;;  %6754 = vrot.lane.b32.xlu1 %v17268_v61, %s15455_s11 }
 0x1a9   :  { %v4329_v20 = vpop.f32.mrf.mxu1  ;;  %v17477_v1 = vpop.f32.mrf.mxu0 }
 0x1aa   :  { %v4353_v13 = vadd.f32 %v4347_v8, %v16518_v4  ;;  %v4348_v14 = vmax.f32 %v4336_v31, %v4342_v21  ;;  %v4344_v7 = vmax.f32 %v4245_v58, %v4329_v20  ;;  %6614 = vrot.lane.b32.xlu0 %v16667_v32, %s15455_s11  ;;  %v17492_v2 = vpop.permute.xlu1 %6395  ;;  %v17497_v61 = vpop.permute.xlu0 %6391 }
 0x1ab   :  { %v4331_v23 = vpop.f32.mrf.mxu1  ;;  %v17488_v43 = vpop.f32.mrf.mxu0  ;;  %20857 = vst [vmem:[#allocation19_spill] sm:$0xff] %v17492_v2  ;;  %20858 = vst [vmem:[#allocation20_spill] sm:$0xff] %v17497_v61 }
 0x1ac   :  { %v4359_v15 = vmax.f32 %v4353_v13, 0.0  ;;  %v4354_v45 = vadd.f32 %v4348_v14, %v16518_v4  ;;  %v4350_v48 = vmax.f32 %v4338_v30, %v4344_v7  ;;  %v4345_v58 = vmax.f32 %v17428_v53, %v4331_v23  ;;  %v15356_v53 = vld [vmem:[#allocation2 + $0x38] ss:$12 sps:$4 sm:$0xff]  }
 0x1ad   :  { %v17490_v31 = vpop.f32.mrf.mxu1  ;;  %v17495_v8 = vpop.f32.mrf.mxu0  ;;  %6736 = vrot.lane.b32.xlu1 %v15356_v53, %s15455_s11  ;;  %v4361_v30 = vmax.f32 %v4355_v52, 0.0 }
 0x1ae   :  { %v14385_v10 = vpack.c.bf16 %v4359_v15, %v4358_v26  ;;  %v4360_v39 = vmax.f32 %v4354_v45, 0.0  ;;  %v4356_v29 = vadd.f32 %v4350_v48, %v16563_v37  ;;  %v4351_v32 = vmax.f32 %v4339_v46, %v4345_v58  ;;  %6728 = vrot.lane.b32.xlu0 %v16837_v40, %s15455_s11  ;;  %v17507_v7 = vpop.permute.xlu1 %6503  ;;  %v17509_v40 = vpop.permute.xlu0 %6501 }
 0x1af   :  { %v4636_v21 = vpop.f32.mrf.mxu1  ;;  %v17503_v14 = vpop.f32.mrf.mxu0  ;;  %20859 = vst [vmem:[#allocation21_spill] sm:$0xff] %v17507_v7  ;;  %20860 = vst [vmem:[#allocation22_spill] sm:$0xff] %v17509_v40 }
 0x1b0   :  { %4384 = vst [vmem:[#allocation2 + $0xc0] sm:$0xff] %v14385_v10  ;;  %v14386_v20 = vpack.c.bf16 %v4360_v39, %v4360_v39  ;;  %v4362_v13 = vmax.f32 %v4356_v29, 0.0  ;;  %v4357_v26 = vadd.f32 %v4351_v32, %v16563_v37  ;;  %v5831_v10 = vld [vmem:[%s20734_s4] sm:$0xff] }
 0x1b1   :  { %v17505_v46 = vpop.f32.mrf.mxu1  ;;  %v4765_v45 = vpop.f32.mrf.mxu0  ;;  %6732 = vrot.lane.b32.xlu1 %v17009_v24, %s15455_s11  ;;  %v15357_v24 = vld [vmem:[#allocation2 + $0x8] ss:$12 sps:$4 sm:$0xff]  }
 0x1b2   :  { %4385 = vst [vmem:[#allocation2 + $0xc8] sm:$0xf] %v14386_v20  ;;  %v14387_v23 = vpack.c.bf16 %v4362_v13, %v4361_v30  ;;  %v4363_v15 = vmax.f32 %v4357_v26, 0.0  ;;  %6612 = vrot.lane.b32.xlu0 %v16696_v59, %s15455_s11  ;;  %v17520_v29 = vpop.permute.xlu1 %5956  ;;  %v17522_v53 = vpop.permute.xlu0 %6399  ;;  %v4815_v59 = vmax.f32 %v17439_v9, %v4636_v21  ;;  %v15358_v21 = vld [vmem:[#allocation2 + $0x20] ss:$12 sps:$4 sm:$0xff]  }
 0x1b3   :  { %v4640_v48 = vpop.f32.mrf.mxu1  ;;  %v17515_v58 = vpop.f32.mrf.mxu0  ;;  %20861 = vst [vmem:[#allocation23_spill] sm:$0xff] %v17522_v53 }
 0x1b4   :  { %4386 = vst [vmem:[#allocation2 + $0xcc] sm:$0xff] %v14387_v23  ;;  %v14388_v52 = vpack.c.bf16 %v4363_v15, %v4363_v15 }
 0x1b5   :  { %v4720_v39 = vpop.f32.mrf.mxu1  ;;  %v4769_v32 = vpop.f32.mrf.mxu0  ;;  %6616 = vrot.lane.b32.xlu1 %v15357_v24, %s15455_s11 }
 0x1b6   :  { %4387 = vst [vmem:[#allocation2 + $0xd4] sm:$0xf] %v14388_v52  ;;  %v4821_v30 = vmax.f32 %v4720_v39, %v4765_v45  ;;  %7108 = vperm.xlu0 %14742, %v5831_v10   ;;  %v17528_v23 = vpop.permute.xlu1 %5954  ;;  %v17532_v60 = vpop.permute.xlu0 %6397  ;;  %v4818_v52 = vmax.f32 %v17454_v51, %v4640_v48  ;;  %v4816_v45 = vmax.f32 %v17443_v55, %v17470_v3 }
 0x1b7   :  { %v4722_v20 = vpop.f32.mrf.mxu1  ;;  %v17526_v13 = vpop.f32.mrf.mxu0  ;;  %20862 = vst [vmem:[#allocation24_spill] sm:$0xff] %v17532_v60  ;;  %v4817_v51 = vmax.f32 %v17490_v31, %v17477_v1  ;;  %v4819_v55 = vmax.f32 %v17460_v36, %v17488_v43  ;;  %v7981_v60 = vld [vmem:[#allocation2 + $0x78] sm:$0xff] }
 0x1b8   :  { %v4827_v6 = vmax.f32 %v4815_v59, %v4821_v30  ;;  %v17645_v63 = vcombine.low %v7981_v60, %v17227_v25 }
 0x1b9   :  { %v4724_v26 = vpop.f32.mrf.mxu1  ;;  %v17530_v15 = vpop.f32.mrf.mxu0  ;;  %6730 = vrot.lane.b32.xlu1 %v15358_v21, %s15455_s11 }
 0x1ba   :  { %v4824_v54 = vmax.f32 %v4724_v26, %v4769_v32  ;;  %7831 = vrot.lane.b32.xlu0 %v17243_v62, %s15453_s19  ;;  %v17542_v24 = vpop.permute.xlu1 %6219  ;;  %v17548_v59 = vpop.permute.xlu0 %6507  ;;  %v4833_v30 = vadd.f32 %v4827_v6, %v16518_v4  ;;  %v5832_v6 = vld [vmem:[%s20734_s4 + $0x8] sm:$0xff]  ;;  %20868 = vst [vmem:[#allocation30_spill] sm:$0xff] %v17645_v63 }
 0x1bb   :  { %v4726_v9 = vpop.f32.mrf.mxu1  ;;  %v17540_v10 = vpop.f32.mrf.mxu0  ;;  %20863 = vst [vmem:[#allocation25_spill] sm:$0xff] %v17548_v59 }
 0x1bc   :  { %v4830_v26 = vmax.f32 %v4818_v52, %v4824_v54  ;;  %v17565_v52 = vld [vmem:[#allocation2 + $0x68] ss:$12 sps:$4 sm:$0xff]  }
 0x1bd   :  { %v4806_v39 = vpop.f32.mrf.mxu1  ;;  %v17546_v32 = vpop.f32.mrf.mxu0  ;;  %6726 = vrot.lane.b32.xlu1 %v16879_v34, %s15455_s11  ;;  %v4820_v34 = vmax.f32 %v17505_v46, %v17495_v8 }
 0x1be   :  { %v4822_v48 = vmax.f32 %v4722_v20, %v4806_v39  ;;  %7829 = vrot.lane.b32.xlu0 %v17241_v38, %s15453_s19  ;;  %v17563_v20 = vpop.permute.xlu1 %6217 }
 0x1bf   :  { %v4808_v21 = vpop.f32.mrf.mxu1 }
 0x1c0   :  { %v4828_v3 = vmax.f32 %v4816_v45, %v4822_v48  ;;  %v4823_v1 = vmax.f32 %v17503_v14, %v4808_v21  ;;  %v17558_v31 = vpop.f32.mrf.mxu0  ;;  %v17572_v14 = vpop.permute.xlu0 %5958  ;;  %v4839_v48 = vmax.f32 %v4833_v30, 0.0  ;;  %v4836_v21 = vadd.f32 %v4830_v26, %v16563_v37 }
 0x1c1   :  { %v4810_v54 = vpop.f32.mrf.mxu1  ;;  %7113 = vperm.xlu1 %14743, %v5832_v6  }
 0x1c2   :  { %v4834_v39 = vadd.f32 %v4828_v3, %v16518_v4  ;;  %v4829_v36 = vmax.f32 %v4817_v51, %v4823_v1  ;;  %v4825_v43 = vmax.f32 %v4726_v9, %v4810_v54  ;;  %v17570_v45 = vpop.f32.mrf.mxu0  ;;  %7827 = vrot.lane.b32.xlu0 %v17565_v52, %s15453_s19  ;;  %v5833_v9 = vld [vmem:[%s20734_s4 + $0x10] sm:$0xf]  ;;  %v17586_v26 = vpop.permute.xlu1 %6505  ;;  %v17588_v3 = vld [vmem:[#allocation2 + $0x4c] ss:$12 sps:$4 sm:$0xff]  }
 0x1c3   :  { %v4812_v40 = vpop.f32.mrf.mxu1  ;;  %20864 = vst [vmem:[#allocation26_spill] sm:$0xff] %v17586_v26 }
 0x1c4   :  { %v4840_v7 = vmax.f32 %v4834_v39, 0.0  ;;  %v4835_v11 = vadd.f32 %v4829_v36, %v16518_v4  ;;  %v4831_v8 = vmax.f32 %v4819_v55, %v4825_v43  ;;  %v4826_v46 = vmax.f32 %v17515_v58, %v4812_v40  ;;  %v17579_v51 = vpop.f32.mrf.mxu0  ;;  %v17593_v40 = vpop.permute.xlu0 %6221 }
 0x1c5   :  { %v17584_v30 = vpop.f32.mrf.mxu1  ;;  %7118 = vperm.xlu1 %14743, %v5833_v9   ;;  %v4842_v36 = vmax.f32 %v4836_v21, 0.0 }
 0x1c6   :  { %v14389_v1 = vpack.c.bf16 %v4840_v7, %v4839_v48  ;;  %v4841_v6 = vmax.f32 %v4835_v11, 0.0  ;;  %v4837_v54 = vadd.f32 %v4831_v8, %v16563_v37  ;;  %v4832_v39 = vmax.f32 %v4820_v34, %v4826_v46  ;;  %v17591_v55 = vpop.f32.mrf.mxu0  ;;  %7819 = vrot.lane.b32.xlu0 %v17588_v3, %s15453_s19  ;;  %v17602_v34 = vpop.permute.xlu1 %6401  ;;  %v17604_v48 = vld [vmem:[#allocation2 + $0x48] ss:$12 sps:$4 sm:$0xff]   ;;  %v17606_v8 = vld [vmem:[#allocation2 + $0x64] ss:$12 sps:$4 sm:$0xff]  }
 0x1c7   :  { %v5117_v58 = vpop.f32.mrf.mxu1  ;;  %20865 = vst [vmem:[#allocation27_spill] sm:$0xff] %v17602_v34 }
 0x1c8   :  { %4865 = vst [vmem:[#allocation2 + $0xd8] sm:$0xff] %v14389_v1  ;;  %v14390_v43 = vpack.c.bf16 %v4841_v6, %v4841_v6  ;;  %v4843_v26 = vmax.f32 %v4837_v54, 0.0  ;;  %v4838_v59 = vadd.f32 %v4832_v39, %v16563_v37  ;;  %v17598_v7 = vpop.f32.mrf.mxu0  ;;  %v17608_v21 = vpop.permute.xlu0 %5960  ;;  %v5296_v41 = vmax.f32 %v17526_v13, %v5117_v58 }
 0x1c9   :  { %v17600_v11 = vpop.f32.mrf.mxu1  ;;  %7825 = vrot.lane.b32.xlu1 %v17606_v8, %s15453_s19 }
 0x1ca   :  { %4866 = vst [vmem:[#allocation2 + $0xe0] sm:$0xf] %v14390_v43  ;;  %v14391_v46 = vpack.c.bf16 %v4843_v26, %v4842_v36  ;;  %v4844_v27 = vmax.f32 %v4838_v59, 0.0  ;;  %v5246_v9 = vpop.f32.mrf.mxu0  ;;  %7817 = vrot.lane.b32.xlu0 %v17604_v48, %s15453_s19  ;;  %v17616_v35 = vpop.permute.xlu1 %6509  ;;  %v15194_v43 = vld [vmem:[#allocation2 + $0x38] ss:$12 sps:$4 sm:$0xff]  }
 0x1cb   :  { %v5121_v1 = vpop.f32.mrf.mxu1  ;;  %20866 = vst [vmem:[#allocation28_spill] sm:$0xff] %v17616_v35  ;;  %v17618_v26 = vld [vmem:[#allocation2 + $0x60] ss:$12 sps:$4 sm:$0xff]   ;;  %v17628_v35 = vld [vmem:[#allocation2 + $0x50] ss:$12 sps:$4 sm:$0xff]  }
 0x1cc   :  { %4867 = vst [vmem:[#allocation2 + $0xe4] sm:$0xff] %v14391_v46  ;;  %v14392_v6 = vpack.c.bf16 %v4844_v27, %v4844_v27  ;;  %v17614_v54 = vpop.f32.mrf.mxu0  ;;  %v17620_v36 = vpop.permute.xlu0 %6225  ;;  %v15196_v46 = vld [vmem:[#allocation2 + $0x30] ss:$12 sps:$4 sm:$0xff]   ;;  %v5299_v13 = vmax.f32 %v17540_v10, %v5121_v1  ;;  %v15199_v10 = vld [vmem:[#allocation2 + $0x34] ss:$12 sps:$4 sm:$0xff]  }
 0x1cd   :  { %v5201_v39 = vpop.f32.mrf.mxu1  ;;  %7823 = vrot.lane.b32.xlu1 %v17618_v26, %s15453_s19 }
 0x1ce   :  { %4868 = vst [vmem:[#allocation2 + $0xec] sm:$0xf] %v14392_v6  ;;  %v5250_v59 = vpop.f32.mrf.mxu0  ;;  %v5302_v42 = vmax.f32 %v5201_v39, %v5246_v9  ;;  %7815 = vrot.lane.b32.xlu0 %v15194_v43, %s15453_s19  ;;  %v5963_v47 = vpop.permute.xlu1 %5962  ;;  %v5297_v43 = vmax.f32 %v17530_v15, %v17558_v31 }
 0x1cf   :  { %v5203_v28 = vpop.f32.mrf.mxu1 }
 0x1d0   :  { %v17626_v27 = vpop.f32.mrf.mxu0  ;;  %v17632_v2 = vpop.permute.xlu0 %6223  ;;  %v5308_v58 = vmax.f32 %v5296_v41, %v5302_v42  ;;  %v5298_v42 = vmax.f32 %v17584_v30, %v17570_v45  ;;  %v5301_v30 = vmax.f32 %v17600_v11, %v17591_v55 }
 0x1d1   :  { %v5205_v61 = vpop.f32.mrf.mxu1  ;;  %7821 = vrot.lane.b32.xlu1 %v17628_v35, %s15453_s19 }
 0x1d2   :  { %v17630_v6 = vpop.f32.mrf.mxu0  ;;  %v5305_v9 = vmax.f32 %v5205_v61, %v5250_v59  ;;  %7811 = vrot.lane.b32.xlu0 %v15196_v46, %s15453_s19  ;;  %v17642_v17 = vpop.permute.xlu1 %6511  ;;  %v5314_v59 = vadd.f32 %v5308_v58, %v16518_v4  ;;  %v5300_v46 = vmax.f32 %v17546_v32, %v17579_v51  ;;  %v15200_v58 = vld [vmem:[#allocation2 + $0x68] ss:$12 sps:$4 sm:$0xff]  }
 0x1d3   :  { %v5207_v39 = vpop.f32.mrf.mxu1  ;;  %20867 = vst [vmem:[#allocation29_spill] sm:$0xff] %v17642_v17 }
 0x1d4   :  { %v17640_v53 = vpop.f32.mrf.mxu0  ;;  %v17651_v1 = vpop.permute.xlu0 %6405  ;;  %v5311_v15 = vmax.f32 %v5299_v13, %v5305_v9  ;;  %v17665_v9 = vcombine.high %v7981_v60, %v17227_v25  ;;  %v5975_v25 = vsel %vm5966_vm4, %v17608_v21, %v5963_v47 }
 0x1d5   :  { %v5287_v34 = vpop.f32.mrf.mxu1  ;;  %20869 = vst [vmem:[#allocation31_spill] sm:$0xff] %v17651_v1  ;;  %7813 = vrot.lane.b32.xlu1 %v15199_v10, %s15453_s19 }
 0x1d6   :  { %v5303_v41 = vmax.f32 %v5203_v28, %v5287_v34  ;;  %v17649_v61 = vpop.f32.mrf.mxu0  ;;  %8070 = vrot.lane.b32.xlu0 %v17645_v63, %s15453_s19  ;;  %v5965_v13 = vpop.permute.xlu1 %5964  ;;  %20870 = vst [vmem:[#allocation32_spill] sm:$0xff] %v17665_v9 }
 0x1d7   :  { %v5289_v31 = vpop.f32.mrf.mxu1  ;;  %v5976_v51 = vsel %vm5966_vm4, %v5963_v47, %v5965_v13 }
 0x1d8   :  { %v5309_v17 = vmax.f32 %v5297_v43, %v5303_v41  ;;  %v5304_v45 = vmax.f32 %v17598_v7, %v5289_v31  ;;  %v17660_v28 = vpop.f32.mrf.mxu0  ;;  %v17671_v7 = vpop.permute.xlu0 %6403  ;;  %v5320_v43 = vmax.f32 %v5314_v59, 0.0  ;;  %v5317_v41 = vadd.f32 %v5311_v15, %v16563_v37  ;;  %6000 = vmatprep.subr.bf16.mxu0 %v5976_v51 }
 0x1d9   :  { %v5291_v34 = vpop.f32.mrf.mxu1  ;;  %8072 = vrot.lane.b32.xlu1 %v17665_v9, %s15453_s19  ;;  %6001 = vmatpush1.bf16.msra.mxu0 %v5975_v25  ;;  %v5974_v15 = vsel %vm5966_vm4, %v17520_v29, %v17572_v14 }
 0x1da   :  { %v5315_v10 = vadd.f32 %v5309_v17, %v16518_v4  ;;  %v5310_v1 = vmax.f32 %v5298_v42, %v5304_v45  ;;  %v5306_v19 = vmax.f32 %v5207_v39, %v5291_v34  ;;  %v17668_v32 = vpop.f32.mrf.mxu0  ;;  %8068 = vrot.lane.b32.xlu0 %v15200_v58, %s15453_s19  ;;  %v17688_v31 = vpop.permute.xlu1 %6227  ;;  %6002 = vmatprep.subr.bf16.mxu0 %v5974_v15  ;;  %v5323_v14 = vmax.f32 %v5317_v41, 0.0 }
 0x1db   :  { %v5293_v55 = vpop.f32.mrf.mxu1  ;;  %v5970_v15 = vsel %vm5966_vm4, %v17334_v56, %v17383_v12  ;;  %v5969_v12 = vsel %vm5966_vm4, %v17350_v50, %v17334_v56  ;;  %v5967_v50 = vsel %vm5966_vm4, %v17255_v16, %v17237_v44 }
 0x1dc   :  { %v5321_v60 = vmax.f32 %v5315_v10, 0.0  ;;  %v5316_v17 = vadd.f32 %v5310_v1, %v16518_v4  ;;  %v5312_v11 = vmax.f32 %v5300_v46, %v5306_v19  ;;  %v5307_v39 = vmax.f32 %v17614_v54, %v5293_v55  ;;  %v17681_v42 = vpop.f32.mrf.mxu0  ;;  %v17693_v54 = vpop.permute.xlu0 %6513 }
 0x1dd   :  { %v17683_v59 = vpop.f32.mrf.mxu1  ;;  %v5973_v46 = vsel %vm5966_vm4, %v17528_v23, %v17520_v29  ;;  %8066 = vrot.lane.b32.xlu1 %v17606_v8, %s15453_s19  ;;  %v5972_v29 = vsel %vm5966_vm4, %v17422_v33, %v17456_v0 }
 0x1de   :  { %v14393_v45 = vpack.c.bf16 %v5321_v60, %v5320_v43  ;;  %v5322_v47 = vmax.f32 %v5316_v17, 0.0  ;;  %v5318_v21 = vadd.f32 %v5312_v11, %v16563_v37  ;;  %v5313_v1 = vmax.f32 %v5301_v30, %v5307_v39  ;;  %v17691_v19 = vpop.f32.mrf.mxu0  ;;  %8060 = vrot.lane.b32.xlu0 %v17588_v3, %s15453_s19  ;;  %6003 = vmatpush1.bf16.msra.mxu0 %v5973_v46  ;;  %v17710_v23 = vpop.permute.xlu1 %6407 }
 0x1df   :  { %v5598_v34 = vpop.f32.mrf.mxu1  ;;  %6004 = vmatprep.subr.bf16.mxu0 %v5972_v29  ;;  %v5971_v60 = vsel %vm5966_vm4, %v17432_v49, %v17422_v33 }
 0x1e0   :  { %5346 = vst [vmem:[#allocation2 + $0xf0] sm:$0xff] %v14393_v45  ;;  %v14394_v13 = vpack.c.bf16 %v5322_v47, %v5322_v47  ;;  %v5324_v30 = vmax.f32 %v5318_v21, 0.0  ;;  %v5319_v58 = vadd.f32 %v5313_v1, %v16563_v37  ;;  %v17703_v10 = vpop.f32.mrf.mxu0  ;;  %v17721_v11 = vpop.permute.xlu0 %6519  ;;  %v17728_v45 = vld [vmem:[#allocation2 + $0x50] ss:$12 sps:$4 sm:$0xff]   ;;  %v5777_v33 = vmax.f32 %v17626_v27, %v5598_v34 }
 0x1e1   :  { %v17705_v51 = vpop.f32.mrf.mxu1  ;;  %8064 = vrot.lane.b32.xlu1 %v17618_v26, %s15453_s19  ;;  %v5968_v27 = vsel %vm5966_vm4, %v17237_v44, %v17287_v22  ;;  %v5778_v22 = vmax.f32 %v17630_v6, %v17660_v28  ;;  %v5781_v28 = vmax.f32 %v17649_v61, %v17681_v42 }
 0x1e2   :  { %5347 = vst [vmem:[#allocation2 + $0xf8] sm:$0xf] %v14394_v13  ;;  %v14395_v43 = vpack.c.bf16 %v5324_v30, %v5323_v14  ;;  %v5325_v55 = vmax.f32 %v5319_v58, 0.0  ;;  %v5727_v41 = vpop.f32.mrf.mxu0  ;;  %8058 = vrot.lane.b32.xlu0 %v17604_v48, %s15453_s19  ;;  %6005 = vmatpush1.bf16.msra.mxu0 %v5971_v60  ;;  %v17726_v48 = vpop.permute.xlu1 %6515  ;;  %v5782_v61 = vmax.f32 %v17705_v51, %v17691_v19 }
 0x1e3   :  { %v5602_v25 = vpop.f32.mrf.mxu1  ;;  %6006 = vmatprep.subr.bf16.mxu0 %v5970_v15  ;;  %v20872_v15 = vmov 0  }
 0x1e4   :  { %5348 = vst [vmem:[#allocation2 + $0xfc] sm:$0xff] %v14395_v43  ;;  %v14396_v0 = vpack.c.bf16 %v5325_v55, %v5325_v55  ;;  %v17719_v17 = vpop.f32.mrf.mxu0  ;;  %v5780_v34 = vmax.f32 %v17640_v53, %v5602_v25  ;;  %v17755_v53 = vld [vmem:[%s20733_s3 + $0xc] sm:$0xff]   ;;  %v5779_v43 = vmax.f32 %v17683_v59, %v17668_v32 }
 0x1e5   :  { %v5682_v39 = vpop.f32.mrf.mxu1  ;;  %8062 = vrot.lane.b32.xlu1 %v17728_v45, %s15453_s19 }
 0x1e6   :  { %5349 = vst [vmem:[#allocation2 + $0x104] sm:$0xf] %v14396_v0  ;;  %v5783_v49 = vmax.f32 %v5682_v39, %v5727_v41  ;;  %8236 = vrot.lane.b32.xlu0 %v17565_v52, %s15454_s13  ;;  %v5731_v21 = vpop.f32.mrf.mxu0  ;;  %6007 = vmatpush1.bf16.msra.mxu0 %v5969_v12  ;;  %v6232_v14 = vpop.permute.xlu1 %6231  ;;  %v17777_v39 = vld [vmem:[#allocation2 + $0x80] ss:$12 sps:$4 sm:$0xff]  }
 0x1e7   :  { %v5684_v47 = vpop.f32.mrf.mxu1  ;;  %6008 = vmatprep.subr.bf16.mxu0 %v5968_v27  ;;  %20871 = vst [vmem:[#allocation33_spill] sm:$0xff] %v17777_v39  ;;  %v6240_v27 = vsel %vm5966_vm4, %v17542_v24, %v17593_v40 }
 0x1e8   :  { %v6234_v46 = vpop.permute.xlu0 %6233  ;;  %v5789_v52 = vmax.f32 %v5777_v33, %v5783_v49 }
 0x1e9   :  { %v5686_v1 = vpop.f32.mrf.mxu1  ;;  %8240 = vrot.lane.b32.xlu1 %v17243_v62, %s15454_s13  ;;  %v6244_v56 = vsel %vm5966_vm4, %v6232_v14, %v6234_v46 }
 0x1ea   :  { %v5786_v13 = vmax.f32 %v5686_v1, %v5731_v21  ;;  %8339 = vrot.lane.b32.xlu0 %v17645_v63, %s15454_s13  ;;  %6009 = vmatpush1.bf16.msra.mxu0 %v5967_v50  ;;  %v6230_v41 = vpop.permute.xlu1 %6229  ;;  %v5795_v44 = vadd.f32 %v5789_v52, %v16518_v4 }
 0x1eb   :  { %v5688_v30 = vpop.f32.mrf.mxu1  ;;  %6261 = vmatprep.subr.bf16.mxu0 %v6244_v56  ;;  %v6243_v6 = vsel %vm5966_vm4, %v6230_v41, %v6232_v14 }
 0x1ec   :  { %v17757_v29 = vpop.permute.xlu0 %6638  ;;  %v5792_v16 = vmax.f32 %v5780_v34, %v5786_v13  ;;  %v5801_v12 = vmax.f32 %v5795_v44, 0.0  ;;  %v17805_v34 = vld [vmem:[#allocation2 + $0x80] ss:$12 sps:$4 sm:$0xff]   ;;  %v6239_v13 = vsel %vm5966_vm4, %v17563_v20, %v17542_v24  ;;  %v6238_v24 = vsel %vm5966_vm4, %v17445_v18, %v17472_v57  ;;  %v17825_v20 = vld [vmem:[#allocation2 + $0x90] ss:$12 sps:$4 sm:$0xff]  }
 0x1ed   :  { %v5768_v58 = vpop.f32.mrf.mxu1  ;;  %8238 = vrot.lane.b32.xlu1 %v17241_v38, %s15454_s13  ;;  %13931 = vmatmul.mubr.msk.bf16.vlgmr.msra.gmra.mxu0 %vm5987_vm3, %v17755_v53  ;;  %20873 = vst [vmem:[#allocation34_spill] sm:$0xff] %v17805_v34  ;;  %20874 = vst [vmem:[#allocation35_spill] sm:$0xff] %v17825_v20  ;;  %v20875_v44 = vld [vmem:[#allocation14_spill] sm:$0xff] }
 0x1ee   :  { %v5784_v55 = vmax.f32 %v5684_v47, %v5768_v58  ;;  %8230 = vrot.lane.b32.xlu0 %v17628_v35, %s15454_s13  ;;  %6262 = vmatpush1.bf16.msra.mxu0 %v6243_v6  ;;  %v6242_v35 = vsel %vm5966_vm4, %v17620_v36, %v17688_v31  ;;  %v17783_v49 = vpop.permute.xlu1 %6517  ;;  %v6241_v47 = vsel %vm5966_vm4, %v17632_v2, %v17620_v36  ;;  %v17798_v2 = vld [vmem:[%s20733_s3 + $0x14] ss:$0 sps:$4 sm:$0x33]  }
 0x1ef   :  { %v5770_v25 = vpop.f32.mrf.mxu1  ;;  %6036 = vmatprep.mubr.bf16.mxu0 %v20872_v15  ;;  %6263 = vmatprep.subr.bf16.mxu0 %v6242_v35  ;;  %v5798_v31 = vadd.f32 %v5792_v16, %v16563_v37  ;;  %v20876_v16 = vld [vmem:[#allocation11_spill] sm:$0xff] }
 0x1f0   :  { %v5790_v60 = vmax.f32 %v5778_v22, %v5784_v55  ;;  %v5785_v32 = vmax.f32 %v17703_v10, %v5770_v25  ;;  %v17772_v0 = vpop.permute.xlu0 %6752  ;;  %v6236_v25 = vsel %vm5966_vm4, %v20876_v16, %v20875_v44  ;;  %v20879_v35 = vld [vmem:[#allocation27_spill] sm:$0xff]  ;;  %v17934_v44 = vld [vmem:[#allocation2 + $0xa8] ss:$12 sps:$4 sm:$0xff]  }
 0x1f1   :  { %v5772_v59 = vpop.f32.mrf.mxu1  ;;  %8234 = vrot.lane.b32.xlu1 %v17606_v8, %s15454_s13  ;;  %v5804_v40 = vmax.f32 %v5798_v31, 0.0  ;;  %v20884_v31 = vld [vmem:[#allocation18_spill] sm:$0xff]  ;;  %20894 = vst [vmem:[#allocation11_spill] sm:$0xff] %v17934_v44 }
 0x1f2   :  { %v5796_v42 = vadd.f32 %v5790_v60, %v16518_v4  ;;  %v5791_v10 = vmax.f32 %v5779_v43, %v5785_v32  ;;  %v5787_v33 = vmax.f32 %v5688_v30, %v5772_v59  ;;  %8242 = vrot.lane.b32.xlu0 %v17777_v39, %s15454_s13  ;;  %6264 = vmatpush1.bf16.msra.mxu0 %v6241_v47  ;;  %v17856_v32 = vld [vmem:[#allocation2 + $0x98] ss:$12 sps:$4 sm:$0xff]  }
 0x1f3   :  { %v5774_v21 = vpop.f32.mrf.mxu1  ;;  %6265 = vmatprep.subr.bf16.mxu0 %v6240_v27 }
 0x1f4   :  { %v5802_v19 = vmax.f32 %v5796_v42, 0.0  ;;  %v5797_v51 = vadd.f32 %v5791_v10, %v16518_v4  ;;  %v5793_v1 = vmax.f32 %v5781_v28, %v5787_v33  ;;  %v5788_v46 = vmax.f32 %v17719_v17, %v5774_v21  ;;  %v17800_v36 = vpop.permute.xlu0 %6636  ;;  %v17808_v17 = vpop.permute.xlu1 %6640  ;;  %v20878_v28 = vld [vmem:[#allocation31_spill] sm:$0xff] }
 0x1f5   :  { %8341 = vrot.lane.b32.xlu1 %v17665_v9, %s15454_s13  ;;  %13932 = vmatmul.mubr.msk.bf16.gmra.mxu0 %vm5987_vm3, %v17798_v2  ;;  %v6419_v60 = vsel %vm6409_vm5, %v20878_v28, %v17710_v23  ;;  %v17874_v10 = vld [vmem:[#allocation2 + $0x98] ss:$12 sps:$4 sm:$0xff]  }
 0x1f6   :  { %v14397_v8 = vpack.c.bf16 %v5802_v19, %v5801_v12  ;;  %v5803_v14 = vmax.f32 %v5797_v51, 0.0  ;;  %v5799_v4 = vadd.f32 %v5793_v1, %v16563_v37  ;;  %v5794_v52 = vmax.f32 %v5782_v61, %v5788_v46  ;;  %8343 = vrot.lane.b32.xlu0 %v17805_v34, %s15454_s13  ;;  %6266 = vmatpush1.bf16.msra.mxu0 %v6239_v13  ;;  %v20880_v61 = vld [vmem:[#allocation23_spill] sm:$0xff]  ;;  %v20885_v46 = vld [vmem:[#allocation20_spill] sm:$0xff] }
 0x1f7   :  { %6287 = vmatprep.mubr.bf16.mxu0 %v20872_v15  ;;  %6267 = vmatprep.subr.bf16.mxu0 %v6238_v24  ;;  %v6417_v42 = vsel %vm6409_vm5, %v20880_v61, %v20879_v35  ;;  %20881 = vst [vmem:[#allocation14_spill] sm:$0xff] %v17874_v10  ;;  %v20883_v12 = vld [vmem:[#allocation19_spill] sm:$0xff]  ;;  %v6414_v27 = vsel %vm6409_vm5, %v20885_v46, %v20884_v31  ;;  %v20891_v24 = vld [vmem:[#allocation5_spill] sm:$0xff]  ;;  %v20898_v35 = vld [vmem:[#allocation22_spill] sm:$0xff] }
 0x1f8   :  { %5827 = vst [vmem:[#allocation2 + $0x108] sm:$0xff] %v14397_v8  ;;  %v14398_v30 = vpack.c.bf16 %v5803_v14, %v5803_v14  ;;  %v5805_v56 = vmax.f32 %v5799_v4, 0.0  ;;  %v5800_v50 = vadd.f32 %v5794_v52, %v16563_v37  ;;  %v17820_v22 = vpop.permute.xlu0 %6632  ;;  %v17828_v55 = vpop.permute.xlu1 %6750  ;;  %v6237_v37 = vsel %vm5966_vm4, %v17462_v5, %v17445_v18  ;;  %v20877_v18 = vld [vmem:[#allocation12_spill] sm:$0xff]  ;;  %v17891_v19 = vld [vmem:[#allocation2 + $0x94] ss:$12 sps:$4 sm:$0xff]  }
 0x1f9   :  { %8232 = vrot.lane.b32.xlu1 %v17618_v26, %s15454_s13  ;;  %v6235_v5 = vsel %vm5966_vm4, %v20877_v18, %v20876_v16  ;;  %v6415_v21 = vsel %vm6409_vm5, %v20884_v31, %v20883_v12  ;;  %v6531_v8 = vsel %vm6409_vm5, %v17783_v49, %v17721_v11  ;;  %v20886_v4 = vld [vmem:[#allocation15_spill] sm:$0xff]  ;;  %v20887_v52 = vld [vmem:[#allocation8_spill] sm:$0xff]  ;;  %v20895_v16 = vld [vmem:[#allocation6_spill] sm:$0xff] }
 0x1fa   :  { %5828 = vst [vmem:[#allocation2 + $0x110] sm:$0xf] %v14398_v30  ;;  %v14399_v58 = vpack.c.bf16 %v5805_v56, %v5804_v40  ;;  %v5806_v43 = vmax.f32 %v5800_v50, 0.0  ;;  %8076 = vrot.lane.b32.xlu0 %v17825_v20, %s15453_s19  ;;  %6268 = vmatpush1.bf16.msra.mxu0 %v6237_v37  ;;  %v6413_v13 = vsel %vm6409_vm5, %v20887_v52, %v20886_v4  ;;  %v20890_v50 = vld [vmem:[#allocation7_spill] sm:$0xff]  ;;  %v20893_v37 = vld [vmem:[#allocation25_spill] sm:$0xff]  ;;  %v20896_v18 = vld [vmem:[#allocation26_spill] sm:$0xff] }
 0x1fb   :  { %6269 = vmatprep.subr.bf16.mxu0 %v6236_v25  ;;  %v6530_v40 = vsel %vm6409_vm5, %v17693_v54, %v17726_v48  ;;  %v6410_v25 = vsel %vm6409_vm5, %v20895_v16, %v20891_v24  ;;  %v20899_v12 = vld [vmem:[#allocation17_spill] sm:$0xff] }
 0x1fc   :  { %5829 = vst [vmem:[#allocation2 + $0x114] sm:$0xff] %v14399_v58  ;;  %v14400_v57 = vpack.c.bf16 %v5806_v43, %v5806_v43  ;;  %v17837_v41 = vpop.permute.xlu0 %6746  ;;  %v17842_v6 = vpop.permute.xlu1 %6634  ;;  %v6411_v58 = vsel %vm6409_vm5, %v20891_v24, %v20890_v50  ;;  %v20892_v43 = vld [vmem:[#allocation28_spill] sm:$0xff]  ;;  %v6525_v31 = vsel %vm6409_vm5, %v20899_v12, %v20898_v35 }
 0x1fd   :  { %8228 = vrot.lane.b32.xlu1 %v17588_v3, %s15454_s13  ;;  %v6418_v3 = vsel %vm6409_vm5, %v17671_v7, %v20878_v28  ;;  %v20882_v7 = vld [vmem:[#allocation24_spill] sm:$0xff]  ;;  %v15214_v28 = vld [vmem:[%s20733_s3 + $0x18] sm:$0xff]   ;;  %v6650_v46 = vsel %vm6642_vm6, %v17820_v22, %v17842_v6  ;;  %v15216_v6 = vld [vmem:[%s20733_s3 + $0x20] ss:$0 sps:$4 sm:$0x33]  }
 0x1fe   :  { %5830 = vst [vmem:[#allocation2 + $0x11c] sm:$0xf] %v14400_v57  ;;  %8345 = vrot.lane.b32.xlu0 %v17825_v20, %s15454_s13  ;;  %6270 = vmatpush1.bf16.msra.mxu0 %v6235_v5  ;;  %v6528_v57 = vsel %vm6409_vm5, %v20893_v37, %v20892_v43  ;;  %v6527_v5 = vsel %vm6409_vm5, %v20896_v18, %v20893_v37  ;;  %v15220_v43 = vld [vmem:[#allocation2 + $0x68] ss:$12 sps:$4 sm:$0xff]  }
 0x1ff   :  { %6442 = vmatprep.subr.bf16.mxu0 %v6419_v60 }
 0x200   :  { %v17851_v26 = vpop.permute.xlu0 %6630  ;;  %v17858_v59 = vpop.permute.xlu1 %6748 }
 0x201   :  { %7833 = vrot.lane.b32.xlu1 %v17777_v39, %s15453_s19  ;;  %13952 = vmatmul.mubr.msk.bf16.vlgmr.msra.gmra.mxu0 %vm5987_vm3, %v17755_v53  ;;  %v6416_v53 = vsel %vm6409_vm5, %v20882_v7, %v20880_v61  ;;  %v6649_v4 = vsel %vm6642_vm6, %v17851_v26, %v17820_v22 }
 0x202   :  { %7839 = vrot.lane.b32.xlu0 %v17856_v32, %s15453_s19  ;;  %6443 = vmatpush1.bf16.msra.mxu0 %v6418_v3  ;;  %v20897_v3 = vld [vmem:[#allocation21_spill] sm:$0xff] }
 0x203   :  { %6297 = vmatprep.mubr.bf16.mxu0 %v20872_v15  ;;  %6444 = vmatprep.subr.bf16.mxu0 %v6417_v42  ;;  %v6526_v61 = vsel %vm6409_vm5, %v20898_v35, %v20897_v3  ;;  %v6652_v42 = vsel %vm6642_vm6, %v17757_v29, %v17808_v17  ;;  %v15230_v3 = vld [vmem:[#allocation2 + $0x38] ss:$12 sps:$4 sm:$0xff]   ;;  %v15231_v35 = vld [vmem:[%s20733_s3 + $0x2c] ss:$0 sps:$4 sm:$0x33]  }
 0x204   :  { %v17869_v23 = vpop.permute.xlu0 %6626  ;;  %v17877_v33 = vpop.permute.xlu1 %6744 }
 0x205   :  { %8074 = vrot.lane.b32.xlu1 %v17805_v34, %s15453_s19 }
 0x206   :  { %8080 = vrot.lane.b32.xlu0 %v17874_v10, %s15453_s19  ;;  %6445 = vmatpush1.bf16.msra.mxu0 %v6416_v53  ;;  %v6651_v53 = vsel %vm6642_vm6, %v17800_v36, %v17757_v29  ;;  %v20903_v36 = vld [vmem:[#allocation13_spill] sm:$0xff] }
 0x207   :  { %6446 = vmatprep.subr.bf16.mxu0 %v6415_v21  ;;  %v20900_v21 = vld [vmem:[#allocation16_spill] sm:$0xff] }
 0x208   :  { %v17886_v47 = vpop.permute.xlu0 %6740  ;;  %v6522_v51 = vpop.permute.xlu1 %6521 }
 0x209   :  { %7837 = vrot.lane.b32.xlu1 %v17891_v19, %s15453_s19  ;;  %v6532_v1 = vsel %vm6409_vm5, %v17721_v11, %v6522_v51  ;;  %13953 = vmatmul.mubr.msk.bf16.gmra.mxu0 %vm5987_vm3, %v17798_v2  ;;  %v20888_v11 = vld [vmem:[#allocation9_spill] sm:$0xff]  ;;  %v20901_v51 = vld [vmem:[#allocation10_spill] sm:$0xff] }
 0x20a   :  { %8248 = vrot.lane.b32.xlu0 %v17856_v32, %s15454_s13  ;;  %6549 = vmatprep.subr.bf16.mxu1 %v6532_v1  ;;  %v6412_v49 = vsel %vm6409_vm5, %v20888_v11, %v20887_v52  ;;  %v20889_v2 = vld [vmem:[#allocation29_spill] sm:$0xff]  ;;  %v6524_v1 = vsel %vm6409_vm5, %v20901_v51, %v20900_v21 }
 0x20b   :  { %6447 = vmatpush1.bf16.msra.mxu0 %v6414_v27  ;;  %6550 = vmatpush1.bf16.msra.mxu1 %v6531_v8  ;;  %v6529_v56 = vsel %vm6409_vm5, %v20889_v2, %v17693_v54  ;;  %v17976_v27 = vld [vmem:[#allocation2 + $0xb0] ss:$12 sps:$4 sm:$0xff]   ;;  %v6523_v8 = vsel %vm6409_vm5, %v20903_v36, %v20901_v51  ;;  %v18008_v2 = vld [vmem:[#allocation2 + $0xac] ss:$12 sps:$4 sm:$0xff]  }
 0x20c   :  { %v17907_v14 = vpop.permute.xlu0 %6624  ;;  %6448 = vmatprep.subr.bf16.mxu0 %v6413_v13  ;;  %6551 = vmatprep.subr.bf16.mxu1 %v6530_v40  ;;  %v6629_v30 = vpop.permute.xlu1 %6628  ;;  %20902 = vst [vmem:[#allocation12_spill] sm:$0xff] %v17976_v27  ;;  %20904 = vst [vmem:[#allocation31_spill] sm:$0xff] %v18008_v2  ;;  %v15235_v51 = vld [vmem:[#allocation2 + $0x4] ss:$12 sps:$4 sm:$0xff]  }
 0x20d   :  { %7835 = vrot.lane.b32.xlu1 %v17825_v20, %s15453_s19  ;;  %6468 = vmatprep.mubr.bf16.mxu0 %v20872_v15  ;;  %v6648_v13 = vsel %vm6642_vm6, %v17869_v23, %v6629_v30  ;;  %v6647_v26 = vsel %vm6642_vm6, %v17907_v14, %v17869_v23  ;;  %v6764_v30 = vsel %vm6642_vm6, %v17828_v55, %v17772_v0 }
 0x20e   :  { %8349 = vrot.lane.b32.xlu0 %v17874_v10, %s15454_s13  ;;  %v6763_v23 = vsel %vm6642_vm6, %v17837_v41, %v17858_v59  ;;  %v6762_v55 = vsel %vm6642_vm6, %v17877_v33, %v17837_v41 }
 0x20f   :  { %6449 = vmatpush1.bf16.msra.mxu0 %v6412_v49  ;;  %6552 = vmatpush1.bf16.msra.mxu1 %v6529_v56 }
 0x210   :  { %v17926_v48 = vpop.permute.xlu0 %6620  ;;  %6450 = vmatprep.subr.bf16.mxu0 %v6411_v58  ;;  %6553 = vmatprep.subr.bf16.mxu1 %v6528_v57  ;;  %v17936_v54 = vpop.permute.xlu1 %6742 }
 0x211   :  { %8078 = vrot.lane.b32.xlu1 %v17891_v19, %s15453_s19  ;;  %v6761_v59 = vsel %vm6642_vm6, %v17886_v47, %v17936_v54  ;;  %v15218_v54 = vld [vmem:[#allocation2 + $0x64] ss:$12 sps:$4 sm:$0xff]  }
 0x212   :  { %8082 = vrot.lane.b32.xlu0 %v17934_v44, %s15453_s19 }
 0x213   :  { %6451 = vmatpush1.bf16.msra.mxu0 %v6410_v25  ;;  %6554 = vmatpush1.bf16.msra.mxu1 %v6527_v5  ;;  %v15224_v25 = vld [vmem:[#allocation2 + $0x50] ss:$12 sps:$4 sm:$0xff]   ;;  %v15222_v5 = vld [vmem:[#allocation2 + $0x4c] ss:$12 sps:$4 sm:$0xff]  }
 0x214   :  { %v17951_v60 = vpop.permute.xlu0 %6734  ;;  %6555 = vmatprep.subr.bf16.mxu1 %v6526_v61  ;;  %6675 = vmatprep.subr.bf16.mxu0 %v6652_v42  ;;  %v6739_v7 = vpop.permute.xlu1 %6738  ;;  %v15225_v61 = vld [vmem:[#allocation2 + $0x7c] ss:$12 sps:$4 sm:$0xff]  }
 0x215   :  { %8246 = vrot.lane.b32.xlu1 %v17891_v19, %s15454_s13 }
 0x216   :  { %8351 = vrot.lane.b32.xlu0 %v17934_v44, %s15454_s13  ;;  %13963 = vmatmul.mubr.msk.bf16.vlgmr.msra.gmra.mxu0 %vm5987_vm3, %v15214_v28 }
 0x217   :  { %6556 = vmatpush1.bf16.msra.mxu1 %v6525_v31  ;;  %6676 = vmatpush1.bf16.msra.mxu0 %v6651_v53  ;;  %v15234_v53 = vld [vmem:[#allocation2 + $0x20] ss:$12 sps:$4 sm:$0xff]   ;;  %v15232_v31 = vld [vmem:[#allocation2 + $0x1c] ss:$12 sps:$4 sm:$0xff]  }
 0x218   :  { %v6619_v17 = vpop.permute.xlu0 %6618  ;;  %6557 = vmatprep.subr.bf16.mxu1 %v6524_v1  ;;  %6677 = vmatprep.subr.bf16.mxu0 %v6650_v46  ;;  %v6623_v29 = vpop.permute.xlu1 %6622  ;;  %v15238_v1 = vld [vmem:[%s20733_s3 + $0x30] sm:$0xff]  }
 0x219   :  { %8244 = vrot.lane.b32.xlu1 %v17825_v20, %s15454_s13  ;;  %6478 = vmatprep.mubr.bf16.mxu0 %v20872_v15  ;;  %v6646_v49 = vsel %vm6642_vm6, %v17926_v48, %v6623_v29 }
 0x21a   :  { %8355 = vrot.lane.b32.xlu0 %v17976_v27, %s15454_s13 }
 0x21b   :  { %6558 = vmatpush1.bf16.msra.mxu1 %v6523_v8  ;;  %6678 = vmatpush1.bf16.msra.mxu0 %v6649_v4  ;;  %v15239_v8 = vld [vmem:[%s20733_s3 + $0x38] ss:$0 sps:$4 sm:$0x33]  }
 0x21c   :  { %v6615_v52 = vpop.permute.xlu0 %6614  ;;  %6679 = vmatprep.subr.bf16.mxu0 %v6648_v13  ;;  %v6755_v40 = vpop.permute.xlu1 %6754 }
 0x21d   :  { %8347 = vrot.lane.b32.xlu1 %v17891_v19, %s15454_s13  ;;  %v6765_v22 = vsel %vm6642_vm6, %v17772_v0, %v6755_v40  ;;  %v6645_v0 = vsel %vm6642_vm6, %v6619_v17, %v17926_v48  ;;  %v6760_v48 = vsel %vm6642_vm6, %v6739_v7, %v17886_v47  ;;  %v15221_v47 = vld [vmem:[%s20733_s3 + $0x24] sm:$0xff]   ;;  %v15228_v7 = vld [vmem:[#allocation2 + $0x34] ss:$12 sps:$4 sm:$0xff]  }
 0x21e   :  { %13964 = vmatmul.mubr.msk.bf16.gmra.mxu0 %vm5987_vm3, %v15216_v6  ;;  %13965 = vmatmul.mubr.msk.bf16.vlgmr.msra.gmra.mxu1 %vm5987_vm3, %v15214_v28  ;;  %v15237_v17 = vld [vmem:[#allocation2 + $0x8] ss:$12 sps:$4 sm:$0xff]  }
 0x21f   :  { %6782 = vmatprep.subr.bf16.mxu1 %v6765_v22  ;;  %6680 = vmatpush1.bf16.msra.mxu0 %v6647_v26 }
 0x220   :  { %v6729_v11 = vpop.permute.xlu0 %6728  ;;  %6783 = vmatpush1.bf16.msra.mxu1 %v6764_v30  ;;  %6681 = vmatprep.subr.bf16.mxu0 %v6646_v49  ;;  %v6737_v14 = vpop.permute.xlu1 %6736 }
 0x221   :  { %6784 = vmatprep.subr.bf16.mxu1 %v6763_v23  ;;  %8084 = vrot.lane.b32.xlu1 %v18008_v2, %s15453_s19  ;;  %v6759_v33 = vsel %vm6642_vm6, %v17951_v60, %v6737_v14 }
 0x222   :  { %6585 = vmatprep.mubr.bf16.mxu1 %v20872_v15  ;;  %6701 = vmatprep.mubr.bf16.mxu0 %v20872_v15 }
 0x223   :  { %6682 = vmatpush1.bf16.msra.mxu0 %v6645_v0 }
 0x224   :  { %6785 = vmatpush1.bf16.msra.mxu1 %v6762_v55  ;;  %v6733_v56 = vpop.permute.xlu1 %6732  ;;  %v6613_v50 = vpop.permute.xlu0 %6612 }
 0x225   :  { %6786 = vmatprep.subr.bf16.mxu1 %v6761_v59  ;;  %8353 = vrot.lane.b32.xlu1 %v18008_v2, %s15454_s13  ;;  %v6643_v41 = vsel %vm6642_vm6, %v6613_v50, %v6615_v52  ;;  %v6758_v37 = vsel %vm6642_vm6, %v6733_v56, %v17951_v60  ;;  %v15227_v60 = vld [vmem:[#allocation2 + $0x80] ss:$12 sps:$4 sm:$0xff]  }
 0x226   :  { %13966 = vmatmul.mubr.msk.bf16.gmra.mxu1 %vm5987_vm3, %v15216_v6 }
 0x227   :  { %6808 = vmatprep.mubr.bf16.mxu1 %v20872_v15 }
 0x228   :  { %6787 = vmatpush1.bf16.msra.mxu1 %v6760_v48  ;;  %v6617_v24 = vpop.permute.xlu1 %6616  ;;  %v18049_v42 = vpop.f32.mrf.mxu1 }
 0x229   :  { %6788 = vmatprep.subr.bf16.mxu1 %v6759_v33  ;;  %8086 = vrot.lane.b32.xlu1 %v17976_v27, %s15453_s19  ;;  %v6644_v58 = vsel %vm6642_vm6, %v6615_v52, %v6617_v24 }
 0x22a   :  { %6683 = vmatprep.subr.bf16.mxu0 %v6644_v58  ;;  %v18054_v12 = vpop.f32.mrf.mxu1 }
 0x22b   :  { %6684 = vmatpush1.bf16.msra.mxu0 %v6643_v41 }
 0x22c   :  { %6789 = vmatpush1.bf16.msra.mxu1 %v6758_v37  ;;  %6917 = vmatprep.subr.bf16.mxu0 %v15220_v43  ;;  %v6731_v57 = vpop.permute.xlu1 %6730  ;;  %v18057_v21 = vpop.f32.mrf.mxu1 }
 0x22d   :  { %v6757_v16 = vsel %vm6642_vm6, %v6729_v11, %v6731_v57 }
 0x22e   :  { %13972 = vmatmul.mubr.msk.bf16.vlgmr.msra.gmra.mxu0 %vm5987_vm3, %v15221_v47  ;;  %6790 = vmatprep.subr.bf16.mxu1 %v6757_v16  ;;  %v18064_v46 = vpop.f32.mrf.mxu1 }
 0x22f   :  { %6918 = vmatpush1.bf16.msra.mxu0 %v15218_v54  ;;  %6711 = vmatprep.mubr.bf16.mxu0 %v20872_v15 }
 0x230   :  { %6919 = vmatprep.subr.bf16.mxu0 %v15224_v25  ;;  %v6727_v18 = vpop.permute.xlu1 %6726 }
 0x231   :  { %v6756_v28 = vsel %vm6642_vm6, %v6727_v18, %v6729_v11 }
 0x232   :  { %6791 = vmatpush1.bf16.msra.mxu1 %v6756_v28 }
 0x233   :  { %6920 = vmatpush1.bf16.msra.mxu0 %v15222_v5  ;;  %7034 = vmatprep.subr.bf16.mxu1 %v15227_v60 }
 0x234   :  { %6921 = vmatprep.subr.bf16.mxu0 %v15230_v3 }
 0x235   :  { %13974 = vmatmul.mubr.msk.bf16.vlgmr.msra.gmra.mxu1 %vm5987_vm3, %v15221_v47 }
 0x236   :  { %13973 = vmatmul.mubr.msk.bf16.gmra.mxu0 %vm5987_vm3, %v15231_v35  ;;  %7035 = vmatpush1.bf16.msra.mxu1 %v15225_v61 }
 0x237   :  { %6922 = vmatpush1.bf16.msra.mxu0 %v15228_v7  ;;  %7036 = vmatprep.subr.bf16.mxu1 %v15220_v43 }
 0x238   :  { %6923 = vmatprep.subr.bf16.mxu0 %v15234_v53  ;;  %6818 = vmatprep.mubr.bf16.mxu1 %v20872_v15 }
 0x239   :  { %6943 = vmatprep.mubr.bf16.mxu0 %v20872_v15 }
 0x23a   :  { %7037 = vmatpush1.bf16.msra.mxu1 %v15218_v54 }
 0x23b   :  { %6924 = vmatpush1.bf16.msra.mxu0 %v15232_v31  ;;  %7038 = vmatprep.subr.bf16.mxu1 %v15224_v25 }
 0x23c   :  { %6925 = vmatprep.subr.bf16.mxu0 %v15237_v17  ;;  %v18119_v17 = vpop.permute.xlu1 %7113 }
 0x23d   :  { %13975 = vmatmul.mubr.msk.bf16.gmra.mxu1 %vm5987_vm3, %v15231_v35  ;;  %20906 = vst [vmem:[#allocation23_spill] sm:$0xff] %v18119_v17 }
 0x23e   :  { %7039 = vmatpush1.bf16.msra.mxu1 %v15222_v5  ;;  %7060 = vmatprep.mubr.bf16.mxu1 %v20872_v15  ;;  %v18067_v29 = vpop.f32.mrf.mxu1 }
 0x23f   :  { %6926 = vmatpush1.bf16.msra.mxu0 %v15235_v51  ;;  %7040 = vmatprep.subr.bf16.mxu1 %v15230_v3 }
 0x240   :  { %v18070_v36 = vpop.f32.mrf.mxu1 }
 0x242   :  { %13991 = vmatmul.mubr.msk.bf16.vlgmr.msra.gmra.mxu0 %vm5987_vm3, %v15238_v1  ;;  %7041 = vmatpush1.bf16.msra.mxu1 %v15228_v7  ;;  %v6117_v4 = vpop.f32.mrf.mxu1 }
 0x243   :  { %7042 = vmatprep.subr.bf16.mxu1 %v15234_v53  ;;  %6953 = vmatprep.mubr.bf16.mxu0 %v20872_v15 }
 0x244   :  { %v6118_v6 = vpop.f32.mrf.mxu1 }
 0x245   :  { %v18127_v6 = vpop.permute.xlu1 %7118 }
 0x246   :  { %7043 = vmatpush1.bf16.msra.mxu1 %v15232_v31  ;;  %v18078_v52 = vpop.f32.mrf.mxu1  ;;  %v18117_v31 = vpop.permute.xlu0 %7108  ;;  %20908 = vst [vmem:[#allocation19_spill] sm:$0xff] %v18127_v6 }
 0x247   :  { %20905 = vst [vmem:[#allocation27_spill] sm:$0xff] %v18117_v31 }
 0x248   :  { %v18080_v13 = vpop.f32.mrf.mxu1 }
 0x249   :  { %14003 = vmatmul.mubr.msk.bf16.vlgmr.msra.gmra.mxu1 %vm5987_vm3, %v15238_v1 }
 0x24a   :  { %13992 = vmatmul.mubr.msk.bf16.gmra.mxu0 %vm5987_vm3, %v15239_v8  ;;  %7070 = vmatprep.mubr.bf16.mxu1 %v20872_v15  ;;  %v18082_v40 = vpop.f32.mrf.mxu1  ;;  %v18125_v4 = vpop.permute.xlu0 %7831 }
 0x24b   :  { %20907 = vst [vmem:[#allocation24_spill] sm:$0xff] %v18125_v4 }
 0x24c   :  { %v18085_v22 = vpop.f32.mrf.mxu1 }
 0x24e   :  { %v18087_v26 = vpop.f32.mrf.mxu1 }
 0x250   :  { %v18089_v30 = vpop.f32.mrf.mxu1 }
 0x251   :  { %14004 = vmatmul.mubr.msk.bf16.gmra.mxu1 %vm5987_vm3, %v15239_v8 }
 0x252   :  { %v6364_v11 = vpop.f32.mrf.mxu1 }
 0x254   :  { %v6365_v49 = vpop.f32.mrf.mxu1 }
 0x2ad   :  { %v6028_v23 = vpop.f32.mrf.mxu0 }
 0x2ae   :  { %v6104_v44 = vadd.f32 %v18049_v42, %v6028_v23 }
 0x2af   :  { %v18091_v14 = vpop.f32.mrf.mxu0 }
 0x2b1   :  { %v18093_v0 = vpop.f32.mrf.mxu0 }
 0x2b3   :  { %v18095_v55 = vpop.f32.mrf.mxu0 }
 0x2b5   :  { %v18097_v59 = vpop.f32.mrf.mxu0 }
 0x2b6   :  { %v6114_v42 = vadd.f32 %v18067_v29, %v18097_v59 }
 0x2b7   :  { %v18099_v56 = vpop.f32.mrf.mxu0 }
 0x2b9   :  { %v6042_v50 = vpop.f32.mrf.mxu0 }
 0x2bb   :  { %v6043_v48 = vpop.f32.mrf.mxu0 }
 0x2bc   :  { %v18129_v48 = vpop.permute.xlu0 %7829 }
 0x2bd   :  { %20909 = vst [vmem:[#allocation18_spill] sm:$0xff] %v18129_v48 }
 0x2c0   :  { %v18135_v9 = vpop.permute.xlu0 %7827 }
 0x2c1   :  { %v6289_v41 = vpop.f32.mrf.mxu0  ;;  %20911 = vst [vmem:[#allocation15_spill] sm:$0xff] %v18135_v9 }
 0x2c3   :  { %v6291_v33 = vpop.f32.mrf.mxu0 }
 0x2c4   :  { %v18141_v31 = vpop.permute.xlu0 %7819  ;;  %v6353_v20 = vadd.f32 %v18080_v13, %v6291_v33 }
 0x2c5   :  { %v6293_v24 = vpop.f32.mrf.mxu0  ;;  %20913 = vst [vmem:[#allocation9_spill] sm:$0xff] %v18141_v31  ;;  %v6106_v31 = vadd.f32 %v18054_v12, %v18091_v14 }
 0x2c7   :  { %v18101_v58 = vpop.f32.mrf.mxu0 }
 0x2c8   :  { %v18149_v9 = vpop.permute.xlu0 %7817 }
 0x2c9   :  { %v18103_v43 = vpop.f32.mrf.mxu0 }
 0x2cb   :  { %v18105_v47 = vpop.f32.mrf.mxu0 }
 0x2cc   :  { %v18165_v13 = vpop.permute.xlu0 %7815 }
 0x2cd   :  { %v6303_v37 = vpop.f32.mrf.mxu0 }
 0x2ce   :  { %v18131_v37 = vpop.permute.xlu1 %7825 }
 0x2cf   :  { %v6304_v57 = vpop.f32.mrf.mxu0  ;;  %20910 = vst [vmem:[#allocation20_spill] sm:$0xff] %v18131_v37 }
 0x2d6   :  { %v6470_v54 = vpop.f32.mrf.mxu0 }
 0x2d8   :  { %v6472_v16 = vpop.f32.mrf.mxu0 }
 0x2d9   :  { %v6488_v23 = vadd.f32 %v6472_v16, %v6106_v31 }
 0x2da   :  { %v18107_v25 = vpop.f32.mrf.mxu0 }
 0x2dc   :  { %v18109_v18 = vpop.f32.mrf.mxu0 }
 0x2de   :  { %v18111_v5 = vpop.f32.mrf.mxu0  ;;  %v6577_v28 = vpop.f32.mrf.mxu1 }
 0x2e0   :  { %v18113_v60 = vpop.f32.mrf.mxu0  ;;  %v6579_v3 = vpop.f32.mrf.mxu1 }
 0x2e2   :  { %v6581_v35 = vpop.f32.mrf.mxu1  ;;  %v6484_v61 = vpop.f32.mrf.mxu0 }
 0x2e4   :  { %v18115_v7 = vpop.f32.mrf.mxu1  ;;  %v6485_v53 = vpop.f32.mrf.mxu0 }
 0x2e6   :  { %v18121_v51 = vpop.f32.mrf.mxu1 }
 0x2e8   :  { %v18123_v1 = vpop.f32.mrf.mxu1 }
 0x2ea   :  { %v6591_v8 = vpop.f32.mrf.mxu1 }
 0x2eb   :  { %v18137_v8 = vpop.permute.xlu1 %7823 }
 0x2ec   :  { %v6592_v11 = vpop.f32.mrf.mxu1  ;;  %20912 = vst [vmem:[#allocation8_spill] sm:$0xff] %v18137_v8 }
 0x2ee   :  { %v6703_v49 = vpop.f32.mrf.mxu0 }
 0x2ef   :  { %v18145_v37 = vpop.permute.xlu1 %7821 }
 0x2f0   :  { %v6705_v50 = vpop.f32.mrf.mxu0  ;;  %20914 = vst [vmem:[#allocation29_spill] sm:$0xff] %v18145_v37  ;;  %v6487_v37 = vadd.f32 %v6470_v54, %v6104_v44  ;;  %v6116_v44 = vadd.f32 %v18070_v36, %v18099_v56 }
 0x2f2   :  { %v6707_v57 = vpop.f32.mrf.mxu0 }
 0x2f3   :  { %v18151_v8 = vpop.permute.xlu1 %7813 }
 0x2f4   :  { %v6709_v61 = vpop.f32.mrf.mxu0  ;;  %20915 = vst [vmem:[#allocation7_spill] sm:$0xff] %v18151_v8  ;;  %v6720_v8 = vadd.f32 %v6703_v49, %v6487_v37  ;;  %v6492_v37 = vadd.f32 %v18113_v60, %v6116_v44 }
 0x2f5   :  { %v6810_v53 = vpop.f32.mrf.mxu1 }
 0x2f6   :  { %v18133_v15 = vpop.f32.mrf.mxu0 }
 0x2f7   :  { %v6812_v63 = vpop.f32.mrf.mxu1  ;;  %v18172_v29 = vpop.permute.xlu1 %8072 }
 0x2f8   :  { %v18139_v4 = vpop.f32.mrf.mxu0 }
 0x2f9   :  { %v6814_v34 = vpop.f32.mrf.mxu1 }
 0x2fa   :  { %v6717_v11 = vpop.f32.mrf.mxu0 }
 0x2fb   :  { %v6816_v6 = vpop.f32.mrf.mxu1  ;;  %v6351_v11 = vadd.f32 %v18078_v52, %v6289_v41  ;;  %v6355_v52 = vadd.f32 %v18082_v40, %v6293_v24  ;;  %v6595_v41 = vadd.f32 %v6579_v3, %v6353_v20  ;;  %v6721_v40 = vadd.f32 %v6705_v50, %v6488_v23  ;;  %v18188_v50 = vpop.permute.xlu0 %7811 }
 0x2fc   :  { %v6718_v17 = vpop.f32.mrf.mxu0  ;;  %v6361_v24 = vadd.f32 %v18087_v26, %v18103_v43 }
 0x2fd   :  { %v18143_v48 = vpop.f32.mrf.mxu1  ;;  %v6594_v27 = vadd.f32 %v6577_v28, %v6351_v11  ;;  %v6828_v59 = vadd.f32 %v6812_v63, %v6595_v41  ;;  %v6363_v63 = vadd.f32 %v18089_v30, %v18105_v47 }
 0x2ff   :  { %v18147_v38 = vpop.f32.mrf.mxu1  ;;  %v6827_v12 = vadd.f32 %v6810_v53, %v6594_v27  ;;  %v6599_v30 = vadd.f32 %v18123_v1, %v6363_v63 }
 0x301   :  { %v6824_v10 = vpop.f32.mrf.mxu1 }
 0x302   :  { %v6945_v39 = vpop.f32.mrf.mxu0  ;;  %v6108_v10 = vadd.f32 %v18057_v21, %v18093_v0  ;;  %v6357_v21 = vadd.f32 %v18085_v22, %v18101_v58  ;;  %v6596_v0 = vadd.f32 %v6581_v35, %v6355_v52  ;;  %v6598_v35 = vadd.f32 %v18121_v51, %v6361_v24  ;;  %v18193_v51 = vpop.permute.xlu1 %8066  ;;  %v18256_v24 = vld [vmem:[#allocation2 + $0x4c] ss:$12 sps:$4 sm:$0xff]  }
 0x303   :  { %v6825_v62 = vpop.f32.mrf.mxu1  ;;  %v6962_v20 = vadd.f32 %v6945_v39, %v6720_v8  ;;  %v6491_v39 = vadd.f32 %v18111_v5, %v6114_v42  ;;  %v6725_v8 = vadd.f32 %v18139_v4, %v6492_v37  ;;  %v18208_v4 = vpop.permute.xlu0 %8070  ;;  %v15367_v37 = vld [vmem:[#allocation2 + $0x68] ss:$12 sps:$4 sm:$0xff]  }
 0x304   :  { %v6947_v17 = vpop.f32.mrf.mxu0  ;;  %v6110_v62 = vadd.f32 %v18064_v46, %v18095_v55  ;;  %v6489_v46 = vadd.f32 %v18107_v25, %v6108_v10  ;;  %v6597_v36 = vadd.f32 %v18115_v7, %v6357_v21  ;;  %v6829_v58 = vadd.f32 %v6814_v34, %v6596_v0  ;;  %v18226_v21 = vld [vmem:[#allocation2 + $0x64] ss:$12 sps:$4 sm:$0xff]   ;;  %v18234_v0 = vld [vmem:[#allocation2 + $0x48] ss:$12 sps:$4 sm:$0xff]  }
 0x305   :  { %v6963_v16 = vadd.f32 %v6947_v17, %v6721_v40  ;;  %v6724_v47 = vadd.f32 %v18133_v15, %v6491_v39  ;;  %v6832_v17 = vadd.f32 %v18147_v38, %v6599_v30  ;;  %v20927_v39 = vld [vmem:[#allocation11_spill] sm:$0xff] }
 0x306   :  { %v6949_v2 = vpop.f32.mrf.mxu0  ;;  %v6490_v54 = vadd.f32 %v18109_v18, %v6110_v62  ;;  %v6722_v56 = vadd.f32 %v6707_v57, %v6489_v46  ;;  %v6830_v18 = vadd.f32 %v6816_v6, %v6597_v36  ;;  %v18210_v23 = vpop.permute.xlu1 %8064  ;;  %v18230_v46 = vld [vmem:[#allocation2 + $0x60] ss:$12 sps:$4 sm:$0xff]  }
 0x308   :  { %v6951_v14 = vpop.f32.mrf.mxu0  ;;  %v6723_v26 = vadd.f32 %v6709_v61, %v6490_v54  ;;  %v6964_v31 = vadd.f32 %v6949_v2, %v6722_v56  ;;  %v6831_v2 = vadd.f32 %v18143_v48, %v6598_v35  ;;  %v18262_v54 = vld [vmem:[#allocation2 + $0x30] ss:$12 sps:$4 sm:$0xff]  }
 0x309   :  { %v7062_v55 = vpop.f32.mrf.mxu1  ;;  %v20929_v35 = vld [vmem:[#allocation33_spill] sm:$0xff] }
 0x30a   :  { %v7079_v33 = vadd.f32 %v7062_v55, %v6827_v12  ;;  %v6955_v27 = vpop.f32.mrf.mxu0  ;;  %v6965_v6 = vadd.f32 %v6951_v14, %v6723_v26  ;;  %v18218_v12 = vld [vmem:[#allocation2 + $0x68] ss:$12 sps:$4 sm:$0xff]   ;;  %v18222_v14 = vpop.permute.xlu0 %8068 }
 0x30b   :  { %v7064_v22 = vpop.f32.mrf.mxu1  ;;  %v6966_v60 = vadd.f32 %v6955_v27, %v6724_v47  ;;  %v18224_v44 = vpop.permute.xlu1 %8062 }
 0x30c   :  { %v18178_v25 = vmax.f32 %v6962_v20, %v7079_v33  ;;  %v7080_v28 = vadd.f32 %v7064_v22, %v6828_v59  ;;  %v6957_v3 = vpop.f32.mrf.mxu0  ;;  %v18244_v59 = vld [vmem:[#allocation2 + $0x34] ss:$12 sps:$4 sm:$0xff]   ;;  %v18248_v20 = vld [vmem:[#allocation2 + $0x38] ss:$12 sps:$4 sm:$0xff]  }
 0x30d   :  { %v7066_v43 = vpop.f32.mrf.mxu1  ;;  %v6967_v62 = vadd.f32 %v6957_v3, %v6725_v8 }
 0x30e   :  { %v18184_v7 = vmax.f32 %v6963_v16, %v7080_v28  ;;  %v7081_v49 = vadd.f32 %v7066_v43, %v6829_v58  ;;  %7094 = vrot.lane.b32.xlu0 %v18178_v25, %s15453_s19  ;;  %v6959_v34 = vpop.f32.mrf.mxu0  ;;  %v18238_v55 = vpop.permute.xlu0 %8060  ;;  %v20922_v58 = vld [vmem:[#allocation31_spill] sm:$0xff]  ;;  %v20923_v16 = vld [vmem:[#allocation12_spill] sm:$0xff] }
 0x30f   :  { %v7068_v5 = vpop.f32.mrf.mxu1  ;;  %v18240_v40 = vpop.permute.xlu1 %8240  ;;  %v20924_v28 = vld [vmem:[#allocation35_spill] sm:$0xff] }
 0x310   :  { %v18196_v57 = vmax.f32 %v6964_v31, %v7081_v49  ;;  %v7082_v61 = vadd.f32 %v7068_v5, %v6830_v18  ;;  %v6960_v53 = vpop.f32.mrf.mxu0  ;;  %20916 = vst [vmem:[#allocation5_spill] sm:$0xff] %v18240_v40  ;;  %v20932_v18 = vld [vmem:[#allocation14_spill] sm:$0xff]  ;;  %v20933_v31 = vld [vmem:[#allocation3_spill] sm:$0xff] }
 0x311   :  { %v7072_v11 = vpop.f32.mrf.mxu1  ;;  %v18598_v40 = vld [vmem:[#allocation2 + $0x98] ss:$12 sps:$4 sm:$0xff]  }
 0x312   :  { %v18200_v10 = vmax.f32 %v6965_v6, %v7082_v61  ;;  %v7083_v1 = vadd.f32 %v7072_v11, %v6831_v2  ;;  %7414 = vrot.lane.b32.xlu0 %v18184_v7, %s15453_s19  ;;  %v18252_v33 = vpop.permute.xlu0 %8058  ;;  %20982 = vst [vmem:[#allocation66_spill] sm:$0xff] %v18598_v40 }
 0x313   :  { %v7074_v15 = vpop.f32.mrf.mxu1  ;;  %v18254_v27 = vpop.permute.xlu1 %8238 }
 0x314   :  { %v18204_v48 = vmax.f32 %v6966_v60, %v7083_v1  ;;  %v7084_v42 = vadd.f32 %v7074_v15, %v6832_v17  ;;  %7416 = vrot.lane.b32.xlu1 %v18200_v10, %s15453_s19  ;;  %20917 = vst [vmem:[#allocation28_spill] sm:$0xff] %v18254_v27  ;;  %v20940_v27 = vld [vmem:[#allocation23_spill] sm:$0xff] }
 0x315   :  { %v7076_v52 = vpop.f32.mrf.mxu1 }
 0x316   :  { %v18212_v38 = vmax.f32 %v6967_v62, %v7084_v42  ;;  %7096 = vrot.lane.b32.xlu0 %v18196_v57, %s15453_s19  ;;  %v18266_v36 = vpop.permute.xlu0 %8236 }
 0x317   :  { %v7077_v41 = vpop.f32.mrf.mxu1  ;;  %20918 = vst [vmem:[#allocation25_spill] sm:$0xff] %v18266_v36  ;;  %v18268_v56 = vpop.permute.xlu1 %8234 }
 0x318   :  { %7098 = vrot.lane.b32.xlu1 %v18204_v48, %s15453_s19  ;;  %20919 = vst [vmem:[#allocation6_spill] sm:$0xff] %v18268_v56 }
 0x31a   :  { %8337 = vrot.lane.b32.xlu0 %v18218_v12, %s15454_s13  ;;  %v18276_v22 = vpop.permute.xlu0 %8339 }
 0x31b   :  { %20920 = vst [vmem:[#allocation26_spill] sm:$0xff] %v18276_v22 }
 0x31c   :  { %8335 = vrot.lane.b32.xlu1 %v18226_v21, %s15454_s13 }
 0x31e   :  { %8333 = vrot.lane.b32.xlu0 %v18230_v46, %s15454_s13  ;;  %v18286_v3 = vpop.permute.xlu0 %8230 }
 0x31f   :  { %20925 = vst [vmem:[#allocation22_spill] sm:$0xff] %v18286_v3 }
 0x320   :  { %8226 = vrot.lane.b32.xlu1 %v18234_v0, %s15454_s13 }
 0x322   :  { %7418 = vrot.lane.b32.xlu0 %v18212_v38, %s15453_s19  ;;  %v18296_v26 = vpop.permute.xlu0 %8242 }
 0x323   :  { %20930 = vst [vmem:[#allocation16_spill] sm:$0xff] %v18296_v26 }
 0x324   :  { %8222 = vrot.lane.b32.xlu1 %v18244_v59, %s15454_s13 }
 0x326   :  { %8224 = vrot.lane.b32.xlu0 %v18248_v20, %s15454_s13  ;;  %v18306_v49 = vpop.permute.xlu0 %8343 }
 0x327   :  { %20934 = vst [vmem:[#allocation13_spill] sm:$0xff] %v18306_v49 }
 0x328   :  { %8329 = vrot.lane.b32.xlu1 %v18256_v24, %s15454_s13 }
 0x32a   :  { %8331 = vrot.lane.b32.xlu0 %v17728_v45, %s15454_s13  ;;  %v18278_v45 = vpop.permute.xlu1 %8341 }
 0x32b   :  { %20921 = vst [vmem:[#allocation21_spill] sm:$0xff] %v18278_v45 }
 0x32c   :  { %8220 = vrot.lane.b32.xlu1 %v18262_v54, %s15454_s13 }
 0x32e   :  { %8327 = vrot.lane.b32.xlu0 %v18234_v0, %s15454_s13  ;;  %v18288_v63 = vpop.permute.xlu1 %8232 }
 0x32f   :  { %20926 = vst [vmem:[#allocation17_spill] sm:$0xff] %v18288_v63 }
 0x330   :  { %8460 = vrot.lane.b32.xlu1 %v17891_v19, %s15455_s11 }
 0x332   :  { %8462 = vrot.lane.b32.xlu0 %v17856_v32, %s15455_s11  ;;  %v20928_v32 = vld [vmem:[#allocation4_spill] sm:$0xff]  ;;  %v18298_v43 = vpop.permute.xlu1 %8228 }
 0x333   :  { %20931 = vst [vmem:[#allocation10_spill] sm:$0xff] %v18298_v43 }
 0x334   :  { %8567 = vrot.lane.b32.xlu1 %v20922_v58, %s15455_s11 }
 0x336   :  { %8569 = vrot.lane.b32.xlu0 %v20923_v16, %s15455_s11  ;;  %v18308_v34 = vpop.permute.xlu1 %7833 }
 0x338   :  { %8458 = vrot.lane.b32.xlu1 %v20924_v28, %s15455_s11 }
 0x33a   :  { %8565 = vrot.lane.b32.xlu0 %v20927_v39, %s15455_s11  ;;  %v18317_v30 = vpop.permute.xlu1 %8074  ;;  %v20939_v39 = vld [vmem:[#allocation27_spill] sm:$0xff] }
 0x33c   :  { %8454 = vrot.lane.b32.xlu1 %v20928_v32, %s15455_s11 }
 0x33e   :  { %8456 = vrot.lane.b32.xlu0 %v20929_v35, %s15455_s11  ;;  %v18321_v5 = vpop.permute.xlu1 %7837 }
 0x340   :  { %8561 = vrot.lane.b32.xlu1 %v17891_v19, %s15455_s11  ;;  %v18315_v19 = vpop.permute.xlu0 %8076 }
 0x342   :  { %8563 = vrot.lane.b32.xlu0 %v20932_v18, %s15455_s11  ;;  %v18325_v6 = vpop.permute.xlu1 %7835 }
 0x344   :  { %8452 = vrot.lane.b32.xlu1 %v20933_v31, %s15455_s11  ;;  %v18319_v47 = vpop.permute.xlu0 %8345 }
 0x345   :  { %20935 = vst [vmem:[#allocation31_spill] sm:$0xff] %v18319_v47 }
 0x346   :  { %8559 = vrot.lane.b32.xlu0 %v20924_v28, %s15455_s11  ;;  %v18329_v53 = vpop.permute.xlu1 %8078 }
 0x348   :  { %8448 = vrot.lane.b32.xlu1 %v18226_v21, %s15455_s11  ;;  %v18323_v2 = vpop.permute.xlu0 %7839 }
 0x34a   :  { %8450 = vrot.lane.b32.xlu0 %v15367_v37, %s15455_s11  ;;  %v18333_v11 = vpop.permute.xlu1 %8246 }
 0x34c   :  { %v18327_v61 = vpop.permute.xlu0 %8080 }
 0x34e   :  { %v18337_v60 = vpop.permute.xlu1 %8244 }
 0x34f   :  { %20937 = vst [vmem:[#allocation35_spill] sm:$0xff] %v18337_v60  ;;  %v18609_v60 = vld [vmem:[#allocation2 + $0x80] ss:$12 sps:$4 sm:$0xff]  }
 0x350   :  { %v18331_v8 = vpop.permute.xlu0 %8248 }
 0x352   :  { %v18341_v15 = vpop.permute.xlu1 %8347 }
 0x353   :  { %20938 = vst [vmem:[#allocation11_spill] sm:$0xff] %v18341_v15  ;;  %v14019_v15 = vld [vmem:[%s20735_s5 + $0x38] sm:$0xff] }
 0x354   :  { %v18335_v17 = vpop.permute.xlu0 %8349 }
 0x355   :  { %20936 = vst [vmem:[#allocation12_spill] sm:$0xff] %v18335_v17 }
 0x356   :  { %v18345_v42 = vpop.permute.xlu1 %8084 }
 0x358   :  { %v18339_v1 = vpop.permute.xlu0 %8082 }
 0x35a   :  { %v18349_v41 = vpop.permute.xlu1 %8353 }
 0x35c   :  { %v18343_v62 = vpop.permute.xlu0 %8351 }
 0x35e   :  { %v18352_v28 = vpop.permute.xlu1 %8086 }
 0x360   :  { %v18347_v52 = vpop.permute.xlu0 %8355 }
 0x380   :  { %v7095_v58 = vpop.permute.xlu0 %7094 }
 0x381   :  { %v7103_v16 = vmax.f32 %v18178_v25, %v7095_v58 }
 0x383   :  { %v7121_v35 = vadd.f32 %v20939_v39, %v7103_v16 }
 0x384   :  { %v7415_v18 = vpop.permute.xlu0 %7414 }
 0x385   :  { %v7124_v37 = vmax.f32 %v7121_v35, 0.0  ;;  %v7423_v43 = vmax.f32 %v18184_v7, %v7415_v18  ;;  %v20944_v18 = vld [vmem:[#allocation34_spill] sm:$0xff] }
 0x386   :  { %v7417_v3 = vpop.permute.xlu1 %7416 }
 0x387   :  { %v7426_v63 = vadd.f32 %v7423_v43, %v20939_v39  ;;  %v7424_v56 = vmax.f32 %v18200_v10, %v7417_v3  ;;  %7137 = vrot.lane.b32.xlu1 %v7124_v37, %s15454_s13  ;;  %v20942_v10 = vld [vmem:[#allocation19_spill] sm:$0xff] }
 0x388   :  { %v7097_v36 = vpop.permute.xlu0 %7096 }
 0x389   :  { %v7429_v22 = vmax.f32 %v7426_v63, 0.0  ;;  %v7427_v45 = vadd.f32 %v7424_v56, %v20940_v27  ;;  %v7104_v25 = vmax.f32 %v18196_v57, %v7097_v36 }
 0x38a   :  { %v7099_v58 = vpop.permute.xlu1 %7098 }
 0x38b   :  { %v7430_v49 = vmax.f32 %v7427_v45, 0.0  ;;  %v7122_v16 = vadd.f32 %v20940_v27, %v7104_v25  ;;  %v7105_v35 = vmax.f32 %v18204_v48, %v7099_v58  ;;  %7579 = vrot.lane.b32.xlu0 %v7429_v22, %s15454_s13  ;;  %v20945_v25 = vld [vmem:[#allocation30_spill] sm:$0xff] }
 0x38c   :  { %v18364_v7 = vpop.permute.xlu0 %8337  ;;  %v15368_v58 = vld [vmem:[#allocation2 + $0x50] ss:$12 sps:$4 sm:$0xff]  }
 0x38d   :  { %20941 = vst [vmem:[#allocation4_spill] sm:$0xff] %v18364_v7  ;;  %v7125_v43 = vmax.f32 %v7122_v16, 0.0  ;;  %v7123_v3 = vadd.f32 %v20942_v10, %v7105_v35  ;;  %7581 = vrot.lane.b32.xlu1 %v7430_v49, %s15454_s13 }
 0x38f   :  { %v7126_v63 = vmax.f32 %v7123_v3, 0.0  ;;  %7139 = vrot.lane.b32.xlu0 %v7125_v43, %s15454_s13 }
 0x390   :  { %v18369_v56 = vpop.permute.xlu0 %8333 }
 0x391   :  { %20943 = vst [vmem:[#allocation33_spill] sm:$0xff] %v18369_v56  ;;  %7141 = vrot.lane.b32.xlu1 %v7126_v63, %s15454_s13  ;;  %v18576_v56 = vld [vmem:[#allocation2 + $0xe0] ss:$12 sps:$4 sm:$0xff]  }
 0x392   :  { %20979 = vst [vmem:[#allocation63_spill] sm:$0xff] %v18576_v56 }
 0x394   :  { %v7419_v57 = vpop.permute.xlu0 %7418 }
 0x395   :  { %v7425_v36 = vmax.f32 %v18212_v38, %v7419_v57  ;;  %v18384_v38 = vpop.permute.xlu1 %8335 }
 0x396   :  { %20946 = vst [vmem:[#allocation14_spill] sm:$0xff] %v18384_v38  ;;  %v18592_v38 = vld [vmem:[#allocation2 + $0xb0] ss:$12 sps:$4 sm:$0xff]  }
 0x397   :  { %v7428_v48 = vadd.f32 %v7425_v36, %v20942_v10  ;;  %v7127_v36 = vld [vmem:[%s20735_s5] sm:$0xff]  ;;  %20981 = vst [vmem:[#allocation65_spill] sm:$0xff] %v18592_v38 }
 0x398   :  { %v18390_v3 = vpop.permute.xlu0 %8224 }
 0x399   :  { %v7431_v45 = vmax.f32 %v7428_v48, 0.0  ;;  %v18386_v16 = vpop.permute.xlu1 %8226  ;;  %20949 = vst [vmem:[#allocation30_spill] sm:$0xff] %v18390_v3  ;;  %v18558_v3 = vld [vmem:[#allocation2 + $0x68] ss:$12 sps:$4 sm:$0xff]  }
 0x39a   :  { %20947 = vst [vmem:[#allocation3_spill] sm:$0xff] %v18386_v16  ;;  %20974 = vst [vmem:[#allocation58_spill] sm:$0xff] %v18558_v3  ;;  %v18568_v16 = vld [vmem:[#allocation2 + $0xdc] ss:$12 sps:$4 sm:$0xff]  }
 0x39b   :  { %7583 = vrot.lane.b32.xlu0 %v7431_v45, %s15454_s13  ;;  %20977 = vst [vmem:[#allocation61_spill] sm:$0xff] %v18568_v16 }
 0x39d   :  { %v18388_v35 = vpop.permute.xlu1 %8222 }
 0x39e   :  { %20948 = vst [vmem:[#allocation34_spill] sm:$0xff] %v18388_v35  ;;  %v18543_v35 = vld [vmem:[#allocation2 + $0x90] ss:$12 sps:$4 sm:$0xff]  }
 0x39f   :  { %8557 = vrot.lane.b32.xlu0 %v20944_v18, %s15455_s11 }
 0x3a1   :  { %v18392_v57 = vpop.permute.xlu1 %8329 }
 0x3a2   :  { %20950 = vst [vmem:[#allocation36_spill] sm:$0xff] %v18392_v57 }
 0x3a3   :  { %8553 = vrot.lane.b32.xlu0 %v20945_v25, %s15455_s11 }
 0x3a5   :  { %v18407_v48 = vpop.permute.xlu1 %8220 }
 0x3a6   :  { %20952 = vst [vmem:[#allocation38_spill] sm:$0xff] %v18407_v48 }
 0x3a7   :  { %8444 = vrot.lane.b32.xlu0 %v15368_v58, %s15455_s11 }
 0x3a9   :  { %v18418_v25 = vpop.permute.xlu1 %8460 }
 0x3aa   :  { %20954 = vst [vmem:[#allocation40_spill] sm:$0xff] %v18418_v25 }
 0x3ab   :  { %8551 = vrot.lane.b32.xlu0 %v18218_v12, %s15455_s11  ;;  %v7129_v12 = vld [vmem:[%s20735_s5 + $0x10] sm:$0xf] }
 0x3ac   :  { %14536 = vmatprep.subr.msk.mxu1 %vm178_vm0, %v7129_v12 }
 0x3ad   :  { %14537 = vmatpush3.msk.msra.mxu1 %vm178_vm0, %v7129_v12  ;;  %v18422_v12 = vpop.permute.xlu1 %8567 }
 0x3ae   :  { %20956 = vst [vmem:[#allocation42_spill] sm:$0xff] %v18422_v12  ;;  %v18531_v12 = vld [vmem:[#allocation2 + $0x94] ss:$12 sps:$4 sm:$0xff]  }
 0x3af   :  { %8547 = vrot.lane.b32.xlu0 %v18230_v46, %s15455_s11 }
 0x3ba   :  { %7436 = vxpose.xlu1.b32.start [1/3] (short) (narrow) %v7429_v22, 32  ;;  %v7128_v22 = vld [vmem:[%s20735_s5 + $0x8] sm:$0xff] }
 0x3bb   :  { %14538 = vmatprep.subr.mxu1 %v7128_v22 }
 0x3bc   :  { %14539 = vmatpush3.msra.mxu1 %v7128_v22 }
 0x3bd   :  { %14540 = vmatprep.subr.mxu1 %v7127_v36 }
 0x3be   :  { %7437 = vxpose.xlu1.b32.cont [2/3] (short) (narrow) %v7430_v49, 32  ;;  %v18402_v49 = vpop.permute.xlu0 %8331  ;;  %14541 = vmatpush3.msra.mxu1 %v7127_v36  ;;  %v18426_v36 = vpop.permute.xlu1 %8458 }
 0x3bf   :  { %20951 = vst [vmem:[#allocation37_spill] sm:$0xff] %v18402_v49  ;;  %20958 = vst [vmem:[#allocation44_spill] sm:$0xff] %v18426_v36  ;;  %v18574_v49 = vld [vmem:[#allocation2 + $0xd8] ss:$12 sps:$4 sm:$0xff]  }
 0x3c0   :  { %20978 = vst [vmem:[#allocation62_spill] sm:$0xff] %v18574_v49 }
 0x3c2   :  { %7438 = vxpose.xlu1.b32.end [3/3] (short) (narrow) %v7431_v45, 32  ;;  %v18412_v45 = vld [vmem:[%s20735_s5 + $0x58] sm:$0xf]  ;;  %v18416_v18 = vpop.permute.xlu0 %8327 }
 0x3c3   :  { %14560 = vmatprep.subr.msk.mxu1 %vm178_vm0, %v18412_v45  ;;  %20953 = vst [vmem:[#allocation39_spill] sm:$0xff] %v18416_v18  ;;  %v18560_v18 = vld [vmem:[#allocation2 + $0x64] ss:$12 sps:$4 sm:$0xff]  }
 0x3c4   :  { %20975 = vst [vmem:[#allocation59_spill] sm:$0xff] %v18560_v18 }
 0x3c6   :  { %v18420_v58 = vpop.permute.xlu0 %8462 }
 0x3c7   :  { %20955 = vst [vmem:[#allocation41_spill] sm:$0xff] %v18420_v58 }
 0x3ca   :  { %v18424_v22 = vpop.permute.xlu0 %8569 }
 0x3cb   :  { %20957 = vst [vmem:[#allocation43_spill] sm:$0xff] %v18424_v22 }
 0x3cd   :  { %7279 = vxpose.xlu0.b32.start [1/3] (short) (narrow) %v7124_v37, 32  ;;  %v18430_v37 = vpop.permute.xlu1 %8454 }
 0x3ce   :  { %v18428_v10 = vpop.permute.xlu0 %8565  ;;  %20960 = vst [vmem:[#allocation46_spill] sm:$0xff] %v18430_v37  ;;  %v14006_v37 = vld [vmem:[%s20735_s5 + $0x20] sm:$0xff] }
 0x3cf   :  { %20959 = vst [vmem:[#allocation45_spill] sm:$0xff] %v18428_v10  ;;  %v18529_v10 = vld [vmem:[#allocation2 + $0x98] ss:$12 sps:$4 sm:$0xff]  }
 0x3d1   :  { %7280 = vxpose.xlu0.b32.cont [2/3] (short) (narrow) %v7125_v43, 32  ;;  %v18434_v39 = vpop.permute.xlu1 %8561 }
 0x3d2   :  { %v18432_v27 = vpop.permute.xlu0 %8456  ;;  %20962 = vst [vmem:[#allocation48_spill] sm:$0xff] %v18434_v39 }
 0x3d3   :  { %20961 = vst [vmem:[#allocation47_spill] sm:$0xff] %v18432_v27 }
 0x3d5   :  { %7281 = vxpose.xlu0.b32.end [3/3] (short) (narrow) %v7126_v63, 32  ;;  %v18438_v43 = vpop.permute.xlu1 %8452  ;;  %v14007_v63 = vld [vmem:[%s20735_s5 + $0x28] sm:$0xf] }
 0x3d6   :  { %v18436_v48 = vpop.permute.xlu0 %8563  ;;  %20964 = vst [vmem:[#allocation50_spill] sm:$0xff] %v18438_v43  ;;  %14524 = vmatprep.subr.msk.mxu0 %vm178_vm0, %v14007_v63  ;;  %v14005_v43 = vld [vmem:[%s20735_s5 + $0x18] sm:$0xff] }
 0x3d7   :  { %20963 = vst [vmem:[#allocation49_spill] sm:$0xff] %v18436_v48  ;;  %14525 = vmatpush3.msk.msra.mxu0 %vm178_vm0, %v14007_v63  ;;  %v18460_v63 = vld [vmem:[%s20735_s5 + $0x40] sm:$0xf]  ;;  %v20968_v48 = vld [vmem:[#allocation32_spill] sm:$0xff] }
 0x3d8   :  { %14526 = vmatprep.subr.mxu0 %v14006_v37 }
 0x3d9   :  { %v18447_v25 = vpop.permute.xlu1 %8448  ;;  %14527 = vmatpush3.msra.mxu0 %v14006_v37 }
 0x3da   :  { %v18445_v36 = vpop.permute.xlu0 %8559  ;;  %20966 = vst [vmem:[#allocation52_spill] sm:$0xff] %v18447_v25  ;;  %14528 = vmatprep.subr.mxu0 %v14005_v43 }
 0x3db   :  { %20965 = vst [vmem:[#allocation51_spill] sm:$0xff] %v18445_v36  ;;  %14529 = vmatpush3.msra.mxu0 %v14005_v43 }
 0x3dc   :  { %14548 = vmatprep.subr.msk.mxu0 %vm178_vm0, %v18460_v63 }
 0x3de   :  { %v18452_v27 = vpop.permute.xlu0 %8450 }
 0x3df   :  { %20967 = vst [vmem:[#allocation53_spill] sm:$0xff] %v18452_v27 }
 0x3f9   :  { %v7138_v39 = vpop.permute.xlu1 %7137 }
 0x3fa   :  { %7146 = vxpose.xlu1.b32.start [1/3] (short) (narrow) %v7138_v39, 32 }
 0x3fd   :  { %v7580_v25 = vpop.permute.xlu0 %7579 }
 0x3fe   :  { %7588 = vxpose.xlu0.b32.start [1/3] (short) (narrow) %v7580_v25, 32 }
 0x3ff   :  { %v7582_v27 = vpop.permute.xlu1 %7581 }
 0x401   :  { %v7140_v36 = vpop.permute.xlu0 %7139 }
 0x402   :  { %7147 = vxpose.xlu1.b32.cont [2/3] (short) (narrow) %v7140_v36, 32  ;;  %7589 = vxpose.xlu0.b32.cont [2/3] (short) (narrow) %v7582_v27, 32  ;;  %v15369_v36 = vld [vmem:[#allocation2 + $0x50] ss:$12 sps:$4 sm:$0xff]  }
 0x403   :  { %v7142_v39 = vpop.permute.xlu1 %7141 }
 0x406   :  { %7148 = vxpose.xlu1.b32.end [3/3] (short) (narrow) %v7142_v39, 32  ;;  %v18497_v39 = vld [vmem:[#allocation2 + $0xc4] ss:$12 sps:$4 sm:$0xff]  }
 0x40d   :  { %v7584_v37 = vpop.permute.xlu0 %7583 }
 0x40e   :  { %7590 = vxpose.xlu0.b32.end [3/3] (short) (narrow) %v7584_v37, 32 }
 0x411   :  { %v18468_v58 = vpop.permute.xlu0 %8557 }
 0x412   :  { %20969 = vst [vmem:[#allocation32_spill] sm:$0xff] %v18468_v58  ;;  %v18518_v58 = vld [vmem:[#allocation2 + $0xb0] ss:$12 sps:$4 sm:$0xff]  }
 0x415   :  { %v18472_v25 = vpop.permute.xlu0 %8553 }
 0x416   :  { %20970 = vst [vmem:[#allocation54_spill] sm:$0xff] %v18472_v25  ;;  %v18515_v25 = vld [vmem:[#allocation2 + $0xa8] ss:$12 sps:$4 sm:$0xff]  }
 0x419   :  { %v18478_v27 = vpop.permute.xlu0 %8444 }
 0x41a   :  { %20971 = vst [vmem:[#allocation55_spill] sm:$0xff] %v18478_v27  ;;  %v18505_v27 = vld [vmem:[#allocation2 + $0xc0] ss:$12 sps:$4 sm:$0xff]  }
 0x428   :  { %8555 = vrot.lane.b32.xlu1 %v20968_v48, %s15455_s11  ;;  %v18484_v48 = vpop.permute.xlu0 %8551 }
 0x429   :  { %20972 = vst [vmem:[#allocation56_spill] sm:$0xff] %v18484_v48  ;;  %v14027_v48 = vld [vmem:[%s20735_s5 + $0x50] sm:$0xff] }
 0x42c   :  { %8446 = vrot.lane.b32.xlu1 %v18230_v46, %s15455_s11  ;;  %v18493_v43 = vpop.permute.xlu0 %8547 }
 0x42d   :  { %20973 = vst [vmem:[#allocation57_spill] sm:$0xff] %v18493_v43 }
 0x430   :  { %8442 = vrot.lane.b32.xlu1 %v18256_v24, %s15455_s11 }
 0x434   :  { %8549 = vrot.lane.b32.xlu1 %v18226_v21, %s15455_s11 }
 0x436   :  { %v7452_v57 = vpop.trf.xlu1 }
 0x438   :  { %8440 = vrot.lane.b32.xlu1 %v18234_v0, %s15455_s11 }
 0x43b   :  { %8438 = vrot.lane.b32.xlu0 %v18248_v20, %s15455_s11  ;;  %v18495_v20 = vld [vmem:[#allocation2 + $0xc8] ss:$12 sps:$4 sm:$0xff]  }
 0x43c   :  { %8436 = vrot.lane.b32.xlu1 %v18244_v59, %s15455_s11 }
 0x43f   :  { %8545 = vrot.lane.b32.xlu0 %v15369_v36, %s15455_s11  ;;  %v18503_v36 = vld [vmem:[#allocation2 + $0xac] ss:$12 sps:$4 sm:$0xff]  }
 0x440   :  { %8543 = vrot.lane.b32.xlu1 %v18256_v24, %s15455_s11 }
 0x443   :  { %8541 = vrot.lane.b32.xlu0 %v18234_v0, %s15455_s11 }
 0x444   :  { %8434 = vrot.lane.b32.xlu1 %v18262_v54, %s15455_s11 }
 0x447   :  { %9629 = vrot.lane.b32.xlu0 %v18495_v20, %s15453_s19 }
 0x448   :  { %9627 = vrot.lane.b32.xlu1 %v18497_v39, %s15453_s19 }
 0x449   :  { %v7295_v37 = vpop.trf.xlu0 }
 0x44a   :  { %14542 = vmatprep.mubr.msk.f32.mxu1 %vm7178_vm7, %v7295_v37  ;;  %v14026_v37 = vld [vmem:[%s20735_s5 + $0x48] sm:$0xff] }
 0x44b   :  { %9621 = vrot.lane.b32.xlu0 %v18503_v36, %s15453_s19 }
 0x44c   :  { %9625 = vrot.lane.b32.xlu1 %v18505_v27, %s15453_s19 }
 0x44d   :  { %v7296_v43 = vpop.trf.xlu0 }
 0x44e   :  { %14543 = vmatmul.mubr.msk.f32.vlgmr.msra.gmra.mxu1 %vm7178_vm7, %v7296_v43 }
 0x44f   :  { %14561 = vmatpush3.msk.msra.mxu1 %vm178_vm0, %v18412_v45  ;;  %9619 = vrot.lane.b32.xlu0 %v18515_v25, %s15453_s19  ;;  %v18536_v45 = vld [vmem:[#allocation2 + $0x94] ss:$12 sps:$4 sm:$0xff]  }
 0x450   :  { %14562 = vmatprep.subr.mxu1 %v14027_v48  ;;  %9623 = vrot.lane.b32.xlu1 %v18518_v58, %s15453_s19 }
 0x451   :  { %14563 = vmatpush3.msra.mxu1 %v14027_v48  ;;  %v7297_v43 = vpop.trf.xlu0  ;;  %v18541_v48 = vld [vmem:[#allocation2 + $0x7c] ss:$12 sps:$4 sm:$0xff]  }
 0x452   :  { %14564 = vmatprep.subr.mxu1 %v14026_v37  ;;  %14545 = vmatprep.mubr.msk.f32.mxu1 %vm7178_vm7, %v7297_v43  ;;  %v18552_v43 = vld [vmem:[#allocation2 + $0x80] ss:$12 sps:$4 sm:$0xff]  }
 0x453   :  { %14565 = vmatpush3.msra.mxu1 %v14026_v37  ;;  %9617 = vrot.lane.b32.xlu0 %v18529_v10, %s15453_s19  ;;  %v18550_v37 = vld [vmem:[#allocation2 + $0x78] ss:$12 sps:$4 sm:$0xff]  }
 0x454   :  { %7928 = vmatprep.subr.bf16.mxu1 %v18536_v45  ;;  %9615 = vrot.lane.b32.xlu1 %v18531_v12, %s15453_s19 }
 0x455   :  { %v7298_v22 = vpop.trf.xlu0 }
 0x456   :  { %14546 = vmatmul.mubr.msk.f32.gmra.mxu1 %vm7178_vm7, %v7298_v22  ;;  %v18566_v22 = vld [vmem:[#allocation2 + $0x60] ss:$12 sps:$4 sm:$0xff]  }
 0x457   :  { %9609 = vrot.lane.b32.xlu0 %v18541_v48, %s15453_s19  ;;  %20976 = vst [vmem:[#allocation60_spill] sm:$0xff] %v18566_v22 }
 0x458   :  { %9613 = vrot.lane.b32.xlu1 %v18543_v35, %s15453_s19 }
 0x45b   :  { %9607 = vrot.lane.b32.xlu0 %v18550_v37, %s15453_s19 }
 0x45c   :  { %9611 = vrot.lane.b32.xlu1 %v18552_v43, %s15453_s19 }
 0x45f   :  { %9605 = vrot.lane.b32.xlu0 %v18558_v3, %s15453_s19  ;;  %v7453_v3 = vpop.trf.xlu1 }
 0x460   :  { %9603 = vrot.lane.b32.xlu1 %v18560_v18, %s15453_s19  ;;  %v18582_v18 = vld [vmem:[#allocation2 + $0xc8] ss:$12 sps:$4 sm:$0xff]  }
 0x461   :  { %20980 = vst [vmem:[#allocation64_spill] sm:$0xff] %v18582_v18 }
 0x463   :  { %9601 = vrot.lane.b32.xlu0 %v18566_v22, %s15453_s19  ;;  %v7454_v22 = vpop.trf.xlu1 }
 0x464   :  { %9874 = vrot.lane.b32.xlu1 %v18568_v16, %s15453_s19 }
 0x467   :  { %9872 = vrot.lane.b32.xlu0 %v18574_v49, %s15453_s19  ;;  %v7455_v7 = vpop.trf.xlu1 }
 0x468   :  { %9876 = vrot.lane.b32.xlu1 %v18576_v56, %s15453_s19 }
 0x46b   :  { %9870 = vrot.lane.b32.xlu0 %v18582_v18, %s15453_s19 }
 0x46c   :  { %9868 = vrot.lane.b32.xlu1 %v18497_v39, %s15453_s19 }
 0x46f   :  { %9866 = vrot.lane.b32.xlu0 %v18505_v27, %s15453_s19 }
 0x470   :  { %9862 = vrot.lane.b32.xlu1 %v18503_v36, %s15453_s19 }
 0x473   :  { %9860 = vrot.lane.b32.xlu0 %v18515_v25, %s15453_s19 }
 0x474   :  { %9864 = vrot.lane.b32.xlu1 %v18592_v38, %s15453_s19 }
 0x477   :  { %9858 = vrot.lane.b32.xlu0 %v18598_v40, %s15453_s19 }
 0x478   :  { %9856 = vrot.lane.b32.xlu1 %v18531_v12, %s15453_s19 }
 0x47a   :  { %v7162_v26 = vpop.trf.xlu1 }
 0x47b   :  { %9850 = vrot.lane.b32.xlu0 %v18541_v48, %s15453_s19  ;;  %14530 = vmatprep.mubr.msk.f32.mxu0 %vm7178_vm7, %v7162_v26  ;;  %v14018_v26 = vld [vmem:[%s20735_s5 + $0x30] sm:$0xff] }
 0x47c   :  { %9854 = vrot.lane.b32.xlu1 %v18543_v35, %s15453_s19 }
 0x47e   :  { %v7163_v47 = vpop.trf.xlu1 }
 0x47f   :  { %9848 = vrot.lane.b32.xlu0 %v18550_v37, %s15453_s19  ;;  %14531 = vmatmul.mubr.msk.f32.vlgmr.msra.gmra.mxu0 %vm7178_vm7, %v7163_v47  ;;  %v7850_v47 = vsel %vm5966_vm4, %v18321_v5, %v18323_v2 }
 0x480   :  { %14549 = vmatpush3.msk.msra.mxu0 %vm178_vm0, %v18460_v63  ;;  %9852 = vrot.lane.b32.xlu1 %v18609_v60, %s15453_s19 }
 0x481   :  { %14550 = vmatprep.subr.mxu0 %v14019_v15 }
 0x482   :  { %14551 = vmatpush3.msra.mxu0 %v14019_v15  ;;  %v7604_v40 = vpop.trf.xlu0  ;;  %v7164_v17 = vpop.trf.xlu1 }
 0x483   :  { %14552 = vmatprep.subr.mxu0 %v14018_v26  ;;  %10038 = vrot.lane.b32.xlu0 %v18495_v20, %s15454_s13  ;;  %v15371_v20 = vld [vmem:[#allocation2 + $0x90] ss:$12 sps:$4 sm:$0xff]  }
 0x484   :  { %14553 = vmatpush3.msra.mxu0 %v14018_v26  ;;  %10036 = vrot.lane.b32.xlu1 %v18497_v39, %s15454_s13 }
 0x485   :  { %14533 = vmatprep.mubr.msk.f32.mxu0 %vm7178_vm7, %v7164_v17  ;;  %7867 = vmatprep.subr.bf16.mxu0 %v7850_v47  ;;  %v20983_v17 = vld [vmem:[#allocation24_spill] sm:$0xff]  ;;  %v20988_v47 = vmov 0  }
 0x486   :  { %14566 = vmatprep.mubr.msk.f32.mxu1 %vm7178_vm7, %v7604_v40  ;;  %v7605_v15 = vpop.trf.xlu0  ;;  %v7165_v63 = vpop.trf.xlu1  ;;  %v7849_v40 = vsel %vm5966_vm4, %v18325_v6, %v18321_v5  ;;  %v20984_v5 = vld [vmem:[#allocation18_spill] sm:$0xff] }
 0x487   :  { %10145 = vrot.lane.b32.xlu0 %v18576_v56, %s15454_s13  ;;  %14534 = vmatmul.mubr.msk.f32.gmra.mxu0 %vm7178_vm7, %v7165_v63  ;;  %v7847_v6 = vsel %vm5966_vm4, %v20984_v5, %v20983_v17  ;;  %v20990_v63 = vld [vmem:[#allocation9_spill] sm:$0xff] }
 0x488   :  { %14567 = vmatmul.mubr.msk.f32.vlgmr.msra.gmra.mxu1 %vm7178_vm7, %v7605_v15  ;;  %10143 = vrot.lane.b32.xlu1 %v18568_v16, %s15454_s13  ;;  %v20989_v15 = vld [vmem:[#allocation29_spill] sm:$0xff] }
 0x489   :  { %7929 = vmatpush1.bf16.msra.mxu1 %v15371_v20  ;;  %14554 = vmatprep.mubr.msk.f32.mxu0 %vm7178_vm7, %v7452_v57  ;;  %v7848_v57 = vsel %vm5966_vm4, %v20983_v17, %v18308_v34  ;;  %v20985_v34 = vld [vmem:[#allocation15_spill] sm:$0xff]  ;;  %v20999_v5 = vld [vmem:[#allocation21_spill] sm:$0xff] }
 0x48a   :  { %7930 = vmatprep.subr.bf16.mxu1 %v20928_v32  ;;  %v7606_v2 = vpop.trf.xlu0 }
 0x48b   :  { %10141 = vrot.lane.b32.xlu0 %v18574_v49, %s15454_s13  ;;  %14555 = vmatmul.mubr.msk.f32.vlgmr.msra.gmra.mxu0 %vm7178_vm7, %v7453_v3 }
 0x48c   :  { %7868 = vmatpush1.bf16.msra.mxu0 %v7849_v40  ;;  %10034 = vrot.lane.b32.xlu1 %v18505_v27, %s15454_s13  ;;  %v7843_v40 = vsel %vm5966_vm4, %v18149_v9, %v20990_v63 }
 0x48d   :  { %7931 = vmatpush1.bf16.msra.mxu1 %v20933_v31  ;;  %14557 = vmatprep.mubr.msk.f32.mxu0 %vm7178_vm7, %v7454_v22  ;;  %v20986_v22 = vld [vmem:[#allocation20_spill] sm:$0xff] }
 0x48e   :  { %7932 = vmatprep.subr.bf16.mxu1 %v18226_v21  ;;  %7869 = vmatprep.subr.bf16.mxu0 %v7848_v57  ;;  %v7607_v3 = vpop.trf.xlu0  ;;  %v7846_v26 = vsel %vm5966_vm4, %v20986_v22, %v20985_v34  ;;  %v20998_v57 = vld [vmem:[#allocation13_spill] sm:$0xff]  ;;  %v21000_v34 = vld [vmem:[#allocation28_spill] sm:$0xff] }
 0x48f   :  { %10032 = vrot.lane.b32.xlu0 %v18518_v58, %s15454_s13  ;;  %14558 = vmatmul.mubr.msk.f32.gmra.mxu0 %vm7178_vm7, %v7455_v7  ;;  %v20987_v58 = vld [vmem:[#allocation8_spill] sm:$0xff] }
 0x490   :  { %7870 = vmatpush1.bf16.msra.mxu0 %v7847_v6  ;;  %14569 = vmatprep.mubr.msk.f32.mxu1 %vm7178_vm7, %v7606_v2  ;;  %v7845_v7 = vsel %vm5966_vm4, %v20987_v58, %v20986_v22  ;;  %v7844_v2 = vsel %vm5966_vm4, %v20990_v63, %v20989_v15  ;;  %v8362_v6 = vsel %vm6409_vm5, %v20999_v5, %v20998_v57  ;;  %v21003_v15 = vld [vmem:[#allocation6_spill] sm:$0xff] }
 0x491   :  { %7933 = vmatpush1.bf16.msra.mxu1 %v18230_v46  ;;  %10030 = vrot.lane.b32.xlu1 %v18503_v36, %s15454_s13 }
 0x492   :  { %7934 = vmatprep.subr.bf16.mxu1 %v18256_v24  ;;  %7871 = vmatprep.subr.bf16.mxu0 %v7846_v26  ;;  %v21001_v26 = vld [vmem:[#allocation26_spill] sm:$0xff] }
 0x493   :  { %14570 = vmatmul.mubr.msk.f32.gmra.mxu1 %vm7178_vm7, %v7607_v3  ;;  %10139 = vrot.lane.b32.xlu0 %v18582_v18, %s15454_s13  ;;  %v8361_v58 = vsel %vm6409_vm5, %v21001_v26, %v20999_v5  ;;  %v21025_v26 = vld [vmem:[#allocation41_spill] sm:$0xff] }
 0x494   :  { %7872 = vmatpush1.bf16.msra.mxu0 %v7845_v7  ;;  %7954 = vmatprep.mubr.bf16.mxu1 %v20988_v47  ;;  %v21002_v7 = vld [vmem:[#allocation25_spill] sm:$0xff] }
 0x495   :  { %7935 = vmatpush1.bf16.msra.mxu1 %v18234_v0  ;;  %10137 = vrot.lane.b32.xlu1 %v18497_v39, %s15454_s13  ;;  %v20991_v39 = vld [vmem:[#allocation7_spill] sm:$0xff]  ;;  %v8255_v63 = vsel %vm6409_vm5, %v21003_v15, %v21002_v7 }
 0x496   :  { %7936 = vmatprep.subr.bf16.mxu1 %v18244_v59  ;;  %7873 = vmatprep.subr.bf16.mxu0 %v7844_v2  ;;  %v7842_v59 = vsel %vm5966_vm4, %v20991_v39, %v18165_v13  ;;  %v7841_v9 = vsel %vm5966_vm4, %v18188_v50, %v20991_v39  ;;  %v8097_v13 = vsel %vm5966_vm4, %v18345_v42, %v18352_v28  ;;  %v21004_v2 = vld [vmem:[#allocation4_spill] sm:$0xff] }
 0x497   :  { %10135 = vrot.lane.b32.xlu0 %v18505_v27, %s15454_s13  ;;  %7893 = vmatprep.mubr.bf16.mxu0 %v20988_v47  ;;  %v8096_v27 = vsel %vm5966_vm4, %v18339_v1, %v18345_v42  ;;  %v8095_v28 = vsel %vm5966_vm4, %v18329_v53, %v18327_v61  ;;  %v8094_v1 = vsel %vm5966_vm4, %v18315_v19, %v18329_v53  ;;  %v15374_v42 = vld [vmem:[%s20733_s3 + $0x8] ss:$0 sps:$4 sm:$0x33]   ;;  %v15375_v61 = vld [vmem:[%s20733_s3 + $0x14] ss:$0 sps:$4 sm:$0x33]  }
 0x498   :  { %7874 = vmatpush1.bf16.msra.mxu0 %v7843_v40  ;;  %v20993_v53 = vld [vmem:[#allocation11_spill] sm:$0xff]  ;;  %v21005_v40 = vld [vmem:[#allocation14_spill] sm:$0xff] }
 0x499   :  { %7937 = vmatpush1.bf16.msra.mxu1 %v18262_v54  ;;  %10028 = vrot.lane.b32.xlu1 %v18515_v25, %s15454_s13  ;;  %v15372_v54 = vld [vmem:[%s20733_s3] sm:$0xff]   ;;  %v8360_v39 = vsel %vm6409_vm5, %v21005_v40, %v21004_v2 }
 0x49a   :  { %8175 = vmatprep.subr.bf16.mxu1 %v18503_v36  ;;  %7875 = vmatprep.subr.bf16.mxu0 %v7842_v59  ;;  %v18696_v17 = vpop.permute.xlu1 %8555 }
 0x49b   :  { %10026 = vrot.lane.b32.xlu0 %v18529_v10, %s15454_s13  ;;  %v15373_v10 = vld [vmem:[%s20733_s3 + $0xc] sm:$0xff]  }
 0x49c   :  { %14051 = vmatmul.mubr.msk.bf16.vlgmr.msra.gmra.mxu1 %vm5987_vm3, %v15372_v54  ;;  %7876 = vmatpush1.bf16.msra.mxu0 %v7841_v9 }
 0x49d   :  { %8176 = vmatpush1.bf16.msra.mxu1 %v18515_v25  ;;  %10024 = vrot.lane.b32.xlu1 %v18531_v12, %s15454_s13 }
 0x49e   :  { %8177 = vmatprep.subr.bf16.mxu1 %v18536_v45  ;;  %8114 = vmatprep.subr.bf16.mxu0 %v8097_v13  ;;  %v18714_v50 = vpop.permute.xlu1 %8446 }
 0x49f   :  { %14049 = vmatmul.mubr.msk.bf16.vlgmr.msra.gmra.mxu0 %vm5987_vm3, %v15373_v10  ;;  %10133 = vrot.lane.b32.xlu0 %v18592_v38, %s15454_s13 }
 0x4a0   :  { %8115 = vmatpush1.bf16.msra.mxu0 %v8096_v27  ;;  %7903 = vmatprep.mubr.bf16.mxu0 %v20988_v47  ;;  %v21008_v27 = vld [vmem:[#allocation33_spill] sm:$0xff] }
 0x4a1   :  { %8178 = vmatpush1.bf16.msra.mxu1 %v15371_v20  ;;  %10131 = vrot.lane.b32.xlu1 %v18503_v36, %s15454_s13  ;;  %v20996_v36 = vld [vmem:[#allocation16_spill] sm:$0xff] }
 0x4a2   :  { %8179 = vmatprep.subr.bf16.mxu1 %v20928_v32  ;;  %8116 = vmatprep.subr.bf16.mxu0 %v8095_v28  ;;  %v18732_v45 = vpop.permute.xlu1 %8442  ;;  %v8093_v32 = vsel %vm5966_vm4, %v18172_v29, %v18317_v30  ;;  %v8359_v28 = vsel %vm6409_vm5, %v21008_v27, %v21005_v40  ;;  %v21033_v27 = vld [vmem:[#allocation46_spill] sm:$0xff] }
 0x4a3   :  { %10129 = vrot.lane.b32.xlu0 %v18515_v25, %s15454_s13  ;;  %7964 = vmatprep.mubr.bf16.mxu1 %v20988_v47 }
 0x4a4   :  { %8117 = vmatpush1.bf16.msra.mxu0 %v8094_v1  ;;  %14052 = vmatmul.mubr.msk.bf16.gmra.mxu1 %vm5987_vm3, %v15374_v42  ;;  %v21009_v1 = vld [vmem:[#allocation22_spill] sm:$0xff] }
 0x4a5   :  { %8180 = vmatpush1.bf16.msra.mxu1 %v20933_v31  ;;  %10022 = vrot.lane.b32.xlu1 %v18543_v35, %s15454_s13  ;;  %v8092_v31 = vsel %vm5966_vm4, %v18208_v4, %v18172_v29  ;;  %v8090_v29 = vsel %vm5966_vm4, %v18210_v23, %v18193_v51  ;;  %v8089_v4 = vsel %vm5966_vm4, %v18238_v55, %v18224_v44 }
 0x4a6   :  { %8181 = vmatprep.subr.bf16.mxu1 %v18226_v21  ;;  %8118 = vmatprep.subr.bf16.mxu0 %v8093_v32  ;;  %v18751_v19 = vpop.permute.xlu1 %8549  ;;  %v8091_v21 = vsel %vm5966_vm4, %v18193_v51, %v18222_v14  ;;  %v8366_v14 = vsel %vm6409_vm5, %v18349_v41, %v18347_v52  ;;  %v8088_v51 = vsel %vm5966_vm4, %v18252_v33, %v18238_v55  ;;  %v20994_v33 = vld [vmem:[#allocation35_spill] sm:$0xff] }
 0x4a7   :  { %14050 = vmatmul.mubr.msk.bf16.gmra.mxu0 %vm5987_vm3, %v15375_v61  ;;  %10020 = vrot.lane.b32.xlu0 %v18552_v43, %s15454_s13  ;;  %v8365_v23 = vsel %vm6409_vm5, %v18343_v62, %v18349_v41  ;;  %v8259_v44 = vsel %vm6409_vm5, %v18333_v11, %v18331_v8  ;;  %v8258_v62 = vsel %vm6409_vm5, %v20994_v33, %v18333_v11  ;;  %v20995_v8 = vld [vmem:[#allocation31_spill] sm:$0xff]  ;;  %v20997_v43 = vld [vmem:[#allocation5_spill] sm:$0xff] }
 0x4a8   :  { %8119 = vmatpush1.bf16.msra.mxu0 %v8092_v31  ;;  %8201 = vmatprep.mubr.bf16.mxu1 %v20988_v47  ;;  %v8363_v41 = vsel %vm6409_vm5, %v20995_v8, %v20993_v53  ;;  %v8257_v20 = vsel %vm6409_vm5, %v20997_v43, %v20996_v36  ;;  %v8256_v22 = vsel %vm6409_vm5, %v21000_v34, %v20997_v43  ;;  %v21011_v31 = vld [vmem:[#allocation37_spill] sm:$0xff]  ;;  %v21020_v8 = vld [vmem:[#allocation42_spill] sm:$0xff] }
 0x4a9   :  { %8182 = vmatpush1.bf16.msra.mxu1 %v18230_v46  ;;  %10018 = vrot.lane.b32.xlu1 %v18541_v48, %s15454_s13 }
 0x4aa   :  { %8183 = vmatprep.subr.bf16.mxu1 %v18256_v24  ;;  %8120 = vmatprep.subr.bf16.mxu0 %v8091_v21  ;;  %v18770_v30 = vpop.permute.xlu1 %8440  ;;  %v21012_v21 = vld [vmem:[#allocation36_spill] sm:$0xff] }
 0x4ab   :  { %8140 = vmatprep.mubr.bf16.mxu0 %v20988_v47 }
 0x4ac   :  { %8121 = vmatpush1.bf16.msra.mxu0 %v8090_v29 }
 0x4ad   :  { %8184 = vmatpush1.bf16.msra.mxu1 %v18234_v0  ;;  %8122 = vmatprep.subr.bf16.mxu0 %v8089_v4  ;;  %v18783_v46 = vpop.permute.xlu0 %8438  ;;  %v20992_v0 = vld [vmem:[#allocation12_spill] sm:$0xff] }
 0x4ae   :  { %8383 = vmatprep.subr.bf16.mxu1 %v8366_v14  ;;  %v18785_v24 = vpop.permute.xlu1 %8436  ;;  %v8364_v52 = vsel %vm6409_vm5, %v20993_v53, %v20992_v0  ;;  %v21014_v14 = vld [vmem:[#allocation3_spill] sm:$0xff]  ;;  %v21017_v53 = vld [vmem:[#allocation30_spill] sm:$0xff] }
 0x4b0   :  { %14072 = vmatmul.mubr.msk.bf16.vlgmr.msra.gmra.mxu1 %vm5987_vm3, %v15372_v54  ;;  %8123 = vmatpush1.bf16.msra.mxu0 %v8088_v51  ;;  %v21006_v54 = vld [vmem:[#allocation17_spill] sm:$0xff] }
 0x4b1   :  { %8384 = vmatpush1.bf16.msra.mxu1 %v8365_v23  ;;  %8276 = vmatprep.subr.bf16.mxu0 %v8259_v44  ;;  %v18800_v25 = vpop.permute.xlu0 %8545  ;;  %v8254_v13 = vsel %vm6409_vm5, %v21006_v54, %v21003_v15  ;;  %v21016_v44 = vld [vmem:[#allocation39_spill] sm:$0xff]  ;;  %v21027_v15 = vld [vmem:[#allocation49_spill] sm:$0xff] }
 0x4b2   :  { %8385 = vmatprep.subr.bf16.mxu1 %v8364_v52  ;;  %v18802_v55 = vpop.permute.xlu1 %8543  ;;  %8211 = vmatprep.mubr.bf16.mxu1 %v20988_v47  ;;  %v8357_v0 = vsel %vm6409_vm5, %v21016_v44, %v21012_v21  ;;  %v21018_v52 = vld [vmem:[#allocation34_spill] sm:$0xff]  ;;  %v21039_v44 = vld [vmem:[#allocation52_spill] sm:$0xff] }
 0x4b3   :  { %14068 = vmatmul.mubr.msk.bf16.vlgmr.msra.gmra.mxu0 %vm5987_vm3, %v15373_v10  ;;  %v8251_v33 = vsel %vm6409_vm5, %v21018_v52, %v21017_v53  ;;  %v21040_v53 = vld [vmem:[#allocation56_spill] sm:$0xff] }
 0x4b4   :  { %8277 = vmatpush1.bf16.msra.mxu0 %v8258_v62  ;;  %8150 = vmatprep.mubr.bf16.mxu0 %v20988_v47  ;;  %v21019_v62 = vld [vmem:[#allocation43_spill] sm:$0xff] }
 0x4b5   :  { %8386 = vmatpush1.bf16.msra.mxu1 %v8363_v41  ;;  %8278 = vmatprep.subr.bf16.mxu0 %v8257_v20  ;;  %v18819_v11 = vpop.permute.xlu0 %8541  ;;  %v8580_v41 = vsel %vm6642_vm6, %v21020_v8, %v21019_v62  ;;  %v21022_v20 = vld [vmem:[#allocation38_spill] sm:$0xff] }
 0x4b6   :  { %8387 = vmatprep.subr.bf16.mxu1 %v8362_v6  ;;  %v18821_v3 = vpop.permute.xlu1 %8434  ;;  %v8250_v57 = vsel %vm6409_vm5, %v21022_v20, %v21018_v52  ;;  %v21024_v6 = vld [vmem:[#allocation45_spill] sm:$0xff]  ;;  %v8574_v52 = vsel %vm6642_vm6, %v18751_v19, %v21040_v53 }
 0x4b7   :  { %v8579_v34 = vsel %vm6642_vm6, %v21024_v6, %v21020_v8  ;;  %v21042_v8 = vld [vmem:[#allocation57_spill] sm:$0xff]  ;;  %v8465_v6 = vsel %vm6642_vm6, %v18785_v24, %v18783_v46  ;;  %v15276_v46 = vld [vmem:[#allocation2 + $0x80] ss:$12 sps:$4 sm:$0xff]  }
 0x4b8   :  { %8279 = vmatpush1.bf16.msra.mxu0 %v8256_v22  ;;  %14073 = vmatmul.mubr.msk.bf16.gmra.mxu1 %vm5987_vm3, %v15374_v42  ;;  %v21010_v42 = vld [vmem:[#allocation10_spill] sm:$0xff] }
 0x4b9   :  { %8388 = vmatpush1.bf16.msra.mxu1 %v8361_v58  ;;  %8280 = vmatprep.subr.bf16.mxu0 %v8255_v63  ;;  %v9630_v59 = vpop.permute.xlu0 %9629  ;;  %v8253_v32 = vsel %vm6409_vm5, %v21010_v42, %v21009_v1  ;;  %v8252_v51 = vsel %vm6409_vm5, %v21014_v14, %v21010_v42  ;;  %v15376_v22 = vld [vmem:[%s20733_s3 + $0x18] sm:$0xff]   ;;  %v21026_v58 = vld [vmem:[#allocation40_spill] sm:$0xff] }
 0x4ba   :  { %8389 = vmatprep.subr.bf16.mxu1 %v8360_v39  ;;  %v9628_v9 = vpop.permute.xlu1 %9627  ;;  %8409 = vmatprep.mubr.bf16.mxu1 %v20988_v47  ;;  %v8473_v7 = vsel %vm6642_vm6, %v21026_v58, %v21025_v26  ;;  %v21028_v63 = vld [vmem:[#allocation48_spill] sm:$0xff]  ;;  %v15273_v26 = vld [vmem:[#allocation2 + $0x98] ss:$12 sps:$4 sm:$0xff]  }
 0x4bb   :  { %14069 = vmatmul.mubr.msk.bf16.gmra.mxu0 %vm5987_vm3, %v15375_v61  ;;  %v18842_v10 = vsel %vm5966_vm4, %v9628_v9, %v9630_v59  ;;  %v8358_v61 = vsel %vm6409_vm5, %v21012_v21, %v21011_v31  ;;  %v8578_v2 = vsel %vm6642_vm6, %v21028_v63, %v21027_v15  ;;  %v21030_v39 = vld [vmem:[#allocation44_spill] sm:$0xff]  ;;  %v21036_v31 = vld [vmem:[#allocation50_spill] sm:$0xff] }
 0x4bc   :  { %21007 = vst [vmem:[#allocation24_spill] sm:$0xff] %v18842_v10  ;;  %8281 = vmatpush1.bf16.msra.mxu0 %v8254_v13  ;;  %8302 = vmatprep.mubr.bf16.mxu0 %v20988_v47  ;;  %v8472_v59 = vsel %vm6642_vm6, %v21030_v39, %v21026_v58  ;;  %v21032_v13 = vld [vmem:[#allocation47_spill] sm:$0xff]  ;;  %v21034_v1 = vld [vmem:[#allocation32_spill] sm:$0xff]  ;;  %v8470_v21 = vsel %vm6642_vm6, %v21036_v31, %v21033_v27  ;;  %v15282_v58 = vld [vmem:[#allocation2 + $0x50] ss:$12 sps:$4 sm:$0xff]  }
 0x4bd   :  { %8390 = vmatpush1.bf16.msra.mxu1 %v8359_v28  ;;  %8282 = vmatprep.subr.bf16.mxu0 %v8253_v32  ;;  %v18854_v29 = vpop.permute.xlu0 %9621  ;;  %v8471_v28 = vsel %vm6642_vm6, %v21033_v27, %v21032_v13  ;;  %v8576_v42 = vsel %vm6642_vm6, %v18696_v17, %v21034_v1  ;;  %v15285_v15 = vld [vmem:[#allocation2 + $0x38] ss:$12 sps:$4 sm:$0xff]  }
 0x4be   :  { %21013 = vst [vmem:[#allocation18_spill] sm:$0xff] %v18854_v29  ;;  %8391 = vmatprep.subr.bf16.mxu1 %v8358_v61  ;;  %v9626_v4 = vpop.permute.xlu1 %9625  ;;  %v15377_v61 = vld [vmem:[%s20733_s3 + $0x20] ss:$0 sps:$4 sm:$0x33]  }
 0x4bf   :  { %v18860_v23 = vsel %vm5966_vm4, %v9626_v4, %v9628_v9  ;;  %v21031_v9 = vld [vmem:[#allocation51_spill] sm:$0xff]  ;;  %v21037_v4 = vld [vmem:[#allocation54_spill] sm:$0xff] }
 0x4c0   :  { %21015 = vst [vmem:[#allocation15_spill] sm:$0xff] %v18860_v23  ;;  %8283 = vmatpush1.bf16.msra.mxu0 %v8252_v51  ;;  %v8577_v54 = vsel %vm6642_vm6, %v21031_v9, %v21028_v63  ;;  %v8575_v14 = vsel %vm6642_vm6, %v21037_v4, %v18696_v17  ;;  %v21038_v51 = vld [vmem:[#allocation53_spill] sm:$0xff]  ;;  %v8468_v17 = vsel %vm6642_vm6, %v18714_v50, %v21039_v44  ;;  %v15381_v39 = vld [vmem:[%s20733_s3 + $0x38] ss:$0 sps:$4 sm:$0x33]  }
 0x4c1   :  { %8392 = vmatpush1.bf16.msra.mxu1 %v8357_v0  ;;  %8284 = vmatprep.subr.bf16.mxu0 %v8251_v33  ;;  %v18871_v36 = vpop.permute.xlu0 %9619  ;;  %v8469_v0 = vsel %vm6642_vm6, %v21039_v44, %v21038_v51  ;;  %v8466_v50 = vsel %vm6642_vm6, %v18770_v30, %v18732_v45  ;;  %v15271_v30 = vld [vmem:[#allocation2 + $0x94] ss:$12 sps:$4 sm:$0xff]  }
 0x4c2   :  { %21021 = vst [vmem:[#allocation20_spill] sm:$0xff] %v18871_v36  ;;  %8597 = vmatprep.subr.bf16.mxu1 %v8580_v41  ;;  %v9624_v43 = vpop.permute.xlu1 %9623  ;;  %v8573_v41 = vsel %vm6642_vm6, %v21042_v8, %v18751_v19  ;;  %v8571_v19 = vsel %vm6642_vm6, %v18819_v11, %v18802_v55  ;;  %v15379_v11 = vld [vmem:[%s20733_s3 + $0x2c] ss:$0 sps:$4 sm:$0x33]   ;;  %v15283_v63 = vld [vmem:[#allocation2 + $0x34] ss:$12 sps:$4 sm:$0xff]  }
 0x4c3   :  { %v18878_v5 = vsel %vm5966_vm4, %v18854_v29, %v9624_v43  ;;  %v21043_v43 = vld [vmem:[#allocation55_spill] sm:$0xff] }
 0x4c4   :  { %21023 = vst [vmem:[#allocation8_spill] sm:$0xff] %v18878_v5  ;;  %14076 = vmatmul.mubr.msk.bf16.vlgmr.msra.gmra.mxu1 %vm5987_vm3, %v15376_v22  ;;  %8285 = vmatpush1.bf16.msra.mxu0 %v8250_v57  ;;  %v8467_v20 = vsel %vm6642_vm6, %v18732_v45, %v21043_v43  ;;  %v8572_v57 = vsel %vm6642_vm6, %v18802_v55, %v18800_v25  ;;  %v15378_v45 = vld [vmem:[%s20733_s3 + $0x24] sm:$0xff]  }
 0x4c5   :  { %8598 = vmatpush1.bf16.msra.mxu1 %v8579_v34  ;;  %8490 = vmatprep.subr.bf16.mxu0 %v8473_v7  ;;  %v18893_v40 = vpop.permute.xlu0 %9617  ;;  %v15270_v34 = vld [vmem:[#allocation2 + $0xb0] ss:$12 sps:$4 sm:$0xff]   ;;  %v8464_v25 = vsel %vm6642_vm6, %v18821_v3, %v18785_v24  ;;  %v15279_v55 = vld [vmem:[#allocation2 + $0x68] ss:$12 sps:$4 sm:$0xff]   ;;  %v15280_v7 = vld [vmem:[#allocation2 + $0x4c] ss:$12 sps:$4 sm:$0xff]  }
 0x4c6   :  { %21029 = vst [vmem:[#allocation29_spill] sm:$0xff] %v18893_v40  ;;  %8599 = vmatprep.subr.bf16.mxu1 %v8578_v2  ;;  %8419 = vmatprep.mubr.bf16.mxu1 %v20988_v47  ;;  %v15274_v24 = vld [vmem:[#allocation2 + $0x7c] ss:$12 sps:$4 sm:$0xff]   ;;  %v15277_v3 = vld [vmem:[#allocation2 + $0x64] ss:$12 sps:$4 sm:$0xff]  }
 0x4c7   :  { %14074 = vmatmul.mubr.msk.bf16.vlgmr.msra.gmra.mxu0 %vm5987_vm3, %v15376_v22  ;;  %v15268_v22 = vld [vmem:[#allocation2 + $0xac] ss:$12 sps:$4 sm:$0xff]   ;;  %v15380_v2 = vld [vmem:[%s20733_s3 + $0x30] sm:$0xff]  }
 0x4c8   :  { %8491 = vmatpush1.bf16.msra.mxu0 %v8472_v59  ;;  %8312 = vmatprep.mubr.bf16.mxu0 %v20988_v47 }
 0x4c9   :  { %8600 = vmatpush1.bf16.msra.mxu1 %v8577_v54  ;;  %8492 = vmatprep.subr.bf16.mxu0 %v8471_v28  ;;  %v18910_v32 = vpop.permute.xlu0 %9609 }
 0x4ca   :  { %21035 = vst [vmem:[#allocation9_spill] sm:$0xff] %v18910_v32  ;;  %8601 = vmatprep.subr.bf16.mxu1 %v8576_v42 }
 0x4cc   :  { %14077 = vmatmul.mubr.msk.bf16.gmra.mxu1 %vm5987_vm3, %v15377_v61  ;;  %8493 = vmatpush1.bf16.msra.mxu0 %v8470_v21 }
 0x4cd   :  { %8602 = vmatpush1.bf16.msra.mxu1 %v8575_v14  ;;  %8494 = vmatprep.subr.bf16.mxu0 %v8469_v0  ;;  %v9608_v33 = vpop.permute.xlu0 %9607 }
 0x4ce   :  { %8603 = vmatprep.subr.bf16.mxu1 %v8574_v52  ;;  %v18930_v62 = vsel %vm5966_vm4, %v9608_v33, %v18910_v32  ;;  %8623 = vmatprep.mubr.bf16.mxu1 %v20988_v47 }
 0x4cf   :  { %21041 = vst [vmem:[#allocation7_spill] sm:$0xff] %v18930_v62  ;;  %14075 = vmatmul.mubr.msk.bf16.gmra.mxu0 %vm5987_vm3, %v15377_v61 }
 0x4d0   :  { %8495 = vmatpush1.bf16.msra.mxu0 %v8468_v17  ;;  %8516 = vmatprep.mubr.bf16.mxu0 %v20988_v47 }
 0x4d1   :  { %8604 = vmatpush1.bf16.msra.mxu1 %v8573_v41  ;;  %8496 = vmatprep.subr.bf16.mxu0 %v8467_v20 }
 0x4d2   :  { %8605 = vmatprep.subr.bf16.mxu1 %v8572_v57 }
 0x4d4   :  { %8497 = vmatpush1.bf16.msra.mxu0 %v8466_v50 }
 0x4d5   :  { %8606 = vmatpush1.bf16.msra.mxu1 %v8571_v19  ;;  %8498 = vmatprep.subr.bf16.mxu0 %v8465_v6 }
 0x4d6   :  { %8831 = vmatprep.subr.bf16.mxu1 %v15270_v34 }
 0x4d8   :  { %14080 = vmatmul.mubr.msk.bf16.vlgmr.msra.gmra.mxu1 %vm5987_vm3, %v15378_v45  ;;  %8499 = vmatpush1.bf16.msra.mxu0 %v8464_v25 }
 0x4d9   :  { %8832 = vmatpush1.bf16.msra.mxu1 %v15268_v22  ;;  %8714 = vmatprep.subr.bf16.mxu0 %v15273_v26 }
 0x4da   :  { %8833 = vmatprep.subr.bf16.mxu1 %v15273_v26  ;;  %8633 = vmatprep.mubr.bf16.mxu1 %v20988_v47 }
 0x4db   :  { %14078 = vmatmul.mubr.msk.bf16.vlgmr.msra.gmra.mxu0 %vm5987_vm3, %v15378_v45 }
 0x4dc   :  { %8715 = vmatpush1.bf16.msra.mxu0 %v15271_v30  ;;  %8526 = vmatprep.mubr.bf16.mxu0 %v20988_v47 }
 0x4dd   :  { %8834 = vmatpush1.bf16.msra.mxu1 %v15271_v30  ;;  %8716 = vmatprep.subr.bf16.mxu0 %v15276_v46 }
 0x4de   :  { %8835 = vmatprep.subr.bf16.mxu1 %v15276_v46 }
 0x4e0   :  { %14081 = vmatmul.mubr.msk.bf16.gmra.mxu1 %vm5987_vm3, %v15379_v11  ;;  %8717 = vmatpush1.bf16.msra.mxu0 %v15274_v24 }
 0x4e1   :  { %8836 = vmatpush1.bf16.msra.mxu1 %v15274_v24  ;;  %8718 = vmatprep.subr.bf16.mxu0 %v15279_v55 }
 0x4e2   :  { %8837 = vmatprep.subr.bf16.mxu1 %v15279_v55  ;;  %8857 = vmatprep.mubr.bf16.mxu1 %v20988_v47 }
 0x4e3   :  { %14079 = vmatmul.mubr.msk.bf16.gmra.mxu0 %vm5987_vm3, %v15379_v11 }
 0x4e4   :  { %8719 = vmatpush1.bf16.msra.mxu0 %v15277_v3  ;;  %8740 = vmatprep.mubr.bf16.mxu0 %v20988_v47 }
 0x4e5   :  { %8838 = vmatpush1.bf16.msra.mxu1 %v15277_v3  ;;  %8720 = vmatprep.subr.bf16.mxu0 %v15282_v58 }
 0x4e6   :  { %8839 = vmatprep.subr.bf16.mxu1 %v15282_v58 }
 0x4e8   :  { %8721 = vmatpush1.bf16.msra.mxu0 %v15280_v7 }
 0x4e9   :  { %8840 = vmatpush1.bf16.msra.mxu1 %v15280_v7  ;;  %8722 = vmatprep.subr.bf16.mxu0 %v15285_v15 }
 0x4ec   :  { %14104 = vmatmul.mubr.msk.bf16.vlgmr.msra.gmra.mxu1 %vm5987_vm3, %v15380_v2  ;;  %8723 = vmatpush1.bf16.msra.mxu0 %v15283_v63 }
 0x4ed   :  { %8867 = vmatprep.mubr.bf16.mxu1 %v20988_v47 }
 0x4ef   :  { %14092 = vmatmul.mubr.msk.bf16.vlgmr.msra.gmra.mxu0 %vm5987_vm3, %v15380_v2 }
 0x4f0   :  { %8750 = vmatprep.mubr.bf16.mxu0 %v20988_v47  ;;  %v19029_v47 = vpop.permute.xlu1 %9615 }
 0x4f4   :  { %14105 = vmatmul.mubr.msk.bf16.gmra.mxu1 %vm5987_vm3, %v15381_v39 }
 0x4f7   :  { %14093 = vmatmul.mubr.msk.bf16.gmra.mxu0 %vm5987_vm3, %v15381_v39 }
 0x50e   :  { %v14544_v59 = vpop.f32.mrf.mxu1 }
 0x510   :  { %v7392_v13 = vpop.f32.mrf.mxu1 }
 0x516   :  { %v14547_v1 = vpop.f32.mrf.mxu1 }
 0x518   :  { %v18985_v21 = vpop.f32.mrf.mxu1 }
 0x519   :  { %21044 = vst [vmem:[#allocation12_spill] sm:$0xff] %v18985_v21 }
 0x53f   :  { %v14532_v9 = vpop.f32.mrf.mxu0 }
 0x540   :  { %v7398_v54 = vadd.f32 %v14544_v59, %v14532_v9 }
 0x541   :  { %v7260_v27 = vpop.f32.mrf.mxu0 }
 0x542   :  { %v7393_v28 = vadd.f32 %v7392_v13, %v7260_v27 }
 0x547   :  { %v14535_v42 = vpop.f32.mrf.mxu0 }
 0x548   :  { %v7408_v31 = vadd.f32 %v14547_v1, %v14535_v42  ;;  %v14568_v4 = vpop.f32.mrf.mxu1 }
 0x549   :  { %v18987_v61 = vpop.f32.mrf.mxu0 }
 0x54a   :  { %21045 = vst [vmem:[#allocation11_spill] sm:$0xff] %v18987_v61  ;;  %v7701_v52 = vpop.f32.mrf.mxu1 }
 0x54b   :  { %v14556_v14 = vpop.f32.mrf.mxu0 }
 0x54c   :  { %v7569_v51 = vadd.f32 %v14556_v14, %v7398_v54 }
 0x54d   :  { %v7549_v44 = vpop.f32.mrf.mxu0 }
 0x54e   :  { %v7568_v0 = vadd.f32 %v7549_v44, %v7393_v28  ;;  %v18989_v53 = vadd.f32 %v14568_v4, %v7569_v51 }
 0x54f   :  { %v14559_v33 = vpop.f32.mrf.mxu0 }
 0x550   :  { %21046 = vst [vmem:[#allocation35_spill] sm:$0xff] %v18989_v53  ;;  %v7571_v17 = vadd.f32 %v14559_v33, %v7408_v31  ;;  %v18991_v8 = vadd.f32 %v7701_v52, %v7568_v0 }
 0x551   :  { %v18997_v50 = vpop.f32.mrf.mxu0 }
 0x552   :  { %21047 = vst [vmem:[#allocation31_spill] sm:$0xff] %v18991_v8  ;;  %21050 = vst [vmem:[#allocation13_spill] sm:$0xff] %v18997_v50 }
 0x553   :  { %v14571_v41 = vpop.f32.mrf.mxu1 }
 0x554   :  { %v18993_v43 = vadd.f32 %v14571_v41, %v7571_v17 }
 0x555   :  { %v18995_v20 = vpop.f32.mrf.mxu1 }
 0x556   :  { %21048 = vst [vmem:[#allocation16_spill] sm:$0xff] %v18993_v43  ;;  %21049 = vst [vmem:[#allocation5_spill] sm:$0xff] %v18995_v20 }
 0x55c   :  { %v7956_v57 = vpop.f32.mrf.mxu1 }
 0x55e   :  { %v7958_v19 = vpop.f32.mrf.mxu1 }
 0x55f   :  { %v7895_v6 = vpop.f32.mrf.mxu0 }
 0x560   :  { %v18999_v34 = vadd.f32 %v7956_v57, %v7895_v6  ;;  %v7960_v25 = vpop.f32.mrf.mxu1 }
 0x561   :  { %v7897_v22 = vpop.f32.mrf.mxu0 }
 0x562   :  { %v19001_v26 = vadd.f32 %v7958_v19, %v7897_v22  ;;  %v19003_v45 = vpop.f32.mrf.mxu1 }
 0x563   :  { %v7899_v30 = vpop.f32.mrf.mxu0 }
 0x564   :  { %v19005_v46 = vadd.f32 %v7960_v25, %v7899_v30  ;;  %v7966_v24 = vpop.f32.mrf.mxu1 }
 0x565   :  { %v19007_v55 = vpop.f32.mrf.mxu0 }
 0x566   :  { %v7968_v11 = vpop.f32.mrf.mxu1 }
 0x567   :  { %v7905_v3 = vpop.f32.mrf.mxu0 }
 0x568   :  { %v19009_v58 = vadd.f32 %v7966_v24, %v7905_v3  ;;  %v7970_v7 = vpop.f32.mrf.mxu1 }
 0x569   :  { %v7907_v15 = vpop.f32.mrf.mxu0 }
 0x56a   :  { %v19011_v63 = vadd.f32 %v7968_v11, %v7907_v15  ;;  %v7971_v2 = vpop.f32.mrf.mxu1 }
 0x56b   :  { %v7909_v39 = vpop.f32.mrf.mxu0 }
 0x56d   :  { %v7910_v59 = vpop.f32.mrf.mxu0 }
 0x570   :  { %v8203_v9 = vpop.f32.mrf.mxu1 }
 0x572   :  { %v8205_v54 = vpop.f32.mrf.mxu1 }
 0x573   :  { %v8142_v13 = vpop.f32.mrf.mxu0 }
 0x574   :  { %v8207_v27 = vpop.f32.mrf.mxu1  ;;  %v8204_v36 = vadd.f32 %v8203_v9, %v8142_v13 }
 0x575   :  { %v8144_v28 = vpop.f32.mrf.mxu0 }
 0x576   :  { %v8209_v1 = vpop.f32.mrf.mxu1  ;;  %v8206_v29 = vadd.f32 %v8205_v54, %v8144_v28 }
 0x577   :  { %v8146_v42 = vpop.f32.mrf.mxu0 }
 0x578   :  { %v19013_v31 = vpop.f32.mrf.mxu1 }
 0x579   :  { %v8148_v4 = vpop.f32.mrf.mxu0 }
 0x57a   :  { %v19015_v14 = vpop.f32.mrf.mxu1 }
 0x57b   :  { %v19017_v51 = vpop.f32.mrf.mxu0 }
 0x57c   :  { %v8217_v44 = vpop.f32.mrf.mxu1 }
 0x57d   :  { %v19019_v0 = vpop.f32.mrf.mxu0 }
 0x57e   :  { %v8218_v52 = vpop.f32.mrf.mxu1 }
 0x57f   :  { %v8156_v33 = vpop.f32.mrf.mxu0 }
 0x581   :  { %v8157_v17 = vpop.f32.mrf.mxu0 }
 0x584   :  { %v8411_v41 = vpop.f32.mrf.mxu1 }
 0x585   :  { %v8428_v5 = vadd.f32 %v8411_v41, %v8204_v36 }
 0x586   :  { %v8413_v57 = vpop.f32.mrf.mxu1 }
 0x587   :  { %v8304_v19 = vpop.f32.mrf.mxu0  ;;  %v8429_v38 = vadd.f32 %v8413_v57, %v8206_v29 }
 0x588   :  { %v8415_v6 = vpop.f32.mrf.mxu1  ;;  %v8321_v23 = vadd.f32 %v8304_v19, %v18999_v34 }
 0x589   :  { %v8306_v25 = vpop.f32.mrf.mxu0 }
 0x58a   :  { %v8417_v22 = vpop.f32.mrf.mxu1  ;;  %v8322_v18 = vadd.f32 %v8306_v25, %v19001_v26 }
 0x58b   :  { %v8308_v30 = vpop.f32.mrf.mxu0 }
 0x58c   :  { %v19021_v24 = vpop.f32.mrf.mxu1 }
 0x58d   :  { %v8310_v11 = vpop.f32.mrf.mxu0 }
 0x58e   :  { %v19023_v3 = vpop.f32.mrf.mxu1 }
 0x58f   :  { %v8314_v7 = vpop.f32.mrf.mxu0 }
 0x590   :  { %v8425_v15 = vpop.f32.mrf.mxu1 }
 0x591   :  { %v19025_v2 = vpop.f32.mrf.mxu0 }
 0x592   :  { %v8426_v39 = vpop.f32.mrf.mxu1 }
 0x593   :  { %v8318_v59 = vpop.f32.mrf.mxu0 }
 0x595   :  { %v8319_v44 = vpop.f32.mrf.mxu0 }
 0x596   :  { %v19031_v44 = vpop.permute.xlu1 %9613 }
 0x597   :  { %21051 = vst [vmem:[#allocation21_spill] sm:$0xff] %v19031_v44 }
 0x598   :  { %v8625_v52 = vpop.f32.mrf.mxu1 }
 0x599   :  { %v8642_v49 = vadd.f32 %v8625_v52, %v8428_v5 }
 0x59a   :  { %v8627_v33 = vpop.f32.mrf.mxu1  ;;  %v19038_v9 = vpop.permute.xlu1 %9611 }
 0x59b   :  { %v8518_v17 = vpop.f32.mrf.mxu0  ;;  %v8643_v36 = vadd.f32 %v8627_v33, %v8429_v38  ;;  %v8216_v38 = vadd.f32 %v19015_v14, %v19019_v0 }
 0x59c   :  { %v8629_v20 = vpop.f32.mrf.mxu1  ;;  %v8535_v56 = vadd.f32 %v8518_v17, %v8321_v23 }
 0x59d   :  { %v8520_v50 = vpop.f32.mrf.mxu0 }
 0x59e   :  { %v8631_v21 = vpop.f32.mrf.mxu1  ;;  %v8536_v54 = vadd.f32 %v8520_v50, %v8322_v18 }
 0x59f   :  { %v8522_v61 = vpop.f32.mrf.mxu0 }
 0x5a0   :  { %v19027_v43 = vpop.f32.mrf.mxu1 }
 0x5a1   :  { %v8524_v8 = vpop.f32.mrf.mxu0 }
 0x5a2   :  { %v8637_v53 = vpop.f32.mrf.mxu1 }
 0x5a3   :  { %v8528_v62 = vpop.f32.mrf.mxu0 }
 0x5a4   :  { %v8639_v15 = vpop.f32.mrf.mxu1 }
 0x5a5   :  { %v8530_v32 = vpop.f32.mrf.mxu0  ;;  %v7963_v15 = vadd.f32 %v19003_v45, %v19007_v55 }
 0x5a6   :  { %v8640_v40 = vpop.f32.mrf.mxu1 }
 0x5a7   :  { %v8532_v39 = vpop.f32.mrf.mxu0  ;;  %v8208_v40 = vadd.f32 %v8207_v27, %v8146_v42  ;;  %v8324_v5 = vadd.f32 %v8310_v11, %v7963_v15  ;;  %v8433_v42 = vadd.f32 %v19023_v3, %v8216_v38  ;;  %v19141_v38 = vld [vmem:[#allocation2 + $0xac] ss:$12 sps:$4 sm:$0xff]  }
 0x5a8   :  { %v8210_v39 = vadd.f32 %v8209_v1, %v8148_v4 }
 0x5a9   :  { %v8533_v59 = vpop.f32.mrf.mxu0  ;;  %v8430_v28 = vadd.f32 %v8415_v6, %v8208_v40  ;;  %v8538_v50 = vadd.f32 %v8524_v8, %v8324_v5  ;;  %v8647_v6 = vadd.f32 %v8637_v53, %v8433_v42  ;;  %v21052_v40 = vld [vmem:[#allocation66_spill] sm:$0xff]  ;;  %v19118_v5 = vld [vmem:[#allocation2 + $0xc4] ss:$12 sps:$4 sm:$0xff]  }
 0x5aa   :  { %v8323_v59 = vadd.f32 %v8308_v30, %v19005_v46  ;;  %v8431_v26 = vadd.f32 %v8417_v22, %v8210_v39  ;;  %v8214_v46 = vadd.f32 %v19013_v31, %v19017_v51  ;;  %v8326_v31 = vadd.f32 %v19025_v2, %v19011_v63  ;;  %v19060_v22 = vpop.permute.xlu0 %9605  ;;  %v15389_v42 = vld [vmem:[#allocation2 + $0x98] ss:$12 sps:$4 sm:$0xff]  }
 0x5ac   :  { %v8859_v10 = vpop.f32.mrf.mxu1  ;;  %v8537_v41 = vadd.f32 %v8522_v61, %v8323_v59  ;;  %v8432_v1 = vadd.f32 %v19021_v24, %v8214_v46  ;;  %v8540_v30 = vadd.f32 %v8530_v32, %v8326_v31 }
 0x5ad   :  { %v8876_v34 = vadd.f32 %v8859_v10, %v8642_v49  ;;  %v8325_v49 = vadd.f32 %v8314_v7, %v19009_v58  ;;  %v8645_v10 = vadd.f32 %v8631_v21, %v8431_v26  ;;  %v19055_v58 = vpop.permute.xlu1 %9603 }
 0x5ae   :  { %v8861_v16 = vpop.f32.mrf.mxu1  ;;  %v8646_v0 = vadd.f32 %v19027_v43, %v8432_v1  ;;  %v19076_v15 = vpop.permute.xlu0 %9601  ;;  %v19164_v1 = vld [vmem:[#allocation2 + $0x94] ss:$12 sps:$4 sm:$0xff]  }
 0x5af   :  { %v8742_v44 = vpop.f32.mrf.mxu0  ;;  %v8877_v57 = vadd.f32 %v8861_v16, %v8643_v36  ;;  %21061 = vst [vmem:[#allocation26_spill] sm:$0xff] %v19164_v1 }
 0x5b0   :  { %v8759_v13 = vadd.f32 %v8742_v44, %v8535_v56  ;;  %v8863_v29 = vpop.f32.mrf.mxu1  ;;  %v8644_v56 = vadd.f32 %v8629_v20, %v8430_v28  ;;  %v8539_v20 = vadd.f32 %v8528_v62, %v8325_v49  ;;  %v15386_v49 = vld [vmem:[#allocation2 + $0xb0] ss:$12 sps:$4 sm:$0xff]  }
 0x5b1   :  { %v8744_v23 = vpop.f32.mrf.mxu0  ;;  %v19070_v43 = vpop.permute.xlu1 %9874 }
 0x5b2   :  { %v19040_v19 = vmax.f32 %v8759_v13, %v8876_v34  ;;  %v8760_v45 = vadd.f32 %v8744_v23, %v8536_v54  ;;  %v8865_v55 = vpop.f32.mrf.mxu1  ;;  %v8878_v21 = vadd.f32 %v8863_v29, %v8644_v56  ;;  %v19088_v59 = vpop.permute.xlu0 %9872  ;;  %v21053_v34 = vld [vmem:[#allocation59_spill] sm:$0xff]  ;;  %v21055_v29 = vld [vmem:[#allocation60_spill] sm:$0xff]  ;;  %v21056_v23 = vld [vmem:[#allocation61_spill] sm:$0xff] }
 0x5b3   :  { %v8746_v18 = vpop.f32.mrf.mxu0  ;;  %v8879_v8 = vadd.f32 %v8865_v55, %v8645_v10 }
 0x5b4   :  { %v19047_v27 = vmax.f32 %v8760_v45, %v8877_v57  ;;  %v8761_v61 = vadd.f32 %v8746_v18, %v8537_v41  ;;  %v8869_v16 = vpop.f32.mrf.mxu1  ;;  %8891 = vrot.lane.b32.xlu1 %v19040_v19, %s15453_s19  ;;  %v21057_v41 = vld [vmem:[#allocation63_spill] sm:$0xff]  ;;  %v21058_v45 = vld [vmem:[#allocation62_spill] sm:$0xff]  ;;  %v21059_v18 = vld [vmem:[#allocation64_spill] sm:$0xff] }
 0x5b5   :  { %v8748_v4 = vpop.f32.mrf.mxu0  ;;  %v8880_v7 = vadd.f32 %v8869_v16, %v8646_v0  ;;  %v19082_v39 = vpop.permute.xlu1 %9876  ;;  %v19131_v57 = vld [vmem:[#allocation2 + $0xc0] ss:$12 sps:$4 sm:$0xff]  }
 0x5b6   :  { %v8762_v14 = vadd.f32 %v8748_v4, %v8538_v50  ;;  %v8871_v51 = vpop.f32.mrf.mxu1  ;;  %9204 = vrot.lane.b32.xlu0 %v19047_v27, %s15453_s19  ;;  %v19062_v24 = vmax.f32 %v8761_v61, %v8878_v21  ;;  %v19096_v54 = vpop.permute.xlu0 %9870  ;;  %v19154_v50 = vld [vmem:[#allocation2 + $0xa8] ss:$12 sps:$4 sm:$0xff]  }
 0x5b7   :  { %v8752_v25 = vpop.f32.mrf.mxu0  ;;  %v8881_v2 = vadd.f32 %v8871_v51, %v8647_v6  ;;  %21060 = vst [vmem:[#allocation28_spill] sm:$0xff] %v19154_v50  ;;  %v21063_v4 = vld [vmem:[#allocation65_spill] sm:$0xff] }
 0x5b8   :  { %v19064_v63 = vmax.f32 %v8762_v14, %v8879_v8  ;;  %v8763_v11 = vadd.f32 %v8752_v25, %v8539_v20  ;;  %v8873_v62 = vpop.f32.mrf.mxu1 }
 0x5b9   :  { %v8754_v3 = vpop.f32.mrf.mxu0  ;;  %v19094_v36 = vpop.permute.xlu1 %9868 }
 0x5ba   :  { %v8764_v52 = vadd.f32 %v8754_v3, %v8540_v30  ;;  %v8874_v33 = vpop.f32.mrf.mxu1  ;;  %8893 = vrot.lane.b32.xlu0 %v19062_v24, %s15453_s19  ;;  %9206 = vrot.lane.b32.xlu1 %v19064_v63, %s15453_s19  ;;  %v19072_v32 = vmax.f32 %v8763_v11, %v8880_v7 }
 0x5bb   :  { %v8756_v53 = vpop.f32.mrf.mxu0 }
 0x5bc   :  { %v19074_v17 = vmax.f32 %v8764_v52, %v8881_v2 }
 0x5bd   :  { %v8757_v44 = vpop.f32.mrf.mxu0  ;;  %v19102_v13 = vpop.permute.xlu1 %9862 }
 0x5be   :  { %10127 = vrot.lane.b32.xlu0 %v21052_v40, %s15454_s13  ;;  %8895 = vrot.lane.b32.xlu1 %v19072_v32, %s15453_s19 }
 0x5c1   :  { %v19114_v28 = vpop.permute.xlu1 %9864 }
 0x5c2   :  { %10123 = vrot.lane.b32.xlu0 %v18543_v35, %s15454_s13  ;;  %10125 = vrot.lane.b32.xlu1 %v18531_v12, %s15454_s13  ;;  %v21054_v35 = vld [vmem:[#allocation58_spill] sm:$0xff]  ;;  %v19108_v12 = vpop.permute.xlu0 %9866 }
 0x5c6   :  { %10016 = vrot.lane.b32.xlu1 %v18550_v37, %s15454_s13  ;;  %9208 = vrot.lane.b32.xlu0 %v19074_v17, %s15453_s19  ;;  %v19116_v26 = vpop.permute.xlu0 %9860 }
 0x5ca   :  { %10012 = vrot.lane.b32.xlu1 %v21053_v34, %s15454_s13  ;;  %10014 = vrot.lane.b32.xlu0 %v21054_v35, %s15454_s13  ;;  %v21072_v35 = vld [vmem:[#allocation27_spill] sm:$0xff] }
 0x5ce   :  { %10119 = vrot.lane.b32.xlu1 %v18541_v48, %s15454_s13  ;;  %10121 = vrot.lane.b32.xlu0 %v18609_v60, %s15454_s13  ;;  %v15383_v48 = vld [vmem:[#allocation2 + $0xc8] ss:$12 sps:$4 sm:$0xff]   ;;  %v19123_v60 = vpop.permute.xlu1 %9856 }
 0x5d2   :  { %10010 = vrot.lane.b32.xlu1 %v21055_v29, %s15454_s13  ;;  %10117 = vrot.lane.b32.xlu0 %v18550_v37, %s15454_s13  ;;  %v19129_v37 = vpop.permute.xlu0 %9858  ;;  %v19137_v55 = vpop.permute.xlu1 %9854 }
 0x5d6   :  { %10250 = vrot.lane.b32.xlu1 %v19118_v5, %s15455_s11  ;;  %10252 = vrot.lane.b32.xlu0 %v15383_v48, %s15455_s11  ;;  %v19139_v46 = vpop.permute.xlu0 %9850  ;;  %v19146_v56 = vpop.permute.xlu1 %9852 }
 0x5da   :  { %10357 = vrot.lane.b32.xlu1 %v21056_v23, %s15455_s11  ;;  %10359 = vrot.lane.b32.xlu0 %v21057_v41, %s15455_s11  ;;  %v19152_v10 = vpop.permute.xlu0 %9848  ;;  %v19160_v61 = vpop.permute.xlu1 %10036 }
 0x5de   :  { %10248 = vrot.lane.b32.xlu1 %v19131_v57, %s15455_s11  ;;  %10355 = vrot.lane.b32.xlu0 %v21058_v45, %s15455_s11  ;;  %v19162_v16 = vpop.permute.xlu0 %10038  ;;  %v19169_v31 = vpop.permute.xlu1 %10143 }
 0x5df   :  { %21062 = vst [vmem:[#allocation25_spill] sm:$0xff] %v19169_v31  ;;  %v15296_v31 = vld [vmem:[#allocation2 + $0x10c] ss:$12 sps:$4 sm:$0xff]  }
 0x5e2   :  { %10244 = vrot.lane.b32.xlu1 %v19141_v38, %s15455_s11  ;;  %10246 = vrot.lane.b32.xlu0 %v15386_v49, %s15455_s11  ;;  %v19175_v20 = vpop.permute.xlu0 %10145  ;;  %v19177_v21 = vpop.permute.xlu1 %10034 }
 0x5e3   :  { %21064 = vst [vmem:[#allocation6_spill] sm:$0xff] %v19175_v20  ;;  %v19373_v20 = vld [vmem:[#allocation2 + $0x110] ss:$12 sps:$4 sm:$0xff]  }
 0x5e6   :  { %10351 = vrot.lane.b32.xlu1 %v19118_v5, %s15455_s11  ;;  %10353 = vrot.lane.b32.xlu0 %v21059_v18, %s15455_s11  ;;  %v19179_v8 = vpop.permute.xlu0 %10141  ;;  %v19181_v14 = vpop.permute.xlu1 %10030 }
 0x5e7   :  { %21065 = vst [vmem:[#allocation4_spill] sm:$0xff] %v19179_v8  ;;  %v19355_v8 = vld [vmem:[#allocation2 + $0xe0] ss:$12 sps:$4 sm:$0xff]  }
 0x5e8   :  { %21095 = vst [vmem:[#allocation53_spill] sm:$0xff] %v19355_v8 }
 0x5ea   :  { %10242 = vrot.lane.b32.xlu1 %v19154_v50, %s15455_s11  ;;  %10349 = vrot.lane.b32.xlu0 %v19131_v57, %s15455_s11  ;;  %v19183_v51 = vpop.permute.xlu0 %10032  ;;  %v19185_v0 = vpop.permute.xlu1 %10137 }
 0x5eb   :  { %21066 = vst [vmem:[#allocation14_spill] sm:$0xff] %v19185_v0  ;;  %v19345_v0 = vld [vmem:[#allocation2 + $0xf4] ss:$12 sps:$4 sm:$0xff]  }
 0x5ee   :  { %10238 = vrot.lane.b32.xlu1 %v19164_v1, %s15455_s11  ;;  %10240 = vrot.lane.b32.xlu0 %v15389_v42, %s15455_s11  ;;  %v19187_v6 = vpop.permute.xlu0 %10139  ;;  %v19189_v25 = vpop.permute.xlu1 %10028 }
 0x5ef   :  { %21067 = vst [vmem:[#allocation17_spill] sm:$0xff] %v19187_v6 }
 0x5f2   :  { %10345 = vrot.lane.b32.xlu1 %v19141_v38, %s15455_s11  ;;  %10347 = vrot.lane.b32.xlu0 %v21063_v4, %s15455_s11  ;;  %v19191_v30 = vpop.permute.xlu0 %10135  ;;  %v19193_v11 = vpop.permute.xlu1 %10024 }
 0x5f3   :  { %21068 = vst [vmem:[#allocation33_spill] sm:$0xff] %v19191_v30 }
 0x5f6   :  { %v19195_v62 = vpop.permute.xlu0 %10026  ;;  %v19197_v3 = vpop.permute.xlu1 %10131 }
 0x5f7   :  { %21069 = vst [vmem:[#allocation22_spill] sm:$0xff] %v19197_v3 }
 0x5fa   :  { %v19199_v7 = vpop.permute.xlu0 %10133  ;;  %v19201_v2 = vpop.permute.xlu1 %10022 }
 0x5fb   :  { %21070 = vst [vmem:[#allocation10_spill] sm:$0xff] %v19199_v7 }
 0x5fe   :  { %v19203_v52 = vpop.permute.xlu0 %10129  ;;  %v19205_v33 = vpop.permute.xlu1 %10018 }
 0x5ff   :  { %21071 = vst [vmem:[#allocation37_spill] sm:$0xff] %v19203_v52  ;;  %v21073_v52 = vld [vmem:[#allocation23_spill] sm:$0xff] }
 0x602   :  { %v19207_v53 = vpop.permute.xlu0 %10020 }
 0x626   :  { %v8892_v44 = vpop.permute.xlu1 %8891 }
 0x627   :  { %v8900_v40 = vmax.f32 %v19040_v19, %v8892_v44 }
 0x628   :  { %v9205_v34 = vpop.permute.xlu0 %9204 }
 0x629   :  { %v8903_v29 = vadd.f32 %v8900_v40, %v21072_v35  ;;  %v9213_v48 = vmax.f32 %v19047_v27, %v9205_v34 }
 0x62b   :  { %v8906_v23 = vmax.f32 %v8903_v29, 0.0  ;;  %v9216_v41 = vadd.f32 %v9213_v48, %v21072_v35  ;;  %v21075_v48 = vld [vmem:[#allocation19_spill] sm:$0xff] }
 0x62c   :  { %v8894_v45 = vpop.permute.xlu0 %8893  ;;  %v9207_v49 = vpop.permute.xlu1 %9206 }
 0x62d   :  { %v9219_v18 = vmax.f32 %v9216_v41, 0.0  ;;  %v8901_v42 = vmax.f32 %v19062_v24, %v8894_v45  ;;  %v9214_v4 = vmax.f32 %v19064_v63, %v9207_v49  ;;  %9056 = vrot.lane.b32.xlu1 %v8906_v23, %s15454_s13 }
 0x62f   :  { %v8904_v3 = vadd.f32 %v8901_v42, %v21073_v52  ;;  %v9217_v19 = vadd.f32 %v9214_v4, %v21073_v52  ;;  %9369 = vrot.lane.b32.xlu0 %v9219_v18, %s15454_s13  ;;  %v15391_v4 = vld [vmem:[#allocation2 + $0x80] ss:$12 sps:$4 sm:$0xff]  }
 0x630   :  { %v19219_v44 = vpop.permute.xlu0 %10127  ;;  %v8896_v27 = vpop.permute.xlu1 %8895 }
 0x631   :  { %21074 = vst [vmem:[#allocation36_spill] sm:$0xff] %v19219_v44  ;;  %v8907_v40 = vmax.f32 %v8904_v3, 0.0  ;;  %v9220_v34 = vmax.f32 %v9217_v19, 0.0  ;;  %v8902_v29 = vmax.f32 %v19072_v32, %v8896_v27  ;;  %v19232_v32 = vld [vmem:[#allocation2 + $0x90] ss:$12 sps:$4 sm:$0xff]  }
 0x632   :  { %21077 = vst [vmem:[#allocation39_spill] sm:$0xff] %v19232_v32  ;;  %v15392_v19 = vld [vmem:[#allocation2 + $0x98] ss:$12 sps:$4 sm:$0xff]  }
 0x633   :  { %v8905_v41 = vadd.f32 %v8902_v29, %v21075_v48  ;;  %9058 = vrot.lane.b32.xlu0 %v8907_v40, %s15454_s13  ;;  %9371 = vrot.lane.b32.xlu1 %v9220_v34, %s15454_s13  ;;  %v14108_v29 = vld [vmem:[%s20735_s5 + $0x70] sm:$0xf] }
 0x634   :  { %v19225_v24 = vpop.permute.xlu0 %10123  ;;  %14572 = vmatprep.subr.msk.mxu0 %vm178_vm0, %v14108_v29 }
 0x635   :  { %21076 = vst [vmem:[#allocation3_spill] sm:$0xff] %v19225_v24  ;;  %v8908_v63 = vmax.f32 %v8905_v41, 0.0  ;;  %14573 = vmatpush3.msk.msra.mxu0 %vm178_vm0, %v14108_v29 }
 0x637   :  { %10343 = vrot.lane.b32.xlu0 %v19154_v50, %s15455_s11  ;;  %9060 = vrot.lane.b32.xlu1 %v8908_v63, %s15454_s13  ;;  %v21105_v50 = vld [vmem:[#allocation21_spill] sm:$0xff] }
 0x638   :  { %v9209_v45 = vpop.permute.xlu0 %9208 }
 0x639   :  { %v9215_v3 = vmax.f32 %v19074_v17, %v9209_v45  ;;  %v19241_v17 = vpop.permute.xlu1 %10125  ;;  %v14107_v45 = vld [vmem:[%s20735_s5 + $0x68] sm:$0xff] }
 0x63a   :  { %21078 = vst [vmem:[#allocation30_spill] sm:$0xff] %v19241_v17  ;;  %14574 = vmatprep.subr.mxu0 %v14107_v45  ;;  %v19305_v17 = vld [vmem:[#allocation2 + $0x7c] ss:$12 sps:$4 sm:$0xff]  }
 0x63b   :  { %v9218_v49 = vadd.f32 %v9215_v3, %v21075_v48  ;;  %10236 = vrot.lane.b32.xlu1 %v19232_v32, %s15455_s11  ;;  %v14106_v3 = vld [vmem:[%s20735_s5 + $0x60] sm:$0xff]  ;;  %14575 = vmatpush3.msra.mxu0 %v14107_v45  ;;  %21089 = vst [vmem:[#allocation51_spill] sm:$0xff] %v19305_v17 }
 0x63c   :  { %14576 = vmatprep.subr.mxu0 %v14106_v3 }
 0x63d   :  { %v9221_v42 = vmax.f32 %v9218_v49, 0.0  ;;  %v19243_v27 = vpop.permute.xlu1 %10016  ;;  %v19258_v49 = vpop.permute.xlu0 %10014  ;;  %14577 = vmatpush3.msra.mxu0 %v14106_v3 }
 0x63f   :  { %9373 = vrot.lane.b32.xlu0 %v9221_v42, %s15454_s13 }
 0x641   :  { %v19250_v41 = vpop.permute.xlu1 %10012  ;;  %v19269_v29 = vpop.permute.xlu0 %10121 }
 0x642   :  { %21080 = vst [vmem:[#allocation43_spill] sm:$0xff] %v19269_v29 }
 0x643   :  { %10234 = vrot.lane.b32.xlu0 %v15391_v4, %s15455_s11  ;;  %v19263_v4 = vld [vmem:[%s20735_s5 + $0xa0] sm:$0xf] }
 0x644   :  { %14596 = vmatprep.subr.msk.mxu0 %vm178_vm0, %v19263_v4 }
 0x645   :  { %v19273_v45 = vpop.permute.xlu0 %10117 }
 0x646   :  { %21081 = vst [vmem:[#allocation42_spill] sm:$0xff] %v19273_v45 }
 0x647   :  { %10341 = vrot.lane.b32.xlu0 %v15392_v19, %s15455_s11  ;;  %v19267_v19 = vpop.permute.xlu1 %10119 }
 0x648   :  { %21079 = vst [vmem:[#allocation34_spill] sm:$0xff] %v19267_v19 }
 0x649   :  { %v19277_v52 = vpop.permute.xlu0 %10252 }
 0x64b   :  { %10337 = vrot.lane.b32.xlu0 %v19232_v32, %s15455_s11  ;;  %v19271_v48 = vpop.permute.xlu1 %10010 }
 0x64d   :  { %v19281_v35 = vpop.permute.xlu0 %10359 }
 0x64e   :  { %21083 = vst [vmem:[#allocation45_spill] sm:$0xff] %v19281_v35 }
 0x64f   :  { %v19275_v3 = vpop.permute.xlu1 %10250 }
 0x651   :  { %v19285_v29 = vpop.permute.xlu0 %10355 }
 0x652   :  { %21084 = vst [vmem:[#allocation41_spill] sm:$0xff] %v19285_v29  ;;  %v14114_v29 = vld [vmem:[%s20735_s5 + $0x78] sm:$0xff] }
 0x664   :  { %8913 = vxpose.xlu1.b32.start [1/3] (short) (narrow) %v8906_v23, 32  ;;  %v19279_v23 = vpop.permute.xlu1 %10357 }
 0x665   :  { %21082 = vst [vmem:[#allocation38_spill] sm:$0xff] %v19279_v23 }
 0x668   :  { %8914 = vxpose.xlu1.b32.cont [2/3] (short) (narrow) %v8907_v40, 32  ;;  %v19283_v19 = vpop.permute.xlu1 %10248 }
 0x66c   :  { %8915 = vxpose.xlu1.b32.end [3/3] (short) (narrow) %v8908_v63, 32  ;;  %v19287_v40 = vpop.permute.xlu1 %10244  ;;  %v19289_v63 = vpop.permute.xlu0 %10246 }
 0x670   :  { %v19291_v45 = vpop.permute.xlu1 %10351  ;;  %v19293_v24 = vpop.permute.xlu0 %10353 }
 0x671   :  { %9226 = vxpose.xlu1.b32.start [1/3] (short) (narrow) %v9219_v18, 32  ;;  %21085 = vst [vmem:[#allocation40_spill] sm:$0xff] %v19291_v45  ;;  %21086 = vst [vmem:[#allocation49_spill] sm:$0xff] %v19293_v24  ;;  %v14116_v45 = vld [vmem:[%s20735_s5 + $0x88] sm:$0xf] }
 0x672   :  { %14584 = vmatprep.subr.msk.mxu1 %vm178_vm0, %v14116_v45 }
 0x673   :  { %14585 = vmatpush3.msk.msra.mxu1 %vm178_vm0, %v14116_v45  ;;  %v19327_v45 = vld [vmem:[%s20735_s5 + $0xb8] sm:$0xf] }
 0x674   :  { %v19295_v18 = vpop.permute.xlu1 %10242 }
 0x675   :  { %9227 = vxpose.xlu1.b32.cont [2/3] (short) (narrow) %v9220_v34, 32  ;;  %v19297_v34 = vpop.permute.xlu0 %10349 }
 0x676   :  { %21087 = vst [vmem:[#allocation48_spill] sm:$0xff] %v19297_v34  ;;  %v14115_v34 = vld [vmem:[%s20735_s5 + $0x80] sm:$0xff] }
 0x677   :  { %14586 = vmatprep.subr.mxu1 %v14115_v34 }
 0x678   :  { %v19299_v23 = vpop.permute.xlu1 %10238  ;;  %14587 = vmatpush3.msra.mxu1 %v14115_v34  ;;  %v19335_v34 = vld [vmem:[#allocation2 + $0x64] ss:$12 sps:$4 sm:$0xff]  }
 0x679   :  { %9228 = vxpose.xlu1.b32.end [3/3] (short) (narrow) %v9221_v42, 32  ;;  %v19301_v35 = vpop.permute.xlu0 %10240  ;;  %14588 = vmatprep.subr.mxu1 %v14114_v29  ;;  %21092 = vst [vmem:[#allocation32_spill] sm:$0xff] %v19335_v34 }
 0x67a   :  { %14589 = vmatpush3.msra.mxu1 %v14114_v29 }
 0x67b   :  { %14608 = vmatprep.subr.msk.mxu1 %vm178_vm0, %v19327_v45 }
 0x67c   :  { %v19303_v42 = vpop.permute.xlu1 %10345 }
 0x67d   :  { %21088 = vst [vmem:[#allocation44_spill] sm:$0xff] %v19303_v42  ;;  %v19313_v24 = vpop.permute.xlu0 %10347 }
 0x67e   :  { %21090 = vst [vmem:[#allocation47_spill] sm:$0xff] %v19313_v24  ;;  %v19329_v24 = vld [vmem:[#allocation2 + $0x78] ss:$12 sps:$4 sm:$0xff]  }
 0x67f   :  { %21091 = vst [vmem:[#allocation46_spill] sm:$0xff] %v19329_v24 }
 0x69b   :  { %10232 = vrot.lane.b32.xlu1 %v19305_v17, %s15455_s11 }
 0x69f   :  { %10339 = vrot.lane.b32.xlu1 %v19164_v1, %s15455_s11  ;;  %v9057_v42 = vpop.permute.xlu1 %9056  ;;  %v14123_v1 = vld [vmem:[%s20735_s5 + $0x98] sm:$0xff] }
 0x6a0   :  { %9065 = vxpose.xlu0.b32.start [1/3] (short) (narrow) %v9057_v42, 32  ;;  %v19341_v42 = vld [vmem:[#allocation2 + $0x60] ss:$12 sps:$4 sm:$0xff]  }
 0x6a1   :  { %v9370_v44 = vpop.permute.xlu0 %9369  ;;  %21093 = vst [vmem:[#allocation50_spill] sm:$0xff] %v19341_v42 }
 0x6a3   :  { %10230 = vrot.lane.b32.xlu1 %v19329_v24, %s15455_s11 }
 0x6a5   :  { %v9059_v7 = vpop.permute.xlu0 %9058  ;;  %v9372_v30 = vpop.permute.xlu1 %9371 }
 0x6a6   :  { %9066 = vxpose.xlu0.b32.cont [2/3] (short) (narrow) %v9059_v7, 32  ;;  %v19351_v7 = vld [vmem:[#allocation2 + $0xf0] ss:$12 sps:$4 sm:$0xff]  }
 0x6a7   :  { %10226 = vrot.lane.b32.xlu1 %v19335_v34, %s15455_s11  ;;  %v19385_v34 = vld [vmem:[#allocation2 + $0xe0] ss:$12 sps:$4 sm:$0xff]  }
 0x6a8   :  { %21098 = vst [vmem:[#allocation57_spill] sm:$0xff] %v19385_v34 }
 0x6a9   :  { %v9061_v29 = vpop.permute.xlu1 %9060  ;;  %v19347_v6 = vpop.permute.xlu0 %10343 }
 0x6aa   :  { %9067 = vxpose.xlu0.b32.end [3/3] (short) (narrow) %v9061_v29, 32  ;;  %21094 = vst [vmem:[#allocation54_spill] sm:$0xff] %v19347_v6  ;;  %v19363_v6 = vld [vmem:[#allocation2 + $0xc0] ss:$12 sps:$4 sm:$0xff]  }
 0x6ab   :  { %10333 = vrot.lane.b32.xlu1 %v19305_v17, %s15455_s11  ;;  %v15397_v17 = vld [vmem:[#allocation2 + $0x68] ss:$12 sps:$4 sm:$0xff]  }
 0x6af   :  { %10224 = vrot.lane.b32.xlu1 %v19341_v42, %s15455_s11  ;;  %9378 = vxpose.xlu0.b32.start [1/3] (short) (narrow) %v9370_v44, 32  ;;  %v19359_v44 = vld [vmem:[#allocation2 + $0xc4] ss:$12 sps:$4 sm:$0xff]   ;;  %v19379_v42 = vld [vmem:[#allocation2 + $0xdc] ss:$12 sps:$4 sm:$0xff]  }
 0x6b1   :  { %v9374_v29 = vpop.permute.xlu0 %9373 }
 0x6b3   :  { %11417 = vrot.lane.b32.xlu1 %v19345_v0, %s15453_s19  ;;  %9379 = vxpose.xlu0.b32.cont [2/3] (short) (narrow) %v9372_v30, 32  ;;  %v19367_v30 = vld [vmem:[#allocation2 + $0xb0] ss:$12 sps:$4 sm:$0xff]  }
 0x6b4   :  { %21096 = vst [vmem:[#allocation52_spill] sm:$0xff] %v19367_v30 }
 0x6b7   :  { %11415 = vrot.lane.b32.xlu1 %v19351_v7, %s15453_s19  ;;  %9380 = vxpose.xlu0.b32.end [3/3] (short) (narrow) %v9374_v29, 32  ;;  %v15294_v29 = vld [vmem:[#allocation2 + $0x94] ss:$12 sps:$4 sm:$0xff]  }
 0x6bb   :  { %11413 = vrot.lane.b32.xlu1 %v19355_v8, %s15453_s19  ;;  %v19437_v8 = vld [vmem:[#allocation2 + $0xc8] ss:$12 sps:$4 sm:$0xff]  }
 0x6bf   :  { %11405 = vrot.lane.b32.xlu1 %v19359_v44, %s15453_s19 }
 0x6c3   :  { %11403 = vrot.lane.b32.xlu1 %v19363_v6, %s15453_s19 }
 0x6c7   :  { %11401 = vrot.lane.b32.xlu1 %v19367_v30, %s15453_s19  ;;  %v19383_v30 = vpop.permute.xlu1 %10236 }
 0x6c8   :  { %21097 = vst [vmem:[#allocation56_spill] sm:$0xff] %v19383_v30  ;;  %v15302_v30 = vld [vmem:[#allocation2 + $0xb0] ss:$12 sps:$4 sm:$0xff]  }
 0x6cb   :  { %11393 = vrot.lane.b32.xlu1 %v15294_v29, %s15453_s19 }
 0x6cf   :  { %11664 = vrot.lane.b32.xlu1 %v15296_v31, %s15453_s19 }
 0x6d3   :  { %11666 = vrot.lane.b32.xlu1 %v19373_v20, %s15453_s19 }
 0x6d7   :  { %11658 = vrot.lane.b32.xlu1 %v19345_v0, %s15453_s19 }
 0x6db   :  { %11652 = vrot.lane.b32.xlu1 %v19379_v42, %s15453_s19 }
 0x6df   :  { %11654 = vrot.lane.b32.xlu1 %v19385_v34, %s15453_s19 }
 0x6e0   :  { %v8929_v29 = vpop.trf.xlu1 }
 0x6e1   :  { %14578 = vmatprep.mubr.msk.f32.mxu0 %vm7178_vm7, %v8929_v29  ;;  %v14122_v29 = vld [vmem:[%s20735_s5 + $0x90] sm:$0xff] }
 0x6e3   :  { %11646 = vrot.lane.b32.xlu1 %v19359_v44, %s15453_s19 }
 0x6e4   :  { %10228 = vrot.lane.b32.xlu0 %v15397_v17, %s15455_s11  ;;  %v8930_v32 = vpop.trf.xlu1  ;;  %v15398_v17 = vld [vmem:[#allocation2 + $0x80] ss:$12 sps:$4 sm:$0xff]  }
 0x6e5   :  { %14579 = vmatmul.mubr.msk.f32.vlgmr.msra.gmra.mxu0 %vm7178_vm7, %v8930_v32  ;;  %v21099_v32 = vld [vmem:[#allocation24_spill] sm:$0xff] }
 0x6e6   :  { %14597 = vmatpush3.msk.msra.mxu0 %vm178_vm0, %v19263_v4 }
 0x6e7   :  { %14598 = vmatprep.subr.mxu0 %v14123_v1  ;;  %11644 = vrot.lane.b32.xlu1 %v19363_v6, %s15453_s19 }
 0x6e8   :  { %14599 = vmatpush3.msra.mxu0 %v14123_v1  ;;  %10335 = vrot.lane.b32.xlu0 %v15398_v17, %s15455_s11  ;;  %v8931_v34 = vpop.trf.xlu1  ;;  %v19411_v1 = vld [vmem:[#allocation2 + $0xf8] ss:$12 sps:$4 sm:$0xff]  }
 0x6e9   :  { %14600 = vmatprep.subr.mxu0 %v14122_v29  ;;  %14581 = vmatprep.mubr.msk.f32.mxu0 %vm7178_vm7, %v8931_v34  ;;  %v19423_v17 = vld [vmem:[#allocation2 + $0xd8] ss:$12 sps:$4 sm:$0xff]  }
 0x6ea   :  { %14601 = vmatpush3.msra.mxu0 %v14122_v29  ;;  %v21100_v29 = vld [vmem:[#allocation15_spill] sm:$0xff] }
 0x6eb   :  { %9657 = vmatprep.subr.bf16.mxu0 %v21099_v32  ;;  %11642 = vrot.lane.b32.xlu1 %v15302_v30, %s15453_s19  ;;  %v21101_v32 = vld [vmem:[#allocation8_spill] sm:$0xff] }
 0x6ec   :  { %10331 = vrot.lane.b32.xlu0 %v19329_v24, %s15455_s11  ;;  %v8932_v4 = vpop.trf.xlu1 }
 0x6ed   :  { %14582 = vmatmul.mubr.msk.f32.gmra.mxu0 %vm7178_vm7, %v8932_v4 }
 0x6ef   :  { %11826 = vrot.lane.b32.xlu1 %v19345_v0, %s15454_s13 }
 0x6f0   :  { %11419 = vrot.lane.b32.xlu0 %v19411_v1, %s15453_s19  ;;  %v9242_v34 = vpop.trf.xlu1 }
 0x6f1   :  { %14602 = vmatprep.mubr.msk.f32.mxu0 %vm7178_vm7, %v9242_v34  ;;  %v21103_v34 = vld [vmem:[#allocation20_spill] sm:$0xff] }
 0x6f3   :  { %11933 = vrot.lane.b32.xlu1 %v15296_v31, %s15454_s13  ;;  %v21102_v31 = vld [vmem:[#allocation18_spill] sm:$0xff] }
 0x6f4   :  { %11411 = vrot.lane.b32.xlu0 %v19379_v42, %s15453_s19  ;;  %v9243_v30 = vpop.trf.xlu1  ;;  %v9637_v24 = vsel %vm5966_vm4, %v21103_v34, %v21102_v31  ;;  %v9635_v31 = vsel %vm5966_vm4, %v21105_v50, %v19029_v47  ;;  %v19450_v34 = vld [vmem:[#allocation2 + $0xac] ss:$12 sps:$4 sm:$0xff]   ;;  %v19461_v50 = vld [vmem:[#allocation2 + $0xa8] ss:$12 sps:$4 sm:$0xff]  }
 0x6f5   :  { %14603 = vmatmul.mubr.msk.f32.vlgmr.msra.gmra.mxu0 %vm7178_vm7, %v9243_v30  ;;  %v21104_v30 = vld [vmem:[#allocation29_spill] sm:$0xff] }
 0x6f6   :  { %9658 = vmatpush1.bf16.msra.mxu0 %v21100_v29  ;;  %v9636_v29 = vsel %vm5966_vm4, %v19029_v47, %v21104_v30  ;;  %v21107_v30 = vmov 0   ;;  %v9632_v47 = vsel %vm5966_vm4, %v19055_v58, %v19060_v22  ;;  %v9886_v22 = vsel %vm5966_vm4, %v19088_v59, %v19070_v43 }
 0x6f7   :  { %9659 = vmatprep.subr.bf16.mxu0 %v21101_v32  ;;  %11824 = vrot.lane.b32.xlu1 %v19351_v7, %s15454_s13 }
 0x6f8   :  { %11409 = vrot.lane.b32.xlu0 %v19423_v17, %s15453_s19  ;;  %v9244_v4 = vpop.trf.xlu1 }
 0x6f9   :  { %14605 = vmatprep.mubr.msk.f32.mxu0 %vm7178_vm7, %v9244_v4 }
 0x6fa   :  { %9660 = vmatpush1.bf16.msra.mxu0 %v9637_v24  ;;  %v21106_v24 = vld [vmem:[#allocation9_spill] sm:$0xff] }
 0x6fb   :  { %9661 = vmatprep.subr.bf16.mxu0 %v9636_v29  ;;  %11820 = vrot.lane.b32.xlu1 %v19379_v42, %s15454_s13  ;;  %v9634_v4 = vsel %vm5966_vm4, %v21106_v24, %v19038_v9  ;;  %v21108_v29 = vld [vmem:[#allocation7_spill] sm:$0xff]  ;;  %v9631_v9 = vsel %vm5966_vm4, %v19076_v15, %v19055_v58  ;;  %v15399_v58 = vld [vmem:[%s20733_s3 + $0xc] sm:$0xff]   ;;  %v9885_v15 = vsel %vm5966_vm4, %v19094_v36, %v19096_v54  ;;  %v15400_v24 = vld [vmem:[%s20733_s3 + $0x14] ss:$0 sps:$4 sm:$0x33]  }
 0x6fc   :  { %11407 = vrot.lane.b32.xlu0 %v19437_v8, %s15453_s19  ;;  %v9245_v32 = vpop.trf.xlu1  ;;  %v9883_v54 = vsel %vm5966_vm4, %v19102_v13, %v19114_v28  ;;  %v9881_v28 = vsel %vm5966_vm4, %v19123_v60, %v19129_v37  ;;  %v9879_v37 = vsel %vm5966_vm4, %v19139_v46, %v19146_v56 }
 0x6fd   :  { %14606 = vmatmul.mubr.msk.f32.gmra.mxu0 %vm7178_vm7, %v9245_v32  ;;  %v19473_v32 = vld [vmem:[#allocation2 + $0x98] ss:$12 sps:$4 sm:$0xff]  }
 0x6fe   :  { %9662 = vmatpush1.bf16.msra.mxu0 %v9635_v31  ;;  %9683 = vmatprep.mubr.bf16.mxu0 %v21107_v30  ;;  %v19506_v31 = vld [vmem:[#allocation2 + $0x108] ss:$12 sps:$4 sm:$0xff]  }
 0x6ff   :  { %9663 = vmatprep.subr.bf16.mxu0 %v9634_v4  ;;  %11927 = vrot.lane.b32.xlu1 %v19345_v0, %s15454_s13  ;;  %v9887_v0 = vsel %vm5966_vm4, %v19070_v43, %v19082_v39  ;;  %v19489_v39 = vld [vmem:[#allocation2 + $0x90] ss:$12 sps:$4 sm:$0xff]   ;;  %v9884_v43 = vsel %vm5966_vm4, %v19108_v12, %v19094_v36  ;;  %v9882_v36 = vsel %vm5966_vm4, %v19116_v26, %v19102_v13 }
 0x700   :  { %11399 = vrot.lane.b32.xlu0 %v19450_v34, %s15453_s19  ;;  %v9880_v26 = vsel %vm5966_vm4, %v19137_v55, %v19123_v60  ;;  %v10049_v60 = vsel %vm6409_vm5, %v19160_v61, %v19162_v16  ;;  %v10048_v55 = vsel %vm6409_vm5, %v19177_v21, %v19160_v61  ;;  %v10046_v61 = vsel %vm6409_vm5, %v19189_v25, %v19181_v14 }
 0x701   :  { %v10044_v25 = vsel %vm6409_vm5, %v19201_v2, %v19193_v11 }
 0x702   :  { %9664 = vmatpush1.bf16.msra.mxu0 %v21108_v29  ;;  %v9878_v29 = vsel %vm5966_vm4, %v19152_v10, %v19139_v46  ;;  %v10047_v10 = vsel %vm6409_vm5, %v19181_v14, %v19183_v51  ;;  %v10045_v51 = vsel %vm6409_vm5, %v19193_v11, %v19195_v62  ;;  %v14130_v14 = vld [vmem:[%s20735_s5 + $0xa8] sm:$0xff]  ;;  %v10042_v11 = vsel %vm6409_vm5, %v19243_v27, %v19205_v33 }
 0x703   :  { %9665 = vmatprep.subr.bf16.mxu0 %v9632_v47  ;;  %11818 = vrot.lane.b32.xlu1 %v19423_v17, %s15454_s13 }
 0x704   :  { %11397 = vrot.lane.b32.xlu0 %v19461_v50, %s15453_s19 }
 0x706   :  { %9666 = vmatpush1.bf16.msra.mxu0 %v9631_v9 }
 0x707   :  { %9904 = vmatprep.subr.bf16.mxu0 %v9887_v0  ;;  %11814 = vrot.lane.b32.xlu1 %v19359_v44, %s15454_s13  ;;  %v19501_v44 = vpop.permute.xlu0 %10234  ;;  %v19564_v0 = vld [vmem:[#allocation2 + $0xc8] ss:$12 sps:$4 sm:$0xff]  }
 0x708   :  { %11395 = vrot.lane.b32.xlu0 %v19473_v32, %s15453_s19 }
 0x709   :  { %14153 = vmatmul.mubr.msk.bf16.vlgmr.msra.gmra.mxu0 %vm5987_vm3, %v15399_v58 }
 0x70a   :  { %9905 = vmatpush1.bf16.msra.mxu0 %v9886_v22  ;;  %9693 = vmatprep.mubr.bf16.mxu0 %v21107_v30  ;;  %v14131_v22 = vld [vmem:[%s20735_s5 + $0xb0] sm:$0xff] }
 0x70b   :  { %9906 = vmatprep.subr.bf16.mxu0 %v9885_v15  ;;  %11921 = vrot.lane.b32.xlu1 %v19379_v42, %s15454_s13  ;;  %v19529_v13 = vpop.permute.xlu0 %10341 }
 0x70c   :  { %11391 = vrot.lane.b32.xlu0 %v19489_v39, %s15453_s19 }
 0x70d   :  { %v19499_v59 = vpop.permute.xlu1 %10232 }
 0x70e   :  { %9907 = vmatpush1.bf16.msra.mxu0 %v9884_v43  ;;  %v10041_v43 = vsel %vm6409_vm5, %v19250_v41, %v19258_v49  ;;  %v10263_v49 = vsel %vm6642_vm6, %v19275_v3, %v19277_v52 }
 0x70f   :  { %9908 = vmatprep.subr.bf16.mxu0 %v9883_v54  ;;  %11812 = vrot.lane.b32.xlu1 %v19363_v6, %s15454_s13  ;;  %v19524_v6 = vld [vmem:[#allocation2 + $0xf8] ss:$12 sps:$4 sm:$0xff]   ;;  %v19548_v9 = vpop.permute.xlu0 %10337 }
 0x710   :  { %11662 = vrot.lane.b32.xlu0 %v19506_v31, %s15453_s19 }
 0x711   :  { %v19515_v12 = vpop.permute.xlu1 %10339  ;;  %14154 = vmatmul.mubr.msk.bf16.gmra.mxu0 %vm5987_vm3, %v15400_v24 }
 0x712   :  { %9909 = vmatpush1.bf16.msra.mxu0 %v9882_v36  ;;  %9930 = vmatprep.mubr.bf16.mxu0 %v21107_v30  ;;  %v10259_v36 = vsel %vm6642_vm6, %v19299_v23, %v19301_v35  ;;  %v19669_v35 = vld [vmem:[%s20733_s3 + $0x20] ss:$0 sps:$4 sm:$0x33]  }
 0x713   :  { %9910 = vmatprep.subr.bf16.mxu0 %v9881_v28  ;;  %11808 = vrot.lane.b32.xlu1 %v19450_v34, %s15454_s13  ;;  %v21113_v28 = vld [vmem:[#allocation53_spill] sm:$0xff] }
 0x714   :  { %11660 = vrot.lane.b32.xlu0 %v19524_v6, %s15453_s19 }
 0x715   :  { %v19536_v4 = vpop.permute.xlu1 %10230 }
 0x716   :  { %9911 = vmatpush1.bf16.msra.mxu0 %v9880_v26  ;;  %v21115_v26 = vld [vmem:[#allocation26_spill] sm:$0xff] }
 0x717   :  { %9912 = vmatprep.subr.bf16.mxu0 %v9879_v37 }
 0x718   :  { %11656 = vrot.lane.b32.xlu0 %v19351_v7, %s15453_s19 }
 0x719   :  { %v19546_v47 = vpop.permute.xlu1 %10226 }
 0x71a   :  { %9913 = vmatpush1.bf16.msra.mxu0 %v9878_v29 }
 0x71b   :  { %10066 = vmatprep.subr.bf16.mxu0 %v10049_v60  ;;  %v10257_v60 = vsel %vm6642_vm6, %v19499_v59, %v19501_v44  ;;  %v21120_v44 = vld [vmem:[#allocation46_spill] sm:$0xff] }
 0x71c   :  { %11650 = vrot.lane.b32.xlu0 %v19423_v17, %s15453_s19 }
 0x71d   :  { %14172 = vmatmul.mubr.msk.bf16.vlgmr.msra.gmra.mxu0 %vm5987_vm3, %v15399_v58  ;;  %v19559_v46 = vpop.permute.xlu1 %10333 }
 0x71e   :  { %10067 = vmatpush1.bf16.msra.mxu0 %v10048_v55  ;;  %v9081_v56 = vpop.trf.xlu0  ;;  %9940 = vmatprep.mubr.bf16.mxu0 %v21107_v30  ;;  %v10256_v55 = vsel %vm6642_vm6, %v19536_v4, %v19499_v59  ;;  %v15403_v4 = vld [vmem:[%s20733_s3] sm:$0xff]  }
 0x71f   :  { %10068 = vmatprep.subr.bf16.mxu0 %v10047_v10  ;;  %14590 = vmatprep.mubr.msk.f32.mxu1 %vm7178_vm7, %v9081_v56  ;;  %v21118_v56 = vld [vmem:[#allocation51_spill] sm:$0xff] }
 0x720   :  { %11648 = vrot.lane.b32.xlu0 %v19564_v0, %s15453_s19 }
 0x721   :  { %v19573_v16 = vpop.permute.xlu1 %10224 }
 0x722   :  { %10069 = vmatpush1.bf16.msra.mxu0 %v10046_v61  ;;  %v9082_v21 = vpop.trf.xlu0  ;;  %v21121_v61 = vld [vmem:[#allocation32_spill] sm:$0xff] }
 0x723   :  { %10070 = vmatprep.subr.bf16.mxu0 %v10045_v51  ;;  %14591 = vmatmul.mubr.msk.f32.vlgmr.msra.gmra.mxu1 %vm7178_vm7, %v9082_v21  ;;  %v21123_v51 = vld [vmem:[#allocation50_spill] sm:$0xff] }
 0x724   :  { %14609 = vmatpush3.msk.msra.mxu1 %vm178_vm0, %v19327_v45  ;;  %11640 = vrot.lane.b32.xlu0 %v19450_v34, %s15453_s19  ;;  %v10043_v45 = vsel %vm6409_vm5, %v19205_v33, %v19207_v53  ;;  %v10040_v33 = vsel %vm6409_vm5, %v19271_v48, %v19250_v41  ;;  %v19633_v48 = vld [vmem:[%s20733_s3 + $0x18] sm:$0xff]  }
 0x725   :  { %14610 = vmatprep.subr.mxu1 %v14131_v22  ;;  %v19592_v62 = vpop.permute.xlu1 %11417  ;;  %14173 = vmatmul.mubr.msk.bf16.gmra.mxu0 %vm5987_vm3, %v15400_v24  ;;  %v21112_v24 = vld [vmem:[#allocation28_spill] sm:$0xff] }
 0x726   :  { %14611 = vmatpush3.msra.mxu1 %v14131_v22  ;;  %10071 = vmatpush1.bf16.msra.mxu0 %v10044_v25  ;;  %v9083_v58 = vpop.trf.xlu0  ;;  %v10254_v25 = vsel %vm6642_vm6, %v19573_v16, %v19546_v47  ;;  %v19752_v16 = vld [vmem:[#allocation2 + $0xc4] ss:$12 sps:$4 sm:$0xff]  }
 0x727   :  { %14612 = vmatprep.subr.mxu1 %v14130_v14  ;;  %10072 = vmatprep.subr.bf16.mxu0 %v10043_v45  ;;  %v21132_v45 = vld [vmem:[#allocation25_spill] sm:$0xff] }
 0x728   :  { %14613 = vmatpush3.msra.mxu1 %v14130_v14  ;;  %11638 = vrot.lane.b32.xlu0 %v19461_v50, %s15453_s19 }
 0x729   :  { %14593 = vmatprep.mubr.msk.f32.mxu1 %vm7178_vm7, %v9083_v58  ;;  %9718 = vmatprep.subr.bf16.mxu1 %v19118_v5  ;;  %v11416_v2 = vpop.permute.xlu1 %11415  ;;  %v21131_v58 = vld [vmem:[#allocation6_spill] sm:$0xff] }
 0x72a   :  { %10073 = vmatpush1.bf16.msra.mxu0 %v10042_v11  ;;  %v19607_v15 = vsel %vm5966_vm4, %v11416_v2, %v19592_v62  ;;  %v9084_v53 = vpop.trf.xlu0  ;;  %10092 = vmatprep.mubr.bf16.mxu0 %v21107_v30  ;;  %v10156_v11 = vsel %vm6409_vm5, %v21132_v45, %v21131_v58  ;;  %v19741_v2 = vld [vmem:[#allocation2 + $0xc8] ss:$12 sps:$4 sm:$0xff]  }
 0x72b   :  { %21109 = vst [vmem:[#allocation55_spill] sm:$0xff] %v19607_v15  ;;  %10074 = vmatprep.subr.bf16.mxu0 %v10041_v43  ;;  %14594 = vmatmul.mubr.msk.f32.gmra.mxu1 %vm7178_vm7, %v9084_v53 }
 0x72c   :  { %11828 = vrot.lane.b32.xlu0 %v19411_v1, %s15454_s13  ;;  %v10262_v1 = vsel %vm6642_vm6, %v19283_v19, %v19275_v3  ;;  %v10260_v19 = vsel %vm6642_vm6, %v19295_v18, %v19287_v40 }
 0x72d   :  { %v19619_v27 = vpop.permute.xlu1 %11413 }
 0x72e   :  { %10075 = vmatpush1.bf16.msra.mxu0 %v10040_v33  ;;  %v9394_v54 = vpop.trf.xlu0  ;;  %v21134_v33 = vld [vmem:[#allocation4_spill] sm:$0xff] }
 0x72f   :  { %10280 = vmatprep.subr.bf16.mxu0 %v10263_v49  ;;  %14614 = vmatprep.mubr.msk.f32.mxu1 %vm7178_vm7, %v9394_v54  ;;  %v21135_v54 = vld [vmem:[#allocation17_spill] sm:$0xff]  ;;  %v21136_v49 = vld [vmem:[#allocation14_spill] sm:$0xff] }
 0x730   :  { %11935 = vrot.lane.b32.xlu0 %v19373_v20, %s15454_s13  ;;  %v10261_v20 = vsel %vm6642_vm6, %v19287_v40, %v19289_v63  ;;  %v21114_v40 = vld [vmem:[#allocation56_spill] sm:$0xff] }
 0x731   :  { %14178 = vmatmul.mubr.msk.bf16.vlgmr.msra.gmra.mxu0 %vm5987_vm3, %v19633_v48  ;;  %v19637_v41 = vpop.permute.xlu1 %11405  ;;  %v10258_v18 = vsel %vm6642_vm6, %v21114_v40, %v19299_v23  ;;  %v21117_v23 = vld [vmem:[#allocation39_spill] sm:$0xff]  ;;  %v21139_v40 = vld [vmem:[#allocation10_spill] sm:$0xff] }
 0x732   :  { %21110 = vst [vmem:[#allocation66_spill] sm:$0xff] %v19637_v41  ;;  %10281 = vmatpush1.bf16.msra.mxu0 %v10262_v1  ;;  %v9395_v52 = vpop.trf.xlu0  ;;  %10102 = vmatprep.mubr.bf16.mxu0 %v21107_v30  ;;  %v10154_v1 = vsel %vm6409_vm5, %v21136_v49, %v21135_v54  ;;  %v15328_v54 = vld [vmem:[#allocation2 + $0x68] ss:$12 sps:$4 sm:$0xff]  }
 0x733   :  { %10282 = vmatprep.subr.bf16.mxu0 %v10261_v20  ;;  %14615 = vmatmul.mubr.msk.f32.vlgmr.msra.gmra.mxu1 %vm7178_vm7, %v9395_v52  ;;  %v19760_v52 = vld [vmem:[%s20733_s3 + $0x24] sm:$0xff]   ;;  %v19764_v20 = vld [vmem:[#allocation2 + $0xb0] ss:$12 sps:$4 sm:$0xff]  }
 0x734   :  { %9719 = vmatpush1.bf16.msra.mxu1 %v19131_v57  ;;  %11931 = vrot.lane.b32.xlu0 %v19506_v31, %s15454_s13 }
 0x735   :  { %9720 = vmatprep.subr.bf16.mxu1 %v19141_v38  ;;  %v19651_v3 = vpop.permute.xlu1 %11403 }
 0x736   :  { %21111 = vst [vmem:[#allocation59_spill] sm:$0xff] %v19651_v3  ;;  %10283 = vmatpush1.bf16.msra.mxu0 %v10260_v19  ;;  %v9396_v63 = vpop.trf.xlu0 }
 0x737   :  { %10284 = vmatprep.subr.bf16.mxu0 %v10259_v36  ;;  %14617 = vmatprep.mubr.msk.f32.mxu1 %vm7178_vm7, %v9396_v63  ;;  %v21138_v36 = vld [vmem:[#allocation33_spill] sm:$0xff] }
 0x738   :  { %9721 = vmatpush1.bf16.msra.mxu1 %v21112_v24  ;;  %11822 = vrot.lane.b32.xlu0 %v21113_v28, %s15454_s13  ;;  %v19776_v28 = vld [vmem:[#allocation2 + $0xac] ss:$12 sps:$4 sm:$0xff]  }
 0x739   :  { %9722 = vmatprep.subr.bf16.mxu1 %v21115_v26  ;;  %v19664_v37 = vpop.permute.xlu1 %11401  ;;  %14179 = vmatmul.mubr.msk.bf16.gmra.mxu0 %vm5987_vm3, %v19669_v35 }
 0x73a   :  { %21116 = vst [vmem:[#allocation58_spill] sm:$0xff] %v19664_v37  ;;  %10285 = vmatpush1.bf16.msra.mxu0 %v10258_v18  ;;  %v9397_v29 = vpop.trf.xlu0  ;;  %10306 = vmatprep.mubr.bf16.mxu0 %v21107_v30  ;;  %v21140_v18 = vld [vmem:[#allocation22_spill] sm:$0xff] }
 0x73b   :  { %10286 = vmatprep.subr.bf16.mxu0 %v10257_v60  ;;  %14618 = vmatmul.mubr.msk.f32.gmra.mxu1 %vm7178_vm7, %v9397_v29  ;;  %v19782_v29 = vld [vmem:[#allocation2 + $0x98] ss:$12 sps:$4 sm:$0xff]  }
 0x73c   :  { %9723 = vmatpush1.bf16.msra.mxu1 %v21117_v23  ;;  %11929 = vrot.lane.b32.xlu0 %v19524_v6, %s15454_s13 }
 0x73d   :  { %9724 = vmatprep.subr.bf16.mxu1 %v21118_v56  ;;  %v19685_v10 = vpop.permute.xlu1 %11393  ;;  %9744 = vmatprep.mubr.bf16.mxu1 %v21107_v30 }
 0x73e   :  { %21119 = vst [vmem:[#allocation60_spill] sm:$0xff] %v19685_v10  ;;  %10287 = vmatpush1.bf16.msra.mxu0 %v10256_v55  ;;  %v21142_v55 = vld [vmem:[#allocation37_spill] sm:$0xff] }
 0x740   :  { %9725 = vmatpush1.bf16.msra.mxu1 %v21120_v44  ;;  %11925 = vrot.lane.b32.xlu0 %v19351_v7, %s15454_s13  ;;  %v21125_v7 = vld [vmem:[#allocation57_spill] sm:$0xff] }
 0x741   :  { %9726 = vmatprep.subr.bf16.mxu1 %v21121_v61  ;;  %v19692_v21 = vpop.permute.xlu1 %11664 }
 0x742   :  { %21122 = vst [vmem:[#allocation61_spill] sm:$0xff] %v19692_v21 }
 0x744   :  { %9727 = vmatpush1.bf16.msra.mxu1 %v21123_v51  ;;  %11816 = vrot.lane.b32.xlu0 %v19437_v8, %s15454_s13  ;;  %v21144_v51 = vld [vmem:[#allocation36_spill] sm:$0xff] }
 0x745   :  { %9965 = vmatprep.subr.bf16.mxu1 %v19379_v42  ;;  %v19698_v59 = vpop.permute.xlu1 %11666  ;;  %v15404_v42 = vld [vmem:[%s20733_s3 + $0x8] ss:$0 sps:$4 sm:$0x33]  }
 0x746   :  { %21124 = vst [vmem:[#allocation63_spill] sm:$0xff] %v19698_v59 }
 0x747   :  { %14155 = vmatmul.mubr.msk.bf16.vlgmr.msra.gmra.mxu1 %vm5987_vm3, %v15403_v4 }
 0x748   :  { %9966 = vmatpush1.bf16.msra.mxu1 %v19423_v17  ;;  %11923 = vrot.lane.b32.xlu0 %v21125_v7, %s15454_s13 }
 0x749   :  { %9967 = vmatprep.subr.bf16.mxu1 %v19118_v5  ;;  %v19708_v22 = vpop.permute.xlu1 %11658  ;;  %9754 = vmatprep.mubr.bf16.mxu1 %v21107_v30  ;;  %v21128_v5 = vld [vmem:[#allocation52_spill] sm:$0xff] }
 0x74a   :  { %21126 = vst [vmem:[#allocation62_spill] sm:$0xff] %v19708_v22 }
 0x74c   :  { %9968 = vmatpush1.bf16.msra.mxu1 %v19131_v57  ;;  %11919 = vrot.lane.b32.xlu0 %v19423_v17, %s15454_s13 }
 0x74d   :  { %9969 = vmatprep.subr.bf16.mxu1 %v19141_v38  ;;  %v19715_v8 = vpop.permute.xlu1 %11652 }
 0x74e   :  { %21127 = vst [vmem:[#allocation64_spill] sm:$0xff] %v19715_v8 }
 0x74f   :  { %14156 = vmatmul.mubr.msk.bf16.gmra.mxu1 %vm5987_vm3, %v15404_v42 }
 0x750   :  { %9970 = vmatpush1.bf16.msra.mxu1 %v21112_v24  ;;  %11810 = vrot.lane.b32.xlu0 %v21128_v5, %s15454_s13  ;;  %v10153_v24 = vsel %vm6409_vm5, %v21138_v36, %v21136_v49  ;;  %v19804_v5 = vld [vmem:[%s20733_s3 + $0x2c] ss:$0 sps:$4 sm:$0x33]   ;;  %v21153_v36 = vld [vmem:[#allocation42_spill] sm:$0xff] }
 0x751   :  { %9971 = vmatprep.subr.bf16.mxu1 %v21115_v26  ;;  %v19725_v57 = vpop.permute.xlu1 %11654  ;;  %9991 = vmatprep.mubr.bf16.mxu1 %v21107_v30  ;;  %v10152_v26 = vsel %vm6409_vm5, %v21140_v18, %v21139_v40  ;;  %v21154_v40 = vld [vmem:[#allocation45_spill] sm:$0xff] }
 0x752   :  { %21129 = vst [vmem:[#allocation65_spill] sm:$0xff] %v19725_v57 }
 0x754   :  { %9972 = vmatpush1.bf16.msra.mxu1 %v21117_v23 }
 0x755   :  { %9973 = vmatprep.subr.bf16.mxu1 %v21118_v56  ;;  %v19730_v38 = vpop.permute.xlu1 %11646  ;;  %v10151_v56 = vsel %vm6409_vm5, %v21142_v55, %v21140_v18  ;;  %v21155_v18 = vld [vmem:[#allocation38_spill] sm:$0xff] }
 0x756   :  { %21130 = vst [vmem:[#allocation24_spill] sm:$0xff] %v19730_v38  ;;  %v10229_v17 = vpop.permute.xlu0 %10228 }
 0x757   :  { %v10255_v14 = vsel %vm6642_vm6, %v19546_v47, %v10229_v17  ;;  %v10155_v47 = vsel %vm6409_vm5, %v21134_v33, %v21132_v45  ;;  %v21150_v33 = vld [vmem:[#allocation34_spill] sm:$0xff] }
 0x758   :  { %9974 = vmatpush1.bf16.msra.mxu1 %v21120_v44  ;;  %10288 = vmatprep.subr.bf16.mxu0 %v10255_v14  ;;  %v19792_v44 = vld [vmem:[#allocation2 + $0x94] ss:$12 sps:$4 sm:$0xff]   ;;  %v19817_v14 = vld [vmem:[#allocation2 + $0x7c] ss:$12 sps:$4 sm:$0xff]  }
 0x759   :  { %10173 = vmatprep.subr.bf16.mxu1 %v10156_v11  ;;  %10289 = vmatpush1.bf16.msra.mxu0 %v10254_v25  ;;  %v19743_v53 = vpop.permute.xlu1 %11644  ;;  %v21147_v25 = vld [vmem:[#allocation3_spill] sm:$0xff] }
 0x75a   :  { %21133 = vst [vmem:[#allocation15_spill] sm:$0xff] %v19743_v53  ;;  %v19745_v43 = vpop.permute.xlu0 %10335  ;;  %10504 = vmatprep.subr.bf16.mxu0 %v19741_v2  ;;  %v21149_v11 = vld [vmem:[#allocation43_spill] sm:$0xff] }
 0x75b   :  { %14176 = vmatmul.mubr.msk.bf16.vlgmr.msra.gmra.mxu1 %vm5987_vm3, %v15403_v4  ;;  %v21145_v4 = vld [vmem:[#allocation30_spill] sm:$0xff] }
 0x75c   :  { %10174 = vmatpush1.bf16.msra.mxu1 %v10155_v47  ;;  %14182 = vmatmul.mubr.msk.bf16.vlgmr.msra.gmra.mxu0 %vm5987_vm3, %v19760_v52  ;;  %v10150_v7 = vsel %vm6409_vm5, %v21145_v4, %v21144_v51  ;;  %v10149_v58 = vsel %vm6409_vm5, %v21147_v25, %v21145_v4  ;;  %v10148_v47 = vsel %vm6409_vm5, %v21150_v33, %v21149_v11  ;;  %v21158_v4 = vld [vmem:[#allocation49_spill] sm:$0xff] }
 0x75d   :  { %10175 = vmatprep.subr.bf16.mxu1 %v10154_v1  ;;  %10505 = vmatpush1.bf16.msra.mxu0 %v19752_v16  ;;  %v19767_v19 = vpop.permute.xlu1 %11642 }
 0x75e   :  { %21137 = vst [vmem:[#allocation8_spill] sm:$0xff] %v19767_v19  ;;  %v19769_v63 = vpop.permute.xlu0 %10331  ;;  %10506 = vmatprep.subr.bf16.mxu0 %v19764_v20  ;;  %10001 = vmatprep.mubr.bf16.mxu1 %v21107_v30 }
 0x75f   :  { %10316 = vmatprep.mubr.bf16.mxu0 %v21107_v30 }
 0x760   :  { %10176 = vmatpush1.bf16.msra.mxu1 %v10153_v24  ;;  %v10147_v24 = vsel %vm6409_vm5, %v21153_v36, %v21150_v33  ;;  %v21164_v36 = vld [vmem:[#allocation44_spill] sm:$0xff] }
 0x761   :  { %10177 = vmatprep.subr.bf16.mxu1 %v10152_v26  ;;  %10507 = vmatpush1.bf16.msra.mxu0 %v19776_v28  ;;  %v19785_v60 = vpop.permute.xlu1 %11826  ;;  %v10370_v26 = vsel %vm6642_vm6, %v21155_v18, %v21154_v40 }
 0x762   :  { %21141 = vst [vmem:[#allocation18_spill] sm:$0xff] %v19785_v60  ;;  %v11420_v23 = vpop.permute.xlu0 %11419  ;;  %10508 = vmatprep.subr.bf16.mxu0 %v19782_v29 }
 0x763   :  { %14177 = vmatmul.mubr.msk.bf16.gmra.mxu1 %vm5987_vm3, %v15404_v42  ;;  %v19796_v61 = vsel %vm5966_vm4, %v19592_v62, %v11420_v23  ;;  %v19808_v42 = vld [vmem:[#allocation2 + $0x80] ss:$12 sps:$4 sm:$0xff]  }
 0x764   :  { %21143 = vst [vmem:[#allocation20_spill] sm:$0xff] %v19796_v61  ;;  %10178 = vmatpush1.bf16.msra.mxu1 %v10151_v56  ;;  %14183 = vmatmul.mubr.msk.bf16.gmra.mxu0 %vm5987_vm3, %v19804_v5  ;;  %v21157_v56 = vld [vmem:[#allocation41_spill] sm:$0xff] }
 0x765   :  { %10179 = vmatprep.subr.bf16.mxu1 %v10150_v7  ;;  %10509 = vmatpush1.bf16.msra.mxu0 %v19792_v44  ;;  %v19811_v62 = vpop.permute.xlu1 %11933  ;;  %v10369_v51 = vsel %vm6642_vm6, %v21157_v56, %v21155_v18  ;;  %v21159_v7 = vld [vmem:[#allocation40_spill] sm:$0xff] }
 0x766   :  { %v19813_v17 = vpop.permute.xlu0 %11411  ;;  %10510 = vmatprep.subr.bf16.mxu0 %v19808_v42  ;;  %10199 = vmatprep.mubr.bf16.mxu1 %v21107_v30  ;;  %v10368_v25 = vsel %vm6642_vm6, %v21159_v7, %v21158_v4  ;;  %v10364_v4 = vsel %vm6642_vm6, %v19515_v12, %v19529_v13  ;;  %v10362_v13 = vsel %vm6642_vm6, %v19559_v46, %v19745_v43 }
 0x767   :  { %21146 = vst [vmem:[#allocation29_spill] sm:$0xff] %v19813_v17  ;;  %10530 = vmatprep.mubr.bf16.mxu0 %v21107_v30  ;;  %v19826_v45 = vsel %vm5966_vm4, %v19813_v17, %v19619_v27  ;;  %v15326_v27 = vld [vmem:[#allocation2 + $0x64] ss:$12 sps:$4 sm:$0xff]  }
 0x768   :  { %21148 = vst [vmem:[#allocation21_spill] sm:$0xff] %v19826_v45  ;;  %10180 = vmatpush1.bf16.msra.mxu1 %v10149_v58  ;;  %v15407_v58 = vld [vmem:[%s20733_s3 + $0x30] sm:$0xff]  }
 0x769   :  { %10181 = vmatprep.subr.bf16.mxu1 %v10148_v47  ;;  %10511 = vmatpush1.bf16.msra.mxu0 %v19817_v14  ;;  %v19832_v49 = vpop.permute.xlu1 %11824 }
 0x76a   :  { %21151 = vst [vmem:[#allocation9_spill] sm:$0xff] %v19832_v49  ;;  %v19834_v1 = vpop.permute.xlu0 %11409  ;;  %10512 = vmatprep.subr.bf16.mxu0 %v15328_v54  ;;  %v21163_v54 = vld [vmem:[#allocation47_spill] sm:$0xff] }
 0x76b   :  { %21152 = vst [vmem:[#allocation7_spill] sm:$0xff] %v19834_v1 }
 0x76c   :  { %10182 = vmatpush1.bf16.msra.mxu1 %v10147_v24  ;;  %v10366_v24 = vsel %vm6642_vm6, %v21164_v36, %v21163_v54  ;;  %v15331_v54 = vld [vmem:[#allocation2 + $0xe0] ss:$12 sps:$4 sm:$0xff]  }
 0x76d   :  { %10387 = vmatprep.subr.bf16.mxu1 %v10370_v26  ;;  %10513 = vmatpush1.bf16.msra.mxu0 %v15326_v27  ;;  %v19842_v23 = vpop.permute.xlu1 %11820  ;;  %v21166_v26 = vld [vmem:[#allocation54_spill] sm:$0xff] }
 0x76e   :  { %v19844_v55 = vpop.permute.xlu0 %11407  ;;  %v10365_v56 = vsel %vm6642_vm6, %v21166_v26, %v21164_v36  ;;  %v15329_v36 = vld [vmem:[#allocation2 + $0xdc] ss:$12 sps:$4 sm:$0xff]  }
 0x76f   :  { %21156 = vst [vmem:[#allocation28_spill] sm:$0xff] %v19844_v55  ;;  %14180 = vmatmul.mubr.msk.bf16.vlgmr.msra.gmra.mxu1 %vm5987_vm3, %v19633_v48  ;;  %v21162_v48 = vld [vmem:[#allocation48_spill] sm:$0xff] }
 0x770   :  { %10388 = vmatpush1.bf16.msra.mxu1 %v10369_v51  ;;  %14196 = vmatmul.mubr.msk.bf16.vlgmr.msra.gmra.mxu0 %vm5987_vm3, %v15407_v58  ;;  %v10367_v47 = vsel %vm6642_vm6, %v21162_v48, %v21159_v7  ;;  %v15408_v7 = vld [vmem:[%s20733_s3 + $0x38] ss:$0 sps:$4 sm:$0x33]  }
 0x771   :  { %10389 = vmatprep.subr.bf16.mxu1 %v10368_v25  ;;  %v19858_v11 = vpop.permute.xlu1 %11927  ;;  %10209 = vmatprep.mubr.bf16.mxu1 %v21107_v30 }
 0x772   :  { %21160 = vst [vmem:[#allocation53_spill] sm:$0xff] %v19858_v11  ;;  %v19861_v33 = vpop.permute.xlu0 %11399  ;;  %10540 = vmatprep.mubr.bf16.mxu0 %v21107_v30 }
 0x773   :  { %21161 = vst [vmem:[#allocation56_spill] sm:$0xff] %v19861_v33 }
 0x774   :  { %10390 = vmatpush1.bf16.msra.mxu1 %v10367_v47  ;;  %v10361_v47 = vsel %vm6642_vm6, %v19769_v63, %v19559_v46 }
 0x775   :  { %10391 = vmatprep.subr.bf16.mxu1 %v10366_v24  ;;  %v11819_v27 = vpop.permute.xlu1 %11818 }
 0x776   :  { %v19872_v40 = vsel %vm6409_vm5, %v11819_v27, %v19842_v23  ;;  %v11398_v18 = vpop.permute.xlu0 %11397 }
 0x777   :  { %21165 = vst [vmem:[#allocation26_spill] sm:$0xff] %v19872_v40  ;;  %14181 = vmatmul.mubr.msk.bf16.gmra.mxu1 %vm5987_vm3, %v19669_v35  ;;  %v19881_v51 = vsel %vm5966_vm4, %v11398_v18, %v19861_v33  ;;  %v10363_v35 = vsel %vm6642_vm6, %v19548_v9, %v19515_v12 }
 0x778   :  { %21167 = vst [vmem:[#allocation39_spill] sm:$0xff] %v19881_v51  ;;  %10392 = vmatpush1.bf16.msra.mxu1 %v10365_v56  ;;  %14197 = vmatmul.mubr.msk.bf16.gmra.mxu0 %vm5987_vm3, %v15408_v7 }
 0x779   :  { %10393 = vmatprep.subr.bf16.mxu1 %v10364_v4  ;;  %10413 = vmatprep.mubr.bf16.mxu1 %v21107_v30  ;;  %v21183_v4 = vld [vmem:[#allocation16_spill] sm:$0xff] }
 0x77a   :  { %v19891_v25 = vpop.permute.xlu0 %11395 }
 0x77b   :  { %21168 = vst [vmem:[#allocation51_spill] sm:$0xff] %v19891_v25 }
 0x77c   :  { %10394 = vmatpush1.bf16.msra.mxu1 %v10363_v35 }
 0x77d   :  { %10395 = vmatprep.subr.bf16.mxu1 %v10362_v13 }
 0x77e   :  { %v19899_v48 = vpop.permute.xlu0 %11391 }
 0x77f   :  { %21169 = vst [vmem:[#allocation46_spill] sm:$0xff] %v19899_v48 }
 0x780   :  { %10396 = vmatpush1.bf16.msra.mxu1 %v10361_v47  ;;  %v19956_v47 = vpop.permute.xlu1 %11814 }
 0x781   :  { %10621 = vmatprep.subr.bf16.mxu1 %v15331_v54  ;;  %21186 = vst [vmem:[#allocation36_spill] sm:$0xff] %v19956_v47 }
 0x782   :  { %v19904_v24 = vpop.permute.xlu0 %11662 }
 0x783   :  { %21170 = vst [vmem:[#allocation32_spill] sm:$0xff] %v19904_v24  ;;  %14184 = vmatmul.mubr.msk.bf16.vlgmr.msra.gmra.mxu1 %vm5987_vm3, %v19760_v52 }
 0x784   :  { %10622 = vmatpush1.bf16.msra.mxu1 %v15329_v36  ;;  %10423 = vmatprep.mubr.bf16.mxu1 %v21107_v30 }
 0x785   :  { %10623 = vmatprep.subr.bf16.mxu1 %v19741_v2 }
 0x786   :  { %v19910_v12 = vpop.permute.xlu0 %11660 }
 0x787   :  { %21171 = vst [vmem:[#allocation50_spill] sm:$0xff] %v19910_v12 }
 0x788   :  { %10624 = vmatpush1.bf16.msra.mxu1 %v19752_v16 }
 0x789   :  { %10625 = vmatprep.subr.bf16.mxu1 %v19764_v20 }
 0x78a   :  { %v19914_v9 = vpop.permute.xlu0 %11656 }
 0x78b   :  { %21172 = vst [vmem:[#allocation57_spill] sm:$0xff] %v19914_v9  ;;  %14185 = vmatmul.mubr.msk.bf16.gmra.mxu1 %vm5987_vm3, %v19804_v5 }
 0x78c   :  { %10626 = vmatpush1.bf16.msra.mxu1 %v19776_v28  ;;  %10647 = vmatprep.mubr.bf16.mxu1 %v21107_v30 }
 0x78d   :  { %10627 = vmatprep.subr.bf16.mxu1 %v19782_v29  ;;  %v21179_v29 = vld [vmem:[#allocation35_spill] sm:$0xff] }
 0x78e   :  { %v19921_v46 = vpop.permute.xlu0 %11650 }
 0x78f   :  { %21173 = vst [vmem:[#allocation52_spill] sm:$0xff] %v19921_v46 }
 0x790   :  { %10628 = vmatpush1.bf16.msra.mxu1 %v19792_v44 }
 0x791   :  { %10629 = vmatprep.subr.bf16.mxu1 %v19808_v42 }
 0x792   :  { %v19925_v2 = vpop.permute.xlu0 %11648 }
 0x793   :  { %21174 = vst [vmem:[#allocation6_spill] sm:$0xff] %v19925_v2  ;;  %v21193_v2 = vld [vmem:[#allocation5_spill] sm:$0xff] }
 0x794   :  { %10630 = vmatpush1.bf16.msra.mxu1 %v19817_v14 }
 0x796   :  { %v19928_v43 = vpop.permute.xlu0 %11640 }
 0x797   :  { %21175 = vst [vmem:[#allocation25_spill] sm:$0xff] %v19928_v43  ;;  %14208 = vmatmul.mubr.msk.bf16.vlgmr.msra.gmra.mxu1 %vm5987_vm3, %v15407_v58  ;;  %v21181_v58 = vld [vmem:[#allocation31_spill] sm:$0xff] }
 0x798   :  { %10657 = vmatprep.mubr.bf16.mxu1 %v21107_v30 }
 0x79a   :  { %v19932_v16 = vpop.permute.xlu0 %11638 }
 0x79b   :  { %21176 = vst [vmem:[#allocation4_spill] sm:$0xff] %v19932_v16  ;;  %v21192_v16 = vld [vmem:[#allocation13_spill] sm:$0xff] }
 0x79e   :  { %v19934_v52 = vpop.permute.xlu0 %11828 }
 0x79f   :  { %21177 = vst [vmem:[#allocation17_spill] sm:$0xff] %v19934_v52  ;;  %14209 = vmatmul.mubr.msk.bf16.gmra.mxu1 %vm5987_vm3, %v15408_v7 }
 0x7a2   :  { %v11936_v20 = vpop.permute.xlu0 %11935 }
 0x7a3   :  { %v19939_v63 = vsel %vm6409_vm5, %v19811_v62, %v11936_v20 }
 0x7a4   :  { %21178 = vst [vmem:[#allocation14_spill] sm:$0xff] %v19939_v63 }
 0x7a5   :  { %v14580_v28 = vpop.f32.mrf.mxu0 }
 0x7a6   :  { %v9046_v44 = vadd.f32 %v14580_v28, %v21179_v29  ;;  %v11932_v5 = vpop.permute.xlu0 %11931  ;;  %v19962_v28 = vpop.permute.xlu1 %11921 }
 0x7a7   :  { %v19944_v42 = vsel %vm6409_vm5, %v11932_v5, %v19811_v62  ;;  %v9026_v14 = vpop.f32.mrf.mxu0  ;;  %21188 = vst [vmem:[#allocation3_spill] sm:$0xff] %v19962_v28 }
 0x7a8   :  { %21180 = vst [vmem:[#allocation33_spill] sm:$0xff] %v19944_v42  ;;  %v9045_v27 = vadd.f32 %v9026_v14, %v21181_v58 }
 0x7aa   :  { %v11823_v18 = vpop.permute.xlu0 %11822 }
 0x7ab   :  { %v19949_v26 = vsel %vm6409_vm5, %v19842_v23, %v11823_v18 }
 0x7ac   :  { %21182 = vst [vmem:[#allocation10_spill] sm:$0xff] %v19949_v26 }
 0x7ad   :  { %v14583_v56 = vpop.f32.mrf.mxu0 }
 0x7ae   :  { %v9048_v7 = vadd.f32 %v14583_v56, %v21183_v4  ;;  %v19952_v35 = vpop.permute.xlu0 %11929 }
 0x7af   :  { %21184 = vst [vmem:[#allocation22_spill] sm:$0xff] %v19952_v35  ;;  %v9036_v62 = vpop.f32.mrf.mxu0 }
 0x7b2   :  { %v19954_v13 = vpop.permute.xlu0 %11925 }
 0x7b3   :  { %21185 = vst [vmem:[#allocation37_spill] sm:$0xff] %v19954_v13 }
 0x7b5   :  { %v14604_v20 = vpop.f32.mrf.mxu0 }
 0x7b6   :  { %v11817_v54 = vpop.permute.xlu0 %11816 }
 0x7b7   :  { %v19960_v36 = vsel %vm6409_vm5, %v19956_v47, %v11817_v54  ;;  %v9339_v5 = vpop.f32.mrf.mxu0 }
 0x7b8   :  { %21187 = vst [vmem:[#allocation30_spill] sm:$0xff] %v19960_v36 }
 0x7ba   :  { %v11924_v23 = vpop.permute.xlu0 %11923 }
 0x7bb   :  { %v19966_v29 = vsel %vm6409_vm5, %v19962_v28, %v11924_v23  ;;  %v21190_v28 = vld [vmem:[#allocation11_spill] sm:$0xff] }
 0x7bc   :  { %21189 = vst [vmem:[#allocation43_spill] sm:$0xff] %v19966_v29  ;;  %v21191_v29 = vld [vmem:[#allocation12_spill] sm:$0xff] }
 0x7bd   :  { %v14607_v14 = vpop.f32.mrf.mxu0  ;;  %v7403_v26 = vadd.f32 %v21191_v29, %v21190_v28 }
 0x7bf   :  { %v9349_v58 = vpop.f32.mrf.mxu0  ;;  %v7570_v43 = vadd.f32 %v21192_v16, %v7403_v26 }
 0x7c1   :  { %v7722_v46 = vadd.f32 %v21193_v2, %v7570_v43 }
 0x7c3   :  { %v9047_v9 = vadd.f32 %v9036_v62, %v7722_v46 }
 0x7c9   :  { %v9685_v18 = vpop.f32.mrf.mxu0 }
 0x7cb   :  { %v9687_v56 = vpop.f32.mrf.mxu0 }
 0x7cd   :  { %v9689_v4 = vpop.f32.mrf.mxu0 }
 0x7cf   :  { %v9691_v13 = vpop.f32.mrf.mxu0 }
 0x7d1   :  { %v9695_v11 = vpop.f32.mrf.mxu0 }
 0x7d3   :  { %v9697_v35 = vpop.f32.mrf.mxu0 }
 0x7d5   :  { %v9699_v42 = vpop.f32.mrf.mxu0 }
 0x7d7   :  { %v9700_v54 = vpop.f32.mrf.mxu0 }
 0x7dd   :  { %v19968_v63 = vpop.f32.mrf.mxu0 }
 0x7df   :  { %v19970_v47 = vpop.f32.mrf.mxu0 }
 0x7e1   :  { %v19972_v36 = vpop.f32.mrf.mxu0 }
 0x7e3   :  { %v14592_v40 = vpop.f32.mrf.mxu1  ;;  %v19974_v23 = vpop.f32.mrf.mxu0 }
 0x7e4   :  { %v9198_v49 = vadd.f32 %v14592_v40, %v9046_v44 }
 0x7e5   :  { %v9178_v60 = vpop.f32.mrf.mxu1  ;;  %v19978_v52 = vpop.f32.mrf.mxu0 }
 0x7e6   :  { %v9197_v42 = vadd.f32 %v9178_v60, %v9045_v27  ;;  %v9359_v54 = vadd.f32 %v14604_v20, %v9198_v49 }
 0x7e7   :  { %v19981_v19 = vpop.f32.mrf.mxu0 }
 0x7e8   :  { %v9358_v53 = vadd.f32 %v9339_v5, %v9197_v42 }
 0x7e9   :  { %v9946_v38 = vpop.f32.mrf.mxu0 }
 0x7eb   :  { %v14595_v8 = vpop.f32.mrf.mxu1  ;;  %v9947_v57 = vpop.f32.mrf.mxu0 }
 0x7ec   :  { %v9200_v22 = vadd.f32 %v14595_v8, %v9048_v7 }
 0x7ed   :  { %v9188_v12 = vpop.f32.mrf.mxu1 }
 0x7ee   :  { %v9199_v28 = vadd.f32 %v9188_v12, %v9047_v9  ;;  %v9361_v40 = vadd.f32 %v14607_v14, %v9200_v22 }
 0x7f0   :  { %v9360_v44 = vadd.f32 %v9349_v58, %v9199_v28 }
 0x7f1   :  { %v10094_v29 = vpop.f32.mrf.mxu0 }
 0x7f3   :  { %v14616_v24 = vpop.f32.mrf.mxu1  ;;  %v10096_v21 = vpop.f32.mrf.mxu0 }
 0x7f4   :  { %v19984_v16 = vadd.f32 %v14616_v24, %v9359_v54 }
 0x7f5   :  { %v9491_v60 = vpop.f32.mrf.mxu1  ;;  %v10098_v49 = vpop.f32.mrf.mxu0 }
 0x7f6   :  { %21194 = vst [vmem:[#allocation34_spill] sm:$0xff] %v19984_v16  ;;  %v19986_v27 = vadd.f32 %v9491_v60, %v9358_v53 }
 0x7f7   :  { %v10100_v38 = vpop.f32.mrf.mxu0 }
 0x7f8   :  { %21195 = vst [vmem:[#allocation42_spill] sm:$0xff] %v19986_v27 }
 0x7f9   :  { %v10104_v26 = vpop.f32.mrf.mxu0 }
 0x7fb   :  { %v14619_v2 = vpop.f32.mrf.mxu1  ;;  %v10106_v43 = vpop.f32.mrf.mxu0 }
 0x7fc   :  { %v19988_v57 = vadd.f32 %v14619_v2, %v9361_v40 }
 0x7fd   :  { %v9501_v8 = vpop.f32.mrf.mxu1  ;;  %v10108_v46 = vpop.f32.mrf.mxu0 }
 0x7fe   :  { %21196 = vst [vmem:[#allocation45_spill] sm:$0xff] %v19988_v57  ;;  %v19990_v12 = vadd.f32 %v9501_v8, %v9360_v44 }
 0x7ff   :  { %v10109_v22 = vpop.f32.mrf.mxu0 }
 0x800   :  { %21197 = vst [vmem:[#allocation38_spill] sm:$0xff] %v19990_v12 }
 0x807   :  { %v9746_v9 = vpop.f32.mrf.mxu1 }
 0x808   :  { %v9747_v7 = vadd.f32 %v9746_v9, %v9685_v18 }
 0x809   :  { %v9748_v62 = vpop.f32.mrf.mxu1 }
 0x80a   :  { %v9749_v24 = vadd.f32 %v9748_v62, %v9687_v56  ;;  %v10111_v20 = vadd.f32 %v10094_v29, %v9747_v7 }
 0x80b   :  { %v9750_v5 = vpop.f32.mrf.mxu1 }
 0x80c   :  { %v9751_v14 = vadd.f32 %v9750_v5, %v9689_v4  ;;  %v10112_v53 = vadd.f32 %v10096_v21, %v9749_v24 }
 0x80d   :  { %v9752_v58 = vpop.f32.mrf.mxu1 }
 0x80e   :  { %v9753_v42 = vadd.f32 %v9752_v58, %v9691_v13  ;;  %v19992_v54 = vadd.f32 %v10098_v49, %v9751_v14 }
 0x80f   :  { %v9756_v28 = vpop.f32.mrf.mxu1 }
 0x810   :  { %v9757_v40 = vadd.f32 %v9756_v28, %v9695_v11  ;;  %v19994_v60 = vadd.f32 %v10100_v38, %v9753_v42 }
 0x811   :  { %v9758_v2 = vpop.f32.mrf.mxu1 }
 0x812   :  { %v9759_v44 = vadd.f32 %v9758_v2, %v9697_v35  ;;  %v19996_v8 = vadd.f32 %v10104_v26, %v9757_v40 }
 0x813   :  { %v9760_v46 = vpop.f32.mrf.mxu1 }
 0x814   :  { %v10116_v18 = vadd.f32 %v10106_v43, %v9759_v44 }
 0x815   :  { %v9761_v22 = vpop.f32.mrf.mxu1 }
 0x81b   :  { %v9993_v56 = vpop.f32.mrf.mxu1 }
 0x81c   :  { %v10308_v29 = vpop.f32.mrf.mxu0  ;;  %v9994_v33 = vadd.f32 %v9993_v56, %v19968_v63 }
 0x81d   :  { %v9995_v9 = vpop.f32.mrf.mxu1  ;;  %v10325_v41 = vadd.f32 %v10308_v29, %v10111_v20 }
 0x81e   :  { %v10310_v4 = vpop.f32.mrf.mxu0  ;;  %v9996_v37 = vadd.f32 %v9995_v9, %v19970_v47 }
 0x81f   :  { %v9997_v21 = vpop.f32.mrf.mxu1 }
 0x820   :  { %v10312_v7 = vpop.f32.mrf.mxu0  ;;  %v9998_v55 = vadd.f32 %v9997_v21, %v19972_v36 }
 0x821   :  { %v9999_v13 = vpop.f32.mrf.mxu1 }
 0x822   :  { %v10314_v49 = vpop.f32.mrf.mxu0 }
 0x823   :  { %v10003_v62 = vpop.f32.mrf.mxu1 }
 0x824   :  { %v19998_v24 = vpop.f32.mrf.mxu0 }
 0x825   :  { %v10005_v11 = vpop.f32.mrf.mxu1 }
 0x826   :  { %v10320_v38 = vpop.f32.mrf.mxu0  ;;  %v10006_v36 = vadd.f32 %v10005_v11, %v19981_v19  ;;  %v15416_v11 = vld [vmem:[#allocation2 + $0x110] ss:$12 sps:$4 sm:$0xff]  }
 0x827   :  { %v10007_v5 = vpop.f32.mrf.mxu1  ;;  %v20000_v35 = vadd.f32 %v10320_v38, %v10116_v18 }
 0x828   :  { %v10322_v26 = vpop.f32.mrf.mxu0 }
 0x829   :  { %v10008_v14 = vpop.f32.mrf.mxu1 }
 0x82a   :  { %v10323_v43 = vpop.f32.mrf.mxu0 }
 0x82f   :  { %v10201_v58 = vpop.f32.mrf.mxu1 }
 0x830   :  { %v10532_v42 = vpop.f32.mrf.mxu0  ;;  %v10218_v3 = vadd.f32 %v10201_v58, %v9994_v33  ;;  %v20087_v58 = vld [vmem:[#allocation2 + $0xd8] ss:$12 sps:$4 sm:$0xff]  }
 0x831   :  { %v10203_v28 = vpop.f32.mrf.mxu1  ;;  %v10549_v17 = vadd.f32 %v10532_v42, %v10325_v41  ;;  %v15422_v42 = vld [vmem:[#allocation2 + $0xe0] ss:$12 sps:$4 sm:$0xff]  }
 0x832   :  { %v10534_v40 = vpop.f32.mrf.mxu0 }
 0x833   :  { %v10205_v2 = vpop.f32.mrf.mxu1 }
 0x834   :  { %v10536_v44 = vpop.f32.mrf.mxu0  ;;  %v10220_v45 = vadd.f32 %v10205_v2, %v9998_v55 }
 0x835   :  { %v10207_v46 = vpop.f32.mrf.mxu1 }
 0x836   :  { %v10538_v22 = vpop.f32.mrf.mxu0 }
 0x837   :  { %v10211_v12 = vpop.f32.mrf.mxu1 }
 0x838   :  { %v10542_v57 = vpop.f32.mrf.mxu0 }
 0x839   :  { %v10213_v27 = vpop.f32.mrf.mxu1 }
 0x83a   :  { %v10544_v16 = vpop.f32.mrf.mxu0 }
 0x83b   :  { %v10215_v59 = vpop.f32.mrf.mxu1 }
 0x83c   :  { %v10546_v48 = vpop.f32.mrf.mxu0  ;;  %v10219_v59 = vadd.f32 %v10203_v28, %v9996_v37  ;;  %v20101_v28 = vpop.permute.xlu0 %11919 }
 0x83d   :  { %v10216_v5 = vpop.f32.mrf.mxu1 }
 0x83e   :  { %v10547_v18 = vpop.f32.mrf.mxu0  ;;  %v10326_v5 = vadd.f32 %v10310_v4, %v10112_v53 }
 0x83f   :  { %v10000_v18 = vadd.f32 %v9999_v13, %v19974_v23  ;;  %v10554_v13 = vadd.f32 %v10544_v16, %v20000_v35  ;;  %v20041_v16 = vld [vmem:[#allocation2 + $0xc4] ss:$12 sps:$4 sm:$0xff]  }
 0x840   :  { %v10550_v63 = vadd.f32 %v10534_v40, %v10326_v5  ;;  %v20072_v35 = vld [vmem:[#allocation2 + $0xf0] ss:$12 sps:$4 sm:$0xff]   ;;  %v20105_v2 = vpop.permute.xlu0 %11810 }
 0x841   :  { %v10221_v33 = vadd.f32 %v10207_v46, %v10000_v18 }
 0x843   :  { %v10415_v38 = vpop.f32.mrf.mxu1 }
 0x844   :  { %v10432_v48 = vadd.f32 %v10415_v38, %v10218_v3  ;;  %v10328_v3 = vadd.f32 %v10314_v49, %v19994_v60  ;;  %v21198_v38 = vld [vmem:[#allocation27_spill] sm:$0xff] }
 0x845   :  { %v10417_v26 = vpop.f32.mrf.mxu1 }
 0x846   :  { %v10433_v15 = vadd.f32 %v10417_v26, %v10219_v59 }
 0x847   :  { %v10419_v14 = vpop.f32.mrf.mxu1 }
 0x848   :  { %v10434_v20 = vadd.f32 %v10419_v14, %v10220_v45  ;;  %v10329_v45 = vadd.f32 %v19998_v24, %v19996_v8  ;;  %v20065_v24 = vld [vmem:[#allocation2 + $0xf4] ss:$12 sps:$4 sm:$0xff]  }
 0x849   :  { %v10421_v43 = vpop.f32.mrf.mxu1 }
 0x84a   :  { %v10435_v53 = vadd.f32 %v10421_v43, %v10221_v33  ;;  %v10553_v29 = vadd.f32 %v10542_v57, %v10329_v45 }
 0x84b   :  { %v10425_v10 = vpop.f32.mrf.mxu1 }
 0x84d   :  { %v10427_v25 = vpop.f32.mrf.mxu1 }
 0x84f   :  { %v10429_v51 = vpop.f32.mrf.mxu1 }
 0x850   :  { %v10004_v51 = vadd.f32 %v10003_v62, %v19978_v52  ;;  %v20057_v62 = vld [vmem:[#allocation2 + $0xb0] ss:$12 sps:$4 sm:$0xff]  }
 0x851   :  { %v10430_v30 = vpop.f32.mrf.mxu1 }
 0x852   :  { %v10327_v30 = vadd.f32 %v10312_v7, %v19992_v54  ;;  %v10222_v55 = vadd.f32 %v10211_v12, %v10004_v51 }
 0x854   :  { %v10551_v23 = vadd.f32 %v10536_v44, %v10327_v30  ;;  %v10436_v52 = vadd.f32 %v10425_v10, %v10222_v55 }
 0x857   :  { %v10649_v1 = vpop.f32.mrf.mxu1 }
 0x858   :  { %v10666_v61 = vadd.f32 %v10649_v1, %v10432_v48 }
 0x859   :  { %v10651_v47 = vpop.f32.mrf.mxu1 }
 0x85a   :  { %v20008_v56 = vmax.f32 %v10549_v17, %v10666_v61  ;;  %v10667_v37 = vadd.f32 %v10651_v47, %v10433_v15  ;;  %v10552_v61 = vadd.f32 %v10538_v22, %v10328_v3  ;;  %v10223_v15 = vadd.f32 %v10213_v27, %v10006_v36 }
 0x85b   :  { %v10653_v41 = vpop.f32.mrf.mxu1 }
 0x85c   :  { %v20012_v1 = vmax.f32 %v10550_v63, %v10667_v37  ;;  %v10668_v54 = vadd.f32 %v10653_v41, %v10434_v20  ;;  %10681 = vrot.lane.b32.xlu1 %v20008_v56, %s15453_s19  ;;  %v10437_v9 = vadd.f32 %v10427_v25, %v10223_v15  ;;  %v20037_v25 = vld [vmem:[#allocation2 + $0xc0] ss:$12 sps:$4 sm:$0xff]  }
 0x85d   :  { %v10655_v17 = vpop.f32.mrf.mxu1  ;;  %v21199_v63 = vld [vmem:[#allocation23_spill] sm:$0xff] }
 0x85e   :  { %v20018_v60 = vmax.f32 %v10551_v23, %v10668_v54  ;;  %v10669_v19 = vadd.f32 %v10655_v17, %v10435_v53  ;;  %10994 = vrot.lane.b32.xlu0 %v20012_v1, %s15453_s19  ;;  %v21200_v23 = vld [vmem:[#allocation19_spill] sm:$0xff] }
 0x85f   :  { %v10659_v12 = vpop.f32.mrf.mxu1 }
 0x860   :  { %v20022_v4 = vmax.f32 %v10552_v61, %v10669_v19  ;;  %v10670_v21 = vadd.f32 %v10659_v12, %v10436_v52 }
 0x861   :  { %v10661_v7 = vpop.f32.mrf.mxu1 }
 0x862   :  { %v20025_v8 = vmax.f32 %v10553_v29, %v10670_v21  ;;  %v10671_v49 = vadd.f32 %v10661_v7, %v10437_v9  ;;  %10683 = vrot.lane.b32.xlu0 %v20018_v60, %s15453_s19  ;;  %10996 = vrot.lane.b32.xlu1 %v20022_v4, %s15453_s19  ;;  %v14212_v29 = vld [vmem:[%s20735_s5 + $0xd0] sm:$0xf]  ;;  %v14211_v9 = vld [vmem:[%s20735_s5 + $0xc8] sm:$0xff] }
 0x863   :  { %v10663_v10 = vpop.f32.mrf.mxu1  ;;  %14620 = vmatprep.subr.msk.mxu0 %vm178_vm0, %v14212_v29 }
 0x864   :  { %v20031_v27 = vmax.f32 %v10554_v13, %v10671_v49  ;;  %14621 = vmatpush3.msk.msra.mxu0 %vm178_vm0, %v14212_v29 }
 0x865   :  { %v10664_v57 = vpop.f32.mrf.mxu1  ;;  %14622 = vmatprep.subr.mxu0 %v14211_v9 }
 0x866   :  { %11917 = vrot.lane.b32.xlu0 %v19564_v0, %s15454_s13  ;;  %10685 = vrot.lane.b32.xlu1 %v20025_v8, %s15453_s19  ;;  %v20049_v0 = vld [vmem:[#allocation2 + $0x94] ss:$12 sps:$4 sm:$0xff]  }
 0x867   :  { %14623 = vmatpush3.msra.mxu0 %v14211_v9  ;;  %v20229_v9 = vld [vmem:[#allocation2 + $0xac] ss:$12 sps:$4 sm:$0xff]  }
 0x86a   :  { %11913 = vrot.lane.b32.xlu0 %v20037_v25, %s15454_s13  ;;  %11915 = vrot.lane.b32.xlu1 %v20041_v16, %s15454_s13 }
 0x86e   :  { %11806 = vrot.lane.b32.xlu1 %v19461_v50, %s15454_s13  ;;  %10998 = vrot.lane.b32.xlu0 %v20031_v27, %s15453_s19 }
 0x872   :  { %11802 = vrot.lane.b32.xlu1 %v20049_v0, %s15454_s13  ;;  %11804 = vrot.lane.b32.xlu0 %v19473_v32, %s15454_s13  ;;  %v15414_v32 = vld [vmem:[#allocation2 + $0xf8] ss:$12 sps:$4 sm:$0xff]  }
 0x876   :  { %11909 = vrot.lane.b32.xlu1 %v19450_v34, %s15454_s13  ;;  %11911 = vrot.lane.b32.xlu0 %v20057_v62, %s15454_s13  ;;  %v15415_v34 = vld [vmem:[#allocation2 + $0x10c] ss:$12 sps:$4 sm:$0xff]  }
 0x87a   :  { %11800 = vrot.lane.b32.xlu1 %v19489_v39, %s15454_s13  ;;  %11907 = vrot.lane.b32.xlu0 %v19461_v50, %s15454_s13  ;;  %v20078_v50 = vld [vmem:[#allocation2 + $0xdc] ss:$12 sps:$4 sm:$0xff]   ;;  %v15419_v39 = vld [vmem:[#allocation2 + $0xe0] ss:$12 sps:$4 sm:$0xff]  }
 0x87e   :  { %12040 = vrot.lane.b32.xlu1 %v20065_v24, %s15455_s11  ;;  %12042 = vrot.lane.b32.xlu0 %v15414_v32, %s15455_s11  ;;  %v15424_v32 = vld [vmem:[#allocation2 + $0xc8] ss:$12 sps:$4 sm:$0xff]  }
 0x882   :  { %12147 = vrot.lane.b32.xlu1 %v15415_v34, %s15455_s11  ;;  %12149 = vrot.lane.b32.xlu0 %v15416_v11, %s15455_s11 }
 0x886   :  { %12038 = vrot.lane.b32.xlu1 %v20072_v35, %s15455_s11  ;;  %12145 = vrot.lane.b32.xlu0 %v19506_v31, %s15455_s11  ;;  %v15421_v31 = vld [vmem:[#allocation2 + $0xc8] ss:$12 sps:$4 sm:$0xff]  }
 0x88a   :  { %12034 = vrot.lane.b32.xlu1 %v20078_v50, %s15455_s11  ;;  %12036 = vrot.lane.b32.xlu0 %v15419_v39, %s15455_s11 }
 0x88e   :  { %12141 = vrot.lane.b32.xlu1 %v20065_v24, %s15455_s11  ;;  %12143 = vrot.lane.b32.xlu0 %v19524_v6, %s15455_s11  ;;  %v20099_v6 = vpop.permute.xlu1 %11812 }
 0x892   :  { %12032 = vrot.lane.b32.xlu1 %v20087_v58, %s15455_s11  ;;  %12139 = vrot.lane.b32.xlu0 %v20072_v35, %s15455_s11  ;;  %v20103_v40 = vpop.permute.xlu1 %11808 }
 0x896   :  { %12028 = vrot.lane.b32.xlu1 %v20041_v16, %s15455_s11  ;;  %12030 = vrot.lane.b32.xlu0 %v15421_v31, %s15455_s11 }
 0x89a   :  { %12135 = vrot.lane.b32.xlu1 %v20078_v50, %s15455_s11  ;;  %12137 = vrot.lane.b32.xlu0 %v15422_v42, %s15455_s11 }
 0x8ce   :  { %v10682_v44 = vpop.permute.xlu1 %10681 }
 0x8cf   :  { %v10690_v46 = vmax.f32 %v20008_v56, %v10682_v44 }
 0x8d0   :  { %v10995_v22 = vpop.permute.xlu0 %10994 }
 0x8d1   :  { %v20109_v26 = vadd.f32 %v10690_v46, %v21198_v38  ;;  %v11003_v14 = vmax.f32 %v20012_v1, %v10995_v22 }
 0x8d3   :  { %v10696_v43 = vmax.f32 %v20109_v26, 0.0  ;;  %v20114_v59 = vadd.f32 %v11003_v14, %v21198_v38  ;;  %v14220_v26 = vld [vmem:[%s20735_s5 + $0xe8] sm:$0xf] }
 0x8d4   :  { %v10684_v48 = vpop.permute.xlu0 %10683  ;;  %v10997_v5 = vpop.permute.xlu1 %10996  ;;  %14632 = vmatprep.subr.msk.mxu1 %vm178_vm0, %v14220_v26 }
 0x8d5   :  { %v11009_v18 = vmax.f32 %v20114_v59, 0.0  ;;  %v10691_v30 = vmax.f32 %v20018_v60, %v10684_v48  ;;  %v11004_v51 = vmax.f32 %v20022_v4, %v10997_v5  ;;  %10846 = vrot.lane.b32.xlu1 %v10696_v43, %s15454_s13  ;;  %14633 = vmatpush3.msk.msra.mxu1 %vm178_vm0, %v14220_v26  ;;  %v14219_v59 = vld [vmem:[%s20735_s5 + $0xe0] sm:$0xff]  ;;  %v21206_v26 = vld [vmem:[#allocation28_spill] sm:$0xff] }
 0x8d6   :  { %14634 = vmatprep.subr.mxu1 %v14219_v59 }
 0x8d7   :  { %v20123_v47 = vadd.f32 %v10691_v30, %v21199_v63  ;;  %v20126_v33 = vadd.f32 %v11004_v51, %v21199_v63  ;;  %11159 = vrot.lane.b32.xlu0 %v11009_v18, %s15454_s13  ;;  %14635 = vmatpush3.msra.mxu1 %v14219_v59  ;;  %v21207_v59 = vld [vmem:[#allocation66_spill] sm:$0xff] }
 0x8d8   :  { %v11918_v20 = vpop.permute.xlu0 %11917  ;;  %v10686_v56 = vpop.permute.xlu1 %10685 }
 0x8d9   :  { %v10697_v37 = vmax.f32 %v20123_v47, 0.0  ;;  %v11010_v3 = vmax.f32 %v20126_v33, 0.0  ;;  %v10692_v36 = vmax.f32 %v20025_v8, %v10686_v56  ;;  %v15423_v8 = vld [vmem:[#allocation2 + $0xb0] ss:$12 sps:$4 sm:$0xff]  }
 0x8da   :  { %v14218_v47 = vld [vmem:[%s20735_s5 + $0xd8] sm:$0xff] }
 0x8db   :  { %v20135_v41 = vadd.f32 %v10692_v36, %v21200_v23  ;;  %10848 = vrot.lane.b32.xlu0 %v10697_v37, %s15454_s13  ;;  %11161 = vrot.lane.b32.xlu1 %v11010_v3, %s15454_s13 }
 0x8dc   :  { %v11914_v55 = vpop.permute.xlu0 %11913  ;;  %v11916_v53 = vpop.permute.xlu1 %11915  ;;  %14636 = vmatprep.subr.mxu1 %v14218_v47 }
 0x8dd   :  { %v10698_v1 = vmax.f32 %v20135_v41, 0.0  ;;  %v20145_v54 = vsel %vm6409_vm5, %v11914_v55, %v11916_v53  ;;  %v20148_v45 = vsel %vm6409_vm5, %v11916_v53, %v11918_v20  ;;  %14637 = vmatpush3.msra.mxu1 %v14218_v47 }
 0x8df   :  { %12133 = vrot.lane.b32.xlu0 %v20087_v58, %s15455_s11  ;;  %10850 = vrot.lane.b32.xlu1 %v10698_v1, %s15454_s13 }
 0x8e0   :  { %v10999_v61 = vpop.permute.xlu0 %10998  ;;  %v20153_v17 = vpop.permute.xlu1 %11806 }
 0x8e1   :  { %v11005_v15 = vmax.f32 %v20031_v27, %v10999_v61 }
 0x8e3   :  { %v11008_v52 = vadd.f32 %v11005_v15, %v21200_v23  ;;  %12026 = vrot.lane.b32.xlu1 %v20037_v25, %s15455_s11  ;;  %v14210_v15 = vld [vmem:[%s20735_s5 + $0xc0] sm:$0xff] }
 0x8e4   :  { %v11805_v60 = vpop.permute.xlu0 %11804  ;;  %v11803_v19 = vpop.permute.xlu1 %11802  ;;  %14624 = vmatprep.subr.mxu0 %v14210_v15 }
 0x8e5   :  { %v11011_v12 = vmax.f32 %v11008_v52, 0.0  ;;  %v20166_v4 = vsel %vm6409_vm5, %v11803_v19, %v11805_v60  ;;  %v14228_v52 = vld [vmem:[%s20735_s5 + $0x100] sm:$0xf]  ;;  %14625 = vmatpush3.msra.mxu0 %v14210_v15 }
 0x8e6   :  { %14644 = vmatprep.subr.msk.mxu0 %vm178_vm0, %v14228_v52  ;;  %v21205_v15 = vld [vmem:[#allocation7_spill] sm:$0xff] }
 0x8e7   :  { %11163 = vrot.lane.b32.xlu0 %v11011_v12, %s15454_s13 }
 0x8e8   :  { %v11912_v21 = vpop.permute.xlu0 %11911  ;;  %v11910_v7 = vpop.permute.xlu1 %11909 }
 0x8e9   :  { %v20172_v13 = vsel %vm6409_vm5, %v11910_v7, %v11912_v21 }
 0x8eb   :  { %12024 = vrot.lane.b32.xlu0 %v15423_v8, %s15455_s11 }
 0x8ec   :  { %v11908_v49 = vpop.permute.xlu0 %11907  ;;  %v11801_v10 = vpop.permute.xlu1 %11800 }
 0x8ed   :  { %v20176_v27 = vsel %vm6409_vm5, %v11908_v49, %v11910_v7  ;;  %v20179_v57 = vsel %vm6409_vm5, %v11801_v10, %v11803_v19  ;;  %v20263_v7 = vld [vmem:[#allocation2 + $0x90] ss:$12 sps:$4 sm:$0xff]  }
 0x8ef   :  { %12131 = vrot.lane.b32.xlu0 %v15424_v32, %s15455_s11 }
 0x8f0   :  { %v12043_v34 = vpop.permute.xlu0 %12042  ;;  %v12041_v11 = vpop.permute.xlu1 %12040 }
 0x8f1   :  { %v20183_v39 = vsel %vm6642_vm6, %v12041_v11, %v12043_v34  ;;  %v15428_v34 = vld [vmem:[#allocation2 + $0x98] ss:$12 sps:$4 sm:$0xff]  }
 0x8f3   :  { %12127 = vrot.lane.b32.xlu0 %v20037_v25, %s15455_s11 }
 0x8f4   :  { %v12150_v31 = vpop.permute.xlu0 %12149  ;;  %v12148_v42 = vpop.permute.xlu1 %12147 }
 0x8f5   :  { %v20188_v44 = vsel %vm6642_vm6, %v12148_v42, %v12150_v31  ;;  %v14227_v31 = vld [vmem:[%s20735_s5 + $0xf8] sm:$0xff] }
 0x8f8   :  { %v12146_v46 = vpop.permute.xlu0 %12145  ;;  %v12039_v22 = vpop.permute.xlu1 %12038 }
 0x8f9   :  { %v20191_v14 = vsel %vm6642_vm6, %v12146_v46, %v12148_v42  ;;  %v20194_v48 = vsel %vm6642_vm6, %v12039_v22, %v12041_v11  ;;  %v14226_v42 = vld [vmem:[%s20735_s5 + $0xf0] sm:$0xff]  ;;  %v21201_v22 = vld [vmem:[#allocation20_spill] sm:$0xff] }
 0x8fc   :  { %v12037_v5 = vpop.permute.xlu0 %12036  ;;  %v12035_v30 = vpop.permute.xlu1 %12034 }
 0x8fd   :  { %v20197_v51 = vsel %vm6642_vm6, %v12035_v30, %v12037_v5 }
 0x900   :  { %v12144_v20 = vpop.permute.xlu0 %12143  ;;  %v12142_v56 = vpop.permute.xlu1 %12141 }
 0x901   :  { %v20200_v36 = vsel %vm6642_vm6, %v12142_v56, %v12144_v20 }
 0x904   :  { %v12140_v41 = vpop.permute.xlu0 %12139  ;;  %v12033_v55 = vpop.permute.xlu1 %12032 }
 0x905   :  { %v20203_v53 = vsel %vm6642_vm6, %v12140_v41, %v12142_v56  ;;  %v20206_v61 = vsel %vm6642_vm6, %v12033_v55, %v12035_v30  ;;  %v21203_v56 = vld [vmem:[#allocation21_spill] sm:$0xff] }
 0x906   :  { %v21204_v55 = vld [vmem:[#allocation29_spill] sm:$0xff] }
 0x908   :  { %v20223_v60 = vpop.permute.xlu1 %12028  ;;  %v20225_v19 = vpop.permute.xlu0 %12030 }
 0x90c   :  { %10703 = vxpose.xlu1.b32.start [1/3] (short) (narrow) %v10696_v43, 32  ;;  %v20227_v29 = vpop.permute.xlu1 %12135  ;;  %v20237_v43 = vpop.permute.xlu0 %12137 }
 0x910   :  { %10704 = vxpose.xlu1.b32.cont [2/3] (short) (narrow) %v10697_v37, 32  ;;  %v20251_v37 = vld [vmem:[%s20735_s5 + $0x118] sm:$0xf] }
 0x911   :  { %14656 = vmatprep.subr.msk.mxu1 %vm178_vm0, %v20251_v37 }
 0x914   :  { %10705 = vxpose.xlu1.b32.end [3/3] (short) (narrow) %v10698_v1, 32 }
 0x919   :  { %11016 = vxpose.xlu1.b32.start [1/3] (short) (narrow) %v11009_v18, 32 }
 0x91d   :  { %11017 = vxpose.xlu1.b32.cont [2/3] (short) (narrow) %v11010_v3, 32  ;;  %v20253_v3 = vld [vmem:[#allocation2 + $0xa8] ss:$12 sps:$4 sm:$0xff]  }
 0x921   :  { %11018 = vxpose.xlu1.b32.end [3/3] (short) (narrow) %v11011_v12, 32 }
 0x943   :  { %12022 = vrot.lane.b32.xlu1 %v20229_v9, %s15455_s11 }
 0x947   :  { %12129 = vrot.lane.b32.xlu1 %v20041_v16, %s15455_s11  ;;  %v10847_v18 = vpop.permute.xlu1 %10846 }
 0x948   :  { %10855 = vxpose.xlu0.b32.start [1/3] (short) (narrow) %v10847_v18, 32  ;;  %v11426_v18 = vsel %vm5966_vm4, %v21207_v59, %v21206_v26 }
 0x949   :  { %v11160_v33 = vpop.permute.xlu0 %11159 }
 0x94b   :  { %12020 = vrot.lane.b32.xlu1 %v20253_v3, %s15455_s11 }
 0x94d   :  { %v10849_v1 = vpop.permute.xlu0 %10848  ;;  %v11162_v12 = vpop.permute.xlu1 %11161 }
 0x94e   :  { %10856 = vxpose.xlu0.b32.cont [2/3] (short) (narrow) %v10849_v1, 32 }
 0x94f   :  { %12016 = vrot.lane.b32.xlu1 %v20049_v0, %s15455_s11 }
 0x951   :  { %v10851_v21 = vpop.permute.xlu1 %10850  ;;  %v20267_v8 = vpop.permute.xlu0 %12133 }
 0x952   :  { %10857 = vxpose.xlu0.b32.end [3/3] (short) (narrow) %v10851_v21, 32  ;;  %v21210_v21 = vld [vmem:[#allocation56_spill] sm:$0xff] }
 0x953   :  { %12123 = vrot.lane.b32.xlu1 %v20229_v9, %s15455_s11 }
 0x955   :  { %v20269_v10 = vpop.permute.xlu1 %12026 }
 0x957   :  { %12014 = vrot.lane.b32.xlu1 %v20263_v7, %s15455_s11  ;;  %11168 = vxpose.xlu0.b32.start [1/3] (short) (narrow) %v11160_v33, 32  ;;  %v21208_v33 = vld [vmem:[#allocation59_spill] sm:$0xff] }
 0x958   :  { %v11425_v1 = vsel %vm5966_vm4, %v21208_v33, %v21207_v59 }
 0x959   :  { %v11164_v49 = vpop.permute.xlu0 %11163 }
 0x95b   :  { %11169 = vxpose.xlu0.b32.cont [2/3] (short) (narrow) %v11162_v12, 32  ;;  %v21209_v12 = vld [vmem:[#allocation58_spill] sm:$0xff] }
 0x95f   :  { %11170 = vxpose.xlu0.b32.end [3/3] (short) (narrow) %v11164_v49, 32  ;;  %v11424_v49 = vsel %vm5966_vm4, %v21210_v21, %v21209_v12  ;;  %v21223_v12 = vld [vmem:[#allocation64_spill] sm:$0xff] }
 0x988   :  { %v10719_v32 = vpop.trf.xlu1 }
 0x989   :  { %14626 = vmatprep.mubr.msk.f32.mxu0 %vm7178_vm7, %v10719_v32  ;;  %v21211_v32 = vmov 0  }
 0x98c   :  { %12018 = vrot.lane.b32.xlu0 %v15428_v34, %s15455_s11  ;;  %v10720_v11 = vpop.trf.xlu1  ;;  %v21212_v34 = vld [vmem:[#allocation39_spill] sm:$0xff] }
 0x98d   :  { %14627 = vmatmul.mubr.msk.f32.vlgmr.msra.gmra.mxu0 %vm7178_vm7, %v10720_v11  ;;  %v21213_v11 = vld [vmem:[#allocation51_spill] sm:$0xff] }
 0x98e   :  { %14645 = vmatpush3.msk.msra.mxu0 %vm178_vm0, %v14228_v52  ;;  %v11427_v52 = vsel %vm5966_vm4, %v21205_v15, %v21204_v55  ;;  %v15429_v55 = vld [vmem:[%s20733_s3 + $0xc] sm:$0xff]   ;;  %v21219_v15 = vld [vmem:[#allocation50_spill] sm:$0xff] }
 0x98f   :  { %14646 = vmatprep.subr.mxu0 %v14227_v31 }
 0x990   :  { %14647 = vmatpush3.msra.mxu0 %v14227_v31  ;;  %12125 = vrot.lane.b32.xlu0 %v20057_v62, %s15455_s11  ;;  %v10721_v46 = vpop.trf.xlu1  ;;  %v21202_v62 = vld [vmem:[#allocation55_spill] sm:$0xff]  ;;  %v21214_v31 = vld [vmem:[#allocation60_spill] sm:$0xff] }
 0x991   :  { %14648 = vmatprep.subr.mxu0 %v14226_v42  ;;  %14629 = vmatprep.mubr.msk.f32.mxu0 %vm7178_vm7, %v10721_v46  ;;  %v21215_v46 = vld [vmem:[#allocation46_spill] sm:$0xff] }
 0x992   :  { %14649 = vmatpush3.msra.mxu0 %v14226_v42  ;;  %v11422_v42 = vsel %vm5966_vm4, %v21214_v31, %v21213_v11 }
 0x993   :  { %11447 = vmatprep.subr.bf16.mxu0 %v21201_v22  ;;  %v11421_v22 = vsel %vm5966_vm4, %v21215_v46, %v21214_v31 }
 0x994   :  { %12121 = vrot.lane.b32.xlu0 %v20253_v3, %s15455_s11  ;;  %v10722_v5 = vpop.trf.xlu1 }
 0x995   :  { %14630 = vmatmul.mubr.msk.f32.gmra.mxu0 %vm7178_vm7, %v10722_v5  ;;  %v20314_v5 = vpop.permute.xlu0 %12024 }
 0x998   :  { %v11032_v30 = vpop.trf.xlu1 }
 0x999   :  { %14650 = vmatprep.mubr.msk.f32.mxu0 %vm7178_vm7, %v11032_v30  ;;  %v21216_v30 = vld [vmem:[#allocation63_spill] sm:$0xff]  ;;  %v20330_v59 = vpop.permute.xlu0 %12131 }
 0x99c   :  { %v11033_v20 = vpop.trf.xlu1 }
 0x99d   :  { %14651 = vmatmul.mubr.msk.f32.vlgmr.msra.gmra.mxu0 %vm7178_vm7, %v11033_v20  ;;  %v21217_v20 = vld [vmem:[#allocation61_spill] sm:$0xff]  ;;  %v12128_v11 = vpop.permute.xlu0 %12127 }
 0x99e   :  { %11448 = vmatpush1.bf16.msra.mxu0 %v21202_v62  ;;  %v11677_v62 = vsel %vm5966_vm4, %v21217_v20, %v21216_v30  ;;  %v21226_v30 = vld [vmem:[#allocation24_spill] sm:$0xff] }
 0x99f   :  { %11449 = vmatprep.subr.bf16.mxu0 %v21203_v56  ;;  %v21218_v56 = vld [vmem:[#allocation32_spill] sm:$0xff] }
 0x9a0   :  { %v11034_v41 = vpop.trf.xlu1 }
 0x9a1   :  { %14653 = vmatprep.mubr.msk.f32.mxu0 %vm7178_vm7, %v11034_v41  ;;  %v11676_v41 = vsel %vm5966_vm4, %v21218_v56, %v21217_v20 }
 0x9a2   :  { %11450 = vmatpush1.bf16.msra.mxu0 %v11427_v52  ;;  %v21220_v52 = vld [vmem:[#allocation62_spill] sm:$0xff] }
 0x9a3   :  { %11451 = vmatprep.subr.bf16.mxu0 %v11426_v18  ;;  %v11675_v26 = vsel %vm5966_vm4, %v21220_v52, %v21219_v15  ;;  %v21221_v18 = vld [vmem:[#allocation57_spill] sm:$0xff] }
 0x9a4   :  { %v11035_v47 = vpop.trf.xlu1  ;;  %v21229_v15 = vld [vmem:[#allocation25_spill] sm:$0xff] }
 0x9a5   :  { %14654 = vmatmul.mubr.msk.f32.gmra.mxu0 %vm7178_vm7, %v11035_v47  ;;  %v11674_v47 = vsel %vm5966_vm4, %v21221_v18, %v21220_v52 }
 0x9a6   :  { %11452 = vmatpush1.bf16.msra.mxu0 %v11425_v1  ;;  %11473 = vmatprep.mubr.bf16.mxu0 %v21211_v32  ;;  %v21222_v1 = vld [vmem:[#allocation65_spill] sm:$0xff] }
 0x9a7   :  { %11453 = vmatprep.subr.bf16.mxu0 %v11424_v49  ;;  %v11673_v21 = vsel %vm5966_vm4, %v21223_v12, %v21222_v1  ;;  %v21224_v49 = vld [vmem:[#allocation52_spill] sm:$0xff]  ;;  %v21232_v1 = vld [vmem:[#allocation18_spill] sm:$0xff] }
 0x9aa   :  { %11454 = vmatpush1.bf16.msra.mxu0 %v21212_v34  ;;  %v11672_v34 = vsel %vm5966_vm4, %v21224_v49, %v21223_v12 }
 0x9ab   :  { %11455 = vmatprep.subr.bf16.mxu0 %v11422_v42  ;;  %v15430_v42 = vld [vmem:[%s20733_s3 + $0x14] ss:$0 sps:$4 sm:$0x33]  }
 0x9ae   :  { %11456 = vmatpush1.bf16.msra.mxu0 %v11421_v22  ;;  %v21225_v22 = vld [vmem:[#allocation6_spill] sm:$0xff] }
 0x9af   :  { %11694 = vmatprep.subr.bf16.mxu0 %v11677_v62  ;;  %v11671_v20 = vsel %vm5966_vm4, %v21226_v30, %v21225_v22  ;;  %v21227_v62 = vld [vmem:[#allocation15_spill] sm:$0xff]  ;;  %v21235_v22 = vld [vmem:[#allocation26_spill] sm:$0xff] }
 0x9b0   :  { %v11670_v56 = vsel %vm5966_vm4, %v21227_v62, %v21226_v30  ;;  %v21236_v62 = vld [vmem:[#allocation30_spill] sm:$0xff] }
 0x9b1   :  { %14257 = vmatmul.mubr.msk.bf16.vlgmr.msra.gmra.mxu0 %vm5987_vm3, %v15429_v55 }
 0x9b2   :  { %11695 = vmatpush1.bf16.msra.mxu0 %v11676_v41  ;;  %11483 = vmatprep.mubr.bf16.mxu0 %v21211_v32  ;;  %v21228_v41 = vld [vmem:[#allocation8_spill] sm:$0xff] }
 0x9b3   :  { %11696 = vmatprep.subr.bf16.mxu0 %v11675_v26  ;;  %v11669_v52 = vsel %vm5966_vm4, %v21229_v15, %v21228_v41  ;;  %v21230_v26 = vld [vmem:[#allocation4_spill] sm:$0xff] }
 0x9b4   :  { %v11668_v18 = vsel %vm5966_vm4, %v21230_v26, %v21229_v15 }
 0x9b5   :  { %v20335_v33 = vpop.permute.xlu1 %12022 }
 0x9b6   :  { %11697 = vmatpush1.bf16.msra.mxu0 %v11674_v47  ;;  %v21231_v47 = vld [vmem:[#allocation17_spill] sm:$0xff] }
 0x9b7   :  { %11698 = vmatprep.subr.bf16.mxu0 %v11673_v21  ;;  %v11839_v12 = vsel %vm6409_vm5, %v21232_v1, %v21231_v47  ;;  %v21233_v21 = vld [vmem:[#allocation9_spill] sm:$0xff] }
 0x9b8   :  { %v11838_v49 = vsel %vm6409_vm5, %v21233_v21, %v21232_v1  ;;  %v21241_v47 = vld [vmem:[#allocation53_spill] sm:$0xff] }
 0x9b9   :  { %v20343_v31 = vpop.permute.xlu1 %12129  ;;  %14258 = vmatmul.mubr.msk.bf16.gmra.mxu0 %vm5987_vm3, %v15430_v42  ;;  %v21242_v21 = vld [vmem:[#allocation37_spill] sm:$0xff] }
 0x9ba   :  { %11699 = vmatpush1.bf16.msra.mxu0 %v11672_v34  ;;  %v20351_v46 = vsel %vm6642_vm6, %v12128_v11, %v20343_v31  ;;  %11720 = vmatprep.mubr.bf16.mxu0 %v21211_v32  ;;  %v21234_v11 = vld [vmem:[#allocation10_spill] sm:$0xff] }
 0x9bb   :  { %11700 = vmatprep.subr.bf16.mxu0 %v11671_v20  ;;  %v14235_v20 = vld [vmem:[%s20735_s5 + $0x110] sm:$0xff] }
 0x9be   :  { %11701 = vmatpush1.bf16.msra.mxu0 %v11670_v56  ;;  %v21237_v56 = vld [vmem:[#allocation36_spill] sm:$0xff] }
 0x9bf   :  { %11702 = vmatprep.subr.bf16.mxu0 %v11669_v52  ;;  %v11834_v41 = vsel %vm6409_vm5, %v20099_v6, %v21237_v56  ;;  %v11833_v52 = vsel %vm6409_vm5, %v20103_v40, %v20105_v2  ;;  %v15346_v56 = vld [vmem:[#allocation2 + $0xb0] ss:$12 sps:$4 sm:$0xff]  }
 0x9c2   :  { %11703 = vmatpush1.bf16.msra.mxu0 %v11668_v18  ;;  %v20470_v18 = vld [vmem:[#allocation2 + $0xf8] ss:$12 sps:$4 sm:$0xff]  }
 0x9c3   :  { %11856 = vmatprep.subr.bf16.mxu0 %v11839_v12  ;;  %v20488_v12 = vld [vmem:[#allocation2 + $0xe0] ss:$12 sps:$4 sm:$0xff]  }
 0x9c5   :  { %14276 = vmatmul.mubr.msk.bf16.vlgmr.msra.gmra.mxu0 %vm5987_vm3, %v15429_v55  ;;  %v14234_v55 = vld [vmem:[%s20735_s5 + $0x108] sm:$0xff] }
 0x9c6   :  { %11857 = vmatpush1.bf16.msra.mxu0 %v11838_v49  ;;  %v10871_v34 = vpop.trf.xlu0  ;;  %11730 = vmatprep.mubr.bf16.mxu0 %v21211_v32  ;;  %v11943_v49 = vsel %vm6409_vm5, %v21242_v21, %v21241_v47 }
 0x9c7   :  { %11858 = vmatprep.subr.bf16.mxu0 %v21234_v11  ;;  %14638 = vmatprep.mubr.msk.f32.mxu1 %vm7178_vm7, %v10871_v34  ;;  %v20496_v34 = vld [vmem:[#allocation2 + $0xdc] ss:$12 sps:$4 sm:$0xff]  }
 0x9c8   :  { %v15343_v11 = vld [vmem:[#allocation2 + $0xc8] ss:$12 sps:$4 sm:$0xff]  }
 0x9ca   :  { %11859 = vmatpush1.bf16.msra.mxu0 %v21235_v22  ;;  %v10872_v30 = vpop.trf.xlu0  ;;  %v21243_v22 = vld [vmem:[#allocation43_spill] sm:$0xff] }
 0x9cb   :  { %11860 = vmatprep.subr.bf16.mxu0 %v21236_v62  ;;  %14639 = vmatmul.mubr.msk.f32.vlgmr.msra.gmra.mxu1 %vm7178_vm7, %v10872_v30  ;;  %v21244_v30 = vld [vmem:[#allocation3_spill] sm:$0xff] }
 0x9cc   :  { %14657 = vmatpush3.msk.msra.mxu1 %vm178_vm0, %v20251_v37  ;;  %v11832_v37 = vsel %vm6409_vm5, %v20153_v17, %v20103_v40  ;;  %v20408_v40 = vld [vmem:[%s20733_s3 + $0x18] sm:$0xff]   ;;  %v15341_v62 = vld [vmem:[#allocation2 + $0xc4] ss:$12 sps:$4 sm:$0xff]  }
 0x9cd   :  { %14658 = vmatprep.subr.mxu1 %v14235_v20  ;;  %14277 = vmatmul.mubr.msk.bf16.gmra.mxu0 %vm5987_vm3, %v15430_v42  ;;  %v15433_v42 = vld [vmem:[%s20733_s3] sm:$0xff]  }
 0x9ce   :  { %14659 = vmatpush3.msra.mxu1 %v14235_v20  ;;  %11861 = vmatpush1.bf16.msra.mxu0 %v11834_v41  ;;  %v10873_v15 = vpop.trf.xlu0  ;;  %v11941_v20 = vsel %vm6409_vm5, %v20101_v28, %v21244_v30  ;;  %v15344_v41 = vld [vmem:[#allocation2 + $0xac] ss:$12 sps:$4 sm:$0xff]  }
 0x9cf   :  { %14660 = vmatprep.subr.mxu1 %v14234_v55  ;;  %11862 = vmatprep.subr.bf16.mxu0 %v11833_v52  ;;  %v15349_v28 = vld [vmem:[#allocation2 + $0x98] ss:$12 sps:$4 sm:$0xff]  }
 0x9d0   :  { %14661 = vmatpush3.msra.mxu1 %v14234_v55  ;;  %14641 = vmatprep.mubr.msk.f32.mxu1 %vm7178_vm7, %v10873_v15  ;;  %v15436_v55 = vld [vmem:[%s20733_s3 + $0x2c] ss:$0 sps:$4 sm:$0x33]   ;;  %v15347_v15 = vld [vmem:[#allocation2 + $0x94] ss:$12 sps:$4 sm:$0xff]  }
 0x9d1   :  { %11508 = vmatprep.subr.bf16.mxu1 %v20065_v24  ;;  %11882 = vmatprep.mubr.bf16.mxu0 %v21211_v32 }
 0x9d2   :  { %11863 = vmatpush1.bf16.msra.mxu0 %v11832_v37  ;;  %v10874_v6 = vpop.trf.xlu0  ;;  %v21246_v37 = vld [vmem:[#allocation42_spill] sm:$0xff] }
 0x9d3   :  { %11864 = vmatprep.subr.bf16.mxu0 %v20166_v4  ;;  %14642 = vmatmul.mubr.msk.f32.gmra.mxu1 %vm7178_vm7, %v10874_v6 }
 0x9d6   :  { %11865 = vmatpush1.bf16.msra.mxu0 %v20179_v57  ;;  %v11184_v2 = vpop.trf.xlu0  ;;  %v12049_v57 = vsel %vm6642_vm6, %v20223_v60, %v20225_v19  ;;  %v12047_v19 = vsel %vm6642_vm6, %v20335_v33, %v20314_v5  ;;  %v15332_v5 = vld [vmem:[#allocation2 + $0x108] ss:$12 sps:$4 sm:$0xff]  }
 0x9d7   :  { %12070 = vmatprep.subr.bf16.mxu0 %v20183_v39  ;;  %14662 = vmatprep.mubr.msk.f32.mxu1 %vm7178_vm7, %v11184_v2  ;;  %v12048_v39 = vsel %vm6642_vm6, %v20269_v10, %v20223_v60  ;;  %v15334_v10 = vld [vmem:[#allocation2 + $0x10c] ss:$12 sps:$4 sm:$0xff]  }
 0x9d9   :  { %14282 = vmatmul.mubr.msk.bf16.vlgmr.msra.gmra.mxu0 %vm5987_vm3, %v20408_v40 }
 0x9da   :  { %12071 = vmatpush1.bf16.msra.mxu0 %v20194_v48  ;;  %v11185_v17 = vpop.trf.xlu0  ;;  %11892 = vmatprep.mubr.bf16.mxu0 %v21211_v32  ;;  %v20431_v48 = vld [vmem:[%s20733_s3 + $0x20] ss:$0 sps:$4 sm:$0x33]  }
 0x9db   :  { %12072 = vmatprep.subr.bf16.mxu0 %v20197_v51  ;;  %14663 = vmatmul.mubr.msk.f32.vlgmr.msra.gmra.mxu1 %vm7178_vm7, %v11185_v17  ;;  %v12021_v51 = vpop.permute.xlu1 %12020 }
 0x9dc   :  { %11509 = vmatpush1.bf16.msra.mxu1 %v20072_v35  ;;  %v12046_v60 = vsel %vm6642_vm6, %v12021_v51, %v20335_v33 }
 0x9dd   :  { %11510 = vmatprep.subr.bf16.mxu1 %v20078_v50 }
 0x9de   :  { %12073 = vmatpush1.bf16.msra.mxu0 %v20206_v61  ;;  %v11186_v4 = vpop.trf.xlu0 }
 0x9df   :  { %12074 = vmatprep.subr.bf16.mxu0 %v12049_v57  ;;  %14665 = vmatprep.mubr.msk.f32.mxu1 %vm7178_vm7, %v11186_v4  ;;  %v12017_v33 = vpop.permute.xlu1 %12016  ;;  %v21248_v57 = vld [vmem:[#allocation38_spill] sm:$0xff] }
 0x9e0   :  { %11511 = vmatpush1.bf16.msra.mxu1 %v20087_v58 }
 0x9e1   :  { %11512 = vmatprep.subr.bf16.mxu1 %v20041_v16  ;;  %14283 = vmatmul.mubr.msk.bf16.gmra.mxu0 %vm5987_vm3, %v20431_v48 }
 0x9e2   :  { %12075 = vmatpush1.bf16.msra.mxu0 %v12048_v39  ;;  %v11187_v61 = vpop.trf.xlu0  ;;  %12096 = vmatprep.mubr.bf16.mxu0 %v21211_v32 }
 0x9e3   :  { %12076 = vmatprep.subr.bf16.mxu0 %v12047_v19  ;;  %14666 = vmatmul.mubr.msk.f32.gmra.mxu1 %vm7178_vm7, %v11187_v61 }
 0x9e4   :  { %11513 = vmatpush1.bf16.msra.mxu1 %v20037_v25  ;;  %11534 = vmatprep.mubr.bf16.mxu1 %v21211_v32 }
 0x9e5   :  { %11514 = vmatprep.subr.bf16.mxu1 %v20229_v9 }
 0x9e6   :  { %12077 = vmatpush1.bf16.msra.mxu0 %v12046_v60 }
 0x9e8   :  { %11515 = vmatpush1.bf16.msra.mxu1 %v20253_v3 }
 0x9e9   :  { %11516 = vmatprep.subr.bf16.mxu1 %v20049_v0  ;;  %v20456_v0 = vpop.permute.xlu1 %12123 }
 0x9ec   :  { %11517 = vmatpush1.bf16.msra.mxu1 %v20263_v7  ;;  %v15434_v7 = vld [vmem:[%s20733_s3 + $0x8] ss:$0 sps:$4 sm:$0x33]  }
 0x9ed   :  { %11755 = vmatprep.subr.bf16.mxu1 %v15334_v10 }
 0x9ef   :  { %14259 = vmatmul.mubr.msk.bf16.vlgmr.msra.gmra.mxu1 %vm5987_vm3, %v15433_v42 }
 0x9f0   :  { %11756 = vmatpush1.bf16.msra.mxu1 %v15332_v5  ;;  %11544 = vmatprep.mubr.bf16.mxu1 %v21211_v32 }
 0x9f1   :  { %11757 = vmatprep.subr.bf16.mxu1 %v20065_v24  ;;  %v12015_v24 = vpop.permute.xlu1 %12014 }
 0x9f2   :  { %v12044_v26 = vsel %vm6642_vm6, %v12015_v24, %v12017_v33 }
 0x9f4   :  { %11758 = vmatpush1.bf16.msra.mxu1 %v20072_v35 }
 0x9f5   :  { %11759 = vmatprep.subr.bf16.mxu1 %v20078_v50 }
 0x9f7   :  { %14260 = vmatmul.mubr.msk.bf16.gmra.mxu1 %vm5987_vm3, %v15434_v7 }
 0x9f8   :  { %11760 = vmatpush1.bf16.msra.mxu1 %v20087_v58  ;;  %11781 = vmatprep.mubr.bf16.mxu1 %v21211_v32  ;;  %v21238_v58 = vld [vmem:[#allocation14_spill] sm:$0xff] }
 0x9f9   :  { %11761 = vmatprep.subr.bf16.mxu1 %v20041_v16  ;;  %v21239_v16 = vld [vmem:[#allocation33_spill] sm:$0xff] }
 0x9fc   :  { %11762 = vmatpush1.bf16.msra.mxu1 %v20037_v25  ;;  %v20475_v25 = vld [vmem:[#allocation2 + $0xf4] ss:$12 sps:$4 sm:$0xff]  }
 0x9fd   :  { %11763 = vmatprep.subr.bf16.mxu1 %v20229_v9  ;;  %v21240_v9 = vld [vmem:[#allocation22_spill] sm:$0xff] }
 0x9fe   :  { %v12019_v35 = vpop.permute.xlu0 %12018  ;;  %v11944_v1 = vsel %vm6409_vm5, %v21241_v47, %v21240_v9 }
 0x9ff   :  { %v12045_v50 = vsel %vm6642_vm6, %v12017_v33, %v12019_v35 }
 0xa00   :  { %11764 = vmatpush1.bf16.msra.mxu1 %v20253_v3  ;;  %12078 = vmatprep.subr.bf16.mxu0 %v12045_v50  ;;  %v20484_v3 = vld [vmem:[%s20733_s3 + $0x24] sm:$0xff]  }
 0xa01   :  { %11963 = vmatprep.subr.bf16.mxu1 %v21238_v58  ;;  %12079 = vmatpush1.bf16.msra.mxu0 %v12044_v26 }
 0xa02   :  { %12294 = vmatprep.subr.bf16.mxu0 %v20470_v18 }
 0xa03   :  { %14280 = vmatmul.mubr.msk.bf16.vlgmr.msra.gmra.mxu1 %vm5987_vm3, %v15433_v42 }
 0xa04   :  { %11964 = vmatpush1.bf16.msra.mxu1 %v21239_v16  ;;  %14286 = vmatmul.mubr.msk.bf16.vlgmr.msra.gmra.mxu0 %vm5987_vm3, %v20484_v3 }
 0xa05   :  { %11965 = vmatprep.subr.bf16.mxu1 %v11944_v1  ;;  %12295 = vmatpush1.bf16.msra.mxu0 %v20475_v25 }
 0xa06   :  { %12296 = vmatprep.subr.bf16.mxu0 %v20488_v12  ;;  %11791 = vmatprep.mubr.bf16.mxu1 %v21211_v32 }
 0xa07   :  { %12106 = vmatprep.mubr.bf16.mxu0 %v21211_v32 }
 0xa08   :  { %11966 = vmatpush1.bf16.msra.mxu1 %v11943_v49 }
 0xa09   :  { %11967 = vmatprep.subr.bf16.mxu1 %v21243_v22  ;;  %12297 = vmatpush1.bf16.msra.mxu0 %v20496_v34 }
 0xa0a   :  { %12298 = vmatprep.subr.bf16.mxu0 %v15343_v11 }
 0xa0b   :  { %14281 = vmatmul.mubr.msk.bf16.gmra.mxu1 %vm5987_vm3, %v15434_v7 }
 0xa0c   :  { %11968 = vmatpush1.bf16.msra.mxu1 %v11941_v20  ;;  %14287 = vmatmul.mubr.msk.bf16.gmra.mxu0 %vm5987_vm3, %v15436_v55 }
 0xa0d   :  { %11969 = vmatprep.subr.bf16.mxu1 %v20148_v45  ;;  %12299 = vmatpush1.bf16.msra.mxu0 %v15341_v62  ;;  %v12156_v45 = vsel %vm6642_vm6, %v20227_v29, %v20237_v43  ;;  %v15352_v43 = vld [vmem:[#allocation2 + $0x110] ss:$12 sps:$4 sm:$0xff]  }
 0xa0e   :  { %12300 = vmatprep.subr.bf16.mxu0 %v15346_v56  ;;  %11989 = vmatprep.mubr.bf16.mxu1 %v21211_v32 }
 0xa0f   :  { %12320 = vmatprep.mubr.bf16.mxu0 %v21211_v32 }
 0xa10   :  { %11970 = vmatpush1.bf16.msra.mxu1 %v20145_v54  ;;  %v15437_v54 = vld [vmem:[%s20733_s3 + $0x30] sm:$0xff]  }
 0xa11   :  { %11971 = vmatprep.subr.bf16.mxu1 %v20172_v13  ;;  %12301 = vmatpush1.bf16.msra.mxu0 %v15344_v41  ;;  %v12126_v13 = vpop.permute.xlu0 %12125 }
 0xa12   :  { %12302 = vmatprep.subr.bf16.mxu0 %v15349_v28 }
 0xa14   :  { %11972 = vmatpush1.bf16.msra.mxu1 %v20176_v27  ;;  %v12155_v27 = vsel %vm6642_vm6, %v20267_v8, %v20227_v29  ;;  %v15350_v8 = vld [vmem:[#allocation2 + $0x10c] ss:$12 sps:$4 sm:$0xff]  }
 0xa15   :  { %12177 = vmatprep.subr.bf16.mxu1 %v20188_v44  ;;  %12303 = vmatpush1.bf16.msra.mxu0 %v15347_v15  ;;  %v12154_v44 = vsel %vm6642_vm6, %v20343_v31, %v20330_v59  ;;  %v21245_v31 = vld [vmem:[#allocation34_spill] sm:$0xff] }
 0xa17   :  { %14284 = vmatmul.mubr.msk.bf16.vlgmr.msra.gmra.mxu1 %vm5987_vm3, %v20408_v40  ;;  %v21247_v40 = vld [vmem:[#allocation45_spill] sm:$0xff] }
 0xa18   :  { %12178 = vmatpush1.bf16.msra.mxu1 %v20191_v14  ;;  %14300 = vmatmul.mubr.msk.bf16.vlgmr.msra.gmra.mxu0 %vm5987_vm3, %v15437_v54  ;;  %v15438_v14 = vld [vmem:[%s20733_s3 + $0x38] ss:$0 sps:$4 sm:$0x33]  }
 0xa19   :  { %12179 = vmatprep.subr.bf16.mxu1 %v20200_v36  ;;  %11999 = vmatprep.mubr.bf16.mxu1 %v21211_v32  ;;  %v12122_v36 = vpop.permute.xlu0 %12121 }
 0xa1a   :  { %12330 = vmatprep.mubr.bf16.mxu0 %v21211_v32  ;;  %v12151_v29 = vsel %vm6642_vm6, %v12122_v36, %v20456_v0 }
 0xa1c   :  { %12180 = vmatpush1.bf16.msra.mxu1 %v20203_v53  ;;  %v12152_v53 = vsel %vm6642_vm6, %v20456_v0, %v12126_v13 }
 0xa1d   :  { %12181 = vmatprep.subr.bf16.mxu1 %v12156_v45 }
 0xa1f   :  { %14285 = vmatmul.mubr.msk.bf16.gmra.mxu1 %vm5987_vm3, %v20431_v48 }
 0xa20   :  { %12182 = vmatpush1.bf16.msra.mxu1 %v12155_v27  ;;  %14301 = vmatmul.mubr.msk.bf16.gmra.mxu0 %vm5987_vm3, %v15438_v14 }
 0xa21   :  { %12183 = vmatprep.subr.bf16.mxu1 %v12154_v44  ;;  %12203 = vmatprep.mubr.bf16.mxu1 %v21211_v32 }
 0xa24   :  { %12184 = vmatpush1.bf16.msra.mxu1 %v20351_v46 }
 0xa25   :  { %12185 = vmatprep.subr.bf16.mxu1 %v12152_v53 }
 0xa28   :  { %12186 = vmatpush1.bf16.msra.mxu1 %v12151_v29 }
 0xa29   :  { %12411 = vmatprep.subr.bf16.mxu1 %v15352_v43 }
 0xa2b   :  { %14288 = vmatmul.mubr.msk.bf16.vlgmr.msra.gmra.mxu1 %vm5987_vm3, %v20484_v3 }
 0xa2c   :  { %12412 = vmatpush1.bf16.msra.mxu1 %v15350_v8  ;;  %12213 = vmatprep.mubr.bf16.mxu1 %v21211_v32 }
 0xa2d   :  { %12413 = vmatprep.subr.bf16.mxu1 %v20470_v18 }
 0xa30   :  { %12414 = vmatpush1.bf16.msra.mxu1 %v20475_v25 }
 0xa31   :  { %12415 = vmatprep.subr.bf16.mxu1 %v20488_v12 }
 0xa33   :  { %14289 = vmatmul.mubr.msk.bf16.gmra.mxu1 %vm5987_vm3, %v15436_v55 }
 0xa34   :  { %12416 = vmatpush1.bf16.msra.mxu1 %v20496_v34  ;;  %12437 = vmatprep.mubr.bf16.mxu1 %v21211_v32 }
 0xa35   :  { %12417 = vmatprep.subr.bf16.mxu1 %v15343_v11 }
 0xa38   :  { %12418 = vmatpush1.bf16.msra.mxu1 %v15341_v62 }
 0xa39   :  { %12419 = vmatprep.subr.bf16.mxu1 %v15346_v56 }
 0xa3c   :  { %12420 = vmatpush1.bf16.msra.mxu1 %v15344_v41 }
 0xa3f   :  { %14312 = vmatmul.mubr.msk.bf16.vlgmr.msra.gmra.mxu1 %vm5987_vm3, %v15437_v54 }
 0xa40   :  { %12447 = vmatprep.mubr.bf16.mxu1 %v21211_v32 }
 0xa47   :  { %14313 = vmatmul.mubr.msk.bf16.gmra.mxu1 %vm5987_vm3, %v15438_v14 }
 0xa4d   :  { %v14628_v59 = vpop.f32.mrf.mxu0 }
 0xa4e   :  { %v10836_v46 = vadd.f32 %v14628_v59, %v21245_v31 }
 0xa4f   :  { %v10816_v52 = vpop.f32.mrf.mxu0 }
 0xa50   :  { %v10835_v6 = vadd.f32 %v10816_v52, %v21246_v37 }
 0xa55   :  { %v14631_v2 = vpop.f32.mrf.mxu0 }
 0xa56   :  { %v10838_v17 = vadd.f32 %v14631_v2, %v21247_v40 }
 0xa57   :  { %v10826_v4 = vpop.f32.mrf.mxu0 }
 0xa58   :  { %v10837_v39 = vadd.f32 %v10826_v4, %v21248_v57 }
 0xa5d   :  { %v14652_v48 = vpop.f32.mrf.mxu0 }
 0xa5f   :  { %v11129_v51 = vpop.f32.mrf.mxu0 }
 0xa65   :  { %v14655_v61 = vpop.f32.mrf.mxu0 }
 0xa67   :  { %v11139_v19 = vpop.f32.mrf.mxu0 }
 0xa71   :  { %v11475_v60 = vpop.f32.mrf.mxu0 }
 0xa73   :  { %v11477_v32 = vpop.f32.mrf.mxu0 }
 0xa75   :  { %v11479_v10 = vpop.f32.mrf.mxu0 }
 0xa77   :  { %v11481_v5 = vpop.f32.mrf.mxu0 }
 0xa79   :  { %v11485_v42 = vpop.f32.mrf.mxu0 }
 0xa7b   :  { %v11487_v33 = vpop.f32.mrf.mxu0 }
 0xa7d   :  { %v11489_v0 = vpop.f32.mrf.mxu0 }
 0xa7f   :  { %v11490_v7 = vpop.f32.mrf.mxu0 }
 0xa85   :  { %v20564_v24 = vpop.f32.mrf.mxu0 }
 0xa87   :  { %v20566_v35 = vpop.f32.mrf.mxu0 }
 0xa89   :  { %v20568_v50 = vpop.f32.mrf.mxu0 }
 0xa8b   :  { %v14640_v26 = vpop.f32.mrf.mxu1  ;;  %v20570_v18 = vpop.f32.mrf.mxu0 }
 0xa8c   :  { %v10988_v58 = vadd.f32 %v14640_v26, %v10836_v46 }
 0xa8d   :  { %v10968_v25 = vpop.f32.mrf.mxu1  ;;  %v20572_v16 = vpop.f32.mrf.mxu0 }
 0xa8e   :  { %v10987_v9 = vadd.f32 %v10968_v25, %v10835_v6  ;;  %v11149_v47 = vadd.f32 %v14652_v48, %v10988_v58 }
 0xa8f   :  { %v20574_v1 = vpop.f32.mrf.mxu0 }
 0xa90   :  { %v11148_v3 = vadd.f32 %v11129_v51, %v10987_v9 }
 0xa91   :  { %v11736_v12 = vpop.f32.mrf.mxu0 }
 0xa93   :  { %v14643_v21 = vpop.f32.mrf.mxu1  ;;  %v11737_v49 = vpop.f32.mrf.mxu0 }
 0xa94   :  { %v10990_v34 = vadd.f32 %v14643_v21, %v10838_v17 }
 0xa95   :  { %v10978_v11 = vpop.f32.mrf.mxu1 }
 0xa96   :  { %v10989_v22 = vadd.f32 %v10978_v11, %v10837_v39  ;;  %v11151_v30 = vadd.f32 %v14655_v61, %v10990_v34 }
 0xa98   :  { %v11150_v20 = vadd.f32 %v11139_v19, %v10989_v22 }
 0xa99   :  { %v11884_v62 = vpop.f32.mrf.mxu0 }
 0xa9b   :  { %v14664_v55 = vpop.f32.mrf.mxu1  ;;  %v11886_v56 = vpop.f32.mrf.mxu0 }
 0xa9c   :  { %v20576_v41 = vadd.f32 %v14664_v55, %v11149_v47 }
 0xa9d   :  { %v11281_v28 = vpop.f32.mrf.mxu1  ;;  %v11888_v15 = vpop.f32.mrf.mxu0 }
 0xa9e   :  { %v20578_v54 = vadd.f32 %v11281_v28, %v11148_v3 }
 0xa9f   :  { %v11890_v45 = vpop.f32.mrf.mxu0 }
 0xaa1   :  { %v11894_v13 = vpop.f32.mrf.mxu0 }
 0xaa3   :  { %v14667_v27 = vpop.f32.mrf.mxu1  ;;  %v11896_v44 = vpop.f32.mrf.mxu0 }
 0xaa4   :  { %v20580_v14 = vadd.f32 %v14667_v27, %v11151_v30 }
 0xaa5   :  { %v11291_v36 = vpop.f32.mrf.mxu1  ;;  %v11898_v53 = vpop.f32.mrf.mxu0 }
 0xaa6   :  { %v20582_v29 = vadd.f32 %v11291_v36, %v11150_v20 }
 0xaa7   :  { %v11899_v43 = vpop.f32.mrf.mxu0 }
 0xaa8   :  { %21249 = vst [vmem:[#allocation41_spill] sm:$0xff] %v20582_v29 }
 0xaaf   :  { %v11536_v8 = vpop.f32.mrf.mxu1 }
 0xab0   :  { %v11537_v59 = vadd.f32 %v11536_v8, %v11475_v60 }
 0xab1   :  { %v11538_v31 = vpop.f32.mrf.mxu1 }
 0xab2   :  { %v11539_v46 = vadd.f32 %v11538_v31, %v11477_v32  ;;  %v11901_v52 = vadd.f32 %v11884_v62, %v11537_v59 }
 0xab3   :  { %v11540_v37 = vpop.f32.mrf.mxu1 }
 0xab4   :  { %v11541_v6 = vadd.f32 %v11540_v37, %v11479_v10  ;;  %v11902_v2 = vadd.f32 %v11886_v56, %v11539_v46 }
 0xab5   :  { %v11542_v40 = vpop.f32.mrf.mxu1 }
 0xab6   :  { %v11543_v17 = vadd.f32 %v11542_v40, %v11481_v5  ;;  %v20584_v4 = vadd.f32 %v11888_v15, %v11541_v6 }
 0xab7   :  { %v11546_v57 = vpop.f32.mrf.mxu1 }
 0xab8   :  { %v11547_v39 = vadd.f32 %v11546_v57, %v11485_v42  ;;  %v20586_v48 = vadd.f32 %v11890_v45, %v11543_v17 }
 0xab9   :  { %v11548_v51 = vpop.f32.mrf.mxu1 }
 0xaba   :  { %v11549_v61 = vadd.f32 %v11548_v51, %v11487_v33  ;;  %v20588_v19 = vadd.f32 %v11894_v13, %v11547_v39 }
 0xabb   :  { %v11550_v0 = vpop.f32.mrf.mxu1 }
 0xabc   :  { %v20590_v60 = vadd.f32 %v11896_v44, %v11549_v61 }
 0xabd   :  { %v11551_v32 = vpop.f32.mrf.mxu1 }
 0xac3   :  { %v11783_v7 = vpop.f32.mrf.mxu1 }
 0xac4   :  { %v12098_v26 = vpop.f32.mrf.mxu0  ;;  %v11784_v39 = vadd.f32 %v11783_v7, %v20564_v24 }
 0xac5   :  { %v11785_v10 = vpop.f32.mrf.mxu1  ;;  %v12115_v0 = vadd.f32 %v12098_v26, %v11901_v52 }
 0xac6   :  { %v12100_v58 = vpop.f32.mrf.mxu0  ;;  %v11786_v51 = vadd.f32 %v11785_v10, %v20566_v35 }
 0xac7   :  { %v11787_v25 = vpop.f32.mrf.mxu1 }
 0xac8   :  { %v12102_v5 = vpop.f32.mrf.mxu0  ;;  %v11788_v32 = vadd.f32 %v11787_v25, %v20568_v50 }
 0xac9   :  { %v11789_v9 = vpop.f32.mrf.mxu1 }
 0xaca   :  { %v12104_v47 = vpop.f32.mrf.mxu0 }
 0xacb   :  { %v11793_v3 = vpop.f32.mrf.mxu1  ;;  %v12118_v25 = vadd.f32 %v12104_v47, %v20586_v48 }
 0xacc   :  { %v12108_v42 = vpop.f32.mrf.mxu0  ;;  %v11794_v24 = vadd.f32 %v11793_v3, %v20572_v16 }
 0xacd   :  { %v11795_v12 = vpop.f32.mrf.mxu1  ;;  %v12119_v16 = vadd.f32 %v12108_v42, %v20588_v19 }
 0xace   :  { %v20592_v21 = vpop.f32.mrf.mxu0 }
 0xacf   :  { %v11797_v33 = vpop.f32.mrf.mxu1  ;;  %v12120_v48 = vadd.f32 %v20592_v21, %v20590_v60 }
 0xad0   :  { %v12112_v49 = vpop.f32.mrf.mxu0 }
 0xad1   :  { %v11798_v34 = vpop.f32.mrf.mxu1 }
 0xad2   :  { %v12113_v11 = vpop.f32.mrf.mxu0  ;;  %v12116_v34 = vadd.f32 %v12100_v58, %v11902_v2  ;;  %v11796_v2 = vadd.f32 %v11795_v12, %v20574_v1 }
 0xad3   :  { %v11790_v11 = vadd.f32 %v11789_v9, %v20570_v18 }
 0xad7   :  { %v11991_v22 = vpop.f32.mrf.mxu1 }
 0xad8   :  { %v12322_v30 = vpop.f32.mrf.mxu0  ;;  %v12008_v61 = vadd.f32 %v11991_v22, %v11784_v39 }
 0xad9   :  { %v11993_v20 = vpop.f32.mrf.mxu1 }
 0xada   :  { %v12324_v62 = vpop.f32.mrf.mxu0  ;;  %v12009_v33 = vadd.f32 %v11993_v20, %v11786_v51 }
 0xadb   :  { %v11995_v55 = vpop.f32.mrf.mxu1  ;;  %v12340_v7 = vadd.f32 %v12324_v62, %v12116_v34 }
 0xadc   :  { %v12326_v56 = vpop.f32.mrf.mxu0 }
 0xadd   :  { %v11997_v28 = vpop.f32.mrf.mxu1 }
 0xade   :  { %v12328_v15 = vpop.f32.mrf.mxu0  ;;  %v12011_v10 = vadd.f32 %v11997_v28, %v11790_v11 }
 0xadf   :  { %v12001_v45 = vpop.f32.mrf.mxu1 }
 0xae0   :  { %v12332_v13 = vpop.f32.mrf.mxu0  ;;  %v12012_v9 = vadd.f32 %v12001_v45, %v11794_v24 }
 0xae1   :  { %v12003_v27 = vpop.f32.mrf.mxu1  ;;  %v12343_v47 = vadd.f32 %v12332_v13, %v12119_v16  ;;  %v14330_v16 = vld [vmem:[%s20735_s5 + $0x150] sm:$0xff] }
 0xae2   :  { %v12334_v44 = vpop.f32.mrf.mxu0  ;;  %v12013_v3 = vadd.f32 %v12003_v27, %v11796_v2  ;;  %v14332_v2 = vld [vmem:[%s20735_s5 + $0x160] sm:$0xf] }
 0xae3   :  { %v12005_v36 = vpop.f32.mrf.mxu1 }
 0xae4   :  { %v12336_v53 = vpop.f32.mrf.mxu0 }
 0xae5   :  { %v12006_v43 = vpop.f32.mrf.mxu1  ;;  %v12339_v53 = vadd.f32 %v12322_v30, %v12115_v0 }
 0xae6   :  { %v12337_v8 = vpop.f32.mrf.mxu0  ;;  %v12010_v43 = vadd.f32 %v11995_v55, %v11788_v32 }
 0xaeb   :  { %v12205_v59 = vpop.f32.mrf.mxu1 }
 0xaec   :  { %v12222_v49 = vadd.f32 %v12205_v59, %v12008_v61  ;;  %v12344_v59 = vadd.f32 %v12334_v44, %v12120_v48 }
 0xaed   :  { %v12207_v31 = vpop.f32.mrf.mxu1 }
 0xaee   :  { %v12223_v8 = vadd.f32 %v12207_v31, %v12009_v33 }
 0xaef   :  { %v12209_v46 = vpop.f32.mrf.mxu1 }
 0xaf0   :  { %v12224_v52 = vadd.f32 %v12209_v46, %v12010_v43 }
 0xaf1   :  { %v12211_v37 = vpop.f32.mrf.mxu1 }
 0xaf2   :  { %v12225_v22 = vadd.f32 %v12211_v37, %v12011_v10  ;;  %v14322_v10 = vld [vmem:[%s20735_s5 + $0x138] sm:$0xff] }
 0xaf3   :  { %v12215_v6 = vpop.f32.mrf.mxu1 }
 0xaf4   :  { %v12226_v62 = vadd.f32 %v12215_v6, %v12012_v9 }
 0xaf5   :  { %v12217_v40 = vpop.f32.mrf.mxu1 }
 0xaf6   :  { %v12227_v12 = vadd.f32 %v12217_v40, %v12013_v3 }
 0xaf7   :  { %v12219_v17 = vpop.f32.mrf.mxu1 }
 0xaf8   :  { %v12117_v17 = vadd.f32 %v12102_v5, %v20584_v4  ;;  %v12342_v4 = vadd.f32 %v12328_v15, %v12118_v25 }
 0xaf9   :  { %v12220_v57 = vpop.f32.mrf.mxu1 }
 0xafa   :  { %v12341_v18 = vadd.f32 %v12326_v56, %v12117_v17 }
 0xaff   :  { %v12439_v36 = vpop.f32.mrf.mxu1 }
 0xb00   :  { %v12456_v29 = vadd.f32 %v12439_v36, %v12222_v49 }
 0xb01   :  { %v12441_v35 = vpop.f32.mrf.mxu1 }
 0xb02   :  { %v12462_v26 = vmax.f32 %v12339_v53, %v12456_v29  ;;  %v12457_v50 = vadd.f32 %v12441_v35, %v12223_v8  ;;  %v14323_v35 = vld [vmem:[%s20735_s5 + $0x140] sm:$0xff] }
 0xb03   :  { %v12443_v58 = vpop.f32.mrf.mxu1 }
 0xb04   :  { %v12463_v30 = vmax.f32 %v12340_v7, %v12457_v50  ;;  %v12458_v20 = vadd.f32 %v12443_v58, %v12224_v52  ;;  %12471 = vrot.lane.b32.xlu1 %v12462_v26, %s15453_s19  ;;  %v14324_v7 = vld [vmem:[%s20735_s5 + $0x148] sm:$0xf] }
 0xb05   :  { %v12445_v5 = vpop.f32.mrf.mxu1  ;;  %14680 = vmatprep.subr.msk.mxu1 %vm178_vm0, %v14324_v7 }
 0xb06   :  { %v12464_v29 = vmax.f32 %v12341_v18, %v12458_v20  ;;  %v12459_v55 = vadd.f32 %v12445_v5, %v12225_v22  ;;  %14681 = vmatpush3.msk.msra.mxu1 %vm178_vm0, %v14324_v7  ;;  %v14340_v18 = vld [vmem:[%s20735_s5 + $0x178] sm:$0xf] }
 0xb07   :  { %v12449_v1 = vpop.f32.mrf.mxu1  ;;  %14682 = vmatprep.subr.mxu1 %v14323_v35  ;;  %v14331_v20 = vld [vmem:[%s20735_s5 + $0x158] sm:$0xff] }
 0xb08   :  { %v12465_v56 = vmax.f32 %v12342_v4, %v12459_v55  ;;  %v12460_v28 = vadd.f32 %v12449_v1, %v12226_v62  ;;  %12473 = vrot.lane.b32.xlu0 %v12464_v29, %s15453_s19  ;;  %14683 = vmatpush3.msra.mxu1 %v14323_v35  ;;  %v14338_v55 = vld [vmem:[%s20735_s5 + $0x168] sm:$0xff] }
 0xb09   :  { %v12451_v45 = vpop.f32.mrf.mxu1  ;;  %14684 = vmatprep.subr.mxu1 %v14322_v10 }
 0xb0a   :  { %v12466_v31 = vmax.f32 %v12343_v47, %v12460_v28  ;;  %v12461_v19 = vadd.f32 %v12451_v45, %v12227_v12  ;;  %14685 = vmatpush3.msra.mxu1 %v14322_v10 }
 0xb0b   :  { %v12453_v42 = vpop.f32.mrf.mxu1  ;;  %14704 = vmatprep.subr.msk.mxu1 %vm178_vm0, %v14340_v18 }
 0xb0c   :  { %v12467_v15 = vmax.f32 %v12344_v59, %v12461_v19  ;;  %12784 = vrot.lane.b32.xlu0 %v12463_v30, %s15453_s19  ;;  %12475 = vrot.lane.b32.xlu1 %v12466_v31, %s15453_s19  ;;  %v13115_v42 = vld [vmem:[%s20736_s7 + $0x30] sm:$0x3] }
 0xb0d   :  { %v12454_v27 = vpop.f32.mrf.mxu1 }
 0xb0e   :  { %v13113_v27 = vld [vmem:[%s20736_s7 + $0x20] sm:$0xff] }
 0xb10   :  { %12786 = vrot.lane.b32.xlu1 %v12465_v56, %s15453_s19  ;;  %12788 = vrot.lane.b32.xlu0 %v12467_v15, %s15453_s19 }
 0xb76   :  { %v12472_v60 = vpop.permute.xlu1 %12471 }
 0xb77   :  { %v12480_v21 = vmax.f32 %v12462_v26, %v12472_v60  ;;  %v13112_v60 = vld [vmem:[%s20736_s7 + $0x18] sm:$0xff] }
 0xb79   :  { %v12483_v13 = vadd.f32 %v12480_v21, %v21198_v38  ;;  %v13111_v21 = vld [vmem:[%s20736_s7 + $0x10] sm:$0xff] }
 0xb7a   :  { %v12474_v46 = vpop.permute.xlu0 %12473 }
 0xb7b   :  { %v12486_v37 = vmax.f32 %v12483_v13, 0.0  ;;  %v12481_v44 = vmax.f32 %v12464_v29, %v12474_v46  ;;  %v14339_v29 = vld [vmem:[%s20735_s5 + $0x170] sm:$0xff]  ;;  %v13110_v13 = vld [vmem:[%s20736_s7 + $0x8] sm:$0xff]  ;;  %v13109_v46 = vld [vmem:[%s20736_s7] sm:$0xff] }
 0xb7d   :  { %v12484_v6 = vadd.f32 %v12481_v44, %v21199_v63  ;;  %12636 = vrot.lane.b32.xlu1 %v12486_v37, %s15454_s13 }
 0xb7e   :  { %v12785_v40 = vpop.permute.xlu0 %12784  ;;  %v12476_v57 = vpop.permute.xlu1 %12475 }
 0xb7f   :  { %v12487_v39 = vmax.f32 %v12484_v6, 0.0  ;;  %v12793_v51 = vmax.f32 %v12463_v30, %v12785_v40  ;;  %v12482_v61 = vmax.f32 %v12466_v31, %v12476_v57 }
 0xb81   :  { %v12796_v0 = vadd.f32 %v12793_v51, %v21198_v38  ;;  %v12485_v32 = vadd.f32 %v12482_v61, %v21200_v23  ;;  %12638 = vrot.lane.b32.xlu0 %v12487_v39, %s15454_s13  ;;  %v14316_v38 = vld [vmem:[%s20735_s5 + $0x130] sm:$0xf] }
 0xb82   :  { %v12787_v33 = vpop.permute.xlu1 %12786  ;;  %v12789_v49 = vpop.permute.xlu0 %12788  ;;  %14668 = vmatprep.subr.msk.mxu0 %vm178_vm0, %v14316_v38 }
 0xb83   :  { %v12799_v34 = vmax.f32 %v12796_v0, 0.0  ;;  %v12488_v11 = vmax.f32 %v12485_v32, 0.0  ;;  %v12794_v36 = vmax.f32 %v12465_v56, %v12787_v33  ;;  %v12795_v53 = vmax.f32 %v12467_v15, %v12789_v49  ;;  %14669 = vmatpush3.msk.msra.mxu0 %vm178_vm0, %v14316_v38  ;;  %v13114_v15 = vld [vmem:[%s20736_s7 + $0x28] sm:$0xff] }
 0xb85   :  { %v12797_v43 = vadd.f32 %v12794_v36, %v21199_v63  ;;  %v12798_v8 = vadd.f32 %v12795_v53, %v21200_v23  ;;  %12640 = vrot.lane.b32.xlu1 %v12488_v11, %s15454_s13  ;;  %12949 = vrot.lane.b32.xlu0 %v12799_v34, %s15454_s13  ;;  %v14315_v63 = vld [vmem:[%s20735_s5 + $0x128] sm:$0xff]  ;;  %v14314_v23 = vld [vmem:[%s20735_s5 + $0x120] sm:$0xff] }
 0xb86   :  { %14670 = vmatprep.subr.mxu0 %v14315_v63 }
 0xb87   :  { %v12800_v17 = vmax.f32 %v12797_v43, 0.0  ;;  %v12801_v24 = vmax.f32 %v12798_v8, 0.0  ;;  %14671 = vmatpush3.msra.mxu0 %v14315_v63  ;;  %v14346_v8 = vld [vmem:[%s20737_s6] ss:$0 sm:$0xff] }
 0xb88   :  { %14672 = vmatprep.subr.mxu0 %v14314_v23 }
 0xb89   :  { %12951 = vrot.lane.b32.xlu1 %v12800_v17, %s15454_s13  ;;  %12953 = vrot.lane.b32.xlu0 %v12801_v24, %s15454_s13 }
 0xb8a   :  { %14673 = vmatpush3.msra.mxu0 %v14314_v23  ;;  %v21250_v23 = vld [vmem:[#allocation41_spill] sm:$0xff] }
 0xb8b   :  { %14692 = vmatprep.subr.msk.mxu0 %vm178_vm0, %v14332_v2 }
 0xbb2   :  { %12493 = vxpose.xlu1.b32.start [1/3] (short) (narrow) %v12486_v37, 32 }
 0xbb6   :  { %12494 = vxpose.xlu1.b32.cont [2/3] (short) (narrow) %v12487_v39, 32 }
 0xbba   :  { %12495 = vxpose.xlu1.b32.end [3/3] (short) (narrow) %v12488_v11, 32 }
 0xbef   :  { %v12637_v52 = vpop.permute.xlu1 %12636 }
 0xbf0   :  { %12645 = vxpose.xlu0.b32.start [1/3] (short) (narrow) %v12637_v52, 32 }
 0xbf3   :  { %v12639_v26 = vpop.permute.xlu0 %12638 }
 0xbf4   :  { %12646 = vxpose.xlu0.b32.cont [2/3] (short) (narrow) %v12639_v26, 32 }
 0xbf7   :  { %v12641_v50 = vpop.permute.xlu1 %12640  ;;  %v12950_v25 = vpop.permute.xlu0 %12949 }
 0xbf8   :  { %12647 = vxpose.xlu0.b32.end [3/3] (short) (narrow) %v12641_v50, 32  ;;  %12958 = vxpose.xlu1.b32.start [1/3] (short) (narrow) %v12950_v25, 32 }
 0xbfb   :  { %v12952_v58 = vpop.permute.xlu1 %12951  ;;  %v12954_v9 = vpop.permute.xlu0 %12953 }
 0xbfc   :  { %12959 = vxpose.xlu1.b32.cont [2/3] (short) (narrow) %v12952_v58, 32 }
 0xbfd   :  { %12806 = vxpose.xlu0.b32.start [1/3] (short) (narrow) %v12799_v34, 32 }
 0xc00   :  { %12960 = vxpose.xlu1.b32.end [3/3] (short) (narrow) %v12954_v9, 32 }
 0xc01   :  { %12807 = vxpose.xlu0.b32.cont [2/3] (short) (narrow) %v12800_v17, 32 }
 0xc05   :  { %12808 = vxpose.xlu0.b32.end [3/3] (short) (narrow) %v12801_v24, 32 }
 0xc2e   :  { %v12509_v22 = vpop.trf.xlu1 }
 0xc2f   :  { %14674 = vmatprep.mubr.msk.f32.mxu0 %vm7178_vm7, %v12509_v22 }
 0xc32   :  { %v12510_v30 = vpop.trf.xlu1 }
 0xc33   :  { %14675 = vmatmul.mubr.msk.f32.vlgmr.msra.gmra.mxu0 %vm7178_vm7, %v12510_v30 }
 0xc34   :  { %14693 = vmatpush3.msk.msra.mxu0 %vm178_vm0, %v14332_v2 }
 0xc35   :  { %14694 = vmatprep.subr.mxu0 %v14331_v20 }
 0xc36   :  { %v12511_v4 = vpop.trf.xlu1  ;;  %14695 = vmatpush3.msra.mxu0 %v14331_v20 }
 0xc37   :  { %14677 = vmatprep.mubr.msk.f32.mxu0 %vm7178_vm7, %v12511_v4  ;;  %14696 = vmatprep.subr.mxu0 %v14330_v16 }
 0xc38   :  { %14697 = vmatpush3.msra.mxu0 %v14330_v16 }
 0xc39   :  { %14716 = vmatprep.subr.msk.mxu0 %vm13136_vm8, %v13115_v42 }
 0xc3a   :  { %v12512_v5 = vpop.trf.xlu1 }
 0xc3b   :  { %14678 = vmatmul.mubr.msk.f32.gmra.mxu0 %vm7178_vm7, %v12512_v5  ;;  %v14347_v5 = vld [vmem:[%s20738_s8] ss:$0 sm:$0xff] }
 0xc6c   :  { %v12661_v3 = vpop.trf.xlu0 }
 0xc6d   :  { %14686 = vmatprep.mubr.msk.f32.mxu1 %vm7178_vm7, %v12661_v3 }
 0xc70   :  { %v12662_v62 = vpop.trf.xlu0 }
 0xc71   :  { %14687 = vmatmul.mubr.msk.f32.vlgmr.msra.gmra.mxu1 %vm7178_vm7, %v12662_v62 }
 0xc72   :  { %14705 = vmatpush3.msk.msra.mxu1 %vm178_vm0, %v14340_v18 }
 0xc73   :  { %14706 = vmatprep.subr.mxu1 %v14339_v29 }
 0xc74   :  { %v12663_v48 = vpop.trf.xlu0  ;;  %v12974_v1 = vpop.trf.xlu1  ;;  %14707 = vmatpush3.msra.mxu1 %v14339_v29 }
 0xc75   :  { %14689 = vmatprep.mubr.msk.f32.mxu1 %vm7178_vm7, %v12663_v48  ;;  %14708 = vmatprep.subr.mxu1 %v14338_v55 }
 0xc76   :  { %14709 = vmatpush3.msra.mxu1 %v14338_v55 }
 0xc78   :  { %v12664_v47 = vpop.trf.xlu0  ;;  %v12975_v12 = vpop.trf.xlu1 }
 0xc79   :  { %14690 = vmatmul.mubr.msk.f32.gmra.mxu1 %vm7178_vm7, %v12664_v47 }
 0xc7a   :  { %14710 = vmatprep.mubr.msk.f32.mxu1 %vm7178_vm7, %v12974_v1 }
 0xc7c   :  { %v12822_v56 = vpop.trf.xlu0  ;;  %v12976_v28 = vpop.trf.xlu1 }
 0xc7d   :  { %14698 = vmatprep.mubr.msk.f32.mxu0 %vm7178_vm7, %v12822_v56  ;;  %14711 = vmatmul.mubr.msk.f32.vlgmr.msra.gmra.mxu1 %vm7178_vm7, %v12975_v12 }
 0xc7e   :  { %14713 = vmatprep.mubr.msk.f32.mxu1 %vm7178_vm7, %v12976_v28 }
 0xc80   :  { %v12823_v45 = vpop.trf.xlu0  ;;  %v12977_v59 = vpop.trf.xlu1 }
 0xc81   :  { %14699 = vmatmul.mubr.msk.f32.vlgmr.msra.gmra.mxu0 %vm7178_vm7, %v12823_v45  ;;  %14714 = vmatmul.mubr.msk.f32.gmra.mxu1 %vm7178_vm7, %v12977_v59 }
 0xc82   :  { %14717 = vmatpush3.msk.msra.mxu0 %vm13136_vm8, %v13115_v42 }
 0xc83   :  { %14718 = vmatprep.subr.mxu0 %v13114_v15 }
 0xc84   :  { %v12824_v31 = vpop.trf.xlu0  ;;  %14719 = vmatpush3.msra.mxu0 %v13114_v15 }
 0xc85   :  { %14701 = vmatprep.mubr.msk.f32.mxu0 %vm7178_vm7, %v12824_v31  ;;  %14720 = vmatprep.subr.mxu0 %v13113_v27 }
 0xc86   :  { %14721 = vmatpush3.msra.mxu0 %v13113_v27 }
 0xc87   :  { %14722 = vmatprep.subr.mxu0 %v13112_v60 }
 0xc88   :  { %v12825_v19 = vpop.trf.xlu0  ;;  %14723 = vmatpush3.msra.mxu0 %v13112_v60 }
 0xc89   :  { %14702 = vmatmul.mubr.msk.f32.gmra.mxu0 %vm7178_vm7, %v12825_v19  ;;  %14724 = vmatprep.subr.mxu0 %v13111_v21 }
 0xc8a   :  { %14725 = vmatpush3.msra.mxu0 %v13111_v21 }
 0xc8b   :  { %14726 = vmatprep.subr.mxu0 %v13110_v13 }
 0xc8c   :  { %14727 = vmatpush3.msra.mxu0 %v13110_v13 }
 0xc8d   :  { %14728 = vmatprep.subr.mxu0 %v13109_v46 }
 0xc8e   :  { %14729 = vmatpush3.msra.mxu0 %v13109_v46 }
 0xcf3   :  { %v14676_v37 = vpop.f32.mrf.mxu0 }
 0xcf4   :  { %v12626_v51 = vadd.f32 %v14676_v37, %v20576_v41 }
 0xcf5   :  { %v12606_v6 = vpop.f32.mrf.mxu0 }
 0xcf6   :  { %v12625_v32 = vadd.f32 %v12606_v6, %v20578_v54 }
 0xcfb   :  { %v14679_v57 = vpop.f32.mrf.mxu0 }
 0xcfc   :  { %v12628_v24 = vadd.f32 %v14679_v57, %v20580_v14 }
 0xcfd   :  { %v12616_v61 = vpop.f32.mrf.mxu0 }
 0xcfe   :  { %v12627_v7 = vadd.f32 %v12616_v61, %v21250_v23 }
 0xd31   :  { %v14688_v44 = vpop.f32.mrf.mxu1 }
 0xd32   :  { %v12778_v33 = vadd.f32 %v14688_v44, %v12626_v51 }
 0xd33   :  { %v12758_v40 = vpop.f32.mrf.mxu1 }
 0xd34   :  { %v12777_v11 = vadd.f32 %v12758_v40, %v12625_v32 }
 0xd39   :  { %v14691_v39 = vpop.f32.mrf.mxu1 }
 0xd3a   :  { %v12780_v54 = vadd.f32 %v14691_v39, %v12628_v24 }
 0xd3b   :  { %v12768_v0 = vpop.f32.mrf.mxu1 }
 0xd3c   :  { %v12779_v26 = vadd.f32 %v12768_v0, %v12627_v7 }
 0xd3d   :  { %v14712_v34 = vpop.f32.mrf.mxu1 }
 0xd3f   :  { %v13071_v17 = vpop.f32.mrf.mxu1 }
 0xd41   :  { %v14700_v49 = vpop.f32.mrf.mxu0  ;;  %v14715_v52 = vpop.f32.mrf.mxu1 }
 0xd42   :  { %v12939_v36 = vadd.f32 %v14700_v49, %v12778_v33 }
 0xd43   :  { %v12919_v53 = vpop.f32.mrf.mxu0  ;;  %v13081_v22 = vpop.f32.mrf.mxu1 }
 0xd44   :  { %v13091_v43 = vadd.f32 %v14712_v34, %v12939_v36  ;;  %v12938_v38 = vadd.f32 %v12919_v53, %v12777_v11 }
 0xd46   :  { %v13090_v41 = vadd.f32 %v13071_v17, %v12938_v38  ;;  %v13102_v63 = vadd.f32 %v14346_v8, %v13091_v43 }
 0xd48   :  { %v13101_v35 = vadd.f32 %v14346_v8, %v13090_v41  ;;  %v13106_v2 = vmax.f32 %v13102_v63, 0.0 }
 0xd49   :  { %v14703_v10 = vpop.f32.mrf.mxu0 }
 0xd4a   :  { %v13105_v50 = vmax.f32 %v13101_v35, 0.0  ;;  %v12941_v25 = vadd.f32 %v14703_v10, %v12780_v54 }
 0xd4b   :  { %v12929_v18 = vpop.f32.mrf.mxu0 }
 0xd4c   :  { %v13093_v58 = vadd.f32 %v14715_v52, %v12941_v25  ;;  %v12940_v9 = vadd.f32 %v12929_v18, %v12779_v26  ;;  %14730 = vmatprep.mubr.msk.f32.mxu0 %vm13123_vm9, %v13105_v50 }
 0xd4d   :  { %14731 = vmatmul.mubr.msk.f32.vlgmr.msra.gmra.mxu0 %vm13123_vm9, %v13106_v2 }
 0xd4e   :  { %v13092_v14 = vadd.f32 %v13081_v22, %v12940_v9  ;;  %v13104_v30 = vadd.f32 %v14346_v8, %v13093_v58 }
 0xd50   :  { %v13103_v20 = vadd.f32 %v14346_v8, %v13092_v14  ;;  %v13108_v4 = vmax.f32 %v13104_v30, 0.0 }
 0xd52   :  { %v13107_v16 = vmax.f32 %v13103_v20, 0.0 }
 0xd54   :  { %14733 = vmatprep.mubr.msk.f32.mxu0 %vm13123_vm9, %v13107_v16 }
 0xd55   :  { %14734 = vmatmul.mubr.msk.f32.gmra.mxu0 %vm13123_vm9, %v13108_v4 }
 0xe0d   :  { %v14732_v3 = vpop.f32.mrf.mxu0 }
 0xe0e   :  { %v13212_v62 = vadd.f32 %v14732_v3, %v14347_v5 }
 0xe0f   :  { %v13206_v29 = vpop.f32.mrf.mxu0 }
 0xe10   :  { %v13226_v55 = vmax.f32 %v13212_v62, 0.0  ;;  %v13207_v48 = vadd.f32 %v14347_v5, %v13206_v29 }
 0xe12   :  { %13231 = vst.msk [vmem:[%s20739_s9 + $0x8] sm:$0xff] %vm13229_vm10, %v13226_v55  ;;  %v13225_v1 = vmax.f32 %v13207_v48, 0.0 }
 0xe14   :  { %13230 = vst.msk [vmem:[%s20739_s9] sm:$0xff] %vm13229_vm10, %v13225_v1 }
 0xe15   :  { %v14735_v47 = vpop.f32.mrf.mxu0 }
 0xe16   :  { %v13222_v12 = vadd.f32 %v14735_v47, %v14347_v5 }
 0xe17   :  { %v13216_v56 = vpop.f32.mrf.mxu0 }
 0xe18   :  { %v13228_v28 = vmax.f32 %v13222_v12, 0.0  ;;  %v13217_v45 = vadd.f32 %v14347_v5, %v13216_v56 }
 0xe1a   :  { %13233 = vst.msk [vmem:[%s20739_s9 + $0x18] sm:$0xff] %vm13229_vm10, %v13228_v28  ;;  %v13227_v59 = vmax.f32 %v13217_v45, 0.0 }
 0xe1c   :  { %13232 = vst.msk [vmem:[%s20739_s9 + $0x10] sm:$0xff] %vm13229_vm10, %v13227_v59 }

</bundles_post_ra>
